<compile_context>
chip_gen: v6e
topology: v6e:2x2x1
jax: 0.10.0
libtpu: 0.0.40
codegen_flags: <defaults>
</compile_context>

<pallas_src>
import functools
import math

import numpy as np
import jax
import jax.numpy as jnp
from jax import lax
from jax.experimental import pallas as pl
from jax.experimental.pallas import tpu as pltpu

# ----------------------------- small config ---------------------------------
B = 2                 # batch
C = 3                 # image channels
IMG = 16              # spatial size (H = W)
PATCH = 4             # patch size (real model: 14)
GRID = IMG // PATCH   # downsampled_w
N_PATCH = GRID * GRID

V_WIDTH, V_HEADS, V_LAYERS, VISUAL_DIM = 32, 4, 2, 32   # ClipViT (tiny)
T_WIDTH, T_HEADS, T_LAYERS, TEXT_DIM = 32, 4, 2, 32     # ClipText (tiny)
VOCAB, CTX = 64, 8
NCLASS = 1

D_MODEL, F_HEADS, F_LAYERS, D_FF = 32, 4, 2, 128        # Fusion transformer
TEMPERATURE = 0.07                                      # Head temperature
LN_EPS = 1e-5

_BLOCK_PARAMS = ("ln1_g", "ln1_b", "w_qkv", "b_qkv", "w_o", "b_o",
                 "ln2_g", "ln2_b", "w1", "b1", "w2", "b2")

# --------------------------- in-kernel helpers -------------------------------


def _ln(x, g, b, eps=LN_EPS):
    mu = jnp.mean(x, axis=-1, keepdims=True)
    var = jnp.mean((x - mu) ** 2, axis=-1, keepdims=True)
    return (x - mu) * lax.rsqrt(var + eps) * g + b


def _block_body(x, l1g, l1b, wqkv, bqkv, wo, bo, l2g, l2b, w1, b1, w2, b2,
                *, heads, causal):
    """One residual attention block (CLIP: LN1->MHA->res, LN2->MLP(QuickGELU)->res)."""
    S, D = x.shape
    Dh = D // heads
    scale = 1.0 / math.sqrt(Dh)

    y = _ln(x, l1g, l1b)
    qkv = jnp.dot(y, wqkv, preferred_element_type=jnp.float32) + bqkv   # (S, 3D)

    if causal:
        row = lax.broadcasted_iota(jnp.int32, (S, S), 0)
        col = lax.broadcasted_iota(jnp.int32, (S, S), 1)
        keep = col <= row

    heads_out = []
    for h in range(heads):                               # static unroll (heads=4)
        qh = qkv[:, h * Dh:(h + 1) * Dh]
        kh = qkv[:, D + h * Dh:D + (h + 1) * Dh]
        vh = qkv[:, 2 * D + h * Dh:2 * D + (h + 1) * Dh]
        # contract axis 1 of both operands -> no explicit transpose of kh
        s = lax.dot_general(qh, kh, (((1,), (1,)), ((), ())),
                            preferred_element_type=jnp.float32) * scale
        if causal:
            s = jnp.where(keep, s, jnp.float32(-1e30))   # safe: score math is f32
        m = jnp.max(s, axis=-1, keepdims=True)
        e = jnp.exp(s - m)
        p = e * pl.reciprocal(jnp.sum(e, axis=-1, keepdims=True), approx=True)
        heads_out.append(jnp.dot(p, vh, preferred_element_type=jnp.float32))

    # lane-concat per-head outputs -> one full-depth output-projection matmul
    attn = jnp.concatenate(heads_out, axis=-1)                            # (S, D)
    x = x + jnp.dot(attn, wo, preferred_element_type=jnp.float32) + bo

    y = _ln(x, l2g, l2b)
    h_mid = jnp.dot(y, w1, preferred_element_type=jnp.float32) + b1
    h_mid = h_mid * jax.nn.sigmoid(1.702 * h_mid)        # CLIP QuickGELU
    return x + jnp.dot(h_mid, w2, preferred_element_type=jnp.float32) + b2


def _run_blocks(x, brefs, *, heads, causal):
    """Statically-unrolled layer loop over stacked (L, ...) weight refs."""
    (l1g, l1b, wqkv, bqkv, wo, bo, l2g, l2b, w1, b1, w2, b2) = brefs
    n_layers = l1g.shape[0]
    for l in range(n_layers):
        x = _block_body(x, l1g[l], l1b[l], wqkv[l], bqkv[l], wo[l], bo[l],
                        l2g[l], l2b[l], w1[l], b1[l], w2[l], b2[l],
                        heads=heads, causal=causal)
    return x


# --------------------- fused vision-encoder kernel ---------------------------


def _vision_kernel(p_ref, convw_ref, cls_ref, pos_ref, preg_ref, preb_ref,
                   l1g, l1b, wqkv, bqkv, wo, bo, l2g, l2b, w1, b1, w2, b2,
                   postg_ref, postb_ref, proj_ref, o_ref, *, n_patch, heads):
    patches = p_ref[0].astype(jnp.float32)                       # (N, C*P*P)
    pos = pos_ref[...]
    xp = jnp.dot(patches, convw_ref[...], preferred_element_type=jnp.float32)
    # CLS token LAST (pos emb already reordered to match) -> one aligned concat
    x = jnp.concatenate([xp + pos[:n_patch, :],
                         cls_ref[...] + pos[n_patch:, :]], axis=0)   # (S, D)
    x = _ln(x, preg_ref[...], preb_ref[...])
    x = _run_blocks(x, (l1g, l1b, wqkv, bqkv, wo, bo, l2g, l2b, w1, b1, w2, b2),
                    heads=heads, causal=False)
    xn = _ln(x[:n_patch, :], postg_ref[...], postb_ref[...])     # drop CLS row
    out = jnp.dot(xn, proj_ref[...], preferred_element_type=jnp.float32)
    out = out * lax.rsqrt(jnp.sum(out * out, axis=-1, keepdims=True) + 1e-12)
    o_ref[0] = out.astype(o_ref.dtype)


def vision_encoder(patches, vp):
    Bn, N, Cp = patches.shape
    D = V_WIDTH
    S = N + 1
    rep2 = lambda i: (0, 0)
    rep3 = lambda i: (0, 0, 0)
    pos = jnp.concatenate([vp["pos_emb"][1:], vp["pos_emb"][:1]], axis=0)
    in_specs = ([
        pl.BlockSpec((1, N, Cp), lambda i: (i, 0, 0)),
        pl.BlockSpec((Cp, D), rep2),
        pl.BlockSpec((1, D), rep2),
        pl.BlockSpec((S, D), rep2),
        pl.BlockSpec((1, D), rep2),
        pl.BlockSpec((1, D), rep2),
    ] + [pl.BlockSpec(vp["blocks"][n].shape, rep3) for n in _BLOCK_PARAMS] + [
        pl.BlockSpec((1, D), rep2),
        pl.BlockSpec((1, D), rep2),
        pl.BlockSpec((D, VISUAL_DIM), rep2),
    ])
    args = ([patches, vp["conv_w"], vp["cls_emb"], pos,
             vp["ln_pre_g"], vp["ln_pre_b"]]
            + [vp["blocks"][n] for n in _BLOCK_PARAMS]
            + [vp["ln_post_g"], vp["ln_post_b"], vp["proj"]])
    return pl.pallas_call(
        functools.partial(_vision_kernel, n_patch=N, heads=V_HEADS),
        out_shape=jax.ShapeDtypeStruct((Bn, N, VISUAL_DIM), jnp.float32),
        grid=(Bn,),
        in_specs=in_specs,
        out_specs=pl.BlockSpec((1, N, VISUAL_DIM), lambda i: (i, 0, 0)),
        compiler_params=pltpu.CompilerParams(dimension_semantics=("parallel",)),
    )(*args)


# ---------------------- fused text-encoder kernel ----------------------------


def _text_kernel(x_ref, onehot_ref,
                 l1g, l1b, wqkv, bqkv, wo, bo, l2g, l2b, w1, b1, w2, b2,
                 lnfg_ref, lnfb_ref, proj_ref, o_ref, *, heads):
    x = x_ref[0].astype(jnp.float32)                              # (CTX, Dt)
    x = _run_blocks(x, (l1g, l1b, wqkv, bqkv, wo, bo, l2g, l2b, w1, b1, w2, b2),
                    heads=heads, causal=True)
    # EOT selection via one-hot matmul (vectorized, no dynamic sublane index);
    # select-then-LN == LN-then-select (per-token LN).
    eot = jnp.dot(onehot_ref[...], x, preferred_element_type=jnp.float32)  # (1, Dt)
    eot = _ln(eot, lnfg_ref[...], lnfb_ref[...])
    o_ref[...] = jnp.dot(eot, proj_ref[...],
                         preferred_element_type=jnp.float32).astype(o_ref.dtype)


def text_encoder(x_emb, onehot, tp):
    K, L, D = x_emb.shape
    rep2 = lambda i: (0, 0)
    rep3 = lambda i: (0, 0, 0)
    in_specs = ([
        pl.BlockSpec((1, L, D), lambda i: (i, 0, 0)),
        pl.BlockSpec((1, L), lambda i: (i, 0)),
    ] + [pl.BlockSpec(tp["blocks"][n].shape, rep3) for n in _BLOCK_PARAMS] + [
        pl.BlockSpec((1, D), rep2),
        pl.BlockSpec((1, D), rep2),
        pl.BlockSpec((D, TEXT_DIM), rep2),
    ])
    args = ([x_emb, onehot] + [tp["blocks"][n] for n in _BLOCK_PARAMS]
            + [tp["lnf_g"], tp["lnf_b"], tp["text_proj"]])
    return pl.pallas_call(
        functools.partial(_text_kernel, heads=T_HEADS),
        out_shape=jax.ShapeDtypeStruct((K, TEXT_DIM), jnp.float32),
        grid=(K,),
        in_specs=in_specs,
        out_specs=pl.BlockSpec((1, TEXT_DIM), lambda i: (i, 0)),
        compiler_params=pltpu.CompilerParams(dimension_semantics=("arbitrary",)),
    )(*args)


# -------------- fused fusion-transformer + decoder + head kernel -------------


def _fusion_kernel(img_ref, txt_ref, wv_ref, bv_ref, wt_ref, bt_ref,
                   l1g, l1b, wqkv, bqkv, wo, bo, l2g, l2b, w1, b1, w2, b2,
                   ng_ref, nb_ref, m_ref, o_ref, *, n_patch, heads, inv_temp):
    v = jnp.dot(img_ref[0].astype(jnp.float32), wv_ref[...],
                preferred_element_type=jnp.float32) + bv_ref[...]          # (N, Dm)
    t = jnp.dot(txt_ref[...].astype(jnp.float32), wt_ref[...],
                preferred_element_type=jnp.float32) + bt_ref[...]          # (K, Dm)
    x = jnp.concatenate([v, t], axis=0)                                    # (N+K, Dm)
    x = _run_blocks(x, (l1g, l1b, wqkv, bqkv, wo, bo, l2g, l2b, w1, b1, w2, b2),
                    heads=heads, causal=False)
    xn = _ln(x, ng_ref[...], nb_ref[...])
    patch = xn[:n_patch, :]                                                # (N, Dm)
    cls = xn[n_patch:, :]                                                  # (K, Dm)
    # bilinear upsample via precomputed kron(Mh, Mw) (align_corners=True)
    # TODO(synk): use separable Mh/Mw application at production resolution.
    dense = jnp.dot(m_ref[...], patch, preferred_element_type=jnp.float32)  # (HW, Dm)
    dn = dense * lax.rsqrt(jnp.sum(dense * dense, axis=-1, keepdims=True) + 1e-12)
    # 1/temperature folded into the (K, Dm)-sized cls normalization
    cn = cls * (lax.rsqrt(jnp.sum(cls * cls, axis=-1, keepdims=True) + 1e-12)
                * inv_temp)
    logits = lax.dot_general(cn, dn, (((1,), (1,)), ((), ())),
                             preferred_element_type=jnp.float32)            # (K, HW)
    o_ref[0] = logits.astype(o_ref.dtype)


def fusion_decoder_head(img_enc, txt, fp):
    Bn, N, Dv = img_enc.shape
    K, Dt = txt.shape
    Dm = D_MODEL
    HW = fp["upsample_m"].shape[0]
    rep2 = lambda i: (0, 0)
    rep3 = lambda i: (0, 0, 0)
    in_specs = ([
        pl.BlockSpec((1, N, Dv), lambda i: (i, 0, 0)),
        pl.BlockSpec((K, Dt), rep2),                     # text broadcast over batch
        pl.BlockSpec((Dv, Dm), rep2), pl.BlockSpec((1, Dm), rep2),
        pl.BlockSpec((Dt, Dm), rep2), pl.BlockSpec((1, Dm), rep2),
    ] + [pl.BlockSpec(fp["blocks"][n].shape, rep3) for n in _BLOCK_PARAMS] + [
        pl.BlockSpec((1, Dm), rep2), pl.BlockSpec((1, Dm), rep2),
        pl.BlockSpec((HW, N), rep2),
    ])
    args = ([img_enc, txt, fp["proj_v_w"], fp["proj_v_b"],
             fp["proj_t_w"], fp["proj_t_b"]]
            + [fp["blocks"][n] for n in _BLOCK_PARAMS]
            + [fp["norm_g"], fp["norm_b"], fp["upsample_m"]])
    return pl.pallas_call(
        functools.partial(_fusion_kernel, n_patch=N, heads=F_HEADS,
                          inv_temp=1.0 / TEMPERATURE),
        out_shape=jax.ShapeDtypeStruct((Bn, K, HW), jnp.float32),
        grid=(Bn,),
        in_specs=in_specs,
        out_specs=pl.BlockSpec((1, K, HW), lambda i: (i, 0, 0)),   # lane-dense (HW=256)
        compiler_params=pltpu.CompilerParams(dimension_semantics=("parallel",)),
    )(*args)


# ------------------------------ full forward ---------------------------------


def full_model_forward(params, img, text):
    tp, vp, fp = params["text"], params["img"], params["fusion"]

    # image -> patch rows (B, N, C*P*P); NCHW like PyTorch conv1-as-matmul
    Bn, Ci, H, W = img.shape
    gh, gw = H // PATCH, W // PATCH
    patches = img.reshape(Bn, Ci, gh, PATCH, gw, PATCH)
    patches = patches.transpose(0, 2, 4, 1, 3, 5).reshape(Bn, gh * gw,
                                                          Ci * PATCH * PATCH)

    img_enc = vision_encoder(patches, vp)                 # (B, N, Dv), L2-normalized

    # token-embedding gather + EOT one-hot (tiny; kept at JAX level)
    x_emb = jnp.take(tp["token_emb"], text, axis=0) + tp["pos_emb"][None]
    eot = jnp.argmax(text, axis=-1)                       # CLIP: EOT = max token id
    onehot = (jnp.arange(CTX)[None, :] == eot[:, None]).astype(jnp.float32)
    txt = text_encoder(x_emb, onehot, tp)                 # (K, TEXT_DIM)

    logits = fusion_decoder_head(img_enc, txt, fp)        # (B, K, H*W), lane-dense
    return logits.reshape(Bn, NCLASS, IMG, IMG)


# ------------------------------ parameter init -------------------------------


def _bilinear_matrix_np(dst, src):
    """align_corners=True bilinear interpolation matrix (dst, src); numpy const."""
    if src == 1:
        return np.ones((dst, 1), np.float32)
    pos = np.arange(dst, dtype=np.float64) * (src - 1) / (dst - 1)
    lo = np.clip(np.floor(pos).astype(np.int64), 0, src - 2)
    w = (pos - lo).astype(np.float32)
    M = np.zeros((dst, src), np.float32)
    M[np.arange(dst), lo] += 1.0 - w
    M[np.arange(dst), lo + 1] += w
    return M


def _init_blocks(key, n_layers, d, d_ff):
    """Per-layer block weights stacked along a leading layer axis."""
    s = 0.02
    per = []
    for kl in jax.random.split(key, n_layers):
        k = jax.random.split(kl, 4)
        per.append(dict(
            ln1_g=jnp.ones((1, d), jnp.float32), ln1_b=jnp.zeros((1, d), jnp.float32),
            w_qkv=jax.random.normal(k[0], (d, 3 * d), jnp.float32) * s,
            b_qkv=jnp.zeros((1, 3 * d), jnp.float32),
            w_o=jax.random.normal(k[1], (d, d), jnp.float32) * s,
            b_o=jnp.zeros((1, d), jnp.float32),
            ln2_g=jnp.ones((1, d), jnp.float32), ln2_b=jnp.zeros((1, d), jnp.float32),
            w1=jax.random.normal(k[2], (d, d_ff), jnp.float32) * s,
            b1=jnp.zeros((1, d_ff), jnp.float32),
            w2=jax.random.normal(k[3], (d_ff, d), jnp.float32) * s,
            b2=jnp.zeros((1, d), jnp.float32),
        ))
    return {n: jnp.stack([p[n] for p in per], axis=0) for n in _BLOCK_PARAMS}


def init_params(key):
    kt, kv, kf = jax.random.split(key, 3)
    s = 0.02

    kts = jax.random.split(kt, 4)
    text = dict(
        token_emb=jax.random.normal(kts[0], (VOCAB, T_WIDTH), jnp.float32) * s,
        pos_emb=jax.random.normal(kts[1], (CTX, T_WIDTH), jnp.float32) * 0.01,
        blocks=_init_blocks(kts[2], T_LAYERS, T_WIDTH, 4 * T_WIDTH),
        lnf_g=jnp.ones((1, T_WIDTH), jnp.float32),
        lnf_b=jnp.zeros((1, T_WIDTH), jnp.float32),
        text_proj=jax.random.normal(kts[3], (T_WIDTH, TEXT_DIM), jnp.float32) * s,
    )

    kvs = jax.random.split(kv, 5)
    img = dict(
        conv_w=jax.random.normal(kvs[0], (C * PATCH * PATCH, V_WIDTH), jnp.float32) * s,
        cls_emb=jax.random.normal(kvs[1], (1, V_WIDTH), jnp.float32) * s,
        pos_emb=jax.random.normal(kvs[2], (N_PATCH + 1, V_WIDTH), jnp.float32) * 0.01,
        ln_pre_g=jnp.ones((1, V_WIDTH), jnp.float32),
        ln_pre_b=jnp.zeros((1, V_WIDTH), jnp.float32),
        blocks=_init_blocks(kvs[3], V_LAYERS, V_WIDTH, 4 * V_WIDTH),
        ln_post_g=jnp.ones((1, V_WIDTH), jnp.float32),
        ln_post_b=jnp.zeros((1, V_WIDTH), jnp.float32),
        proj=jax.random.normal(kvs[4], (V_WIDTH, VISUAL_DIM), jnp.float32) * s,
    )

    kfs = jax.random.split(kf, 3)
    mh = _bilinear_matrix_np(IMG, GRID)
    mw = _bilinear_matrix_np(IMG, GRID)
    fusion = dict(
        proj_v_w=jax.random.normal(kfs[0], (VISUAL_DIM, D_MODEL), jnp.float32) * s,
        proj_v_b=jnp.zeros((1, D_MODEL), jnp.float32),
        proj_t_w=jax.random.normal(kfs[1], (TEXT_DIM, D_MODEL), jnp.float32) * s,
        proj_t_b=jnp.zeros((1, D_MODEL), jnp.float32),
        blocks=_init_blocks(kfs[2], F_LAYERS, D_MODEL, D_FF),
        norm_g=jnp.ones((1, D_MODEL), jnp.float32),
        norm_b=jnp.zeros((1, D_MODEL), jnp.float32),
        # (H*W, gh*gw) separable bilinear matrix = kron(Mh, Mw); precomputed once.
        upsample_m=jnp.asarray(np.kron(mh, mw), jnp.float32),
    )
    return dict(text=text, img=img, fusion=fusion)


# ----------------------------------- main ------------------------------------

if __name__ == "__main__":
    key = jax.random.PRNGKey(0)
    kp, ki, kt = jax.random.split(key, 3)
    params = init_params(kp)
    img = jax.random.normal(ki, (B, C, IMG, IMG), jnp.float32)      # NCHW, like PyTorch
    text = jax.random.randint(kt, (NCLASS, CTX), 1, VOCAB)          # tokenized class prompts

    fwd = jax.jit(full_model_forward)
    out = jax.block_until_ready(fwd(params, img, text))
    assert out.shape == (B, NCLASS, IMG, IMG), out.shape
    assert bool(jnp.all(jnp.isfinite(out)))
    print("KERNEL_OK")
</pallas_src>

<mosaic_0001>
module attributes {stable_mosaic.version = 11 : i64} {
  func.func @_vision_kernel(%arg0: i32, %arg1: memref<1x16x48xf32, #tpu.memory_space<vmem>>, %arg2: memref<48x32xf32, #tpu.memory_space<vmem>>, %arg3: memref<1x32xf32, #tpu.memory_space<vmem>>, %arg4: memref<17x32xf32, #tpu.memory_space<vmem>>, %arg5: memref<1x32xf32, #tpu.memory_space<vmem>>, %arg6: memref<1x32xf32, #tpu.memory_space<vmem>>, %arg7: memref<2x1x32xf32, #tpu.memory_space<vmem>>, %arg8: memref<2x1x32xf32, #tpu.memory_space<vmem>>, %arg9: memref<2x32x96xf32, #tpu.memory_space<vmem>>, %arg10: memref<2x1x96xf32, #tpu.memory_space<vmem>>, %arg11: memref<2x32x32xf32, #tpu.memory_space<vmem>>, %arg12: memref<2x1x32xf32, #tpu.memory_space<vmem>>, %arg13: memref<2x1x32xf32, #tpu.memory_space<vmem>>, %arg14: memref<2x1x32xf32, #tpu.memory_space<vmem>>, %arg15: memref<2x32x128xf32, #tpu.memory_space<vmem>>, %arg16: memref<2x1x128xf32, #tpu.memory_space<vmem>>, %arg17: memref<2x128x32xf32, #tpu.memory_space<vmem>>, %arg18: memref<2x1x32xf32, #tpu.memory_space<vmem>>, %arg19: memref<1x32xf32, #tpu.memory_space<vmem>>, %arg20: memref<1x32xf32, #tpu.memory_space<vmem>>, %arg21: memref<32x32xf32, #tpu.memory_space<vmem>>, %arg22: memref<1x16x32xf32, #tpu.memory_space<vmem>>) attributes {dimension_semantics = [#tpu.dimension_semantics<parallel>], iteration_bounds = array<i64: 2>, scalar_prefetch = 0 : i64, scratch_operands = 0 : i64, tpu.core_type = #tpu.core_type<tc>, window_params = [{transform_indices = @transform_0, window_bounds = array<i64: 1, 16, 48>}, {pipeline_mode = #tpu.pipeline_mode<synchronous>, transform_indices = @transform_1, window_bounds = array<i64: 48, 32>}, {pipeline_mode = #tpu.pipeline_mode<synchronous>, transform_indices = @transform_2, window_bounds = array<i64: 1, 32>}, {pipeline_mode = #tpu.pipeline_mode<synchronous>, transform_indices = @transform_3, window_bounds = array<i64: 17, 32>}, {pipeline_mode = #tpu.pipeline_mode<synchronous>, transform_indices = @transform_4, window_bounds = array<i64: 1, 32>}, {pipeline_mode = #tpu.pipeline_mode<synchronous>, transform_indices = @transform_5, window_bounds = array<i64: 1, 32>}, {pipeline_mode = #tpu.pipeline_mode<synchronous>, transform_indices = @transform_6, window_bounds = array<i64: 2, 1, 32>}, {pipeline_mode = #tpu.pipeline_mode<synchronous>, transform_indices = @transform_7, window_bounds = array<i64: 2, 1, 32>}, {pipeline_mode = #tpu.pipeline_mode<synchronous>, transform_indices = @transform_8, window_bounds = array<i64: 2, 32, 96>}, {pipeline_mode = #tpu.pipeline_mode<synchronous>, transform_indices = @transform_9, window_bounds = array<i64: 2, 1, 96>}, {pipeline_mode = #tpu.pipeline_mode<synchronous>, transform_indices = @transform_10, window_bounds = array<i64: 2, 32, 32>}, {pipeline_mode = #tpu.pipeline_mode<synchronous>, transform_indices = @transform_11, window_bounds = array<i64: 2, 1, 32>}, {pipeline_mode = #tpu.pipeline_mode<synchronous>, transform_indices = @transform_12, window_bounds = array<i64: 2, 1, 32>}, {pipeline_mode = #tpu.pipeline_mode<synchronous>, transform_indices = @transform_13, window_bounds = array<i64: 2, 1, 32>}, {pipeline_mode = #tpu.pipeline_mode<synchronous>, transform_indices = @transform_14, window_bounds = array<i64: 2, 32, 128>}, {pipeline_mode = #tpu.pipeline_mode<synchronous>, transform_indices = @transform_15, window_bounds = array<i64: 2, 1, 128>}, {pipeline_mode = #tpu.pipeline_mode<synchronous>, transform_indices = @transform_16, window_bounds = array<i64: 2, 128, 32>}, {pipeline_mode = #tpu.pipeline_mode<synchronous>, transform_indices = @transform_17, window_bounds = array<i64: 2, 1, 32>}, {pipeline_mode = #tpu.pipeline_mode<synchronous>, transform_indices = @transform_18, window_bounds = array<i64: 1, 32>}, {pipeline_mode = #tpu.pipeline_mode<synchronous>, transform_indices = @transform_19, window_bounds = array<i64: 1, 32>}, {pipeline_mode = #tpu.pipeline_mode<synchronous>, transform_indices = @transform_20, window_bounds = array<i64: 32, 32>}, {transform_indices = @transform_21, window_bounds = array<i64: 1, 16, 32>}]} {
    %c0 = arith.constant 0 : index
    %c0_0 = arith.constant 0 : index
    %c0_1 = arith.constant 0 : index
    %0 = vector.load %arg1[%c0, %c0_0, %c0_1] : memref<1x16x48xf32, #tpu.memory_space<vmem>>, vector<1x16x48xf32>
    %1 = vector.shape_cast %0 : vector<1x16x48xf32> to vector<16x48xf32>
    %c0_2 = arith.constant 0 : index
    %c0_3 = arith.constant 0 : index
    %2 = vector.load %arg4[%c0_2, %c0_3] : memref<17x32xf32, #tpu.memory_space<vmem>>, vector<17x32xf32>
    %c0_4 = arith.constant 0 : index
    %c0_5 = arith.constant 0 : index
    %3 = vector.load %arg2[%c0_4, %c0_5] : memref<48x32xf32, #tpu.memory_space<vmem>>, vector<48x32xf32>
    %cst = arith.constant dense<0.000000e+00> : vector<16x32xf32>
    %4 = tpu.matmul %1, %3, %cst {dimension_numbers = #tpu.dot_dimension_numbers<[1], [0], [0], [1], [0, 0, 1, 1], [], []>} : vector<16x48xf32>, vector<48x32xf32>, vector<16x32xf32> -> vector<16x32xf32>
    %5 = vector.extract_strided_slice %2 {offsets = [0, 0], sizes = [16, 32], strides = [1, 1]} : vector<17x32xf32> to vector<16x32xf32>
    %6 = arith.addf %4, %5 : vector<16x32xf32>
    %c0_6 = arith.constant 0 : index
    %c0_7 = arith.constant 0 : index
    %7 = vector.load %arg3[%c0_6, %c0_7] : memref<1x32xf32, #tpu.memory_space<vmem>>, vector<1x32xf32>
    %8 = vector.extract_strided_slice %2 {offsets = [16, 0], sizes = [1, 32], strides = [1, 1]} : vector<17x32xf32> to vector<1x32xf32>
    %9 = arith.addf %7, %8 : vector<1x32xf32>
    %10 = tpu.concatenate %6, %9 in 0 : vector<16x32xf32>, vector<1x32xf32> -> vector<17x32xf32>
    %c0_8 = arith.constant 0 : index
    %c0_9 = arith.constant 0 : index
    %11 = vector.load %arg5[%c0_8, %c0_9] : memref<1x32xf32, #tpu.memory_space<vmem>>, vector<1x32xf32>
    %c0_10 = arith.constant 0 : index
    %c0_11 = arith.constant 0 : index
    %12 = vector.load %arg6[%c0_10, %c0_11] : memref<1x32xf32, #tpu.memory_space<vmem>>, vector<1x32xf32>
    %cst_12 = arith.constant dense<0.000000e+00> : vector<17xf32>
    %13 = vector.multi_reduction <add>, %10, %cst_12 [1] : vector<17x32xf32> to vector<17xf32>
    %14 = vector.shape_cast %13 : vector<17xf32> to vector<17x1xf32>
    %cst_13 = arith.constant 3.200000e+01 : f32
    %15 = vector.broadcast %cst_13 : f32 to vector<17x1xf32>
    %16 = arith.divf %14, %15 : vector<17x1xf32>
    %17 = vector.broadcast %16 : vector<17x1xf32> to vector<17x32xf32>
    %18 = arith.subf %10, %17 : vector<17x32xf32>
    %19 = arith.mulf %18, %18 : vector<17x32xf32>
    %cst_14 = arith.constant dense<0.000000e+00> : vector<17xf32>
    %20 = vector.multi_reduction <add>, %19, %cst_14 [1] : vector<17x32xf32> to vector<17xf32>
    %21 = vector.shape_cast %20 : vector<17xf32> to vector<17x1xf32>
    %cst_15 = arith.constant 3.200000e+01 : f32
    %22 = vector.broadcast %cst_15 : f32 to vector<17x1xf32>
    %23 = arith.divf %21, %22 : vector<17x1xf32>
    %24 = vector.broadcast %16 : vector<17x1xf32> to vector<17x32xf32>
    %25 = arith.subf %10, %24 : vector<17x32xf32>
    %cst_16 = arith.constant 9.99999974E-6 : f32
    %26 = vector.broadcast %cst_16 : f32 to vector<17x1xf32>
    %27 = arith.addf %23, %26 : vector<17x1xf32>
    %28 = math.rsqrt %27 : vector<17x1xf32>
    %29 = vector.broadcast %28 : vector<17x1xf32> to vector<17x32xf32>
    %30 = arith.mulf %25, %29 : vector<17x32xf32>
    %31 = vector.broadcast %11 : vector<1x32xf32> to vector<17x32xf32>
    %32 = arith.mulf %30, %31 : vector<17x32xf32>
    %33 = vector.broadcast %12 : vector<1x32xf32> to vector<17x32xf32>
    %34 = arith.addf %32, %33 : vector<17x32xf32>
    %c0_17 = arith.constant 0 : index
    %c0_18 = arith.constant 0 : index
    %c0_19 = arith.constant 0 : index
    %35 = vector.load %arg7[%c0_17, %c0_18, %c0_19] : memref<2x1x32xf32, #tpu.memory_space<vmem>>, vector<1x1x32xf32>
    %36 = vector.shape_cast %35 : vector<1x1x32xf32> to vector<1x32xf32>
    %c0_20 = arith.constant 0 : index
    %c0_21 = arith.constant 0 : index
    %c0_22 = arith.constant 0 : index
    %37 = vector.load %arg8[%c0_20, %c0_21, %c0_22] : memref<2x1x32xf32, #tpu.memory_space<vmem>>, vector<1x1x32xf32>
    %38 = vector.shape_cast %37 : vector<1x1x32xf32> to vector<1x32xf32>
    %c0_23 = arith.constant 0 : index
    %c0_24 = arith.constant 0 : index
    %c0_25 = arith.constant 0 : index
    %39 = vector.load %arg9[%c0_23, %c0_24, %c0_25] : memref<2x32x96xf32, #tpu.memory_space<vmem>>, vector<1x32x96xf32>
    %40 = vector.shape_cast %39 : vector<1x32x96xf32> to vector<32x96xf32>
    %c0_26 = arith.constant 0 : index
    %c0_27 = arith.constant 0 : index
    %c0_28 = arith.constant 0 : index
    %41 = vector.load %arg10[%c0_26, %c0_27, %c0_28] : memref<2x1x96xf32, #tpu.memory_space<vmem>>, vector<1x1x96xf32>
    %42 = vector.shape_cast %41 : vector<1x1x96xf32> to vector<1x96xf32>
    %c0_29 = arith.constant 0 : index
    %c0_30 = arith.constant 0 : index
    %c0_31 = arith.constant 0 : index
    %43 = vector.load %arg11[%c0_29, %c0_30, %c0_31] : memref<2x32x32xf32, #tpu.memory_space<vmem>>, vector<1x32x32xf32>
    %44 = vector.shape_cast %43 : vector<1x32x32xf32> to vector<32x32xf32>
    %c0_32 = arith.constant 0 : index
    %c0_33 = arith.constant 0 : index
    %c0_34 = arith.constant 0 : index
    %45 = vector.load %arg12[%c0_32, %c0_33, %c0_34] : memref<2x1x32xf32, #tpu.memory_space<vmem>>, vector<1x1x32xf32>
    %46 = vector.shape_cast %45 : vector<1x1x32xf32> to vector<1x32xf32>
    %c0_35 = arith.constant 0 : index
    %c0_36 = arith.constant 0 : index
    %c0_37 = arith.constant 0 : index
    %47 = vector.load %arg13[%c0_35, %c0_36, %c0_37] : memref<2x1x32xf32, #tpu.memory_space<vmem>>, vector<1x1x32xf32>
    %48 = vector.shape_cast %47 : vector<1x1x32xf32> to vector<1x32xf32>
    %c0_38 = arith.constant 0 : index
    %c0_39 = arith.constant 0 : index
    %c0_40 = arith.constant 0 : index
    %49 = vector.load %arg14[%c0_38, %c0_39, %c0_40] : memref<2x1x32xf32, #tpu.memory_space<vmem>>, vector<1x1x32xf32>
    %50 = vector.shape_cast %49 : vector<1x1x32xf32> to vector<1x32xf32>
    %c0_41 = arith.constant 0 : index
    %c0_42 = arith.constant 0 : index
    %c0_43 = arith.constant 0 : index
    %51 = vector.load %arg15[%c0_41, %c0_42, %c0_43] : memref<2x32x128xf32, #tpu.memory_space<vmem>>, vector<1x32x128xf32>
    %52 = vector.shape_cast %51 : vector<1x32x128xf32> to vector<32x128xf32>
    %c0_44 = arith.constant 0 : index
    %c0_45 = arith.constant 0 : index
    %c0_46 = arith.constant 0 : index
    %53 = vector.load %arg16[%c0_44, %c0_45, %c0_46] : memref<2x1x128xf32, #tpu.memory_space<vmem>>, vector<1x1x128xf32>
    %54 = vector.shape_cast %53 : vector<1x1x128xf32> to vector<1x128xf32>
    %c0_47 = arith.constant 0 : index
    %c0_48 = arith.constant 0 : index
    %c0_49 = arith.constant 0 : index
    %55 = vector.load %arg17[%c0_47, %c0_48, %c0_49] : memref<2x128x32xf32, #tpu.memory_space<vmem>>, vector<1x128x32xf32>
    %56 = vector.shape_cast %55 : vector<1x128x32xf32> to vector<128x32xf32>
    %c0_50 = arith.constant 0 : index
    %c0_51 = arith.constant 0 : index
    %c0_52 = arith.constant 0 : index
    %57 = vector.load %arg18[%c0_50, %c0_51, %c0_52] : memref<2x1x32xf32, #tpu.memory_space<vmem>>, vector<1x1x32xf32>
    %58 = vector.shape_cast %57 : vector<1x1x32xf32> to vector<1x32xf32>
    %cst_53 = arith.constant dense<0.000000e+00> : vector<17xf32>
    %59 = vector.multi_reduction <add>, %34, %cst_53 [1] : vector<17x32xf32> to vector<17xf32>
    %60 = vector.shape_cast %59 : vector<17xf32> to vector<17x1xf32>
    %cst_54 = arith.constant 3.200000e+01 : f32
    %61 = vector.broadcast %cst_54 : f32 to vector<17x1xf32>
    %62 = arith.divf %60, %61 : vector<17x1xf32>
    %63 = vector.broadcast %62 : vector<17x1xf32> to vector<17x32xf32>
    %64 = arith.subf %34, %63 : vector<17x32xf32>
    %65 = arith.mulf %64, %64 : vector<17x32xf32>
    %cst_55 = arith.constant dense<0.000000e+00> : vector<17xf32>
    %66 = vector.multi_reduction <add>, %65, %cst_55 [1] : vector<17x32xf32> to vector<17xf32>
    %67 = vector.shape_cast %66 : vector<17xf32> to vector<17x1xf32>
    %cst_56 = arith.constant 3.200000e+01 : f32
    %68 = vector.broadcast %cst_56 : f32 to vector<17x1xf32>
    %69 = arith.divf %67, %68 : vector<17x1xf32>
    %70 = vector.broadcast %62 : vector<17x1xf32> to vector<17x32xf32>
    %71 = arith.subf %34, %70 : vector<17x32xf32>
    %cst_57 = arith.constant 9.99999974E-6 : f32
    %72 = vector.broadcast %cst_57 : f32 to vector<17x1xf32>
    %73 = arith.addf %69, %72 : vector<17x1xf32>
    %74 = math.rsqrt %73 : vector<17x1xf32>
    %75 = vector.broadcast %74 : vector<17x1xf32> to vector<17x32xf32>
    %76 = arith.mulf %71, %75 : vector<17x32xf32>
    %77 = vector.broadcast %36 : vector<1x32xf32> to vector<17x32xf32>
    %78 = arith.mulf %76, %77 : vector<17x32xf32>
    %79 = vector.broadcast %38 : vector<1x32xf32> to vector<17x32xf32>
    %80 = arith.addf %78, %79 : vector<17x32xf32>
    %cst_58 = arith.constant dense<0.000000e+00> : vector<17x96xf32>
    %81 = tpu.matmul %80, %40, %cst_58 {dimension_numbers = #tpu.dot_dimension_numbers<[1], [0], [0], [1], [0, 0, 1, 1], [], []>} : vector<17x32xf32>, vector<32x96xf32>, vector<17x96xf32> -> vector<17x96xf32>
    %82 = vector.broadcast %42 : vector<1x96xf32> to vector<17x96xf32>
    %83 = arith.addf %81, %82 : vector<17x96xf32>
    %84 = vector.extract_strided_slice %83 {offsets = [0, 0], sizes = [17, 8], strides = [1, 1]} : vector<17x96xf32> to vector<17x8xf32>
    %85 = vector.extract_strided_slice %83 {offsets = [0, 32], sizes = [17, 8], strides = [1, 1]} : vector<17x96xf32> to vector<17x8xf32>
    %86 = vector.extract_strided_slice %83 {offsets = [0, 64], sizes = [17, 8], strides = [1, 1]} : vector<17x96xf32> to vector<17x8xf32>
    %cst_59 = arith.constant dense<0.000000e+00> : vector<17x17xf32>
    %87 = tpu.matmul %84, %85, %cst_59 {dimension_numbers = #tpu.dot_dimension_numbers<[1], [1], [0], [0], [0, 0, 1, 0], [], []>} : vector<17x8xf32>, vector<17x8xf32>, vector<17x17xf32> -> vector<17x17xf32>
    %cst_60 = arith.constant 0.353553385 : f32
    %88 = vector.broadcast %cst_60 : f32 to vector<17x17xf32>
    %89 = arith.mulf %87, %88 : vector<17x17xf32>
    %cst_61 = arith.constant dense<0xFF800000> : vector<17xf32>
    %90 = vector.multi_reduction <maximumf>, %89, %cst_61 [1] : vector<17x17xf32> to vector<17xf32>
    %91 = vector.shape_cast %90 : vector<17xf32> to vector<17x1xf32>
    %92 = vector.broadcast %91 : vector<17x1xf32> to vector<17x17xf32>
    %93 = arith.subf %89, %92 : vector<17x17xf32>
    %94 = math.exp %93 : vector<17x17xf32>
    %cst_62 = arith.constant dense<0.000000e+00> : vector<17xf32>
    %95 = vector.multi_reduction <add>, %94, %cst_62 [1] : vector<17x17xf32> to vector<17xf32>
    %96 = vector.shape_cast %95 : vector<17xf32> to vector<17x1xf32>
    %97 = tpu.reciprocal %96 {approx = true} : vector<17x1xf32> -> vector<17x1xf32>
    %98 = vector.broadcast %97 : vector<17x1xf32> to vector<17x17xf32>
    %99 = arith.mulf %94, %98 : vector<17x17xf32>
    %cst_63 = arith.constant dense<0.000000e+00> : vector<17x8xf32>
    %100 = tpu.matmul %99, %86, %cst_63 {dimension_numbers = #tpu.dot_dimension_numbers<[1], [0], [0], [1], [0, 0, 1, 1], [], []>} : vector<17x17xf32>, vector<17x8xf32>, vector<17x8xf32> -> vector<17x8xf32>
    %101 = vector.extract_strided_slice %83 {offsets = [0, 8], sizes = [17, 8], strides = [1, 1]} : vector<17x96xf32> to vector<17x8xf32>
    %102 = vector.extract_strided_slice %83 {offsets = [0, 40], sizes = [17, 8], strides = [1, 1]} : vector<17x96xf32> to vector<17x8xf32>
    %103 = vector.extract_strided_slice %83 {offsets = [0, 72], sizes = [17, 8], strides = [1, 1]} : vector<17x96xf32> to vector<17x8xf32>
    %cst_64 = arith.constant dense<0.000000e+00> : vector<17x17xf32>
    %104 = tpu.matmul %101, %102, %cst_64 {dimension_numbers = #tpu.dot_dimension_numbers<[1], [1], [0], [0], [0, 0, 1, 0], [], []>} : vector<17x8xf32>, vector<17x8xf32>, vector<17x17xf32> -> vector<17x17xf32>
    %cst_65 = arith.constant 0.353553385 : f32
    %105 = vector.broadcast %cst_65 : f32 to vector<17x17xf32>
    %106 = arith.mulf %104, %105 : vector<17x17xf32>
    %cst_66 = arith.constant dense<0xFF800000> : vector<17xf32>
    %107 = vector.multi_reduction <maximumf>, %106, %cst_66 [1] : vector<17x17xf32> to vector<17xf32>
    %108 = vector.shape_cast %107 : vector<17xf32> to vector<17x1xf32>
    %109 = vector.broadcast %108 : vector<17x1xf32> to vector<17x17xf32>
    %110 = arith.subf %106, %109 : vector<17x17xf32>
    %111 = math.exp %110 : vector<17x17xf32>
    %cst_67 = arith.constant dense<0.000000e+00> : vector<17xf32>
    %112 = vector.multi_reduction <add>, %111, %cst_67 [1] : vector<17x17xf32> to vector<17xf32>
    %113 = vector.shape_cast %112 : vector<17xf32> to vector<17x1xf32>
    %114 = tpu.reciprocal %113 {approx = true} : vector<17x1xf32> -> vector<17x1xf32>
    %115 = vector.broadcast %114 : vector<17x1xf32> to vector<17x17xf32>
    %116 = arith.mulf %111, %115 : vector<17x17xf32>
    %cst_68 = arith.constant dense<0.000000e+00> : vector<17x8xf32>
    %117 = tpu.matmul %116, %103, %cst_68 {dimension_numbers = #tpu.dot_dimension_numbers<[1], [0], [0], [1], [0, 0, 1, 1], [], []>} : vector<17x17xf32>, vector<17x8xf32>, vector<17x8xf32> -> vector<17x8xf32>
    %118 = vector.extract_strided_slice %83 {offsets = [0, 16], sizes = [17, 8], strides = [1, 1]} : vector<17x96xf32> to vector<17x8xf32>
    %119 = vector.extract_strided_slice %83 {offsets = [0, 48], sizes = [17, 8], strides = [1, 1]} : vector<17x96xf32> to vector<17x8xf32>
    %120 = vector.extract_strided_slice %83 {offsets = [0, 80], sizes = [17, 8], strides = [1, 1]} : vector<17x96xf32> to vector<17x8xf32>
    %cst_69 = arith.constant dense<0.000000e+00> : vector<17x17xf32>
    %121 = tpu.matmul %118, %119, %cst_69 {dimension_numbers = #tpu.dot_dimension_numbers<[1], [1], [0], [0], [0, 0, 1, 0], [], []>} : vector<17x8xf32>, vector<17x8xf32>, vector<17x17xf32> -> vector<17x17xf32>
    %cst_70 = arith.constant 0.353553385 : f32
    %122 = vector.broadcast %cst_70 : f32 to vector<17x17xf32>
    %123 = arith.mulf %121, %122 : vector<17x17xf32>
    %cst_71 = arith.constant dense<0xFF800000> : vector<17xf32>
    %124 = vector.multi_reduction <maximumf>, %123, %cst_71 [1] : vector<17x17xf32> to vector<17xf32>
    %125 = vector.shape_cast %124 : vector<17xf32> to vector<17x1xf32>
    %126 = vector.broadcast %125 : vector<17x1xf32> to vector<17x17xf32>
    %127 = arith.subf %123, %126 : vector<17x17xf32>
    %128 = math.exp %127 : vector<17x17xf32>
    %cst_72 = arith.constant dense<0.000000e+00> : vector<17xf32>
    %129 = vector.multi_reduction <add>, %128, %cst_72 [1] : vector<17x17xf32> to vector<17xf32>
    %130 = vector.shape_cast %129 : vector<17xf32> to vector<17x1xf32>
    %131 = tpu.reciprocal %130 {approx = true} : vector<17x1xf32> -> vector<17x1xf32>
    %132 = vector.broadcast %131 : vector<17x1xf32> to vector<17x17xf32>
    %133 = arith.mulf %128, %132 : vector<17x17xf32>
    %cst_73 = arith.constant dense<0.000000e+00> : vector<17x8xf32>
    %134 = tpu.matmul %133, %120, %cst_73 {dimension_numbers = #tpu.dot_dimension_numbers<[1], [0], [0], [1], [0, 0, 1, 1], [], []>} : vector<17x17xf32>, vector<17x8xf32>, vector<17x8xf32> -> vector<17x8xf32>
    %135 = vector.extract_strided_slice %83 {offsets = [0, 24], sizes = [17, 8], strides = [1, 1]} : vector<17x96xf32> to vector<17x8xf32>
    %136 = vector.extract_strided_slice %83 {offsets = [0, 56], sizes = [17, 8], strides = [1, 1]} : vector<17x96xf32> to vector<17x8xf32>
    %137 = vector.extract_strided_slice %83 {offsets = [0, 88], sizes = [17, 8], strides = [1, 1]} : vector<17x96xf32> to vector<17x8xf32>
    %cst_74 = arith.constant dense<0.000000e+00> : vector<17x17xf32>
    %138 = tpu.matmul %135, %136, %cst_74 {dimension_numbers = #tpu.dot_dimension_numbers<[1], [1], [0], [0], [0, 0, 1, 0], [], []>} : vector<17x8xf32>, vector<17x8xf32>, vector<17x17xf32> -> vector<17x17xf32>
    %cst_75 = arith.constant 0.353553385 : f32
    %139 = vector.broadcast %cst_75 : f32 to vector<17x17xf32>
    %140 = arith.mulf %138, %139 : vector<17x17xf32>
    %cst_76 = arith.constant dense<0xFF800000> : vector<17xf32>
    %141 = vector.multi_reduction <maximumf>, %140, %cst_76 [1] : vector<17x17xf32> to vector<17xf32>
    %142 = vector.shape_cast %141 : vector<17xf32> to vector<17x1xf32>
    %143 = vector.broadcast %142 : vector<17x1xf32> to vector<17x17xf32>
    %144 = arith.subf %140, %143 : vector<17x17xf32>
    %145 = math.exp %144 : vector<17x17xf32>
    %cst_77 = arith.constant dense<0.000000e+00> : vector<17xf32>
    %146 = vector.multi_reduction <add>, %145, %cst_77 [1] : vector<17x17xf32> to vector<17xf32>
    %147 = vector.shape_cast %146 : vector<17xf32> to vector<17x1xf32>
    %148 = tpu.reciprocal %147 {approx = true} : vector<17x1xf32> -> vector<17x1xf32>
    %149 = vector.broadcast %148 : vector<17x1xf32> to vector<17x17xf32>
    %150 = arith.mulf %145, %149 : vector<17x17xf32>
    %cst_78 = arith.constant dense<0.000000e+00> : vector<17x8xf32>
    %151 = tpu.matmul %150, %137, %cst_78 {dimension_numbers = #tpu.dot_dimension_numbers<[1], [0], [0], [1], [0, 0, 1, 1], [], []>} : vector<17x17xf32>, vector<17x8xf32>, vector<17x8xf32> -> vector<17x8xf32>
    %152 = tpu.concatenate %100, %117, %134, %151 in 1 : vector<17x8xf32>, vector<17x8xf32>, vector<17x8xf32>, vector<17x8xf32> -> vector<17x32xf32>
    %cst_79 = arith.constant dense<0.000000e+00> : vector<17x32xf32>
    %153 = tpu.matmul %152, %44, %cst_79 {dimension_numbers = #tpu.dot_dimension_numbers<[1], [0], [0], [1], [0, 0, 1, 1], [], []>} : vector<17x32xf32>, vector<32x32xf32>, vector<17x32xf32> -> vector<17x32xf32>
    %154 = arith.addf %34, %153 : vector<17x32xf32>
    %155 = vector.broadcast %46 : vector<1x32xf32> to vector<17x32xf32>
    %156 = arith.addf %154, %155 : vector<17x32xf32>
    %cst_80 = arith.constant dense<0.000000e+00> : vector<17xf32>
    %157 = vector.multi_reduction <add>, %156, %cst_80 [1] : vector<17x32xf32> to vector<17xf32>
    %158 = vector.shape_cast %157 : vector<17xf32> to vector<17x1xf32>
    %cst_81 = arith.constant 3.200000e+01 : f32
    %159 = vector.broadcast %cst_81 : f32 to vector<17x1xf32>
    %160 = arith.divf %158, %159 : vector<17x1xf32>
    %161 = vector.broadcast %160 : vector<17x1xf32> to vector<17x32xf32>
    %162 = arith.subf %156, %161 : vector<17x32xf32>
    %163 = arith.mulf %162, %162 : vector<17x32xf32>
    %cst_82 = arith.constant dense<0.000000e+00> : vector<17xf32>
    %164 = vector.multi_reduction <add>, %163, %cst_82 [1] : vector<17x32xf32> to vector<17xf32>
    %165 = vector.shape_cast %164 : vector<17xf32> to vector<17x1xf32>
    %cst_83 = arith.constant 3.200000e+01 : f32
    %166 = vector.broadcast %cst_83 : f32 to vector<17x1xf32>
    %167 = arith.divf %165, %166 : vector<17x1xf32>
    %168 = vector.broadcast %160 : vector<17x1xf32> to vector<17x32xf32>
    %169 = arith.subf %156, %168 : vector<17x32xf32>
    %cst_84 = arith.constant 9.99999974E-6 : f32
    %170 = vector.broadcast %cst_84 : f32 to vector<17x1xf32>
    %171 = arith.addf %167, %170 : vector<17x1xf32>
    %172 = math.rsqrt %171 : vector<17x1xf32>
    %173 = vector.broadcast %172 : vector<17x1xf32> to vector<17x32xf32>
    %174 = arith.mulf %169, %173 : vector<17x32xf32>
    %175 = vector.broadcast %48 : vector<1x32xf32> to vector<17x32xf32>
    %176 = arith.mulf %174, %175 : vector<17x32xf32>
    %177 = vector.broadcast %50 : vector<1x32xf32> to vector<17x32xf32>
    %178 = arith.addf %176, %177 : vector<17x32xf32>
    %cst_85 = arith.constant dense<0.000000e+00> : vector<17x128xf32>
    %179 = tpu.matmul %178, %52, %cst_85 {dimension_numbers = #tpu.dot_dimension_numbers<[1], [0], [0], [1], [0, 0, 1, 1], [], []>} : vector<17x32xf32>, vector<32x128xf32>, vector<17x128xf32> -> vector<17x128xf32>
    %180 = vector.broadcast %54 : vector<1x128xf32> to vector<17x128xf32>
    %181 = arith.addf %179, %180 : vector<17x128xf32>
    %cst_86 = arith.constant 1.702000e+00 : f32
    %182 = vector.broadcast %cst_86 : f32 to vector<17x128xf32>
    %183 = arith.mulf %182, %181 : vector<17x128xf32>
    %184 = arith.negf %183 : vector<17x128xf32>
    %185 = math.exp %184 : vector<17x128xf32>
    %cst_87 = arith.constant 1.000000e+00 : f32
    %186 = vector.broadcast %cst_87 : f32 to vector<17x128xf32>
    %187 = arith.addf %186, %185 : vector<17x128xf32>
    %188 = arith.divf %186, %187 : vector<17x128xf32>
    %189 = arith.mulf %181, %188 : vector<17x128xf32>
    %cst_88 = arith.constant dense<0.000000e+00> : vector<17x32xf32>
    %190 = tpu.matmul %189, %56, %cst_88 {dimension_numbers = #tpu.dot_dimension_numbers<[1], [0], [0], [1], [0, 0, 1, 1], [], []>} : vector<17x128xf32>, vector<128x32xf32>, vector<17x32xf32> -> vector<17x32xf32>
    %191 = arith.addf %156, %190 : vector<17x32xf32>
    %192 = vector.broadcast %58 : vector<1x32xf32> to vector<17x32xf32>
    %193 = arith.addf %191, %192 : vector<17x32xf32>
    %c1 = arith.constant 1 : index
    %c0_89 = arith.constant 0 : index
    %c0_90 = arith.constant 0 : index
    %194 = vector.load %arg7[%c1, %c0_89, %c0_90] : memref<2x1x32xf32, #tpu.memory_space<vmem>>, vector<1x1x32xf32>
    %195 = vector.shape_cast %194 : vector<1x1x32xf32> to vector<1x32xf32>
    %c1_91 = arith.constant 1 : index
    %c0_92 = arith.constant 0 : index
    %c0_93 = arith.constant 0 : index
    %196 = vector.load %arg8[%c1_91, %c0_92, %c0_93] : memref<2x1x32xf32, #tpu.memory_space<vmem>>, vector<1x1x32xf32>
    %197 = vector.shape_cast %196 : vector<1x1x32xf32> to vector<1x32xf32>
    %c1_94 = arith.constant 1 : index
    %c0_95 = arith.constant 0 : index
    %c0_96 = arith.constant 0 : index
    %198 = vector.load %arg9[%c1_94, %c0_95, %c0_96] : memref<2x32x96xf32, #tpu.memory_space<vmem>>, vector<1x32x96xf32>
    %199 = vector.shape_cast %198 : vector<1x32x96xf32> to vector<32x96xf32>
    %c1_97 = arith.constant 1 : index
    %c0_98 = arith.constant 0 : index
    %c0_99 = arith.constant 0 : index
    %200 = vector.load %arg10[%c1_97, %c0_98, %c0_99] : memref<2x1x96xf32, #tpu.memory_space<vmem>>, vector<1x1x96xf32>
    %201 = vector.shape_cast %200 : vector<1x1x96xf32> to vector<1x96xf32>
    %c1_100 = arith.constant 1 : index
    %c0_101 = arith.constant 0 : index
    %c0_102 = arith.constant 0 : index
    %202 = vector.load %arg11[%c1_100, %c0_101, %c0_102] : memref<2x32x32xf32, #tpu.memory_space<vmem>>, vector<1x32x32xf32>
    %203 = vector.shape_cast %202 : vector<1x32x32xf32> to vector<32x32xf32>
    %c1_103 = arith.constant 1 : index
    %c0_104 = arith.constant 0 : index
    %c0_105 = arith.constant 0 : index
    %204 = vector.load %arg12[%c1_103, %c0_104, %c0_105] : memref<2x1x32xf32, #tpu.memory_space<vmem>>, vector<1x1x32xf32>
    %205 = vector.shape_cast %204 : vector<1x1x32xf32> to vector<1x32xf32>
    %c1_106 = arith.constant 1 : index
    %c0_107 = arith.constant 0 : index
    %c0_108 = arith.constant 0 : index
    %206 = vector.load %arg13[%c1_106, %c0_107, %c0_108] : memref<2x1x32xf32, #tpu.memory_space<vmem>>, vector<1x1x32xf32>
    %207 = vector.shape_cast %206 : vector<1x1x32xf32> to vector<1x32xf32>
    %c1_109 = arith.constant 1 : index
    %c0_110 = arith.constant 0 : index
    %c0_111 = arith.constant 0 : index
    %208 = vector.load %arg14[%c1_109, %c0_110, %c0_111] : memref<2x1x32xf32, #tpu.memory_space<vmem>>, vector<1x1x32xf32>
    %209 = vector.shape_cast %208 : vector<1x1x32xf32> to vector<1x32xf32>
    %c1_112 = arith.constant 1 : index
    %c0_113 = arith.constant 0 : index
    %c0_114 = arith.constant 0 : index
    %210 = vector.load %arg15[%c1_112, %c0_113, %c0_114] : memref<2x32x128xf32, #tpu.memory_space<vmem>>, vector<1x32x128xf32>
    %211 = vector.shape_cast %210 : vector<1x32x128xf32> to vector<32x128xf32>
    %c1_115 = arith.constant 1 : index
    %c0_116 = arith.constant 0 : index
    %c0_117 = arith.constant 0 : index
    %212 = vector.load %arg16[%c1_115, %c0_116, %c0_117] : memref<2x1x128xf32, #tpu.memory_space<vmem>>, vector<1x1x128xf32>
    %213 = vector.shape_cast %212 : vector<1x1x128xf32> to vector<1x128xf32>
    %c1_118 = arith.constant 1 : index
    %c0_119 = arith.constant 0 : index
    %c0_120 = arith.constant 0 : index
    %214 = vector.load %arg17[%c1_118, %c0_119, %c0_120] : memref<2x128x32xf32, #tpu.memory_space<vmem>>, vector<1x128x32xf32>
    %215 = vector.shape_cast %214 : vector<1x128x32xf32> to vector<128x32xf32>
    %c1_121 = arith.constant 1 : index
    %c0_122 = arith.constant 0 : index
    %c0_123 = arith.constant 0 : index
    %216 = vector.load %arg18[%c1_121, %c0_122, %c0_123] : memref<2x1x32xf32, #tpu.memory_space<vmem>>, vector<1x1x32xf32>
    %217 = vector.shape_cast %216 : vector<1x1x32xf32> to vector<1x32xf32>
    %cst_124 = arith.constant dense<0.000000e+00> : vector<17xf32>
    %218 = vector.multi_reduction <add>, %193, %cst_124 [1] : vector<17x32xf32> to vector<17xf32>
    %219 = vector.shape_cast %218 : vector<17xf32> to vector<17x1xf32>
    %cst_125 = arith.constant 3.200000e+01 : f32
    %220 = vector.broadcast %cst_125 : f32 to vector<17x1xf32>
    %221 = arith.divf %219, %220 : vector<17x1xf32>
    %222 = vector.broadcast %221 : vector<17x1xf32> to vector<17x32xf32>
    %223 = arith.subf %193, %222 : vector<17x32xf32>
    %224 = arith.mulf %223, %223 : vector<17x32xf32>
    %cst_126 = arith.constant dense<0.000000e+00> : vector<17xf32>
    %225 = vector.multi_reduction <add>, %224, %cst_126 [1] : vector<17x32xf32> to vector<17xf32>
    %226 = vector.shape_cast %225 : vector<17xf32> to vector<17x1xf32>
    %cst_127 = arith.constant 3.200000e+01 : f32
    %227 = vector.broadcast %cst_127 : f32 to vector<17x1xf32>
    %228 = arith.divf %226, %227 : vector<17x1xf32>
    %229 = vector.broadcast %221 : vector<17x1xf32> to vector<17x32xf32>
    %230 = arith.subf %193, %229 : vector<17x32xf32>
    %cst_128 = arith.constant 9.99999974E-6 : f32
    %231 = vector.broadcast %cst_128 : f32 to vector<17x1xf32>
    %232 = arith.addf %228, %231 : vector<17x1xf32>
    %233 = math.rsqrt %232 : vector<17x1xf32>
    %234 = vector.broadcast %233 : vector<17x1xf32> to vector<17x32xf32>
    %235 = arith.mulf %230, %234 : vector<17x32xf32>
    %236 = vector.broadcast %195 : vector<1x32xf32> to vector<17x32xf32>
    %237 = arith.mulf %235, %236 : vector<17x32xf32>
    %238 = vector.broadcast %197 : vector<1x32xf32> to vector<17x32xf32>
    %239 = arith.addf %237, %238 : vector<17x32xf32>
    %cst_129 = arith.constant dense<0.000000e+00> : vector<17x96xf32>
    %240 = tpu.matmul %239, %199, %cst_129 {dimension_numbers = #tpu.dot_dimension_numbers<[1], [0], [0], [1], [0, 0, 1, 1], [], []>} : vector<17x32xf32>, vector<32x96xf32>, vector<17x96xf32> -> vector<17x96xf32>
    %241 = vector.broadcast %201 : vector<1x96xf32> to vector<17x96xf32>
    %242 = arith.addf %240, %241 : vector<17x96xf32>
    %243 = vector.extract_strided_slice %242 {offsets = [0, 0], sizes = [17, 8], strides = [1, 1]} : vector<17x96xf32> to vector<17x8xf32>
    %244 = vector.extract_strided_slice %242 {offsets = [0, 32], sizes = [17, 8], strides = [1, 1]} : vector<17x96xf32> to vector<17x8xf32>
    %245 = vector.extract_strided_slice %242 {offsets = [0, 64], sizes = [17, 8], strides = [1, 1]} : vector<17x96xf32> to vector<17x8xf32>
    %cst_130 = arith.constant dense<0.000000e+00> : vector<17x17xf32>
    %246 = tpu.matmul %243, %244, %cst_130 {dimension_numbers = #tpu.dot_dimension_numbers<[1], [1], [0], [0], [0, 0, 1, 0], [], []>} : vector<17x8xf32>, vector<17x8xf32>, vector<17x17xf32> -> vector<17x17xf32>
    %cst_131 = arith.constant 0.353553385 : f32
    %247 = vector.broadcast %cst_131 : f32 to vector<17x17xf32>
    %248 = arith.mulf %246, %247 : vector<17x17xf32>
    %cst_132 = arith.constant dense<0xFF800000> : vector<17xf32>
    %249 = vector.multi_reduction <maximumf>, %248, %cst_132 [1] : vector<17x17xf32> to vector<17xf32>
    %250 = vector.shape_cast %249 : vector<17xf32> to vector<17x1xf32>
    %251 = vector.broadcast %250 : vector<17x1xf32> to vector<17x17xf32>
    %252 = arith.subf %248, %251 : vector<17x17xf32>
    %253 = math.exp %252 : vector<17x17xf32>
    %cst_133 = arith.constant dense<0.000000e+00> : vector<17xf32>
    %254 = vector.multi_reduction <add>, %253, %cst_133 [1] : vector<17x17xf32> to vector<17xf32>
    %255 = vector.shape_cast %254 : vector<17xf32> to vector<17x1xf32>
    %256 = tpu.reciprocal %255 {approx = true} : vector<17x1xf32> -> vector<17x1xf32>
    %257 = vector.broadcast %256 : vector<17x1xf32> to vector<17x17xf32>
    %258 = arith.mulf %253, %257 : vector<17x17xf32>
    %cst_134 = arith.constant dense<0.000000e+00> : vector<17x8xf32>
    %259 = tpu.matmul %258, %245, %cst_134 {dimension_numbers = #tpu.dot_dimension_numbers<[1], [0], [0], [1], [0, 0, 1, 1], [], []>} : vector<17x17xf32>, vector<17x8xf32>, vector<17x8xf32> -> vector<17x8xf32>
    %260 = vector.extract_strided_slice %242 {offsets = [0, 8], sizes = [17, 8], strides = [1, 1]} : vector<17x96xf32> to vector<17x8xf32>
    %261 = vector.extract_strided_slice %242 {offsets = [0, 40], sizes = [17, 8], strides = [1, 1]} : vector<17x96xf32> to vector<17x8xf32>
    %262 = vector.extract_strided_slice %242 {offsets = [0, 72], sizes = [17, 8], strides = [1, 1]} : vector<17x96xf32> to vector<17x8xf32>
    %cst_135 = arith.constant dense<0.000000e+00> : vector<17x17xf32>
    %263 = tpu.matmul %260, %261, %cst_135 {dimension_numbers = #tpu.dot_dimension_numbers<[1], [1], [0], [0], [0, 0, 1, 0], [], []>} : vector<17x8xf32>, vector<17x8xf32>, vector<17x17xf32> -> vector<17x17xf32>
    %cst_136 = arith.constant 0.353553385 : f32
    %264 = vector.broadcast %cst_136 : f32 to vector<17x17xf32>
    %265 = arith.mulf %263, %264 : vector<17x17xf32>
    %cst_137 = arith.constant dense<0xFF800000> : vector<17xf32>
    %266 = vector.multi_reduction <maximumf>, %265, %cst_137 [1] : vector<17x17xf32> to vector<17xf32>
    %267 = vector.shape_cast %266 : vector<17xf32> to vector<17x1xf32>
    %268 = vector.broadcast %267 : vector<17x1xf32> to vector<17x17xf32>
    %269 = arith.subf %265, %268 : vector<17x17xf32>
    %270 = math.exp %269 : vector<17x17xf32>
    %cst_138 = arith.constant dense<0.000000e+00> : vector<17xf32>
    %271 = vector.multi_reduction <add>, %270, %cst_138 [1] : vector<17x17xf32> to vector<17xf32>
    %272 = vector.shape_cast %271 : vector<17xf32> to vector<17x1xf32>
    %273 = tpu.reciprocal %272 {approx = true} : vector<17x1xf32> -> vector<17x1xf32>
    %274 = vector.broadcast %273 : vector<17x1xf32> to vector<17x17xf32>
    %275 = arith.mulf %270, %274 : vector<17x17xf32>
    %cst_139 = arith.constant dense<0.000000e+00> : vector<17x8xf32>
    %276 = tpu.matmul %275, %262, %cst_139 {dimension_numbers = #tpu.dot_dimension_numbers<[1], [0], [0], [1], [0, 0, 1, 1], [], []>} : vector<17x17xf32>, vector<17x8xf32>, vector<17x8xf32> -> vector<17x8xf32>
    %277 = vector.extract_strided_slice %242 {offsets = [0, 16], sizes = [17, 8], strides = [1, 1]} : vector<17x96xf32> to vector<17x8xf32>
    %278 = vector.extract_strided_slice %242 {offsets = [0, 48], sizes = [17, 8], strides = [1, 1]} : vector<17x96xf32> to vector<17x8xf32>
    %279 = vector.extract_strided_slice %242 {offsets = [0, 80], sizes = [17, 8], strides = [1, 1]} : vector<17x96xf32> to vector<17x8xf32>
    %cst_140 = arith.constant dense<0.000000e+00> : vector<17x17xf32>
    %280 = tpu.matmul %277, %278, %cst_140 {dimension_numbers = #tpu.dot_dimension_numbers<[1], [1], [0], [0], [0, 0, 1, 0], [], []>} : vector<17x8xf32>, vector<17x8xf32>, vector<17x17xf32> -> vector<17x17xf32>
    %cst_141 = arith.constant 0.353553385 : f32
    %281 = vector.broadcast %cst_141 : f32 to vector<17x17xf32>
    %282 = arith.mulf %280, %281 : vector<17x17xf32>
    %cst_142 = arith.constant dense<0xFF800000> : vector<17xf32>
    %283 = vector.multi_reduction <maximumf>, %282, %cst_142 [1] : vector<17x17xf32> to vector<17xf32>
    %284 = vector.shape_cast %283 : vector<17xf32> to vector<17x1xf32>
    %285 = vector.broadcast %284 : vector<17x1xf32> to vector<17x17xf32>
    %286 = arith.subf %282, %285 : vector<17x17xf32>
    %287 = math.exp %286 : vector<17x17xf32>
    %cst_143 = arith.constant dense<0.000000e+00> : vector<17xf32>
    %288 = vector.multi_reduction <add>, %287, %cst_143 [1] : vector<17x17xf32> to vector<17xf32>
    %289 = vector.shape_cast %288 : vector<17xf32> to vector<17x1xf32>
    %290 = tpu.reciprocal %289 {approx = true} : vector<17x1xf32> -> vector<17x1xf32>
    %291 = vector.broadcast %290 : vector<17x1xf32> to vector<17x17xf32>
    %292 = arith.mulf %287, %291 : vector<17x17xf32>
    %cst_144 = arith.constant dense<0.000000e+00> : vector<17x8xf32>
    %293 = tpu.matmul %292, %279, %cst_144 {dimension_numbers = #tpu.dot_dimension_numbers<[1], [0], [0], [1], [0, 0, 1, 1], [], []>} : vector<17x17xf32>, vector<17x8xf32>, vector<17x8xf32> -> vector<17x8xf32>
    %294 = vector.extract_strided_slice %242 {offsets = [0, 24], sizes = [17, 8], strides = [1, 1]} : vector<17x96xf32> to vector<17x8xf32>
    %295 = vector.extract_strided_slice %242 {offsets = [0, 56], sizes = [17, 8], strides = [1, 1]} : vector<17x96xf32> to vector<17x8xf32>
    %296 = vector.extract_strided_slice %242 {offsets = [0, 88], sizes = [17, 8], strides = [1, 1]} : vector<17x96xf32> to vector<17x8xf32>
    %cst_145 = arith.constant dense<0.000000e+00> : vector<17x17xf32>
    %297 = tpu.matmul %294, %295, %cst_145 {dimension_numbers = #tpu.dot_dimension_numbers<[1], [1], [0], [0], [0, 0, 1, 0], [], []>} : vector<17x8xf32>, vector<17x8xf32>, vector<17x17xf32> -> vector<17x17xf32>
    %cst_146 = arith.constant 0.353553385 : f32
    %298 = vector.broadcast %cst_146 : f32 to vector<17x17xf32>
    %299 = arith.mulf %297, %298 : vector<17x17xf32>
    %cst_147 = arith.constant dense<0xFF800000> : vector<17xf32>
    %300 = vector.multi_reduction <maximumf>, %299, %cst_147 [1] : vector<17x17xf32> to vector<17xf32>
    %301 = vector.shape_cast %300 : vector<17xf32> to vector<17x1xf32>
    %302 = vector.broadcast %301 : vector<17x1xf32> to vector<17x17xf32>
    %303 = arith.subf %299, %302 : vector<17x17xf32>
    %304 = math.exp %303 : vector<17x17xf32>
    %cst_148 = arith.constant dense<0.000000e+00> : vector<17xf32>
    %305 = vector.multi_reduction <add>, %304, %cst_148 [1] : vector<17x17xf32> to vector<17xf32>
    %306 = vector.shape_cast %305 : vector<17xf32> to vector<17x1xf32>
    %307 = tpu.reciprocal %306 {approx = true} : vector<17x1xf32> -> vector<17x1xf32>
    %308 = vector.broadcast %307 : vector<17x1xf32> to vector<17x17xf32>
    %309 = arith.mulf %304, %308 : vector<17x17xf32>
    %cst_149 = arith.constant dense<0.000000e+00> : vector<17x8xf32>
    %310 = tpu.matmul %309, %296, %cst_149 {dimension_numbers = #tpu.dot_dimension_numbers<[1], [0], [0], [1], [0, 0, 1, 1], [], []>} : vector<17x17xf32>, vector<17x8xf32>, vector<17x8xf32> -> vector<17x8xf32>
    %311 = tpu.concatenate %259, %276, %293, %310 in 1 : vector<17x8xf32>, vector<17x8xf32>, vector<17x8xf32>, vector<17x8xf32> -> vector<17x32xf32>
    %cst_150 = arith.constant dense<0.000000e+00> : vector<17x32xf32>
    %312 = tpu.matmul %311, %203, %cst_150 {dimension_numbers = #tpu.dot_dimension_numbers<[1], [0], [0], [1], [0, 0, 1, 1], [], []>} : vector<17x32xf32>, vector<32x32xf32>, vector<17x32xf32> -> vector<17x32xf32>
    %313 = arith.addf %193, %312 : vector<17x32xf32>
    %314 = vector.broadcast %205 : vector<1x32xf32> to vector<17x32xf32>
    %315 = arith.addf %313, %314 : vector<17x32xf32>
    %cst_151 = arith.constant dense<0.000000e+00> : vector<17xf32>
    %316 = vector.multi_reduction <add>, %315, %cst_151 [1] : vector<17x32xf32> to vector<17xf32>
    %317 = vector.shape_cast %316 : vector<17xf32> to vector<17x1xf32>
    %cst_152 = arith.constant 3.200000e+01 : f32
    %318 = vector.broadcast %cst_152 : f32 to vector<17x1xf32>
    %319 = arith.divf %317, %318 : vector<17x1xf32>
    %320 = vector.broadcast %319 : vector<17x1xf32> to vector<17x32xf32>
    %321 = arith.subf %315, %320 : vector<17x32xf32>
    %322 = arith.mulf %321, %321 : vector<17x32xf32>
    %cst_153 = arith.constant dense<0.000000e+00> : vector<17xf32>
    %323 = vector.multi_reduction <add>, %322, %cst_153 [1] : vector<17x32xf32> to vector<17xf32>
    %324 = vector.shape_cast %323 : vector<17xf32> to vector<17x1xf32>
    %cst_154 = arith.constant 3.200000e+01 : f32
    %325 = vector.broadcast %cst_154 : f32 to vector<17x1xf32>
    %326 = arith.divf %324, %325 : vector<17x1xf32>
    %327 = vector.broadcast %319 : vector<17x1xf32> to vector<17x32xf32>
    %328 = arith.subf %315, %327 : vector<17x32xf32>
    %cst_155 = arith.constant 9.99999974E-6 : f32
    %329 = vector.broadcast %cst_155 : f32 to vector<17x1xf32>
    %330 = arith.addf %326, %329 : vector<17x1xf32>
    %331 = math.rsqrt %330 : vector<17x1xf32>
    %332 = vector.broadcast %331 : vector<17x1xf32> to vector<17x32xf32>
    %333 = arith.mulf %328, %332 : vector<17x32xf32>
    %334 = vector.broadcast %207 : vector<1x32xf32> to vector<17x32xf32>
    %335 = arith.mulf %333, %334 : vector<17x32xf32>
    %336 = vector.broadcast %209 : vector<1x32xf32> to vector<17x32xf32>
    %337 = arith.addf %335, %336 : vector<17x32xf32>
    %cst_156 = arith.constant dense<0.000000e+00> : vector<17x128xf32>
    %338 = tpu.matmul %337, %211, %cst_156 {dimension_numbers = #tpu.dot_dimension_numbers<[1], [0], [0], [1], [0, 0, 1, 1], [], []>} : vector<17x32xf32>, vector<32x128xf32>, vector<17x128xf32> -> vector<17x128xf32>
    %339 = vector.broadcast %213 : vector<1x128xf32> to vector<17x128xf32>
    %340 = arith.addf %338, %339 : vector<17x128xf32>
    %cst_157 = arith.constant 1.702000e+00 : f32
    %341 = vector.broadcast %cst_157 : f32 to vector<17x128xf32>
    %342 = arith.mulf %341, %340 : vector<17x128xf32>
    %343 = arith.negf %342 : vector<17x128xf32>
    %344 = math.exp %343 : vector<17x128xf32>
    %cst_158 = arith.constant 1.000000e+00 : f32
    %345 = vector.broadcast %cst_158 : f32 to vector<17x128xf32>
    %346 = arith.addf %345, %344 : vector<17x128xf32>
    %347 = arith.divf %345, %346 : vector<17x128xf32>
    %348 = arith.mulf %340, %347 : vector<17x128xf32>
    %cst_159 = arith.constant dense<0.000000e+00> : vector<17x32xf32>
    %349 = tpu.matmul %348, %215, %cst_159 {dimension_numbers = #tpu.dot_dimension_numbers<[1], [0], [0], [1], [0, 0, 1, 1], [], []>} : vector<17x128xf32>, vector<128x32xf32>, vector<17x32xf32> -> vector<17x32xf32>
    %350 = arith.addf %315, %349 : vector<17x32xf32>
    %351 = vector.broadcast %217 : vector<1x32xf32> to vector<17x32xf32>
    %352 = arith.addf %350, %351 : vector<17x32xf32>
    %353 = vector.extract_strided_slice %352 {offsets = [0, 0], sizes = [16, 32], strides = [1, 1]} : vector<17x32xf32> to vector<16x32xf32>
    %c0_160 = arith.constant 0 : index
    %c0_161 = arith.constant 0 : index
    %354 = vector.load %arg19[%c0_160, %c0_161] : memref<1x32xf32, #tpu.memory_space<vmem>>, vector<1x32xf32>
    %c0_162 = arith.constant 0 : index
    %c0_163 = arith.constant 0 : index
    %355 = vector.load %arg20[%c0_162, %c0_163] : memref<1x32xf32, #tpu.memory_space<vmem>>, vector<1x32xf32>
    %cst_164 = arith.constant dense<0.000000e+00> : vector<16xf32>
    %356 = vector.multi_reduction <add>, %353, %cst_164 [1] : vector<16x32xf32> to vector<16xf32>
    %357 = vector.shape_cast %356 : vector<16xf32> to vector<16x1xf32>
    %cst_165 = arith.constant 3.200000e+01 : f32
    %358 = vector.broadcast %cst_165 : f32 to vector<16x1xf32>
    %359 = arith.divf %357, %358 : vector<16x1xf32>
    %360 = vector.broadcast %359 : vector<16x1xf32> to vector<16x32xf32>
    %361 = arith.subf %353, %360 : vector<16x32xf32>
    %362 = arith.mulf %361, %361 : vector<16x32xf32>
    %cst_166 = arith.constant dense<0.000000e+00> : vector<16xf32>
    %363 = vector.multi_reduction <add>, %362, %cst_166 [1] : vector<16x32xf32> to vector<16xf32>
    %364 = vector.shape_cast %363 : vector<16xf32> to vector<16x1xf32>
    %cst_167 = arith.constant 3.200000e+01 : f32
    %365 = vector.broadcast %cst_167 : f32 to vector<16x1xf32>
    %366 = arith.divf %364, %365 : vector<16x1xf32>
    %367 = vector.broadcast %359 : vector<16x1xf32> to vector<16x32xf32>
    %368 = arith.subf %353, %367 : vector<16x32xf32>
    %cst_168 = arith.constant 9.99999974E-6 : f32
    %369 = vector.broadcast %cst_168 : f32 to vector<16x1xf32>
    %370 = arith.addf %366, %369 : vector<16x1xf32>
    %371 = math.rsqrt %370 : vector<16x1xf32>
    %372 = vector.broadcast %371 : vector<16x1xf32> to vector<16x32xf32>
    %373 = arith.mulf %368, %372 : vector<16x32xf32>
    %374 = vector.broadcast %354 : vector<1x32xf32> to vector<16x32xf32>
    %375 = arith.mulf %373, %374 : vector<16x32xf32>
    %376 = vector.broadcast %355 : vector<1x32xf32> to vector<16x32xf32>
    %377 = arith.addf %375, %376 : vector<16x32xf32>
    %c0_169 = arith.constant 0 : index
    %c0_170 = arith.constant 0 : index
    %378 = vector.load %arg21[%c0_169, %c0_170] : memref<32x32xf32, #tpu.memory_space<vmem>>, vector<32x32xf32>
    %cst_171 = arith.constant dense<0.000000e+00> : vector<16x32xf32>
    %379 = tpu.matmul %377, %378, %cst_171 {dimension_numbers = #tpu.dot_dimension_numbers<[1], [0], [0], [1], [0, 0, 1, 1], [], []>} : vector<16x32xf32>, vector<32x32xf32>, vector<16x32xf32> -> vector<16x32xf32>
    %380 = arith.mulf %379, %379 : vector<16x32xf32>
    %cst_172 = arith.constant dense<0.000000e+00> : vector<16xf32>
    %381 = vector.multi_reduction <add>, %380, %cst_172 [1] : vector<16x32xf32> to vector<16xf32>
    %382 = vector.shape_cast %381 : vector<16xf32> to vector<16x1xf32>
    %cst_173 = arith.constant 9.99999996E-13 : f32
    %383 = vector.broadcast %cst_173 : f32 to vector<16x1xf32>
    %384 = arith.addf %382, %383 : vector<16x1xf32>
    %385 = math.rsqrt %384 : vector<16x1xf32>
    %386 = vector.broadcast %385 : vector<16x1xf32> to vector<16x32xf32>
    %387 = arith.mulf %379, %386 : vector<16x32xf32>
    %c0_174 = arith.constant 0 : index
    %c0_175 = arith.constant 0 : index
    %c0_176 = arith.constant 0 : index
    %388 = vector.load %arg22[%c0_174, %c0_175, %c0_176] : memref<1x16x32xf32, #tpu.memory_space<vmem>>, vector<1x16x32xf32>
    %389 = vector.shape_cast %388 : vector<1x16x32xf32> to vector<16x32xf32>
    %390 = vector.shape_cast %387 : vector<16x32xf32> to vector<1x16x32xf32>
    tpu.vector_store %arg22[%c0_174, %c0_175, %c0_176], %390 {strides = array<i32>} : memref<1x16x32xf32, #tpu.memory_space<vmem>>, vector<1x16x32xf32>,
    return
  }
  func.func @transform_0(%arg0: i32) -> (i32, i32, i32) {
    %c0_i32 = arith.constant 0 : i32
    %c0_i32_0 = arith.constant 0 : i32
    %c0_i32_1 = arith.constant 0 : i32
    return %arg0, %c0_i32, %c0_i32_0 : i32, i32, i32
  }
  func.func @transform_1(%arg0: i32) -> (i32, i32) {
    %c0_i32 = arith.constant 0 : i32
    %c0_i32_0 = arith.constant 0 : i32
    %c0_i32_1 = arith.constant 0 : i32
    return %c0_i32, %c0_i32_0 : i32, i32
  }
  func.func @transform_2(%arg0: i32) -> (i32, i32) {
    %c0_i32 = arith.constant 0 : i32
    %c0_i32_0 = arith.constant 0 : i32
    %c0_i32_1 = arith.constant 0 : i32
    return %c0_i32, %c0_i32_0 : i32, i32
  }
  func.func @transform_3(%arg0: i32) -> (i32, i32) {
    %c0_i32 = arith.constant 0 : i32
    %c0_i32_0 = arith.constant 0 : i32
    %c0_i32_1 = arith.constant 0 : i32
    return %c0_i32, %c0_i32_0 : i32, i32
  }
  func.func @transform_4(%arg0: i32) -> (i32, i32) {
    %c0_i32 = arith.constant 0 : i32
    %c0_i32_0 = arith.constant 0 : i32
    %c0_i32_1 = arith.constant 0 : i32
    return %c0_i32, %c0_i32_0 : i32, i32
  }
  func.func @transform_5(%arg0: i32) -> (i32, i32) {
    %c0_i32 = arith.constant 0 : i32
    %c0_i32_0 = arith.constant 0 : i32
    %c0_i32_1 = arith.constant 0 : i32
    return %c0_i32, %c0_i32_0 : i32, i32
  }
  func.func @transform_6(%arg0: i32) -> (i32, i32, i32) {
    %c0_i32 = arith.constant 0 : i32
    %c0_i32_0 = arith.constant 0 : i32
    %c0_i32_1 = arith.constant 0 : i32
    %c0_i32_2 = arith.constant 0 : i32
    return %c0_i32, %c0_i32_0, %c0_i32_1 : i32, i32, i32
  }
  func.func @transform_7(%arg0: i32) -> (i32, i32, i32) {
    %c0_i32 = arith.constant 0 : i32
    %c0_i32_0 = arith.constant 0 : i32
    %c0_i32_1 = arith.constant 0 : i32
    %c0_i32_2 = arith.constant 0 : i32
    return %c0_i32, %c0_i32_0, %c0_i32_1 : i32, i32, i32
  }
  func.func @transform_8(%arg0: i32) -> (i32, i32, i32) {
    %c0_i32 = arith.constant 0 : i32
    %c0_i32_0 = arith.constant 0 : i32
    %c0_i32_1 = arith.constant 0 : i32
    %c0_i32_2 = arith.constant 0 : i32
    return %c0_i32, %c0_i32_0, %c0_i32_1 : i32, i32, i32
  }
  func.func @transform_9(%arg0: i32) -> (i32, i32, i32) {
    %c0_i32 = arith.constant 0 : i32
    %c0_i32_0 = arith.constant 0 : i32
    %c0_i32_1 = arith.constant 0 : i32
    %c0_i32_2 = arith.constant 0 : i32
    return %c0_i32, %c0_i32_0, %c0_i32_1 : i32, i32, i32
  }
  func.func @transform_10(%arg0: i32) -> (i32, i32, i32) {
    %c0_i32 = arith.constant 0 : i32
    %c0_i32_0 = arith.constant 0 : i32
    %c0_i32_1 = arith.constant 0 : i32
    %c0_i32_2 = arith.constant 0 : i32
    return %c0_i32, %c0_i32_0, %c0_i32_1 : i32, i32, i32
  }
  func.func @transform_11(%arg0: i32) -> (i32, i32, i32) {
    %c0_i32 = arith.constant 0 : i32
    %c0_i32_0 = arith.constant 0 : i32
    %c0_i32_1 = arith.constant 0 : i32
    %c0_i32_2 = arith.constant 0 : i32
    return %c0_i32, %c0_i32_0, %c0_i32_1 : i32, i32, i32
  }
  func.func @transform_12(%arg0: i32) -> (i32, i32, i32) {
    %c0_i32 = arith.constant 0 : i32
    %c0_i32_0 = arith.constant 0 : i32
    %c0_i32_1 = arith.constant 0 : i32
    %c0_i32_2 = arith.constant 0 : i32
    return %c0_i32, %c0_i32_0, %c0_i32_1 : i32, i32, i32
  }
  func.func @transform_13(%arg0: i32) -> (i32, i32, i32) {
    %c0_i32 = arith.constant 0 : i32
    %c0_i32_0 = arith.constant 0 : i32
    %c0_i32_1 = arith.constant 0 : i32
    %c0_i32_2 = arith.constant 0 : i32
    return %c0_i32, %c0_i32_0, %c0_i32_1 : i32, i32, i32
  }
  func.func @transform_14(%arg0: i32) -> (i32, i32, i32) {
    %c0_i32 = arith.constant 0 : i32
    %c0_i32_0 = arith.constant 0 : i32
    %c0_i32_1 = arith.constant 0 : i32
    %c0_i32_2 = arith.constant 0 : i32
    return %c0_i32, %c0_i32_0, %c0_i32_1 : i32, i32, i32
  }
  func.func @transform_15(%arg0: i32) -> (i32, i32, i32) {
    %c0_i32 = arith.constant 0 : i32
    %c0_i32_0 = arith.constant 0 : i32
    %c0_i32_1 = arith.constant 0 : i32
    %c0_i32_2 = arith.constant 0 : i32
    return %c0_i32, %c0_i32_0, %c0_i32_1 : i32, i32, i32
  }
  func.func @transform_16(%arg0: i32) -> (i32, i32, i32) {
    %c0_i32 = arith.constant 0 : i32
    %c0_i32_0 = arith.constant 0 : i32
    %c0_i32_1 = arith.constant 0 : i32
    %c0_i32_2 = arith.constant 0 : i32
    return %c0_i32, %c0_i32_0, %c0_i32_1 : i32, i32, i32
  }
  func.func @transform_17(%arg0: i32) -> (i32, i32, i32) {
    %c0_i32 = arith.constant 0 : i32
    %c0_i32_0 = arith.constant 0 : i32
    %c0_i32_1 = arith.constant 0 : i32
    %c0_i32_2 = arith.constant 0 : i32
    return %c0_i32, %c0_i32_0, %c0_i32_1 : i32, i32, i32
  }
  func.func @transform_18(%arg0: i32) -> (i32, i32) {
    %c0_i32 = arith.constant 0 : i32
    %c0_i32_0 = arith.constant 0 : i32
    %c0_i32_1 = arith.constant 0 : i32
    return %c0_i32, %c0_i32_0 : i32, i32
  }
  func.func @transform_19(%arg0: i32) -> (i32, i32) {
    %c0_i32 = arith.constant 0 : i32
    %c0_i32_0 = arith.constant 0 : i32
    %c0_i32_1 = arith.constant 0 : i32
    return %c0_i32, %c0_i32_0 : i32, i32
  }
  func.func @transform_20(%arg0: i32) -> (i32, i32) {
    %c0_i32 = arith.constant 0 : i32
    %c0_i32_0 = arith.constant 0 : i32
    %c0_i32_1 = arith.constant 0 : i32
    return %c0_i32, %c0_i32_0 : i32, i32
  }
  func.func @transform_21(%arg0: i32) -> (i32, i32, i32) {
    %c0_i32 = arith.constant 0 : i32
    %c0_i32_0 = arith.constant 0 : i32
    %c0_i32_1 = arith.constant 0 : i32
    return %arg0, %c0_i32, %c0_i32_0 : i32, i32, i32
  }
}

module attributes {stable_mosaic.version = 11 : i64} {
  func.func @_text_kernel(%arg0: i32, %arg1: memref<1x8x32xf32, #tpu.memory_space<vmem>>, %arg2: memref<1x8xf32, #tpu.memory_space<vmem>>, %arg3: memref<2x1x32xf32, #tpu.memory_space<vmem>>, %arg4: memref<2x1x32xf32, #tpu.memory_space<vmem>>, %arg5: memref<2x32x96xf32, #tpu.memory_space<vmem>>, %arg6: memref<2x1x96xf32, #tpu.memory_space<vmem>>, %arg7: memref<2x32x32xf32, #tpu.memory_space<vmem>>, %arg8: memref<2x1x32xf32, #tpu.memory_space<vmem>>, %arg9: memref<2x1x32xf32, #tpu.memory_space<vmem>>, %arg10: memref<2x1x32xf32, #tpu.memory_space<vmem>>, %arg11: memref<2x32x128xf32, #tpu.memory_space<vmem>>, %arg12: memref<2x1x128xf32, #tpu.memory_space<vmem>>, %arg13: memref<2x128x32xf32, #tpu.memory_space<vmem>>, %arg14: memref<2x1x32xf32, #tpu.memory_space<vmem>>, %arg15: memref<1x32xf32, #tpu.memory_space<vmem>>, %arg16: memref<1x32xf32, #tpu.memory_space<vmem>>, %arg17: memref<32x32xf32, #tpu.memory_space<vmem>>, %arg18: memref<1x32xf32, #tpu.memory_space<vmem>>) attributes {dimension_semantics = [#tpu.dimension_semantics<arbitrary>], iteration_bounds = array<i64: 1>, scalar_prefetch = 0 : i64, scratch_operands = 0 : i64, tpu.core_type = #tpu.core_type<tc>, window_params = [{transform_indices = @transform_0, window_bounds = array<i64: 1, 8, 32>}, {transform_indices = @transform_1, window_bounds = array<i64: 1, 8>}, {pipeline_mode = #tpu.pipeline_mode<synchronous>, transform_indices = @transform_2, window_bounds = array<i64: 2, 1, 32>}, {pipeline_mode = #tpu.pipeline_mode<synchronous>, transform_indices = @transform_3, window_bounds = array<i64: 2, 1, 32>}, {pipeline_mode = #tpu.pipeline_mode<synchronous>, transform_indices = @transform_4, window_bounds = array<i64: 2, 32, 96>}, {pipeline_mode = #tpu.pipeline_mode<synchronous>, transform_indices = @transform_5, window_bounds = array<i64: 2, 1, 96>}, {pipeline_mode = #tpu.pipeline_mode<synchronous>, transform_indices = @transform_6, window_bounds = array<i64: 2, 32, 32>}, {pipeline_mode = #tpu.pipeline_mode<synchronous>, transform_indices = @transform_7, window_bounds = array<i64: 2, 1, 32>}, {pipeline_mode = #tpu.pipeline_mode<synchronous>, transform_indices = @transform_8, window_bounds = array<i64: 2, 1, 32>}, {pipeline_mode = #tpu.pipeline_mode<synchronous>, transform_indices = @transform_9, window_bounds = array<i64: 2, 1, 32>}, {pipeline_mode = #tpu.pipeline_mode<synchronous>, transform_indices = @transform_10, window_bounds = array<i64: 2, 32, 128>}, {pipeline_mode = #tpu.pipeline_mode<synchronous>, transform_indices = @transform_11, window_bounds = array<i64: 2, 1, 128>}, {pipeline_mode = #tpu.pipeline_mode<synchronous>, transform_indices = @transform_12, window_bounds = array<i64: 2, 128, 32>}, {pipeline_mode = #tpu.pipeline_mode<synchronous>, transform_indices = @transform_13, window_bounds = array<i64: 2, 1, 32>}, {pipeline_mode = #tpu.pipeline_mode<synchronous>, transform_indices = @transform_14, window_bounds = array<i64: 1, 32>}, {pipeline_mode = #tpu.pipeline_mode<synchronous>, transform_indices = @transform_15, window_bounds = array<i64: 1, 32>}, {pipeline_mode = #tpu.pipeline_mode<synchronous>, transform_indices = @transform_16, window_bounds = array<i64: 32, 32>}, {transform_indices = @transform_17, window_bounds = array<i64: 1, 32>}]} {
    %c0 = arith.constant 0 : index
    %c0_0 = arith.constant 0 : index
    %c0_1 = arith.constant 0 : index
    %0 = vector.load %arg1[%c0, %c0_0, %c0_1] : memref<1x8x32xf32, #tpu.memory_space<vmem>>, vector<1x8x32xf32>
    %1 = vector.shape_cast %0 : vector<1x8x32xf32> to vector<8x32xf32>
    %c0_2 = arith.constant 0 : index
    %c0_3 = arith.constant 0 : index
    %c0_4 = arith.constant 0 : index
    %2 = vector.load %arg3[%c0_2, %c0_3, %c0_4] : memref<2x1x32xf32, #tpu.memory_space<vmem>>, vector<1x1x32xf32>
    %3 = vector.shape_cast %2 : vector<1x1x32xf32> to vector<1x32xf32>
    %c0_5 = arith.constant 0 : index
    %c0_6 = arith.constant 0 : index
    %c0_7 = arith.constant 0 : index
    %4 = vector.load %arg4[%c0_5, %c0_6, %c0_7] : memref<2x1x32xf32, #tpu.memory_space<vmem>>, vector<1x1x32xf32>
    %5 = vector.shape_cast %4 : vector<1x1x32xf32> to vector<1x32xf32>
    %c0_8 = arith.constant 0 : index
    %c0_9 = arith.constant 0 : index
    %c0_10 = arith.constant 0 : index
    %6 = vector.load %arg5[%c0_8, %c0_9, %c0_10] : memref<2x32x96xf32, #tpu.memory_space<vmem>>, vector<1x32x96xf32>
    %7 = vector.shape_cast %6 : vector<1x32x96xf32> to vector<32x96xf32>
    %c0_11 = arith.constant 0 : index
    %c0_12 = arith.constant 0 : index
    %c0_13 = arith.constant 0 : index
    %8 = vector.load %arg6[%c0_11, %c0_12, %c0_13] : memref<2x1x96xf32, #tpu.memory_space<vmem>>, vector<1x1x96xf32>
    %9 = vector.shape_cast %8 : vector<1x1x96xf32> to vector<1x96xf32>
    %c0_14 = arith.constant 0 : index
    %c0_15 = arith.constant 0 : index
    %c0_16 = arith.constant 0 : index
    %10 = vector.load %arg7[%c0_14, %c0_15, %c0_16] : memref<2x32x32xf32, #tpu.memory_space<vmem>>, vector<1x32x32xf32>
    %11 = vector.shape_cast %10 : vector<1x32x32xf32> to vector<32x32xf32>
    %c0_17 = arith.constant 0 : index
    %c0_18 = arith.constant 0 : index
    %c0_19 = arith.constant 0 : index
    %12 = vector.load %arg8[%c0_17, %c0_18, %c0_19] : memref<2x1x32xf32, #tpu.memory_space<vmem>>, vector<1x1x32xf32>
    %13 = vector.shape_cast %12 : vector<1x1x32xf32> to vector<1x32xf32>
    %c0_20 = arith.constant 0 : index
    %c0_21 = arith.constant 0 : index
    %c0_22 = arith.constant 0 : index
    %14 = vector.load %arg9[%c0_20, %c0_21, %c0_22] : memref<2x1x32xf32, #tpu.memory_space<vmem>>, vector<1x1x32xf32>
    %15 = vector.shape_cast %14 : vector<1x1x32xf32> to vector<1x32xf32>
    %c0_23 = arith.constant 0 : index
    %c0_24 = arith.constant 0 : index
    %c0_25 = arith.constant 0 : index
    %16 = vector.load %arg10[%c0_23, %c0_24, %c0_25] : memref<2x1x32xf32, #tpu.memory_space<vmem>>, vector<1x1x32xf32>
    %17 = vector.shape_cast %16 : vector<1x1x32xf32> to vector<1x32xf32>
    %c0_26 = arith.constant 0 : index
    %c0_27 = arith.constant 0 : index
    %c0_28 = arith.constant 0 : index
    %18 = vector.load %arg11[%c0_26, %c0_27, %c0_28] : memref<2x32x128xf32, #tpu.memory_space<vmem>>, vector<1x32x128xf32>
    %19 = vector.shape_cast %18 : vector<1x32x128xf32> to vector<32x128xf32>
    %c0_29 = arith.constant 0 : index
    %c0_30 = arith.constant 0 : index
    %c0_31 = arith.constant 0 : index
    %20 = vector.load %arg12[%c0_29, %c0_30, %c0_31] : memref<2x1x128xf32, #tpu.memory_space<vmem>>, vector<1x1x128xf32>
    %21 = vector.shape_cast %20 : vector<1x1x128xf32> to vector<1x128xf32>
    %c0_32 = arith.constant 0 : index
    %c0_33 = arith.constant 0 : index
    %c0_34 = arith.constant 0 : index
    %22 = vector.load %arg13[%c0_32, %c0_33, %c0_34] : memref<2x128x32xf32, #tpu.memory_space<vmem>>, vector<1x128x32xf32>
    %23 = vector.shape_cast %22 : vector<1x128x32xf32> to vector<128x32xf32>
    %c0_35 = arith.constant 0 : index
    %c0_36 = arith.constant 0 : index
    %c0_37 = arith.constant 0 : index
    %24 = vector.load %arg14[%c0_35, %c0_36, %c0_37] : memref<2x1x32xf32, #tpu.memory_space<vmem>>, vector<1x1x32xf32>
    %25 = vector.shape_cast %24 : vector<1x1x32xf32> to vector<1x32xf32>
    %cst = arith.constant dense<0.000000e+00> : vector<8xf32>
    %26 = vector.multi_reduction <add>, %1, %cst [1] : vector<8x32xf32> to vector<8xf32>
    %27 = vector.shape_cast %26 : vector<8xf32> to vector<8x1xf32>
    %cst_38 = arith.constant 3.200000e+01 : f32
    %28 = vector.broadcast %cst_38 : f32 to vector<8x1xf32>
    %29 = arith.divf %27, %28 : vector<8x1xf32>
    %30 = vector.broadcast %29 : vector<8x1xf32> to vector<8x32xf32>
    %31 = arith.subf %1, %30 : vector<8x32xf32>
    %32 = arith.mulf %31, %31 : vector<8x32xf32>
    %cst_39 = arith.constant dense<0.000000e+00> : vector<8xf32>
    %33 = vector.multi_reduction <add>, %32, %cst_39 [1] : vector<8x32xf32> to vector<8xf32>
    %34 = vector.shape_cast %33 : vector<8xf32> to vector<8x1xf32>
    %cst_40 = arith.constant 3.200000e+01 : f32
    %35 = vector.broadcast %cst_40 : f32 to vector<8x1xf32>
    %36 = arith.divf %34, %35 : vector<8x1xf32>
    %37 = vector.broadcast %29 : vector<8x1xf32> to vector<8x32xf32>
    %38 = arith.subf %1, %37 : vector<8x32xf32>
    %cst_41 = arith.constant 9.99999974E-6 : f32
    %39 = vector.broadcast %cst_41 : f32 to vector<8x1xf32>
    %40 = arith.addf %36, %39 : vector<8x1xf32>
    %41 = math.rsqrt %40 : vector<8x1xf32>
    %42 = vector.broadcast %41 : vector<8x1xf32> to vector<8x32xf32>
    %43 = arith.mulf %38, %42 : vector<8x32xf32>
    %44 = vector.broadcast %3 : vector<1x32xf32> to vector<8x32xf32>
    %45 = arith.mulf %43, %44 : vector<8x32xf32>
    %46 = vector.broadcast %5 : vector<1x32xf32> to vector<8x32xf32>
    %47 = arith.addf %45, %46 : vector<8x32xf32>
    %cst_42 = arith.constant dense<0.000000e+00> : vector<8x96xf32>
    %48 = tpu.matmul %47, %7, %cst_42 {dimension_numbers = #tpu.dot_dimension_numbers<[1], [0], [0], [1], [0, 0, 1, 1], [], []>} : vector<8x32xf32>, vector<32x96xf32>, vector<8x96xf32> -> vector<8x96xf32>
    %49 = vector.broadcast %9 : vector<1x96xf32> to vector<8x96xf32>
    %50 = arith.addf %48, %49 : vector<8x96xf32>
    %51 = tpu.iota {dimensions = array<i32: 0>} : vector<8x8xi32>
    %52 = tpu.iota {dimensions = array<i32: 1>} : vector<8x8xi32>
    %53 = arith.cmpi sle, %52, %51 : vector<8x8xi32>
    %54 = vector.extract_strided_slice %50 {offsets = [0, 0], sizes = [8, 8], strides = [1, 1]} : vector<8x96xf32> to vector<8x8xf32>
    %55 = vector.extract_strided_slice %50 {offsets = [0, 32], sizes = [8, 8], strides = [1, 1]} : vector<8x96xf32> to vector<8x8xf32>
    %56 = vector.extract_strided_slice %50 {offsets = [0, 64], sizes = [8, 8], strides = [1, 1]} : vector<8x96xf32> to vector<8x8xf32>
    %cst_43 = arith.constant dense<0.000000e+00> : vector<8x8xf32>
    %57 = tpu.matmul %54, %55, %cst_43 {dimension_numbers = #tpu.dot_dimension_numbers<[1], [1], [0], [0], [0, 0, 1, 0], [], []>} : vector<8x8xf32>, vector<8x8xf32>, vector<8x8xf32> -> vector<8x8xf32>
    %cst_44 = arith.constant 0.353553385 : f32
    %58 = vector.broadcast %cst_44 : f32 to vector<8x8xf32>
    %59 = arith.mulf %57, %58 : vector<8x8xf32>
    %cst_45 = arith.constant -1.000000e+30 : f32
    %60 = vector.broadcast %cst_45 : f32 to vector<8x8xf32>
    %61 = arith.select %53, %59, %60 : vector<8x8xi1>, vector<8x8xf32>
    %cst_46 = arith.constant dense<0xFF800000> : vector<8xf32>
    %62 = vector.multi_reduction <maximumf>, %61, %cst_46 [1] : vector<8x8xf32> to vector<8xf32>
    %63 = vector.shape_cast %62 : vector<8xf32> to vector<8x1xf32>
    %64 = vector.broadcast %63 : vector<8x1xf32> to vector<8x8xf32>
    %65 = arith.subf %61, %64 : vector<8x8xf32>
    %66 = math.exp %65 : vector<8x8xf32>
    %cst_47 = arith.constant dense<0.000000e+00> : vector<8xf32>
    %67 = vector.multi_reduction <add>, %66, %cst_47 [1] : vector<8x8xf32> to vector<8xf32>
    %68 = vector.shape_cast %67 : vector<8xf32> to vector<8x1xf32>
    %69 = tpu.reciprocal %68 {approx = true} : vector<8x1xf32> -> vector<8x1xf32>
    %70 = vector.broadcast %69 : vector<8x1xf32> to vector<8x8xf32>
    %71 = arith.mulf %66, %70 : vector<8x8xf32>
    %cst_48 = arith.constant dense<0.000000e+00> : vector<8x8xf32>
    %72 = tpu.matmul %71, %56, %cst_48 {dimension_numbers = #tpu.dot_dimension_numbers<[1], [0], [0], [1], [0, 0, 1, 1], [], []>} : vector<8x8xf32>, vector<8x8xf32>, vector<8x8xf32> -> vector<8x8xf32>
    %73 = vector.extract_strided_slice %50 {offsets = [0, 8], sizes = [8, 8], strides = [1, 1]} : vector<8x96xf32> to vector<8x8xf32>
    %74 = vector.extract_strided_slice %50 {offsets = [0, 40], sizes = [8, 8], strides = [1, 1]} : vector<8x96xf32> to vector<8x8xf32>
    %75 = vector.extract_strided_slice %50 {offsets = [0, 72], sizes = [8, 8], strides = [1, 1]} : vector<8x96xf32> to vector<8x8xf32>
    %cst_49 = arith.constant dense<0.000000e+00> : vector<8x8xf32>
    %76 = tpu.matmul %73, %74, %cst_49 {dimension_numbers = #tpu.dot_dimension_numbers<[1], [1], [0], [0], [0, 0, 1, 0], [], []>} : vector<8x8xf32>, vector<8x8xf32>, vector<8x8xf32> -> vector<8x8xf32>
    %cst_50 = arith.constant 0.353553385 : f32
    %77 = vector.broadcast %cst_50 : f32 to vector<8x8xf32>
    %78 = arith.mulf %76, %77 : vector<8x8xf32>
    %cst_51 = arith.constant -1.000000e+30 : f32
    %79 = vector.broadcast %cst_51 : f32 to vector<8x8xf32>
    %80 = arith.select %53, %78, %79 : vector<8x8xi1>, vector<8x8xf32>
    %cst_52 = arith.constant dense<0xFF800000> : vector<8xf32>
    %81 = vector.multi_reduction <maximumf>, %80, %cst_52 [1] : vector<8x8xf32> to vector<8xf32>
    %82 = vector.shape_cast %81 : vector<8xf32> to vector<8x1xf32>
    %83 = vector.broadcast %82 : vector<8x1xf32> to vector<8x8xf32>
    %84 = arith.subf %80, %83 : vector<8x8xf32>
    %85 = math.exp %84 : vector<8x8xf32>
    %cst_53 = arith.constant dense<0.000000e+00> : vector<8xf32>
    %86 = vector.multi_reduction <add>, %85, %cst_53 [1] : vector<8x8xf32> to vector<8xf32>
    %87 = vector.shape_cast %86 : vector<8xf32> to vector<8x1xf32>
    %88 = tpu.reciprocal %87 {approx = true} : vector<8x1xf32> -> vector<8x1xf32>
    %89 = vector.broadcast %88 : vector<8x1xf32> to vector<8x8xf32>
    %90 = arith.mulf %85, %89 : vector<8x8xf32>
    %cst_54 = arith.constant dense<0.000000e+00> : vector<8x8xf32>
    %91 = tpu.matmul %90, %75, %cst_54 {dimension_numbers = #tpu.dot_dimension_numbers<[1], [0], [0], [1], [0, 0, 1, 1], [], []>} : vector<8x8xf32>, vector<8x8xf32>, vector<8x8xf32> -> vector<8x8xf32>
    %92 = vector.extract_strided_slice %50 {offsets = [0, 16], sizes = [8, 8], strides = [1, 1]} : vector<8x96xf32> to vector<8x8xf32>
    %93 = vector.extract_strided_slice %50 {offsets = [0, 48], sizes = [8, 8], strides = [1, 1]} : vector<8x96xf32> to vector<8x8xf32>
    %94 = vector.extract_strided_slice %50 {offsets = [0, 80], sizes = [8, 8], strides = [1, 1]} : vector<8x96xf32> to vector<8x8xf32>
    %cst_55 = arith.constant dense<0.000000e+00> : vector<8x8xf32>
    %95 = tpu.matmul %92, %93, %cst_55 {dimension_numbers = #tpu.dot_dimension_numbers<[1], [1], [0], [0], [0, 0, 1, 0], [], []>} : vector<8x8xf32>, vector<8x8xf32>, vector<8x8xf32> -> vector<8x8xf32>
    %cst_56 = arith.constant 0.353553385 : f32
    %96 = vector.broadcast %cst_56 : f32 to vector<8x8xf32>
    %97 = arith.mulf %95, %96 : vector<8x8xf32>
    %cst_57 = arith.constant -1.000000e+30 : f32
    %98 = vector.broadcast %cst_57 : f32 to vector<8x8xf32>
    %99 = arith.select %53, %97, %98 : vector<8x8xi1>, vector<8x8xf32>
    %cst_58 = arith.constant dense<0xFF800000> : vector<8xf32>
    %100 = vector.multi_reduction <maximumf>, %99, %cst_58 [1] : vector<8x8xf32> to vector<8xf32>
    %101 = vector.shape_cast %100 : vector<8xf32> to vector<8x1xf32>
    %102 = vector.broadcast %101 : vector<8x1xf32> to vector<8x8xf32>
    %103 = arith.subf %99, %102 : vector<8x8xf32>
    %104 = math.exp %103 : vector<8x8xf32>
    %cst_59 = arith.constant dense<0.000000e+00> : vector<8xf32>
    %105 = vector.multi_reduction <add>, %104, %cst_59 [1] : vector<8x8xf32> to vector<8xf32>
    %106 = vector.shape_cast %105 : vector<8xf32> to vector<8x1xf32>
    %107 = tpu.reciprocal %106 {approx = true} : vector<8x1xf32> -> vector<8x1xf32>
    %108 = vector.broadcast %107 : vector<8x1xf32> to vector<8x8xf32>
    %109 = arith.mulf %104, %108 : vector<8x8xf32>
    %cst_60 = arith.constant dense<0.000000e+00> : vector<8x8xf32>
    %110 = tpu.matmul %109, %94, %cst_60 {dimension_numbers = #tpu.dot_dimension_numbers<[1], [0], [0], [1], [0, 0, 1, 1], [], []>} : vector<8x8xf32>, vector<8x8xf32>, vector<8x8xf32> -> vector<8x8xf32>
    %111 = vector.extract_strided_slice %50 {offsets = [0, 24], sizes = [8, 8], strides = [1, 1]} : vector<8x96xf32> to vector<8x8xf32>
    %112 = vector.extract_strided_slice %50 {offsets = [0, 56], sizes = [8, 8], strides = [1, 1]} : vector<8x96xf32> to vector<8x8xf32>
    %113 = vector.extract_strided_slice %50 {offsets = [0, 88], sizes = [8, 8], strides = [1, 1]} : vector<8x96xf32> to vector<8x8xf32>
    %cst_61 = arith.constant dense<0.000000e+00> : vector<8x8xf32>
    %114 = tpu.matmul %111, %112, %cst_61 {dimension_numbers = #tpu.dot_dimension_numbers<[1], [1], [0], [0], [0, 0, 1, 0], [], []>} : vector<8x8xf32>, vector<8x8xf32>, vector<8x8xf32> -> vector<8x8xf32>
    %cst_62 = arith.constant 0.353553385 : f32
    %115 = vector.broadcast %cst_62 : f32 to vector<8x8xf32>
    %116 = arith.mulf %114, %115 : vector<8x8xf32>
    %cst_63 = arith.constant -1.000000e+30 : f32
    %117 = vector.broadcast %cst_63 : f32 to vector<8x8xf32>
    %118 = arith.select %53, %116, %117 : vector<8x8xi1>, vector<8x8xf32>
    %cst_64 = arith.constant dense<0xFF800000> : vector<8xf32>
    %119 = vector.multi_reduction <maximumf>, %118, %cst_64 [1] : vector<8x8xf32> to vector<8xf32>
    %120 = vector.shape_cast %119 : vector<8xf32> to vector<8x1xf32>
    %121 = vector.broadcast %120 : vector<8x1xf32> to vector<8x8xf32>
    %122 = arith.subf %118, %121 : vector<8x8xf32>
    %123 = math.exp %122 : vector<8x8xf32>
    %cst_65 = arith.constant dense<0.000000e+00> : vector<8xf32>
    %124 = vector.multi_reduction <add>, %123, %cst_65 [1] : vector<8x8xf32> to vector<8xf32>
    %125 = vector.shape_cast %124 : vector<8xf32> to vector<8x1xf32>
    %126 = tpu.reciprocal %125 {approx = true} : vector<8x1xf32> -> vector<8x1xf32>
    %127 = vector.broadcast %126 : vector<8x1xf32> to vector<8x8xf32>
    %128 = arith.mulf %123, %127 : vector<8x8xf32>
    %cst_66 = arith.constant dense<0.000000e+00> : vector<8x8xf32>
    %129 = tpu.matmul %128, %113, %cst_66 {dimension_numbers = #tpu.dot_dimension_numbers<[1], [0], [0], [1], [0, 0, 1, 1], [], []>} : vector<8x8xf32>, vector<8x8xf32>, vector<8x8xf32> -> vector<8x8xf32>
    %130 = tpu.concatenate %72, %91, %110, %129 in 1 : vector<8x8xf32>, vector<8x8xf32>, vector<8x8xf32>, vector<8x8xf32> -> vector<8x32xf32>
    %cst_67 = arith.constant dense<0.000000e+00> : vector<8x32xf32>
    %131 = tpu.matmul %130, %11, %cst_67 {dimension_numbers = #tpu.dot_dimension_numbers<[1], [0], [0], [1], [0, 0, 1, 1], [], []>} : vector<8x32xf32>, vector<32x32xf32>, vector<8x32xf32> -> vector<8x32xf32>
    %132 = arith.addf %1, %131 : vector<8x32xf32>
    %133 = vector.broadcast %13 : vector<1x32xf32> to vector<8x32xf32>
    %134 = arith.addf %132, %133 : vector<8x32xf32>
    %cst_68 = arith.constant dense<0.000000e+00> : vector<8xf32>
    %135 = vector.multi_reduction <add>, %134, %cst_68 [1] : vector<8x32xf32> to vector<8xf32>
    %136 = vector.shape_cast %135 : vector<8xf32> to vector<8x1xf32>
    %cst_69 = arith.constant 3.200000e+01 : f32
    %137 = vector.broadcast %cst_69 : f32 to vector<8x1xf32>
    %138 = arith.divf %136, %137 : vector<8x1xf32>
    %139 = vector.broadcast %138 : vector<8x1xf32> to vector<8x32xf32>
    %140 = arith.subf %134, %139 : vector<8x32xf32>
    %141 = arith.mulf %140, %140 : vector<8x32xf32>
    %cst_70 = arith.constant dense<0.000000e+00> : vector<8xf32>
    %142 = vector.multi_reduction <add>, %141, %cst_70 [1] : vector<8x32xf32> to vector<8xf32>
    %143 = vector.shape_cast %142 : vector<8xf32> to vector<8x1xf32>
    %cst_71 = arith.constant 3.200000e+01 : f32
    %144 = vector.broadcast %cst_71 : f32 to vector<8x1xf32>
    %145 = arith.divf %143, %144 : vector<8x1xf32>
    %146 = vector.broadcast %138 : vector<8x1xf32> to vector<8x32xf32>
    %147 = arith.subf %134, %146 : vector<8x32xf32>
    %cst_72 = arith.constant 9.99999974E-6 : f32
    %148 = vector.broadcast %cst_72 : f32 to vector<8x1xf32>
    %149 = arith.addf %145, %148 : vector<8x1xf32>
    %150 = math.rsqrt %149 : vector<8x1xf32>
    %151 = vector.broadcast %150 : vector<8x1xf32> to vector<8x32xf32>
    %152 = arith.mulf %147, %151 : vector<8x32xf32>
    %153 = vector.broadcast %15 : vector<1x32xf32> to vector<8x32xf32>
    %154 = arith.mulf %152, %153 : vector<8x32xf32>
    %155 = vector.broadcast %17 : vector<1x32xf32> to vector<8x32xf32>
    %156 = arith.addf %154, %155 : vector<8x32xf32>
    %cst_73 = arith.constant dense<0.000000e+00> : vector<8x128xf32>
    %157 = tpu.matmul %156, %19, %cst_73 {dimension_numbers = #tpu.dot_dimension_numbers<[1], [0], [0], [1], [0, 0, 1, 1], [], []>} : vector<8x32xf32>, vector<32x128xf32>, vector<8x128xf32> -> vector<8x128xf32>
    %158 = vector.broadcast %21 : vector<1x128xf32> to vector<8x128xf32>
    %159 = arith.addf %157, %158 : vector<8x128xf32>
    %cst_74 = arith.constant 1.702000e+00 : f32
    %160 = vector.broadcast %cst_74 : f32 to vector<8x128xf32>
    %161 = arith.mulf %160, %159 : vector<8x128xf32>
    %162 = arith.negf %161 : vector<8x128xf32>
    %163 = math.exp %162 : vector<8x128xf32>
    %cst_75 = arith.constant 1.000000e+00 : f32
    %164 = vector.broadcast %cst_75 : f32 to vector<8x128xf32>
    %165 = arith.addf %164, %163 : vector<8x128xf32>
    %166 = arith.divf %164, %165 : vector<8x128xf32>
    %167 = arith.mulf %159, %166 : vector<8x128xf32>
    %cst_76 = arith.constant dense<0.000000e+00> : vector<8x32xf32>
    %168 = tpu.matmul %167, %23, %cst_76 {dimension_numbers = #tpu.dot_dimension_numbers<[1], [0], [0], [1], [0, 0, 1, 1], [], []>} : vector<8x128xf32>, vector<128x32xf32>, vector<8x32xf32> -> vector<8x32xf32>
    %169 = arith.addf %134, %168 : vector<8x32xf32>
    %170 = vector.broadcast %25 : vector<1x32xf32> to vector<8x32xf32>
    %171 = arith.addf %169, %170 : vector<8x32xf32>
    %c1 = arith.constant 1 : index
    %c0_77 = arith.constant 0 : index
    %c0_78 = arith.constant 0 : index
    %172 = vector.load %arg3[%c1, %c0_77, %c0_78] : memref<2x1x32xf32, #tpu.memory_space<vmem>>, vector<1x1x32xf32>
    %173 = vector.shape_cast %172 : vector<1x1x32xf32> to vector<1x32xf32>
    %c1_79 = arith.constant 1 : index
    %c0_80 = arith.constant 0 : index
    %c0_81 = arith.constant 0 : index
    %174 = vector.load %arg4[%c1_79, %c0_80, %c0_81] : memref<2x1x32xf32, #tpu.memory_space<vmem>>, vector<1x1x32xf32>
    %175 = vector.shape_cast %174 : vector<1x1x32xf32> to vector<1x32xf32>
    %c1_82 = arith.constant 1 : index
    %c0_83 = arith.constant 0 : index
    %c0_84 = arith.constant 0 : index
    %176 = vector.load %arg5[%c1_82, %c0_83, %c0_84] : memref<2x32x96xf32, #tpu.memory_space<vmem>>, vector<1x32x96xf32>
    %177 = vector.shape_cast %176 : vector<1x32x96xf32> to vector<32x96xf32>
    %c1_85 = arith.constant 1 : index
    %c0_86 = arith.constant 0 : index
    %c0_87 = arith.constant 0 : index
    %178 = vector.load %arg6[%c1_85, %c0_86, %c0_87] : memref<2x1x96xf32, #tpu.memory_space<vmem>>, vector<1x1x96xf32>
    %179 = vector.shape_cast %178 : vector<1x1x96xf32> to vector<1x96xf32>
    %c1_88 = arith.constant 1 : index
    %c0_89 = arith.constant 0 : index
    %c0_90 = arith.constant 0 : index
    %180 = vector.load %arg7[%c1_88, %c0_89, %c0_90] : memref<2x32x32xf32, #tpu.memory_space<vmem>>, vector<1x32x32xf32>
    %181 = vector.shape_cast %180 : vector<1x32x32xf32> to vector<32x32xf32>
    %c1_91 = arith.constant 1 : index
    %c0_92 = arith.constant 0 : index
    %c0_93 = arith.constant 0 : index
    %182 = vector.load %arg8[%c1_91, %c0_92, %c0_93] : memref<2x1x32xf32, #tpu.memory_space<vmem>>, vector<1x1x32xf32>
    %183 = vector.shape_cast %182 : vector<1x1x32xf32> to vector<1x32xf32>
    %c1_94 = arith.constant 1 : index
    %c0_95 = arith.constant 0 : index
    %c0_96 = arith.constant 0 : index
    %184 = vector.load %arg9[%c1_94, %c0_95, %c0_96] : memref<2x1x32xf32, #tpu.memory_space<vmem>>, vector<1x1x32xf32>
    %185 = vector.shape_cast %184 : vector<1x1x32xf32> to vector<1x32xf32>
    %c1_97 = arith.constant 1 : index
    %c0_98 = arith.constant 0 : index
    %c0_99 = arith.constant 0 : index
    %186 = vector.load %arg10[%c1_97, %c0_98, %c0_99] : memref<2x1x32xf32, #tpu.memory_space<vmem>>, vector<1x1x32xf32>
    %187 = vector.shape_cast %186 : vector<1x1x32xf32> to vector<1x32xf32>
    %c1_100 = arith.constant 1 : index
    %c0_101 = arith.constant 0 : index
    %c0_102 = arith.constant 0 : index
    %188 = vector.load %arg11[%c1_100, %c0_101, %c0_102] : memref<2x32x128xf32, #tpu.memory_space<vmem>>, vector<1x32x128xf32>
    %189 = vector.shape_cast %188 : vector<1x32x128xf32> to vector<32x128xf32>
    %c1_103 = arith.constant 1 : index
    %c0_104 = arith.constant 0 : index
    %c0_105 = arith.constant 0 : index
    %190 = vector.load %arg12[%c1_103, %c0_104, %c0_105] : memref<2x1x128xf32, #tpu.memory_space<vmem>>, vector<1x1x128xf32>
    %191 = vector.shape_cast %190 : vector<1x1x128xf32> to vector<1x128xf32>
    %c1_106 = arith.constant 1 : index
    %c0_107 = arith.constant 0 : index
    %c0_108 = arith.constant 0 : index
    %192 = vector.load %arg13[%c1_106, %c0_107, %c0_108] : memref<2x128x32xf32, #tpu.memory_space<vmem>>, vector<1x128x32xf32>
    %193 = vector.shape_cast %192 : vector<1x128x32xf32> to vector<128x32xf32>
    %c1_109 = arith.constant 1 : index
    %c0_110 = arith.constant 0 : index
    %c0_111 = arith.constant 0 : index
    %194 = vector.load %arg14[%c1_109, %c0_110, %c0_111] : memref<2x1x32xf32, #tpu.memory_space<vmem>>, vector<1x1x32xf32>
    %195 = vector.shape_cast %194 : vector<1x1x32xf32> to vector<1x32xf32>
    %cst_112 = arith.constant dense<0.000000e+00> : vector<8xf32>
    %196 = vector.multi_reduction <add>, %171, %cst_112 [1] : vector<8x32xf32> to vector<8xf32>
    %197 = vector.shape_cast %196 : vector<8xf32> to vector<8x1xf32>
    %cst_113 = arith.constant 3.200000e+01 : f32
    %198 = vector.broadcast %cst_113 : f32 to vector<8x1xf32>
    %199 = arith.divf %197, %198 : vector<8x1xf32>
    %200 = vector.broadcast %199 : vector<8x1xf32> to vector<8x32xf32>
    %201 = arith.subf %171, %200 : vector<8x32xf32>
    %202 = arith.mulf %201, %201 : vector<8x32xf32>
    %cst_114 = arith.constant dense<0.000000e+00> : vector<8xf32>
    %203 = vector.multi_reduction <add>, %202, %cst_114 [1] : vector<8x32xf32> to vector<8xf32>
    %204 = vector.shape_cast %203 : vector<8xf32> to vector<8x1xf32>
    %cst_115 = arith.constant 3.200000e+01 : f32
    %205 = vector.broadcast %cst_115 : f32 to vector<8x1xf32>
    %206 = arith.divf %204, %205 : vector<8x1xf32>
    %207 = vector.broadcast %199 : vector<8x1xf32> to vector<8x32xf32>
    %208 = arith.subf %171, %207 : vector<8x32xf32>
    %cst_116 = arith.constant 9.99999974E-6 : f32
    %209 = vector.broadcast %cst_116 : f32 to vector<8x1xf32>
    %210 = arith.addf %206, %209 : vector<8x1xf32>
    %211 = math.rsqrt %210 : vector<8x1xf32>
    %212 = vector.broadcast %211 : vector<8x1xf32> to vector<8x32xf32>
    %213 = arith.mulf %208, %212 : vector<8x32xf32>
    %214 = vector.broadcast %173 : vector<1x32xf32> to vector<8x32xf32>
    %215 = arith.mulf %213, %214 : vector<8x32xf32>
    %216 = vector.broadcast %175 : vector<1x32xf32> to vector<8x32xf32>
    %217 = arith.addf %215, %216 : vector<8x32xf32>
    %cst_117 = arith.constant dense<0.000000e+00> : vector<8x96xf32>
    %218 = tpu.matmul %217, %177, %cst_117 {dimension_numbers = #tpu.dot_dimension_numbers<[1], [0], [0], [1], [0, 0, 1, 1], [], []>} : vector<8x32xf32>, vector<32x96xf32>, vector<8x96xf32> -> vector<8x96xf32>
    %219 = vector.broadcast %179 : vector<1x96xf32> to vector<8x96xf32>
    %220 = arith.addf %218, %219 : vector<8x96xf32>
    %221 = tpu.iota {dimensions = array<i32: 0>} : vector<8x8xi32>
    %222 = tpu.iota {dimensions = array<i32: 1>} : vector<8x8xi32>
    %223 = arith.cmpi sle, %222, %221 : vector<8x8xi32>
    %224 = vector.extract_strided_slice %220 {offsets = [0, 0], sizes = [8, 8], strides = [1, 1]} : vector<8x96xf32> to vector<8x8xf32>
    %225 = vector.extract_strided_slice %220 {offsets = [0, 32], sizes = [8, 8], strides = [1, 1]} : vector<8x96xf32> to vector<8x8xf32>
    %226 = vector.extract_strided_slice %220 {offsets = [0, 64], sizes = [8, 8], strides = [1, 1]} : vector<8x96xf32> to vector<8x8xf32>
    %cst_118 = arith.constant dense<0.000000e+00> : vector<8x8xf32>
    %227 = tpu.matmul %224, %225, %cst_118 {dimension_numbers = #tpu.dot_dimension_numbers<[1], [1], [0], [0], [0, 0, 1, 0], [], []>} : vector<8x8xf32>, vector<8x8xf32>, vector<8x8xf32> -> vector<8x8xf32>
    %cst_119 = arith.constant 0.353553385 : f32
    %228 = vector.broadcast %cst_119 : f32 to vector<8x8xf32>
    %229 = arith.mulf %227, %228 : vector<8x8xf32>
    %cst_120 = arith.constant -1.000000e+30 : f32
    %230 = vector.broadcast %cst_120 : f32 to vector<8x8xf32>
    %231 = arith.select %223, %229, %230 : vector<8x8xi1>, vector<8x8xf32>
    %cst_121 = arith.constant dense<0xFF800000> : vector<8xf32>
    %232 = vector.multi_reduction <maximumf>, %231, %cst_121 [1] : vector<8x8xf32> to vector<8xf32>
    %233 = vector.shape_cast %232 : vector<8xf32> to vector<8x1xf32>
    %234 = vector.broadcast %233 : vector<8x1xf32> to vector<8x8xf32>
    %235 = arith.subf %231, %234 : vector<8x8xf32>
    %236 = math.exp %235 : vector<8x8xf32>
    %cst_122 = arith.constant dense<0.000000e+00> : vector<8xf32>
    %237 = vector.multi_reduction <add>, %236, %cst_122 [1] : vector<8x8xf32> to vector<8xf32>
    %238 = vector.shape_cast %237 : vector<8xf32> to vector<8x1xf32>
    %239 = tpu.reciprocal %238 {approx = true} : vector<8x1xf32> -> vector<8x1xf32>
    %240 = vector.broadcast %239 : vector<8x1xf32> to vector<8x8xf32>
    %241 = arith.mulf %236, %240 : vector<8x8xf32>
    %cst_123 = arith.constant dense<0.000000e+00> : vector<8x8xf32>
    %242 = tpu.matmul %241, %226, %cst_123 {dimension_numbers = #tpu.dot_dimension_numbers<[1], [0], [0], [1], [0, 0, 1, 1], [], []>} : vector<8x8xf32>, vector<8x8xf32>, vector<8x8xf32> -> vector<8x8xf32>
    %243 = vector.extract_strided_slice %220 {offsets = [0, 8], sizes = [8, 8], strides = [1, 1]} : vector<8x96xf32> to vector<8x8xf32>
    %244 = vector.extract_strided_slice %220 {offsets = [0, 40], sizes = [8, 8], strides = [1, 1]} : vector<8x96xf32> to vector<8x8xf32>
    %245 = vector.extract_strided_slice %220 {offsets = [0, 72], sizes = [8, 8], strides = [1, 1]} : vector<8x96xf32> to vector<8x8xf32>
    %cst_124 = arith.constant dense<0.000000e+00> : vector<8x8xf32>
    %246 = tpu.matmul %243, %244, %cst_124 {dimension_numbers = #tpu.dot_dimension_numbers<[1], [1], [0], [0], [0, 0, 1, 0], [], []>} : vector<8x8xf32>, vector<8x8xf32>, vector<8x8xf32> -> vector<8x8xf32>
    %cst_125 = arith.constant 0.353553385 : f32
    %247 = vector.broadcast %cst_125 : f32 to vector<8x8xf32>
    %248 = arith.mulf %246, %247 : vector<8x8xf32>
    %cst_126 = arith.constant -1.000000e+30 : f32
    %249 = vector.broadcast %cst_126 : f32 to vector<8x8xf32>
    %250 = arith.select %223, %248, %249 : vector<8x8xi1>, vector<8x8xf32>
    %cst_127 = arith.constant dense<0xFF800000> : vector<8xf32>
    %251 = vector.multi_reduction <maximumf>, %250, %cst_127 [1] : vector<8x8xf32> to vector<8xf32>
    %252 = vector.shape_cast %251 : vector<8xf32> to vector<8x1xf32>
    %253 = vector.broadcast %252 : vector<8x1xf32> to vector<8x8xf32>
    %254 = arith.subf %250, %253 : vector<8x8xf32>
    %255 = math.exp %254 : vector<8x8xf32>
    %cst_128 = arith.constant dense<0.000000e+00> : vector<8xf32>
    %256 = vector.multi_reduction <add>, %255, %cst_128 [1] : vector<8x8xf32> to vector<8xf32>
    %257 = vector.shape_cast %256 : vector<8xf32> to vector<8x1xf32>
    %258 = tpu.reciprocal %257 {approx = true} : vector<8x1xf32> -> vector<8x1xf32>
    %259 = vector.broadcast %258 : vector<8x1xf32> to vector<8x8xf32>
    %260 = arith.mulf %255, %259 : vector<8x8xf32>
    %cst_129 = arith.constant dense<0.000000e+00> : vector<8x8xf32>
    %261 = tpu.matmul %260, %245, %cst_129 {dimension_numbers = #tpu.dot_dimension_numbers<[1], [0], [0], [1], [0, 0, 1, 1], [], []>} : vector<8x8xf32>, vector<8x8xf32>, vector<8x8xf32> -> vector<8x8xf32>
    %262 = vector.extract_strided_slice %220 {offsets = [0, 16], sizes = [8, 8], strides = [1, 1]} : vector<8x96xf32> to vector<8x8xf32>
    %263 = vector.extract_strided_slice %220 {offsets = [0, 48], sizes = [8, 8], strides = [1, 1]} : vector<8x96xf32> to vector<8x8xf32>
    %264 = vector.extract_strided_slice %220 {offsets = [0, 80], sizes = [8, 8], strides = [1, 1]} : vector<8x96xf32> to vector<8x8xf32>
    %cst_130 = arith.constant dense<0.000000e+00> : vector<8x8xf32>
    %265 = tpu.matmul %262, %263, %cst_130 {dimension_numbers = #tpu.dot_dimension_numbers<[1], [1], [0], [0], [0, 0, 1, 0], [], []>} : vector<8x8xf32>, vector<8x8xf32>, vector<8x8xf32> -> vector<8x8xf32>
    %cst_131 = arith.constant 0.353553385 : f32
    %266 = vector.broadcast %cst_131 : f32 to vector<8x8xf32>
    %267 = arith.mulf %265, %266 : vector<8x8xf32>
    %cst_132 = arith.constant -1.000000e+30 : f32
    %268 = vector.broadcast %cst_132 : f32 to vector<8x8xf32>
    %269 = arith.select %223, %267, %268 : vector<8x8xi1>, vector<8x8xf32>
    %cst_133 = arith.constant dense<0xFF800000> : vector<8xf32>
    %270 = vector.multi_reduction <maximumf>, %269, %cst_133 [1] : vector<8x8xf32> to vector<8xf32>
    %271 = vector.shape_cast %270 : vector<8xf32> to vector<8x1xf32>
    %272 = vector.broadcast %271 : vector<8x1xf32> to vector<8x8xf32>
    %273 = arith.subf %269, %272 : vector<8x8xf32>
    %274 = math.exp %273 : vector<8x8xf32>
    %cst_134 = arith.constant dense<0.000000e+00> : vector<8xf32>
    %275 = vector.multi_reduction <add>, %274, %cst_134 [1] : vector<8x8xf32> to vector<8xf32>
    %276 = vector.shape_cast %275 : vector<8xf32> to vector<8x1xf32>
    %277 = tpu.reciprocal %276 {approx = true} : vector<8x1xf32> -> vector<8x1xf32>
    %278 = vector.broadcast %277 : vector<8x1xf32> to vector<8x8xf32>
    %279 = arith.mulf %274, %278 : vector<8x8xf32>
    %cst_135 = arith.constant dense<0.000000e+00> : vector<8x8xf32>
    %280 = tpu.matmul %279, %264, %cst_135 {dimension_numbers = #tpu.dot_dimension_numbers<[1], [0], [0], [1], [0, 0, 1, 1], [], []>} : vector<8x8xf32>, vector<8x8xf32>, vector<8x8xf32> -> vector<8x8xf32>
    %281 = vector.extract_strided_slice %220 {offsets = [0, 24], sizes = [8, 8], strides = [1, 1]} : vector<8x96xf32> to vector<8x8xf32>
    %282 = vector.extract_strided_slice %220 {offsets = [0, 56], sizes = [8, 8], strides = [1, 1]} : vector<8x96xf32> to vector<8x8xf32>
    %283 = vector.extract_strided_slice %220 {offsets = [0, 88], sizes = [8, 8], strides = [1, 1]} : vector<8x96xf32> to vector<8x8xf32>
    %cst_136 = arith.constant dense<0.000000e+00> : vector<8x8xf32>
    %284 = tpu.matmul %281, %282, %cst_136 {dimension_numbers = #tpu.dot_dimension_numbers<[1], [1], [0], [0], [0, 0, 1, 0], [], []>} : vector<8x8xf32>, vector<8x8xf32>, vector<8x8xf32> -> vector<8x8xf32>
    %cst_137 = arith.constant 0.353553385 : f32
    %285 = vector.broadcast %cst_137 : f32 to vector<8x8xf32>
    %286 = arith.mulf %284, %285 : vector<8x8xf32>
    %cst_138 = arith.constant -1.000000e+30 : f32
    %287 = vector.broadcast %cst_138 : f32 to vector<8x8xf32>
    %288 = arith.select %223, %286, %287 : vector<8x8xi1>, vector<8x8xf32>
    %cst_139 = arith.constant dense<0xFF800000> : vector<8xf32>
    %289 = vector.multi_reduction <maximumf>, %288, %cst_139 [1] : vector<8x8xf32> to vector<8xf32>
    %290 = vector.shape_cast %289 : vector<8xf32> to vector<8x1xf32>
    %291 = vector.broadcast %290 : vector<8x1xf32> to vector<8x8xf32>
    %292 = arith.subf %288, %291 : vector<8x8xf32>
    %293 = math.exp %292 : vector<8x8xf32>
    %cst_140 = arith.constant dense<0.000000e+00> : vector<8xf32>
    %294 = vector.multi_reduction <add>, %293, %cst_140 [1] : vector<8x8xf32> to vector<8xf32>
    %295 = vector.shape_cast %294 : vector<8xf32> to vector<8x1xf32>
    %296 = tpu.reciprocal %295 {approx = true} : vector<8x1xf32> -> vector<8x1xf32>
    %297 = vector.broadcast %296 : vector<8x1xf32> to vector<8x8xf32>
    %298 = arith.mulf %293, %297 : vector<8x8xf32>
    %cst_141 = arith.constant dense<0.000000e+00> : vector<8x8xf32>
    %299 = tpu.matmul %298, %283, %cst_141 {dimension_numbers = #tpu.dot_dimension_numbers<[1], [0], [0], [1], [0, 0, 1, 1], [], []>} : vector<8x8xf32>, vector<8x8xf32>, vector<8x8xf32> -> vector<8x8xf32>
    %300 = tpu.concatenate %242, %261, %280, %299 in 1 : vector<8x8xf32>, vector<8x8xf32>, vector<8x8xf32>, vector<8x8xf32> -> vector<8x32xf32>
    %cst_142 = arith.constant dense<0.000000e+00> : vector<8x32xf32>
    %301 = tpu.matmul %300, %181, %cst_142 {dimension_numbers = #tpu.dot_dimension_numbers<[1], [0], [0], [1], [0, 0, 1, 1], [], []>} : vector<8x32xf32>, vector<32x32xf32>, vector<8x32xf32> -> vector<8x32xf32>
    %302 = arith.addf %171, %301 : vector<8x32xf32>
    %303 = vector.broadcast %183 : vector<1x32xf32> to vector<8x32xf32>
    %304 = arith.addf %302, %303 : vector<8x32xf32>
    %cst_143 = arith.constant dense<0.000000e+00> : vector<8xf32>
    %305 = vector.multi_reduction <add>, %304, %cst_143 [1] : vector<8x32xf32> to vector<8xf32>
    %306 = vector.shape_cast %305 : vector<8xf32> to vector<8x1xf32>
    %cst_144 = arith.constant 3.200000e+01 : f32
    %307 = vector.broadcast %cst_144 : f32 to vector<8x1xf32>
    %308 = arith.divf %306, %307 : vector<8x1xf32>
    %309 = vector.broadcast %308 : vector<8x1xf32> to vector<8x32xf32>
    %310 = arith.subf %304, %309 : vector<8x32xf32>
    %311 = arith.mulf %310, %310 : vector<8x32xf32>
    %cst_145 = arith.constant dense<0.000000e+00> : vector<8xf32>
    %312 = vector.multi_reduction <add>, %311, %cst_145 [1] : vector<8x32xf32> to vector<8xf32>
    %313 = vector.shape_cast %312 : vector<8xf32> to vector<8x1xf32>
    %cst_146 = arith.constant 3.200000e+01 : f32
    %314 = vector.broadcast %cst_146 : f32 to vector<8x1xf32>
    %315 = arith.divf %313, %314 : vector<8x1xf32>
    %316 = vector.broadcast %308 : vector<8x1xf32> to vector<8x32xf32>
    %317 = arith.subf %304, %316 : vector<8x32xf32>
    %cst_147 = arith.constant 9.99999974E-6 : f32
    %318 = vector.broadcast %cst_147 : f32 to vector<8x1xf32>
    %319 = arith.addf %315, %318 : vector<8x1xf32>
    %320 = math.rsqrt %319 : vector<8x1xf32>
    %321 = vector.broadcast %320 : vector<8x1xf32> to vector<8x32xf32>
    %322 = arith.mulf %317, %321 : vector<8x32xf32>
    %323 = vector.broadcast %185 : vector<1x32xf32> to vector<8x32xf32>
    %324 = arith.mulf %322, %323 : vector<8x32xf32>
    %325 = vector.broadcast %187 : vector<1x32xf32> to vector<8x32xf32>
    %326 = arith.addf %324, %325 : vector<8x32xf32>
    %cst_148 = arith.constant dense<0.000000e+00> : vector<8x128xf32>
    %327 = tpu.matmul %326, %189, %cst_148 {dimension_numbers = #tpu.dot_dimension_numbers<[1], [0], [0], [1], [0, 0, 1, 1], [], []>} : vector<8x32xf32>, vector<32x128xf32>, vector<8x128xf32> -> vector<8x128xf32>
    %328 = vector.broadcast %191 : vector<1x128xf32> to vector<8x128xf32>
    %329 = arith.addf %327, %328 : vector<8x128xf32>
    %cst_149 = arith.constant 1.702000e+00 : f32
    %330 = vector.broadcast %cst_149 : f32 to vector<8x128xf32>
    %331 = arith.mulf %330, %329 : vector<8x128xf32>
    %332 = arith.negf %331 : vector<8x128xf32>
    %333 = math.exp %332 : vector<8x128xf32>
    %cst_150 = arith.constant 1.000000e+00 : f32
    %334 = vector.broadcast %cst_150 : f32 to vector<8x128xf32>
    %335 = arith.addf %334, %333 : vector<8x128xf32>
    %336 = arith.divf %334, %335 : vector<8x128xf32>
    %337 = arith.mulf %329, %336 : vector<8x128xf32>
    %cst_151 = arith.constant dense<0.000000e+00> : vector<8x32xf32>
    %338 = tpu.matmul %337, %193, %cst_151 {dimension_numbers = #tpu.dot_dimension_numbers<[1], [0], [0], [1], [0, 0, 1, 1], [], []>} : vector<8x128xf32>, vector<128x32xf32>, vector<8x32xf32> -> vector<8x32xf32>
    %339 = arith.addf %304, %338 : vector<8x32xf32>
    %340 = vector.broadcast %195 : vector<1x32xf32> to vector<8x32xf32>
    %341 = arith.addf %339, %340 : vector<8x32xf32>
    %c0_152 = arith.constant 0 : index
    %c0_153 = arith.constant 0 : index
    %342 = vector.load %arg2[%c0_152, %c0_153] : memref<1x8xf32, #tpu.memory_space<vmem>>, vector<1x8xf32>
    %cst_154 = arith.constant dense<0.000000e+00> : vector<1x32xf32>
    %343 = tpu.matmul %342, %341, %cst_154 {dimension_numbers = #tpu.dot_dimension_numbers<[1], [0], [0], [1], [0, 0, 1, 1], [], []>} : vector<1x8xf32>, vector<8x32xf32>, vector<1x32xf32> -> vector<1x32xf32>
    %c0_155 = arith.constant 0 : index
    %c0_156 = arith.constant 0 : index
    %344 = vector.load %arg15[%c0_155, %c0_156] : memref<1x32xf32, #tpu.memory_space<vmem>>, vector<1x32xf32>
    %c0_157 = arith.constant 0 : index
    %c0_158 = arith.constant 0 : index
    %345 = vector.load %arg16[%c0_157, %c0_158] : memref<1x32xf32, #tpu.memory_space<vmem>>, vector<1x32xf32>
    %cst_159 = arith.constant dense<0.000000e+00> : vector<1xf32>
    %346 = vector.multi_reduction <add>, %343, %cst_159 [1] : vector<1x32xf32> to vector<1xf32>
    %347 = vector.shape_cast %346 : vector<1xf32> to vector<1x1xf32>
    %cst_160 = arith.constant 3.200000e+01 : f32
    %348 = vector.broadcast %cst_160 : f32 to vector<1x1xf32>
    %349 = arith.divf %347, %348 : vector<1x1xf32>
    %350 = vector.broadcast %349 : vector<1x1xf32> to vector<1x32xf32>
    %351 = arith.subf %343, %350 : vector<1x32xf32>
    %352 = arith.mulf %351, %351 : vector<1x32xf32>
    %cst_161 = arith.constant dense<0.000000e+00> : vector<1xf32>
    %353 = vector.multi_reduction <add>, %352, %cst_161 [1] : vector<1x32xf32> to vector<1xf32>
    %354 = vector.shape_cast %353 : vector<1xf32> to vector<1x1xf32>
    %cst_162 = arith.constant 3.200000e+01 : f32
    %355 = vector.broadcast %cst_162 : f32 to vector<1x1xf32>
    %356 = arith.divf %354, %355 : vector<1x1xf32>
    %357 = vector.broadcast %349 : vector<1x1xf32> to vector<1x32xf32>
    %358 = arith.subf %343, %357 : vector<1x32xf32>
    %cst_163 = arith.constant 9.99999974E-6 : f32
    %359 = vector.broadcast %cst_163 : f32 to vector<1x1xf32>
    %360 = arith.addf %356, %359 : vector<1x1xf32>
    %361 = math.rsqrt %360 : vector<1x1xf32>
    %362 = vector.broadcast %361 : vector<1x1xf32> to vector<1x32xf32>
    %363 = arith.mulf %358, %362 : vector<1x32xf32>
    %364 = arith.mulf %363, %344 : vector<1x32xf32>
    %365 = arith.addf %364, %345 : vector<1x32xf32>
    %c0_164 = arith.constant 0 : index
    %c0_165 = arith.constant 0 : index
    %366 = vector.load %arg17[%c0_164, %c0_165] : memref<32x32xf32, #tpu.memory_space<vmem>>, vector<32x32xf32>
    %cst_166 = arith.constant dense<0.000000e+00> : vector<1x32xf32>
    %367 = tpu.matmul %365, %366, %cst_166 {dimension_numbers = #tpu.dot_dimension_numbers<[1], [0], [0], [1], [0, 0, 1, 1], [], []>} : vector<1x32xf32>, vector<32x32xf32>, vector<1x32xf32> -> vector<1x32xf32>
    %c0_167 = arith.constant 0 : index
    %c0_168 = arith.constant 0 : index
    %368 = vector.load %arg18[%c0_167, %c0_168] : memref<1x32xf32, #tpu.memory_space<vmem>>, vector<1x32xf32>
    tpu.vector_store %arg18[%c0_167, %c0_168], %367 {strides = array<i32>} : memref<1x32xf32, #tpu.memory_space<vmem>>, vector<1x32xf32>,
    return
  }
  func.func @transform_0(%arg0: i32) -> (i32, i32, i32) {
    %c0_i32 = arith.constant 0 : i32
    %c0_i32_0 = arith.constant 0 : i32
    %c0_i32_1 = arith.constant 0 : i32
    return %arg0, %c0_i32, %c0_i32_0 : i32, i32, i32
  }
  func.func @transform_1(%arg0: i32) -> (i32, i32) {
    %c0_i32 = arith.constant 0 : i32
    %c0_i32_0 = arith.constant 0 : i32
    return %arg0, %c0_i32 : i32, i32
  }
  func.func @transform_2(%arg0: i32) -> (i32, i32, i32) {
    %c0_i32 = arith.constant 0 : i32
    %c0_i32_0 = arith.constant 0 : i32
    %c0_i32_1 = arith.constant 0 : i32
    %c0_i32_2 = arith.constant 0 : i32
    return %c0_i32, %c0_i32_0, %c0_i32_1 : i32, i32, i32
  }
  func.func @transform_3(%arg0: i32) -> (i32, i32, i32) {
    %c0_i32 = arith.constant 0 : i32
    %c0_i32_0 = arith.constant 0 : i32
    %c0_i32_1 = arith.constant 0 : i32
    %c0_i32_2 = arith.constant 0 : i32
    return %c0_i32, %c0_i32_0, %c0_i32_1 : i32, i32, i32
  }
  func.func @transform_4(%arg0: i32) -> (i32, i32, i32) {
    %c0_i32 = arith.constant 0 : i32
    %c0_i32_0 = arith.constant 0 : i32
    %c0_i32_1 = arith.constant 0 : i32
    %c0_i32_2 = arith.constant 0 : i32
    return %c0_i32, %c0_i32_0, %c0_i32_1 : i32, i32, i32
  }
  func.func @transform_5(%arg0: i32) -> (i32, i32, i32) {
    %c0_i32 = arith.constant 0 : i32
    %c0_i32_0 = arith.constant 0 : i32
    %c0_i32_1 = arith.constant 0 : i32
    %c0_i32_2 = arith.constant 0 : i32
    return %c0_i32, %c0_i32_0, %c0_i32_1 : i32, i32, i32
  }
  func.func @transform_6(%arg0: i32) -> (i32, i32, i32) {
    %c0_i32 = arith.constant 0 : i32
    %c0_i32_0 = arith.constant 0 : i32
    %c0_i32_1 = arith.constant 0 : i32
    %c0_i32_2 = arith.constant 0 : i32
    return %c0_i32, %c0_i32_0, %c0_i32_1 : i32, i32, i32
  }
  func.func @transform_7(%arg0: i32) -> (i32, i32, i32) {
    %c0_i32 = arith.constant 0 : i32
    %c0_i32_0 = arith.constant 0 : i32
    %c0_i32_1 = arith.constant 0 : i32
    %c0_i32_2 = arith.constant 0 : i32
    return %c0_i32, %c0_i32_0, %c0_i32_1 : i32, i32, i32
  }
  func.func @transform_8(%arg0: i32) -> (i32, i32, i32) {
    %c0_i32 = arith.constant 0 : i32
    %c0_i32_0 = arith.constant 0 : i32
    %c0_i32_1 = arith.constant 0 : i32
    %c0_i32_2 = arith.constant 0 : i32
    return %c0_i32, %c0_i32_0, %c0_i32_1 : i32, i32, i32
  }
  func.func @transform_9(%arg0: i32) -> (i32, i32, i32) {
    %c0_i32 = arith.constant 0 : i32
    %c0_i32_0 = arith.constant 0 : i32
    %c0_i32_1 = arith.constant 0 : i32
    %c0_i32_2 = arith.constant 0 : i32
    return %c0_i32, %c0_i32_0, %c0_i32_1 : i32, i32, i32
  }
  func.func @transform_10(%arg0: i32) -> (i32, i32, i32) {
    %c0_i32 = arith.constant 0 : i32
    %c0_i32_0 = arith.constant 0 : i32
    %c0_i32_1 = arith.constant 0 : i32
    %c0_i32_2 = arith.constant 0 : i32
    return %c0_i32, %c0_i32_0, %c0_i32_1 : i32, i32, i32
  }
  func.func @transform_11(%arg0: i32) -> (i32, i32, i32) {
    %c0_i32 = arith.constant 0 : i32
    %c0_i32_0 = arith.constant 0 : i32
    %c0_i32_1 = arith.constant 0 : i32
    %c0_i32_2 = arith.constant 0 : i32
    return %c0_i32, %c0_i32_0, %c0_i32_1 : i32, i32, i32
  }
  func.func @transform_12(%arg0: i32) -> (i32, i32, i32) {
    %c0_i32 = arith.constant 0 : i32
    %c0_i32_0 = arith.constant 0 : i32
    %c0_i32_1 = arith.constant 0 : i32
    %c0_i32_2 = arith.constant 0 : i32
    return %c0_i32, %c0_i32_0, %c0_i32_1 : i32, i32, i32
  }
  func.func @transform_13(%arg0: i32) -> (i32, i32, i32) {
    %c0_i32 = arith.constant 0 : i32
    %c0_i32_0 = arith.constant 0 : i32
    %c0_i32_1 = arith.constant 0 : i32
    %c0_i32_2 = arith.constant 0 : i32
    return %c0_i32, %c0_i32_0, %c0_i32_1 : i32, i32, i32
  }
  func.func @transform_14(%arg0: i32) -> (i32, i32) {
    %c0_i32 = arith.constant 0 : i32
    %c0_i32_0 = arith.constant 0 : i32
    %c0_i32_1 = arith.constant 0 : i32
    return %c0_i32, %c0_i32_0 : i32, i32
  }
  func.func @transform_15(%arg0: i32) -> (i32, i32) {
    %c0_i32 = arith.constant 0 : i32
    %c0_i32_0 = arith.constant 0 : i32
    %c0_i32_1 = arith.constant 0 : i32
    return %c0_i32, %c0_i32_0 : i32, i32
  }
  func.func @transform_16(%arg0: i32) -> (i32, i32) {
    %c0_i32 = arith.constant 0 : i32
    %c0_i32_0 = arith.constant 0 : i32
    %c0_i32_1 = arith.constant 0 : i32
    return %c0_i32, %c0_i32_0 : i32, i32
  }
  func.func @transform_17(%arg0: i32) -> (i32, i32) {
    %c0_i32 = arith.constant 0 : i32
    %c0_i32_0 = arith.constant 0 : i32
    return %arg0, %c0_i32 : i32, i32
  }
}

module attributes {stable_mosaic.version = 11 : i64} {
  func.func @_fusion_kernel(%arg0: i32, %arg1: memref<1x16x32xf32, #tpu.memory_space<vmem>>, %arg2: memref<1x32xf32, #tpu.memory_space<vmem>>, %arg3: memref<32x32xf32, #tpu.memory_space<vmem>>, %arg4: memref<1x32xf32, #tpu.memory_space<vmem>>, %arg5: memref<32x32xf32, #tpu.memory_space<vmem>>, %arg6: memref<1x32xf32, #tpu.memory_space<vmem>>, %arg7: memref<2x1x32xf32, #tpu.memory_space<vmem>>, %arg8: memref<2x1x32xf32, #tpu.memory_space<vmem>>, %arg9: memref<2x32x96xf32, #tpu.memory_space<vmem>>, %arg10: memref<2x1x96xf32, #tpu.memory_space<vmem>>, %arg11: memref<2x32x32xf32, #tpu.memory_space<vmem>>, %arg12: memref<2x1x32xf32, #tpu.memory_space<vmem>>, %arg13: memref<2x1x32xf32, #tpu.memory_space<vmem>>, %arg14: memref<2x1x32xf32, #tpu.memory_space<vmem>>, %arg15: memref<2x32x128xf32, #tpu.memory_space<vmem>>, %arg16: memref<2x1x128xf32, #tpu.memory_space<vmem>>, %arg17: memref<2x128x32xf32, #tpu.memory_space<vmem>>, %arg18: memref<2x1x32xf32, #tpu.memory_space<vmem>>, %arg19: memref<1x32xf32, #tpu.memory_space<vmem>>, %arg20: memref<1x32xf32, #tpu.memory_space<vmem>>, %arg21: memref<256x16xf32, #tpu.memory_space<vmem>>, %arg22: memref<1x1x256xf32, #tpu.memory_space<vmem>>) attributes {dimension_semantics = [#tpu.dimension_semantics<parallel>], iteration_bounds = array<i64: 2>, scalar_prefetch = 0 : i64, scratch_operands = 0 : i64, tpu.core_type = #tpu.core_type<tc>, window_params = [{transform_indices = @transform_0, window_bounds = array<i64: 1, 16, 32>}, {pipeline_mode = #tpu.pipeline_mode<synchronous>, transform_indices = @transform_1, window_bounds = array<i64: 1, 32>}, {pipeline_mode = #tpu.pipeline_mode<synchronous>, transform_indices = @transform_2, window_bounds = array<i64: 32, 32>}, {pipeline_mode = #tpu.pipeline_mode<synchronous>, transform_indices = @transform_3, window_bounds = array<i64: 1, 32>}, {pipeline_mode = #tpu.pipeline_mode<synchronous>, transform_indices = @transform_4, window_bounds = array<i64: 32, 32>}, {pipeline_mode = #tpu.pipeline_mode<synchronous>, transform_indices = @transform_5, window_bounds = array<i64: 1, 32>}, {pipeline_mode = #tpu.pipeline_mode<synchronous>, transform_indices = @transform_6, window_bounds = array<i64: 2, 1, 32>}, {pipeline_mode = #tpu.pipeline_mode<synchronous>, transform_indices = @transform_7, window_bounds = array<i64: 2, 1, 32>}, {pipeline_mode = #tpu.pipeline_mode<synchronous>, transform_indices = @transform_8, window_bounds = array<i64: 2, 32, 96>}, {pipeline_mode = #tpu.pipeline_mode<synchronous>, transform_indices = @transform_9, window_bounds = array<i64: 2, 1, 96>}, {pipeline_mode = #tpu.pipeline_mode<synchronous>, transform_indices = @transform_10, window_bounds = array<i64: 2, 32, 32>}, {pipeline_mode = #tpu.pipeline_mode<synchronous>, transform_indices = @transform_11, window_bounds = array<i64: 2, 1, 32>}, {pipeline_mode = #tpu.pipeline_mode<synchronous>, transform_indices = @transform_12, window_bounds = array<i64: 2, 1, 32>}, {pipeline_mode = #tpu.pipeline_mode<synchronous>, transform_indices = @transform_13, window_bounds = array<i64: 2, 1, 32>}, {pipeline_mode = #tpu.pipeline_mode<synchronous>, transform_indices = @transform_14, window_bounds = array<i64: 2, 32, 128>}, {pipeline_mode = #tpu.pipeline_mode<synchronous>, transform_indices = @transform_15, window_bounds = array<i64: 2, 1, 128>}, {pipeline_mode = #tpu.pipeline_mode<synchronous>, transform_indices = @transform_16, window_bounds = array<i64: 2, 128, 32>}, {pipeline_mode = #tpu.pipeline_mode<synchronous>, transform_indices = @transform_17, window_bounds = array<i64: 2, 1, 32>}, {pipeline_mode = #tpu.pipeline_mode<synchronous>, transform_indices = @transform_18, window_bounds = array<i64: 1, 32>}, {pipeline_mode = #tpu.pipeline_mode<synchronous>, transform_indices = @transform_19, window_bounds = array<i64: 1, 32>}, {pipeline_mode = #tpu.pipeline_mode<synchronous>, transform_indices = @transform_20, window_bounds = array<i64: 256, 16>}, {transform_indices = @transform_21, window_bounds = array<i64: 1, 1, 256>}]} {
    %c0 = arith.constant 0 : index
    %c0_0 = arith.constant 0 : index
    %c0_1 = arith.constant 0 : index
    %0 = vector.load %arg1[%c0, %c0_0, %c0_1] : memref<1x16x32xf32, #tpu.memory_space<vmem>>, vector<1x16x32xf32>
    %1 = vector.shape_cast %0 : vector<1x16x32xf32> to vector<16x32xf32>
    %c0_2 = arith.constant 0 : index
    %c0_3 = arith.constant 0 : index
    %2 = vector.load %arg3[%c0_2, %c0_3] : memref<32x32xf32, #tpu.memory_space<vmem>>, vector<32x32xf32>
    %cst = arith.constant dense<0.000000e+00> : vector<16x32xf32>
    %3 = tpu.matmul %1, %2, %cst {dimension_numbers = #tpu.dot_dimension_numbers<[1], [0], [0], [1], [0, 0, 1, 1], [], []>} : vector<16x32xf32>, vector<32x32xf32>, vector<16x32xf32> -> vector<16x32xf32>
    %c0_4 = arith.constant 0 : index
    %c0_5 = arith.constant 0 : index
    %4 = vector.load %arg4[%c0_4, %c0_5] : memref<1x32xf32, #tpu.memory_space<vmem>>, vector<1x32xf32>
    %5 = vector.broadcast %4 : vector<1x32xf32> to vector<16x32xf32>
    %6 = arith.addf %3, %5 : vector<16x32xf32>
    %c0_6 = arith.constant 0 : index
    %c0_7 = arith.constant 0 : index
    %7 = vector.load %arg2[%c0_6, %c0_7] : memref<1x32xf32, #tpu.memory_space<vmem>>, vector<1x32xf32>
    %c0_8 = arith.constant 0 : index
    %c0_9 = arith.constant 0 : index
    %8 = vector.load %arg5[%c0_8, %c0_9] : memref<32x32xf32, #tpu.memory_space<vmem>>, vector<32x32xf32>
    %cst_10 = arith.constant dense<0.000000e+00> : vector<1x32xf32>
    %9 = tpu.matmul %7, %8, %cst_10 {dimension_numbers = #tpu.dot_dimension_numbers<[1], [0], [0], [1], [0, 0, 1, 1], [], []>} : vector<1x32xf32>, vector<32x32xf32>, vector<1x32xf32> -> vector<1x32xf32>
    %c0_11 = arith.constant 0 : index
    %c0_12 = arith.constant 0 : index
    %10 = vector.load %arg6[%c0_11, %c0_12] : memref<1x32xf32, #tpu.memory_space<vmem>>, vector<1x32xf32>
    %11 = arith.addf %9, %10 : vector<1x32xf32>
    %12 = tpu.concatenate %6, %11 in 0 : vector<16x32xf32>, vector<1x32xf32> -> vector<17x32xf32>
    %c0_13 = arith.constant 0 : index
    %c0_14 = arith.constant 0 : index
    %c0_15 = arith.constant 0 : index
    %13 = vector.load %arg7[%c0_13, %c0_14, %c0_15] : memref<2x1x32xf32, #tpu.memory_space<vmem>>, vector<1x1x32xf32>
    %14 = vector.shape_cast %13 : vector<1x1x32xf32> to vector<1x32xf32>
    %c0_16 = arith.constant 0 : index
    %c0_17 = arith.constant 0 : index
    %c0_18 = arith.constant 0 : index
    %15 = vector.load %arg8[%c0_16, %c0_17, %c0_18] : memref<2x1x32xf32, #tpu.memory_space<vmem>>, vector<1x1x32xf32>
    %16 = vector.shape_cast %15 : vector<1x1x32xf32> to vector<1x32xf32>
    %c0_19 = arith.constant 0 : index
    %c0_20 = arith.constant 0 : index
    %c0_21 = arith.constant 0 : index
    %17 = vector.load %arg9[%c0_19, %c0_20, %c0_21] : memref<2x32x96xf32, #tpu.memory_space<vmem>>, vector<1x32x96xf32>
    %18 = vector.shape_cast %17 : vector<1x32x96xf32> to vector<32x96xf32>
    %c0_22 = arith.constant 0 : index
    %c0_23 = arith.constant 0 : index
    %c0_24 = arith.constant 0 : index
    %19 = vector.load %arg10[%c0_22, %c0_23, %c0_24] : memref<2x1x96xf32, #tpu.memory_space<vmem>>, vector<1x1x96xf32>
    %20 = vector.shape_cast %19 : vector<1x1x96xf32> to vector<1x96xf32>
    %c0_25 = arith.constant 0 : index
    %c0_26 = arith.constant 0 : index
    %c0_27 = arith.constant 0 : index
    %21 = vector.load %arg11[%c0_25, %c0_26, %c0_27] : memref<2x32x32xf32, #tpu.memory_space<vmem>>, vector<1x32x32xf32>
    %22 = vector.shape_cast %21 : vector<1x32x32xf32> to vector<32x32xf32>
    %c0_28 = arith.constant 0 : index
    %c0_29 = arith.constant 0 : index
    %c0_30 = arith.constant 0 : index
    %23 = vector.load %arg12[%c0_28, %c0_29, %c0_30] : memref<2x1x32xf32, #tpu.memory_space<vmem>>, vector<1x1x32xf32>
    %24 = vector.shape_cast %23 : vector<1x1x32xf32> to vector<1x32xf32>
    %c0_31 = arith.constant 0 : index
    %c0_32 = arith.constant 0 : index
    %c0_33 = arith.constant 0 : index
    %25 = vector.load %arg13[%c0_31, %c0_32, %c0_33] : memref<2x1x32xf32, #tpu.memory_space<vmem>>, vector<1x1x32xf32>
    %26 = vector.shape_cast %25 : vector<1x1x32xf32> to vector<1x32xf32>
    %c0_34 = arith.constant 0 : index
    %c0_35 = arith.constant 0 : index
    %c0_36 = arith.constant 0 : index
    %27 = vector.load %arg14[%c0_34, %c0_35, %c0_36] : memref<2x1x32xf32, #tpu.memory_space<vmem>>, vector<1x1x32xf32>
    %28 = vector.shape_cast %27 : vector<1x1x32xf32> to vector<1x32xf32>
    %c0_37 = arith.constant 0 : index
    %c0_38 = arith.constant 0 : index
    %c0_39 = arith.constant 0 : index
    %29 = vector.load %arg15[%c0_37, %c0_38, %c0_39] : memref<2x32x128xf32, #tpu.memory_space<vmem>>, vector<1x32x128xf32>
    %30 = vector.shape_cast %29 : vector<1x32x128xf32> to vector<32x128xf32>
    %c0_40 = arith.constant 0 : index
    %c0_41 = arith.constant 0 : index
    %c0_42 = arith.constant 0 : index
    %31 = vector.load %arg16[%c0_40, %c0_41, %c0_42] : memref<2x1x128xf32, #tpu.memory_space<vmem>>, vector<1x1x128xf32>
    %32 = vector.shape_cast %31 : vector<1x1x128xf32> to vector<1x128xf32>
    %c0_43 = arith.constant 0 : index
    %c0_44 = arith.constant 0 : index
    %c0_45 = arith.constant 0 : index
    %33 = vector.load %arg17[%c0_43, %c0_44, %c0_45] : memref<2x128x32xf32, #tpu.memory_space<vmem>>, vector<1x128x32xf32>
    %34 = vector.shape_cast %33 : vector<1x128x32xf32> to vector<128x32xf32>
    %c0_46 = arith.constant 0 : index
    %c0_47 = arith.constant 0 : index
    %c0_48 = arith.constant 0 : index
    %35 = vector.load %arg18[%c0_46, %c0_47, %c0_48] : memref<2x1x32xf32, #tpu.memory_space<vmem>>, vector<1x1x32xf32>
    %36 = vector.shape_cast %35 : vector<1x1x32xf32> to vector<1x32xf32>
    %cst_49 = arith.constant dense<0.000000e+00> : vector<17xf32>
    %37 = vector.multi_reduction <add>, %12, %cst_49 [1] : vector<17x32xf32> to vector<17xf32>
    %38 = vector.shape_cast %37 : vector<17xf32> to vector<17x1xf32>
    %cst_50 = arith.constant 3.200000e+01 : f32
    %39 = vector.broadcast %cst_50 : f32 to vector<17x1xf32>
    %40 = arith.divf %38, %39 : vector<17x1xf32>
    %41 = vector.broadcast %40 : vector<17x1xf32> to vector<17x32xf32>
    %42 = arith.subf %12, %41 : vector<17x32xf32>
    %43 = arith.mulf %42, %42 : vector<17x32xf32>
    %cst_51 = arith.constant dense<0.000000e+00> : vector<17xf32>
    %44 = vector.multi_reduction <add>, %43, %cst_51 [1] : vector<17x32xf32> to vector<17xf32>
    %45 = vector.shape_cast %44 : vector<17xf32> to vector<17x1xf32>
    %cst_52 = arith.constant 3.200000e+01 : f32
    %46 = vector.broadcast %cst_52 : f32 to vector<17x1xf32>
    %47 = arith.divf %45, %46 : vector<17x1xf32>
    %48 = vector.broadcast %40 : vector<17x1xf32> to vector<17x32xf32>
    %49 = arith.subf %12, %48 : vector<17x32xf32>
    %cst_53 = arith.constant 9.99999974E-6 : f32
    %50 = vector.broadcast %cst_53 : f32 to vector<17x1xf32>
    %51 = arith.addf %47, %50 : vector<17x1xf32>
    %52 = math.rsqrt %51 : vector<17x1xf32>
    %53 = vector.broadcast %52 : vector<17x1xf32> to vector<17x32xf32>
    %54 = arith.mulf %49, %53 : vector<17x32xf32>
    %55 = vector.broadcast %14 : vector<1x32xf32> to vector<17x32xf32>
    %56 = arith.mulf %54, %55 : vector<17x32xf32>
    %57 = vector.broadcast %16 : vector<1x32xf32> to vector<17x32xf32>
    %58 = arith.addf %56, %57 : vector<17x32xf32>
    %cst_54 = arith.constant dense<0.000000e+00> : vector<17x96xf32>
    %59 = tpu.matmul %58, %18, %cst_54 {dimension_numbers = #tpu.dot_dimension_numbers<[1], [0], [0], [1], [0, 0, 1, 1], [], []>} : vector<17x32xf32>, vector<32x96xf32>, vector<17x96xf32> -> vector<17x96xf32>
    %60 = vector.broadcast %20 : vector<1x96xf32> to vector<17x96xf32>
    %61 = arith.addf %59, %60 : vector<17x96xf32>
    %62 = vector.extract_strided_slice %61 {offsets = [0, 0], sizes = [17, 8], strides = [1, 1]} : vector<17x96xf32> to vector<17x8xf32>
    %63 = vector.extract_strided_slice %61 {offsets = [0, 32], sizes = [17, 8], strides = [1, 1]} : vector<17x96xf32> to vector<17x8xf32>
    %64 = vector.extract_strided_slice %61 {offsets = [0, 64], sizes = [17, 8], strides = [1, 1]} : vector<17x96xf32> to vector<17x8xf32>
    %cst_55 = arith.constant dense<0.000000e+00> : vector<17x17xf32>
    %65 = tpu.matmul %62, %63, %cst_55 {dimension_numbers = #tpu.dot_dimension_numbers<[1], [1], [0], [0], [0, 0, 1, 0], [], []>} : vector<17x8xf32>, vector<17x8xf32>, vector<17x17xf32> -> vector<17x17xf32>
    %cst_56 = arith.constant 0.353553385 : f32
    %66 = vector.broadcast %cst_56 : f32 to vector<17x17xf32>
    %67 = arith.mulf %65, %66 : vector<17x17xf32>
    %cst_57 = arith.constant dense<0xFF800000> : vector<17xf32>
    %68 = vector.multi_reduction <maximumf>, %67, %cst_57 [1] : vector<17x17xf32> to vector<17xf32>
    %69 = vector.shape_cast %68 : vector<17xf32> to vector<17x1xf32>
    %70 = vector.broadcast %69 : vector<17x1xf32> to vector<17x17xf32>
    %71 = arith.subf %67, %70 : vector<17x17xf32>
    %72 = math.exp %71 : vector<17x17xf32>
    %cst_58 = arith.constant dense<0.000000e+00> : vector<17xf32>
    %73 = vector.multi_reduction <add>, %72, %cst_58 [1] : vector<17x17xf32> to vector<17xf32>
    %74 = vector.shape_cast %73 : vector<17xf32> to vector<17x1xf32>
    %75 = tpu.reciprocal %74 {approx = true} : vector<17x1xf32> -> vector<17x1xf32>
    %76 = vector.broadcast %75 : vector<17x1xf32> to vector<17x17xf32>
    %77 = arith.mulf %72, %76 : vector<17x17xf32>
    %cst_59 = arith.constant dense<0.000000e+00> : vector<17x8xf32>
    %78 = tpu.matmul %77, %64, %cst_59 {dimension_numbers = #tpu.dot_dimension_numbers<[1], [0], [0], [1], [0, 0, 1, 1], [], []>} : vector<17x17xf32>, vector<17x8xf32>, vector<17x8xf32> -> vector<17x8xf32>
    %79 = vector.extract_strided_slice %61 {offsets = [0, 8], sizes = [17, 8], strides = [1, 1]} : vector<17x96xf32> to vector<17x8xf32>
    %80 = vector.extract_strided_slice %61 {offsets = [0, 40], sizes = [17, 8], strides = [1, 1]} : vector<17x96xf32> to vector<17x8xf32>
    %81 = vector.extract_strided_slice %61 {offsets = [0, 72], sizes = [17, 8], strides = [1, 1]} : vector<17x96xf32> to vector<17x8xf32>
    %cst_60 = arith.constant dense<0.000000e+00> : vector<17x17xf32>
    %82 = tpu.matmul %79, %80, %cst_60 {dimension_numbers = #tpu.dot_dimension_numbers<[1], [1], [0], [0], [0, 0, 1, 0], [], []>} : vector<17x8xf32>, vector<17x8xf32>, vector<17x17xf32> -> vector<17x17xf32>
    %cst_61 = arith.constant 0.353553385 : f32
    %83 = vector.broadcast %cst_61 : f32 to vector<17x17xf32>
    %84 = arith.mulf %82, %83 : vector<17x17xf32>
    %cst_62 = arith.constant dense<0xFF800000> : vector<17xf32>
    %85 = vector.multi_reduction <maximumf>, %84, %cst_62 [1] : vector<17x17xf32> to vector<17xf32>
    %86 = vector.shape_cast %85 : vector<17xf32> to vector<17x1xf32>
    %87 = vector.broadcast %86 : vector<17x1xf32> to vector<17x17xf32>
    %88 = arith.subf %84, %87 : vector<17x17xf32>
    %89 = math.exp %88 : vector<17x17xf32>
    %cst_63 = arith.constant dense<0.000000e+00> : vector<17xf32>
    %90 = vector.multi_reduction <add>, %89, %cst_63 [1] : vector<17x17xf32> to vector<17xf32>
    %91 = vector.shape_cast %90 : vector<17xf32> to vector<17x1xf32>
    %92 = tpu.reciprocal %91 {approx = true} : vector<17x1xf32> -> vector<17x1xf32>
    %93 = vector.broadcast %92 : vector<17x1xf32> to vector<17x17xf32>
    %94 = arith.mulf %89, %93 : vector<17x17xf32>
    %cst_64 = arith.constant dense<0.000000e+00> : vector<17x8xf32>
    %95 = tpu.matmul %94, %81, %cst_64 {dimension_numbers = #tpu.dot_dimension_numbers<[1], [0], [0], [1], [0, 0, 1, 1], [], []>} : vector<17x17xf32>, vector<17x8xf32>, vector<17x8xf32> -> vector<17x8xf32>
    %96 = vector.extract_strided_slice %61 {offsets = [0, 16], sizes = [17, 8], strides = [1, 1]} : vector<17x96xf32> to vector<17x8xf32>
    %97 = vector.extract_strided_slice %61 {offsets = [0, 48], sizes = [17, 8], strides = [1, 1]} : vector<17x96xf32> to vector<17x8xf32>
    %98 = vector.extract_strided_slice %61 {offsets = [0, 80], sizes = [17, 8], strides = [1, 1]} : vector<17x96xf32> to vector<17x8xf32>
    %cst_65 = arith.constant dense<0.000000e+00> : vector<17x17xf32>
    %99 = tpu.matmul %96, %97, %cst_65 {dimension_numbers = #tpu.dot_dimension_numbers<[1], [1], [0], [0], [0, 0, 1, 0], [], []>} : vector<17x8xf32>, vector<17x8xf32>, vector<17x17xf32> -> vector<17x17xf32>
    %cst_66 = arith.constant 0.353553385 : f32
    %100 = vector.broadcast %cst_66 : f32 to vector<17x17xf32>
    %101 = arith.mulf %99, %100 : vector<17x17xf32>
    %cst_67 = arith.constant dense<0xFF800000> : vector<17xf32>
    %102 = vector.multi_reduction <maximumf>, %101, %cst_67 [1] : vector<17x17xf32> to vector<17xf32>
    %103 = vector.shape_cast %102 : vector<17xf32> to vector<17x1xf32>
    %104 = vector.broadcast %103 : vector<17x1xf32> to vector<17x17xf32>
    %105 = arith.subf %101, %104 : vector<17x17xf32>
    %106 = math.exp %105 : vector<17x17xf32>
    %cst_68 = arith.constant dense<0.000000e+00> : vector<17xf32>
    %107 = vector.multi_reduction <add>, %106, %cst_68 [1] : vector<17x17xf32> to vector<17xf32>
    %108 = vector.shape_cast %107 : vector<17xf32> to vector<17x1xf32>
    %109 = tpu.reciprocal %108 {approx = true} : vector<17x1xf32> -> vector<17x1xf32>
    %110 = vector.broadcast %109 : vector<17x1xf32> to vector<17x17xf32>
    %111 = arith.mulf %106, %110 : vector<17x17xf32>
    %cst_69 = arith.constant dense<0.000000e+00> : vector<17x8xf32>
    %112 = tpu.matmul %111, %98, %cst_69 {dimension_numbers = #tpu.dot_dimension_numbers<[1], [0], [0], [1], [0, 0, 1, 1], [], []>} : vector<17x17xf32>, vector<17x8xf32>, vector<17x8xf32> -> vector<17x8xf32>
    %113 = vector.extract_strided_slice %61 {offsets = [0, 24], sizes = [17, 8], strides = [1, 1]} : vector<17x96xf32> to vector<17x8xf32>
    %114 = vector.extract_strided_slice %61 {offsets = [0, 56], sizes = [17, 8], strides = [1, 1]} : vector<17x96xf32> to vector<17x8xf32>
    %115 = vector.extract_strided_slice %61 {offsets = [0, 88], sizes = [17, 8], strides = [1, 1]} : vector<17x96xf32> to vector<17x8xf32>
    %cst_70 = arith.constant dense<0.000000e+00> : vector<17x17xf32>
    %116 = tpu.matmul %113, %114, %cst_70 {dimension_numbers = #tpu.dot_dimension_numbers<[1], [1], [0], [0], [0, 0, 1, 0], [], []>} : vector<17x8xf32>, vector<17x8xf32>, vector<17x17xf32> -> vector<17x17xf32>
    %cst_71 = arith.constant 0.353553385 : f32
    %117 = vector.broadcast %cst_71 : f32 to vector<17x17xf32>
    %118 = arith.mulf %116, %117 : vector<17x17xf32>
    %cst_72 = arith.constant dense<0xFF800000> : vector<17xf32>
    %119 = vector.multi_reduction <maximumf>, %118, %cst_72 [1] : vector<17x17xf32> to vector<17xf32>
    %120 = vector.shape_cast %119 : vector<17xf32> to vector<17x1xf32>
    %121 = vector.broadcast %120 : vector<17x1xf32> to vector<17x17xf32>
    %122 = arith.subf %118, %121 : vector<17x17xf32>
    %123 = math.exp %122 : vector<17x17xf32>
    %cst_73 = arith.constant dense<0.000000e+00> : vector<17xf32>
    %124 = vector.multi_reduction <add>, %123, %cst_73 [1] : vector<17x17xf32> to vector<17xf32>
    %125 = vector.shape_cast %124 : vector<17xf32> to vector<17x1xf32>
    %126 = tpu.reciprocal %125 {approx = true} : vector<17x1xf32> -> vector<17x1xf32>
    %127 = vector.broadcast %126 : vector<17x1xf32> to vector<17x17xf32>
    %128 = arith.mulf %123, %127 : vector<17x17xf32>
    %cst_74 = arith.constant dense<0.000000e+00> : vector<17x8xf32>
    %129 = tpu.matmul %128, %115, %cst_74 {dimension_numbers = #tpu.dot_dimension_numbers<[1], [0], [0], [1], [0, 0, 1, 1], [], []>} : vector<17x17xf32>, vector<17x8xf32>, vector<17x8xf32> -> vector<17x8xf32>
    %130 = tpu.concatenate %78, %95, %112, %129 in 1 : vector<17x8xf32>, vector<17x8xf32>, vector<17x8xf32>, vector<17x8xf32> -> vector<17x32xf32>
    %cst_75 = arith.constant dense<0.000000e+00> : vector<17x32xf32>
    %131 = tpu.matmul %130, %22, %cst_75 {dimension_numbers = #tpu.dot_dimension_numbers<[1], [0], [0], [1], [0, 0, 1, 1], [], []>} : vector<17x32xf32>, vector<32x32xf32>, vector<17x32xf32> -> vector<17x32xf32>
    %132 = arith.addf %12, %131 : vector<17x32xf32>
    %133 = vector.broadcast %24 : vector<1x32xf32> to vector<17x32xf32>
    %134 = arith.addf %132, %133 : vector<17x32xf32>
    %cst_76 = arith.constant dense<0.000000e+00> : vector<17xf32>
    %135 = vector.multi_reduction <add>, %134, %cst_76 [1] : vector<17x32xf32> to vector<17xf32>
    %136 = vector.shape_cast %135 : vector<17xf32> to vector<17x1xf32>
    %cst_77 = arith.constant 3.200000e+01 : f32
    %137 = vector.broadcast %cst_77 : f32 to vector<17x1xf32>
    %138 = arith.divf %136, %137 : vector<17x1xf32>
    %139 = vector.broadcast %138 : vector<17x1xf32> to vector<17x32xf32>
    %140 = arith.subf %134, %139 : vector<17x32xf32>
    %141 = arith.mulf %140, %140 : vector<17x32xf32>
    %cst_78 = arith.constant dense<0.000000e+00> : vector<17xf32>
    %142 = vector.multi_reduction <add>, %141, %cst_78 [1] : vector<17x32xf32> to vector<17xf32>
    %143 = vector.shape_cast %142 : vector<17xf32> to vector<17x1xf32>
    %cst_79 = arith.constant 3.200000e+01 : f32
    %144 = vector.broadcast %cst_79 : f32 to vector<17x1xf32>
    %145 = arith.divf %143, %144 : vector<17x1xf32>
    %146 = vector.broadcast %138 : vector<17x1xf32> to vector<17x32xf32>
    %147 = arith.subf %134, %146 : vector<17x32xf32>
    %cst_80 = arith.constant 9.99999974E-6 : f32
    %148 = vector.broadcast %cst_80 : f32 to vector<17x1xf32>
    %149 = arith.addf %145, %148 : vector<17x1xf32>
    %150 = math.rsqrt %149 : vector<17x1xf32>
    %151 = vector.broadcast %150 : vector<17x1xf32> to vector<17x32xf32>
    %152 = arith.mulf %147, %151 : vector<17x32xf32>
    %153 = vector.broadcast %26 : vector<1x32xf32> to vector<17x32xf32>
    %154 = arith.mulf %152, %153 : vector<17x32xf32>
    %155 = vector.broadcast %28 : vector<1x32xf32> to vector<17x32xf32>
    %156 = arith.addf %154, %155 : vector<17x32xf32>
    %cst_81 = arith.constant dense<0.000000e+00> : vector<17x128xf32>
    %157 = tpu.matmul %156, %30, %cst_81 {dimension_numbers = #tpu.dot_dimension_numbers<[1], [0], [0], [1], [0, 0, 1, 1], [], []>} : vector<17x32xf32>, vector<32x128xf32>, vector<17x128xf32> -> vector<17x128xf32>
    %158 = vector.broadcast %32 : vector<1x128xf32> to vector<17x128xf32>
    %159 = arith.addf %157, %158 : vector<17x128xf32>
    %cst_82 = arith.constant 1.702000e+00 : f32
    %160 = vector.broadcast %cst_82 : f32 to vector<17x128xf32>
    %161 = arith.mulf %160, %159 : vector<17x128xf32>
    %162 = arith.negf %161 : vector<17x128xf32>
    %163 = math.exp %162 : vector<17x128xf32>
    %cst_83 = arith.constant 1.000000e+00 : f32
    %164 = vector.broadcast %cst_83 : f32 to vector<17x128xf32>
    %165 = arith.addf %164, %163 : vector<17x128xf32>
    %166 = arith.divf %164, %165 : vector<17x128xf32>
    %167 = arith.mulf %159, %166 : vector<17x128xf32>
    %cst_84 = arith.constant dense<0.000000e+00> : vector<17x32xf32>
    %168 = tpu.matmul %167, %34, %cst_84 {dimension_numbers = #tpu.dot_dimension_numbers<[1], [0], [0], [1], [0, 0, 1, 1], [], []>} : vector<17x128xf32>, vector<128x32xf32>, vector<17x32xf32> -> vector<17x32xf32>
    %169 = arith.addf %134, %168 : vector<17x32xf32>
    %170 = vector.broadcast %36 : vector<1x32xf32> to vector<17x32xf32>
    %171 = arith.addf %169, %170 : vector<17x32xf32>
    %c1 = arith.constant 1 : index
    %c0_85 = arith.constant 0 : index
    %c0_86 = arith.constant 0 : index
    %172 = vector.load %arg7[%c1, %c0_85, %c0_86] : memref<2x1x32xf32, #tpu.memory_space<vmem>>, vector<1x1x32xf32>
    %173 = vector.shape_cast %172 : vector<1x1x32xf32> to vector<1x32xf32>
    %c1_87 = arith.constant 1 : index
    %c0_88 = arith.constant 0 : index
    %c0_89 = arith.constant 0 : index
    %174 = vector.load %arg8[%c1_87, %c0_88, %c0_89] : memref<2x1x32xf32, #tpu.memory_space<vmem>>, vector<1x1x32xf32>
    %175 = vector.shape_cast %174 : vector<1x1x32xf32> to vector<1x32xf32>
    %c1_90 = arith.constant 1 : index
    %c0_91 = arith.constant 0 : index
    %c0_92 = arith.constant 0 : index
    %176 = vector.load %arg9[%c1_90, %c0_91, %c0_92] : memref<2x32x96xf32, #tpu.memory_space<vmem>>, vector<1x32x96xf32>
    %177 = vector.shape_cast %176 : vector<1x32x96xf32> to vector<32x96xf32>
    %c1_93 = arith.constant 1 : index
    %c0_94 = arith.constant 0 : index
    %c0_95 = arith.constant 0 : index
    %178 = vector.load %arg10[%c1_93, %c0_94, %c0_95] : memref<2x1x96xf32, #tpu.memory_space<vmem>>, vector<1x1x96xf32>
    %179 = vector.shape_cast %178 : vector<1x1x96xf32> to vector<1x96xf32>
    %c1_96 = arith.constant 1 : index
    %c0_97 = arith.constant 0 : index
    %c0_98 = arith.constant 0 : index
    %180 = vector.load %arg11[%c1_96, %c0_97, %c0_98] : memref<2x32x32xf32, #tpu.memory_space<vmem>>, vector<1x32x32xf32>
    %181 = vector.shape_cast %180 : vector<1x32x32xf32> to vector<32x32xf32>
    %c1_99 = arith.constant 1 : index
    %c0_100 = arith.constant 0 : index
    %c0_101 = arith.constant 0 : index
    %182 = vector.load %arg12[%c1_99, %c0_100, %c0_101] : memref<2x1x32xf32, #tpu.memory_space<vmem>>, vector<1x1x32xf32>
    %183 = vector.shape_cast %182 : vector<1x1x32xf32> to vector<1x32xf32>
    %c1_102 = arith.constant 1 : index
    %c0_103 = arith.constant 0 : index
    %c0_104 = arith.constant 0 : index
    %184 = vector.load %arg13[%c1_102, %c0_103, %c0_104] : memref<2x1x32xf32, #tpu.memory_space<vmem>>, vector<1x1x32xf32>
    %185 = vector.shape_cast %184 : vector<1x1x32xf32> to vector<1x32xf32>
    %c1_105 = arith.constant 1 : index
    %c0_106 = arith.constant 0 : index
    %c0_107 = arith.constant 0 : index
    %186 = vector.load %arg14[%c1_105, %c0_106, %c0_107] : memref<2x1x32xf32, #tpu.memory_space<vmem>>, vector<1x1x32xf32>
    %187 = vector.shape_cast %186 : vector<1x1x32xf32> to vector<1x32xf32>
    %c1_108 = arith.constant 1 : index
    %c0_109 = arith.constant 0 : index
    %c0_110 = arith.constant 0 : index
    %188 = vector.load %arg15[%c1_108, %c0_109, %c0_110] : memref<2x32x128xf32, #tpu.memory_space<vmem>>, vector<1x32x128xf32>
    %189 = vector.shape_cast %188 : vector<1x32x128xf32> to vector<32x128xf32>
    %c1_111 = arith.constant 1 : index
    %c0_112 = arith.constant 0 : index
    %c0_113 = arith.constant 0 : index
    %190 = vector.load %arg16[%c1_111, %c0_112, %c0_113] : memref<2x1x128xf32, #tpu.memory_space<vmem>>, vector<1x1x128xf32>
    %191 = vector.shape_cast %190 : vector<1x1x128xf32> to vector<1x128xf32>
    %c1_114 = arith.constant 1 : index
    %c0_115 = arith.constant 0 : index
    %c0_116 = arith.constant 0 : index
    %192 = vector.load %arg17[%c1_114, %c0_115, %c0_116] : memref<2x128x32xf32, #tpu.memory_space<vmem>>, vector<1x128x32xf32>
    %193 = vector.shape_cast %192 : vector<1x128x32xf32> to vector<128x32xf32>
    %c1_117 = arith.constant 1 : index
    %c0_118 = arith.constant 0 : index
    %c0_119 = arith.constant 0 : index
    %194 = vector.load %arg18[%c1_117, %c0_118, %c0_119] : memref<2x1x32xf32, #tpu.memory_space<vmem>>, vector<1x1x32xf32>
    %195 = vector.shape_cast %194 : vector<1x1x32xf32> to vector<1x32xf32>
    %cst_120 = arith.constant dense<0.000000e+00> : vector<17xf32>
    %196 = vector.multi_reduction <add>, %171, %cst_120 [1] : vector<17x32xf32> to vector<17xf32>
    %197 = vector.shape_cast %196 : vector<17xf32> to vector<17x1xf32>
    %cst_121 = arith.constant 3.200000e+01 : f32
    %198 = vector.broadcast %cst_121 : f32 to vector<17x1xf32>
    %199 = arith.divf %197, %198 : vector<17x1xf32>
    %200 = vector.broadcast %199 : vector<17x1xf32> to vector<17x32xf32>
    %201 = arith.subf %171, %200 : vector<17x32xf32>
    %202 = arith.mulf %201, %201 : vector<17x32xf32>
    %cst_122 = arith.constant dense<0.000000e+00> : vector<17xf32>
    %203 = vector.multi_reduction <add>, %202, %cst_122 [1] : vector<17x32xf32> to vector<17xf32>
    %204 = vector.shape_cast %203 : vector<17xf32> to vector<17x1xf32>
    %cst_123 = arith.constant 3.200000e+01 : f32
    %205 = vector.broadcast %cst_123 : f32 to vector<17x1xf32>
    %206 = arith.divf %204, %205 : vector<17x1xf32>
    %207 = vector.broadcast %199 : vector<17x1xf32> to vector<17x32xf32>
    %208 = arith.subf %171, %207 : vector<17x32xf32>
    %cst_124 = arith.constant 9.99999974E-6 : f32
    %209 = vector.broadcast %cst_124 : f32 to vector<17x1xf32>
    %210 = arith.addf %206, %209 : vector<17x1xf32>
    %211 = math.rsqrt %210 : vector<17x1xf32>
    %212 = vector.broadcast %211 : vector<17x1xf32> to vector<17x32xf32>
    %213 = arith.mulf %208, %212 : vector<17x32xf32>
    %214 = vector.broadcast %173 : vector<1x32xf32> to vector<17x32xf32>
    %215 = arith.mulf %213, %214 : vector<17x32xf32>
    %216 = vector.broadcast %175 : vector<1x32xf32> to vector<17x32xf32>
    %217 = arith.addf %215, %216 : vector<17x32xf32>
    %cst_125 = arith.constant dense<0.000000e+00> : vector<17x96xf32>
    %218 = tpu.matmul %217, %177, %cst_125 {dimension_numbers = #tpu.dot_dimension_numbers<[1], [0], [0], [1], [0, 0, 1, 1], [], []>} : vector<17x32xf32>, vector<32x96xf32>, vector<17x96xf32> -> vector<17x96xf32>
    %219 = vector.broadcast %179 : vector<1x96xf32> to vector<17x96xf32>
    %220 = arith.addf %218, %219 : vector<17x96xf32>
    %221 = vector.extract_strided_slice %220 {offsets = [0, 0], sizes = [17, 8], strides = [1, 1]} : vector<17x96xf32> to vector<17x8xf32>
    %222 = vector.extract_strided_slice %220 {offsets = [0, 32], sizes = [17, 8], strides = [1, 1]} : vector<17x96xf32> to vector<17x8xf32>
    %223 = vector.extract_strided_slice %220 {offsets = [0, 64], sizes = [17, 8], strides = [1, 1]} : vector<17x96xf32> to vector<17x8xf32>
    %cst_126 = arith.constant dense<0.000000e+00> : vector<17x17xf32>
    %224 = tpu.matmul %221, %222, %cst_126 {dimension_numbers = #tpu.dot_dimension_numbers<[1], [1], [0], [0], [0, 0, 1, 0], [], []>} : vector<17x8xf32>, vector<17x8xf32>, vector<17x17xf32> -> vector<17x17xf32>
    %cst_127 = arith.constant 0.353553385 : f32
    %225 = vector.broadcast %cst_127 : f32 to vector<17x17xf32>
    %226 = arith.mulf %224, %225 : vector<17x17xf32>
    %cst_128 = arith.constant dense<0xFF800000> : vector<17xf32>
    %227 = vector.multi_reduction <maximumf>, %226, %cst_128 [1] : vector<17x17xf32> to vector<17xf32>
    %228 = vector.shape_cast %227 : vector<17xf32> to vector<17x1xf32>
    %229 = vector.broadcast %228 : vector<17x1xf32> to vector<17x17xf32>
    %230 = arith.subf %226, %229 : vector<17x17xf32>
    %231 = math.exp %230 : vector<17x17xf32>
    %cst_129 = arith.constant dense<0.000000e+00> : vector<17xf32>
    %232 = vector.multi_reduction <add>, %231, %cst_129 [1] : vector<17x17xf32> to vector<17xf32>
    %233 = vector.shape_cast %232 : vector<17xf32> to vector<17x1xf32>
    %234 = tpu.reciprocal %233 {approx = true} : vector<17x1xf32> -> vector<17x1xf32>
    %235 = vector.broadcast %234 : vector<17x1xf32> to vector<17x17xf32>
    %236 = arith.mulf %231, %235 : vector<17x17xf32>
    %cst_130 = arith.constant dense<0.000000e+00> : vector<17x8xf32>
    %237 = tpu.matmul %236, %223, %cst_130 {dimension_numbers = #tpu.dot_dimension_numbers<[1], [0], [0], [1], [0, 0, 1, 1], [], []>} : vector<17x17xf32>, vector<17x8xf32>, vector<17x8xf32> -> vector<17x8xf32>
    %238 = vector.extract_strided_slice %220 {offsets = [0, 8], sizes = [17, 8], strides = [1, 1]} : vector<17x96xf32> to vector<17x8xf32>
    %239 = vector.extract_strided_slice %220 {offsets = [0, 40], sizes = [17, 8], strides = [1, 1]} : vector<17x96xf32> to vector<17x8xf32>
    %240 = vector.extract_strided_slice %220 {offsets = [0, 72], sizes = [17, 8], strides = [1, 1]} : vector<17x96xf32> to vector<17x8xf32>
    %cst_131 = arith.constant dense<0.000000e+00> : vector<17x17xf32>
    %241 = tpu.matmul %238, %239, %cst_131 {dimension_numbers = #tpu.dot_dimension_numbers<[1], [1], [0], [0], [0, 0, 1, 0], [], []>} : vector<17x8xf32>, vector<17x8xf32>, vector<17x17xf32> -> vector<17x17xf32>
    %cst_132 = arith.constant 0.353553385 : f32
    %242 = vector.broadcast %cst_132 : f32 to vector<17x17xf32>
    %243 = arith.mulf %241, %242 : vector<17x17xf32>
    %cst_133 = arith.constant dense<0xFF800000> : vector<17xf32>
    %244 = vector.multi_reduction <maximumf>, %243, %cst_133 [1] : vector<17x17xf32> to vector<17xf32>
    %245 = vector.shape_cast %244 : vector<17xf32> to vector<17x1xf32>
    %246 = vector.broadcast %245 : vector<17x1xf32> to vector<17x17xf32>
    %247 = arith.subf %243, %246 : vector<17x17xf32>
    %248 = math.exp %247 : vector<17x17xf32>
    %cst_134 = arith.constant dense<0.000000e+00> : vector<17xf32>
    %249 = vector.multi_reduction <add>, %248, %cst_134 [1] : vector<17x17xf32> to vector<17xf32>
    %250 = vector.shape_cast %249 : vector<17xf32> to vector<17x1xf32>
    %251 = tpu.reciprocal %250 {approx = true} : vector<17x1xf32> -> vector<17x1xf32>
    %252 = vector.broadcast %251 : vector<17x1xf32> to vector<17x17xf32>
    %253 = arith.mulf %248, %252 : vector<17x17xf32>
    %cst_135 = arith.constant dense<0.000000e+00> : vector<17x8xf32>
    %254 = tpu.matmul %253, %240, %cst_135 {dimension_numbers = #tpu.dot_dimension_numbers<[1], [0], [0], [1], [0, 0, 1, 1], [], []>} : vector<17x17xf32>, vector<17x8xf32>, vector<17x8xf32> -> vector<17x8xf32>
    %255 = vector.extract_strided_slice %220 {offsets = [0, 16], sizes = [17, 8], strides = [1, 1]} : vector<17x96xf32> to vector<17x8xf32>
    %256 = vector.extract_strided_slice %220 {offsets = [0, 48], sizes = [17, 8], strides = [1, 1]} : vector<17x96xf32> to vector<17x8xf32>
    %257 = vector.extract_strided_slice %220 {offsets = [0, 80], sizes = [17, 8], strides = [1, 1]} : vector<17x96xf32> to vector<17x8xf32>
    %cst_136 = arith.constant dense<0.000000e+00> : vector<17x17xf32>
    %258 = tpu.matmul %255, %256, %cst_136 {dimension_numbers = #tpu.dot_dimension_numbers<[1], [1], [0], [0], [0, 0, 1, 0], [], []>} : vector<17x8xf32>, vector<17x8xf32>, vector<17x17xf32> -> vector<17x17xf32>
    %cst_137 = arith.constant 0.353553385 : f32
    %259 = vector.broadcast %cst_137 : f32 to vector<17x17xf32>
    %260 = arith.mulf %258, %259 : vector<17x17xf32>
    %cst_138 = arith.constant dense<0xFF800000> : vector<17xf32>
    %261 = vector.multi_reduction <maximumf>, %260, %cst_138 [1] : vector<17x17xf32> to vector<17xf32>
    %262 = vector.shape_cast %261 : vector<17xf32> to vector<17x1xf32>
    %263 = vector.broadcast %262 : vector<17x1xf32> to vector<17x17xf32>
    %264 = arith.subf %260, %263 : vector<17x17xf32>
    %265 = math.exp %264 : vector<17x17xf32>
    %cst_139 = arith.constant dense<0.000000e+00> : vector<17xf32>
    %266 = vector.multi_reduction <add>, %265, %cst_139 [1] : vector<17x17xf32> to vector<17xf32>
    %267 = vector.shape_cast %266 : vector<17xf32> to vector<17x1xf32>
    %268 = tpu.reciprocal %267 {approx = true} : vector<17x1xf32> -> vector<17x1xf32>
    %269 = vector.broadcast %268 : vector<17x1xf32> to vector<17x17xf32>
    %270 = arith.mulf %265, %269 : vector<17x17xf32>
    %cst_140 = arith.constant dense<0.000000e+00> : vector<17x8xf32>
    %271 = tpu.matmul %270, %257, %cst_140 {dimension_numbers = #tpu.dot_dimension_numbers<[1], [0], [0], [1], [0, 0, 1, 1], [], []>} : vector<17x17xf32>, vector<17x8xf32>, vector<17x8xf32> -> vector<17x8xf32>
    %272 = vector.extract_strided_slice %220 {offsets = [0, 24], sizes = [17, 8], strides = [1, 1]} : vector<17x96xf32> to vector<17x8xf32>
    %273 = vector.extract_strided_slice %220 {offsets = [0, 56], sizes = [17, 8], strides = [1, 1]} : vector<17x96xf32> to vector<17x8xf32>
    %274 = vector.extract_strided_slice %220 {offsets = [0, 88], sizes = [17, 8], strides = [1, 1]} : vector<17x96xf32> to vector<17x8xf32>
    %cst_141 = arith.constant dense<0.000000e+00> : vector<17x17xf32>
    %275 = tpu.matmul %272, %273, %cst_141 {dimension_numbers = #tpu.dot_dimension_numbers<[1], [1], [0], [0], [0, 0, 1, 0], [], []>} : vector<17x8xf32>, vector<17x8xf32>, vector<17x17xf32> -> vector<17x17xf32>
    %cst_142 = arith.constant 0.353553385 : f32
    %276 = vector.broadcast %cst_142 : f32 to vector<17x17xf32>
    %277 = arith.mulf %275, %276 : vector<17x17xf32>
    %cst_143 = arith.constant dense<0xFF800000> : vector<17xf32>
    %278 = vector.multi_reduction <maximumf>, %277, %cst_143 [1] : vector<17x17xf32> to vector<17xf32>
    %279 = vector.shape_cast %278 : vector<17xf32> to vector<17x1xf32>
    %280 = vector.broadcast %279 : vector<17x1xf32> to vector<17x17xf32>
    %281 = arith.subf %277, %280 : vector<17x17xf32>
    %282 = math.exp %281 : vector<17x17xf32>
    %cst_144 = arith.constant dense<0.000000e+00> : vector<17xf32>
    %283 = vector.multi_reduction <add>, %282, %cst_144 [1] : vector<17x17xf32> to vector<17xf32>
    %284 = vector.shape_cast %283 : vector<17xf32> to vector<17x1xf32>
    %285 = tpu.reciprocal %284 {approx = true} : vector<17x1xf32> -> vector<17x1xf32>
    %286 = vector.broadcast %285 : vector<17x1xf32> to vector<17x17xf32>
    %287 = arith.mulf %282, %286 : vector<17x17xf32>
    %cst_145 = arith.constant dense<0.000000e+00> : vector<17x8xf32>
    %288 = tpu.matmul %287, %274, %cst_145 {dimension_numbers = #tpu.dot_dimension_numbers<[1], [0], [0], [1], [0, 0, 1, 1], [], []>} : vector<17x17xf32>, vector<17x8xf32>, vector<17x8xf32> -> vector<17x8xf32>
    %289 = tpu.concatenate %237, %254, %271, %288 in 1 : vector<17x8xf32>, vector<17x8xf32>, vector<17x8xf32>, vector<17x8xf32> -> vector<17x32xf32>
    %cst_146 = arith.constant dense<0.000000e+00> : vector<17x32xf32>
    %290 = tpu.matmul %289, %181, %cst_146 {dimension_numbers = #tpu.dot_dimension_numbers<[1], [0], [0], [1], [0, 0, 1, 1], [], []>} : vector<17x32xf32>, vector<32x32xf32>, vector<17x32xf32> -> vector<17x32xf32>
    %291 = arith.addf %171, %290 : vector<17x32xf32>
    %292 = vector.broadcast %183 : vector<1x32xf32> to vector<17x32xf32>
    %293 = arith.addf %291, %292 : vector<17x32xf32>
    %cst_147 = arith.constant dense<0.000000e+00> : vector<17xf32>
    %294 = vector.multi_reduction <add>, %293, %cst_147 [1] : vector<17x32xf32> to vector<17xf32>
    %295 = vector.shape_cast %294 : vector<17xf32> to vector<17x1xf32>
    %cst_148 = arith.constant 3.200000e+01 : f32
    %296 = vector.broadcast %cst_148 : f32 to vector<17x1xf32>
    %297 = arith.divf %295, %296 : vector<17x1xf32>
    %298 = vector.broadcast %297 : vector<17x1xf32> to vector<17x32xf32>
    %299 = arith.subf %293, %298 : vector<17x32xf32>
    %300 = arith.mulf %299, %299 : vector<17x32xf32>
    %cst_149 = arith.constant dense<0.000000e+00> : vector<17xf32>
    %301 = vector.multi_reduction <add>, %300, %cst_149 [1] : vector<17x32xf32> to vector<17xf32>
    %302 = vector.shape_cast %301 : vector<17xf32> to vector<17x1xf32>
    %cst_150 = arith.constant 3.200000e+01 : f32
    %303 = vector.broadcast %cst_150 : f32 to vector<17x1xf32>
    %304 = arith.divf %302, %303 : vector<17x1xf32>
    %305 = vector.broadcast %297 : vector<17x1xf32> to vector<17x32xf32>
    %306 = arith.subf %293, %305 : vector<17x32xf32>
    %cst_151 = arith.constant 9.99999974E-6 : f32
    %307 = vector.broadcast %cst_151 : f32 to vector<17x1xf32>
    %308 = arith.addf %304, %307 : vector<17x1xf32>
    %309 = math.rsqrt %308 : vector<17x1xf32>
    %310 = vector.broadcast %309 : vector<17x1xf32> to vector<17x32xf32>
    %311 = arith.mulf %306, %310 : vector<17x32xf32>
    %312 = vector.broadcast %185 : vector<1x32xf32> to vector<17x32xf32>
    %313 = arith.mulf %311, %312 : vector<17x32xf32>
    %314 = vector.broadcast %187 : vector<1x32xf32> to vector<17x32xf32>
    %315 = arith.addf %313, %314 : vector<17x32xf32>
    %cst_152 = arith.constant dense<0.000000e+00> : vector<17x128xf32>
    %316 = tpu.matmul %315, %189, %cst_152 {dimension_numbers = #tpu.dot_dimension_numbers<[1], [0], [0], [1], [0, 0, 1, 1], [], []>} : vector<17x32xf32>, vector<32x128xf32>, vector<17x128xf32> -> vector<17x128xf32>
    %317 = vector.broadcast %191 : vector<1x128xf32> to vector<17x128xf32>
    %318 = arith.addf %316, %317 : vector<17x128xf32>
    %cst_153 = arith.constant 1.702000e+00 : f32
    %319 = vector.broadcast %cst_153 : f32 to vector<17x128xf32>
    %320 = arith.mulf %319, %318 : vector<17x128xf32>
    %321 = arith.negf %320 : vector<17x128xf32>
    %322 = math.exp %321 : vector<17x128xf32>
    %cst_154 = arith.constant 1.000000e+00 : f32
    %323 = vector.broadcast %cst_154 : f32 to vector<17x128xf32>
    %324 = arith.addf %323, %322 : vector<17x128xf32>
    %325 = arith.divf %323, %324 : vector<17x128xf32>
    %326 = arith.mulf %318, %325 : vector<17x128xf32>
    %cst_155 = arith.constant dense<0.000000e+00> : vector<17x32xf32>
    %327 = tpu.matmul %326, %193, %cst_155 {dimension_numbers = #tpu.dot_dimension_numbers<[1], [0], [0], [1], [0, 0, 1, 1], [], []>} : vector<17x128xf32>, vector<128x32xf32>, vector<17x32xf32> -> vector<17x32xf32>
    %328 = arith.addf %293, %327 : vector<17x32xf32>
    %329 = vector.broadcast %195 : vector<1x32xf32> to vector<17x32xf32>
    %330 = arith.addf %328, %329 : vector<17x32xf32>
    %c0_156 = arith.constant 0 : index
    %c0_157 = arith.constant 0 : index
    %331 = vector.load %arg19[%c0_156, %c0_157] : memref<1x32xf32, #tpu.memory_space<vmem>>, vector<1x32xf32>
    %c0_158 = arith.constant 0 : index
    %c0_159 = arith.constant 0 : index
    %332 = vector.load %arg20[%c0_158, %c0_159] : memref<1x32xf32, #tpu.memory_space<vmem>>, vector<1x32xf32>
    %cst_160 = arith.constant dense<0.000000e+00> : vector<17xf32>
    %333 = vector.multi_reduction <add>, %330, %cst_160 [1] : vector<17x32xf32> to vector<17xf32>
    %334 = vector.shape_cast %333 : vector<17xf32> to vector<17x1xf32>
    %cst_161 = arith.constant 3.200000e+01 : f32
    %335 = vector.broadcast %cst_161 : f32 to vector<17x1xf32>
    %336 = arith.divf %334, %335 : vector<17x1xf32>
    %337 = vector.broadcast %336 : vector<17x1xf32> to vector<17x32xf32>
    %338 = arith.subf %330, %337 : vector<17x32xf32>
    %339 = arith.mulf %338, %338 : vector<17x32xf32>
    %cst_162 = arith.constant dense<0.000000e+00> : vector<17xf32>
    %340 = vector.multi_reduction <add>, %339, %cst_162 [1] : vector<17x32xf32> to vector<17xf32>
    %341 = vector.shape_cast %340 : vector<17xf32> to vector<17x1xf32>
    %cst_163 = arith.constant 3.200000e+01 : f32
    %342 = vector.broadcast %cst_163 : f32 to vector<17x1xf32>
    %343 = arith.divf %341, %342 : vector<17x1xf32>
    %344 = vector.broadcast %336 : vector<17x1xf32> to vector<17x32xf32>
    %345 = arith.subf %330, %344 : vector<17x32xf32>
    %cst_164 = arith.constant 9.99999974E-6 : f32
    %346 = vector.broadcast %cst_164 : f32 to vector<17x1xf32>
    %347 = arith.addf %343, %346 : vector<17x1xf32>
    %348 = math.rsqrt %347 : vector<17x1xf32>
    %349 = vector.broadcast %348 : vector<17x1xf32> to vector<17x32xf32>
    %350 = arith.mulf %345, %349 : vector<17x32xf32>
    %351 = vector.broadcast %331 : vector<1x32xf32> to vector<17x32xf32>
    %352 = arith.mulf %350, %351 : vector<17x32xf32>
    %353 = vector.broadcast %332 : vector<1x32xf32> to vector<17x32xf32>
    %354 = arith.addf %352, %353 : vector<17x32xf32>
    %355 = vector.extract_strided_slice %354 {offsets = [0, 0], sizes = [16, 32], strides = [1, 1]} : vector<17x32xf32> to vector<16x32xf32>
    %356 = vector.extract_strided_slice %354 {offsets = [16, 0], sizes = [1, 32], strides = [1, 1]} : vector<17x32xf32> to vector<1x32xf32>
    %c0_165 = arith.constant 0 : index
    %c0_166 = arith.constant 0 : index
    %357 = vector.load %arg21[%c0_165, %c0_166] : memref<256x16xf32, #tpu.memory_space<vmem>>, vector<256x16xf32>
    %cst_167 = arith.constant dense<0.000000e+00> : vector<256x32xf32>
    %358 = tpu.matmul %357, %355, %cst_167 {dimension_numbers = #tpu.dot_dimension_numbers<[1], [0], [0], [1], [0, 0, 1, 1], [], []>} : vector<256x16xf32>, vector<16x32xf32>, vector<256x32xf32> -> vector<256x32xf32>
    %359 = arith.mulf %358, %358 : vector<256x32xf32>
    %cst_168 = arith.constant dense<0.000000e+00> : vector<256xf32>
    %360 = vector.multi_reduction <add>, %359, %cst_168 [1] : vector<256x32xf32> to vector<256xf32>
    %361 = vector.shape_cast %360 : vector<256xf32> to vector<256x1xf32>
    %cst_169 = arith.constant 9.99999996E-13 : f32
    %362 = vector.broadcast %cst_169 : f32 to vector<256x1xf32>
    %363 = arith.addf %361, %362 : vector<256x1xf32>
    %364 = math.rsqrt %363 : vector<256x1xf32>
    %365 = vector.broadcast %364 : vector<256x1xf32> to vector<256x32xf32>
    %366 = arith.mulf %358, %365 : vector<256x32xf32>
    %367 = arith.mulf %356, %356 : vector<1x32xf32>
    %cst_170 = arith.constant dense<0.000000e+00> : vector<1xf32>
    %368 = vector.multi_reduction <add>, %367, %cst_170 [1] : vector<1x32xf32> to vector<1xf32>
    %369 = vector.shape_cast %368 : vector<1xf32> to vector<1x1xf32>
    %cst_171 = arith.constant 9.99999996E-13 : f32
    %370 = vector.broadcast %cst_171 : f32 to vector<1x1xf32>
    %371 = arith.addf %369, %370 : vector<1x1xf32>
    %372 = math.rsqrt %371 : vector<1x1xf32>
    %cst_172 = arith.constant 14.2857141 : f32
    %373 = vector.broadcast %cst_172 : f32 to vector<1x1xf32>
    %374 = arith.mulf %372, %373 : vector<1x1xf32>
    %375 = vector.broadcast %374 : vector<1x1xf32> to vector<1x32xf32>
    %376 = arith.mulf %356, %375 : vector<1x32xf32>
    %cst_173 = arith.constant dense<0.000000e+00> : vector<1x256xf32>
    %377 = tpu.matmul %376, %366, %cst_173 {dimension_numbers = #tpu.dot_dimension_numbers<[1], [1], [0], [0], [0, 0, 1, 0], [], []>} : vector<1x32xf32>, vector<256x32xf32>, vector<1x256xf32> -> vector<1x256xf32>
    %c0_174 = arith.constant 0 : index
    %c0_175 = arith.constant 0 : index
    %c0_176 = arith.constant 0 : index
    %378 = vector.load %arg22[%c0_174, %c0_175, %c0_176] : memref<1x1x256xf32, #tpu.memory_space<vmem>>, vector<1x1x256xf32>
    %379 = vector.shape_cast %378 : vector<1x1x256xf32> to vector<1x256xf32>
    %380 = vector.shape_cast %377 : vector<1x256xf32> to vector<1x1x256xf32>
    tpu.vector_store %arg22[%c0_174, %c0_175, %c0_176], %380 {strides = array<i32>} : memref<1x1x256xf32, #tpu.memory_space<vmem>>, vector<1x1x256xf32>,
    return
  }
  func.func @transform_0(%arg0: i32) -> (i32, i32, i32) {
    %c0_i32 = arith.constant 0 : i32
    %c0_i32_0 = arith.constant 0 : i32
    %c0_i32_1 = arith.constant 0 : i32
    return %arg0, %c0_i32, %c0_i32_0 : i32, i32, i32
  }
  func.func @transform_1(%arg0: i32) -> (i32, i32) {
    %c0_i32 = arith.constant 0 : i32
    %c0_i32_0 = arith.constant 0 : i32
    %c0_i32_1 = arith.constant 0 : i32
    return %c0_i32, %c0_i32_0 : i32, i32
  }
  func.func @transform_2(%arg0: i32) -> (i32, i32) {
    %c0_i32 = arith.constant 0 : i32
    %c0_i32_0 = arith.constant 0 : i32
    %c0_i32_1 = arith.constant 0 : i32
    return %c0_i32, %c0_i32_0 : i32, i32
  }
  func.func @transform_3(%arg0: i32) -> (i32, i32) {
    %c0_i32 = arith.constant 0 : i32
    %c0_i32_0 = arith.constant 0 : i32
    %c0_i32_1 = arith.constant 0 : i32
    return %c0_i32, %c0_i32_0 : i32, i32
  }
  func.func @transform_4(%arg0: i32) -> (i32, i32) {
    %c0_i32 = arith.constant 0 : i32
    %c0_i32_0 = arith.constant 0 : i32
    %c0_i32_1 = arith.constant 0 : i32
    return %c0_i32, %c0_i32_0 : i32, i32
  }
  func.func @transform_5(%arg0: i32) -> (i32, i32) {
    %c0_i32 = arith.constant 0 : i32
    %c0_i32_0 = arith.constant 0 : i32
    %c0_i32_1 = arith.constant 0 : i32
    return %c0_i32, %c0_i32_0 : i32, i32
  }
  func.func @transform_6(%arg0: i32) -> (i32, i32, i32) {
    %c0_i32 = arith.constant 0 : i32
    %c0_i32_0 = arith.constant 0 : i32
    %c0_i32_1 = arith.constant 0 : i32
    %c0_i32_2 = arith.constant 0 : i32
    return %c0_i32, %c0_i32_0, %c0_i32_1 : i32, i32, i32
  }
  func.func @transform_7(%arg0: i32) -> (i32, i32, i32) {
    %c0_i32 = arith.constant 0 : i32
    %c0_i32_0 = arith.constant 0 : i32
    %c0_i32_1 = arith.constant 0 : i32
    %c0_i32_2 = arith.constant 0 : i32
    return %c0_i32, %c0_i32_0, %c0_i32_1 : i32, i32, i32
  }
  func.func @transform_8(%arg0: i32) -> (i32, i32, i32) {
    %c0_i32 = arith.constant 0 : i32
    %c0_i32_0 = arith.constant 0 : i32
    %c0_i32_1 = arith.constant 0 : i32
    %c0_i32_2 = arith.constant 0 : i32
    return %c0_i32, %c0_i32_0, %c0_i32_1 : i32, i32, i32
  }
  func.func @transform_9(%arg0: i32) -> (i32, i32, i32) {
    %c0_i32 = arith.constant 0 : i32
    %c0_i32_0 = arith.constant 0 : i32
    %c0_i32_1 = arith.constant 0 : i32
    %c0_i32_2 = arith.constant 0 : i32
    return %c0_i32, %c0_i32_0, %c0_i32_1 : i32, i32, i32
  }
  func.func @transform_10(%arg0: i32) -> (i32, i32, i32) {
    %c0_i32 = arith.constant 0 : i32
    %c0_i32_0 = arith.constant 0 : i32
    %c0_i32_1 = arith.constant 0 : i32
    %c0_i32_2 = arith.constant 0 : i32
    return %c0_i32, %c0_i32_0, %c0_i32_1 : i32, i32, i32
  }
  func.func @transform_11(%arg0: i32) -> (i32, i32, i32) {
    %c0_i32 = arith.constant 0 : i32
    %c0_i32_0 = arith.constant 0 : i32
    %c0_i32_1 = arith.constant 0 : i32
    %c0_i32_2 = arith.constant 0 : i32
    return %c0_i32, %c0_i32_0, %c0_i32_1 : i32, i32, i32
  }
  func.func @transform_12(%arg0: i32) -> (i32, i32, i32) {
    %c0_i32 = arith.constant 0 : i32
    %c0_i32_0 = arith.constant 0 : i32
    %c0_i32_1 = arith.constant 0 : i32
    %c0_i32_2 = arith.constant 0 : i32
    return %c0_i32, %c0_i32_0, %c0_i32_1 : i32, i32, i32
  }
  func.func @transform_13(%arg0: i32) -> (i32, i32, i32) {
    %c0_i32 = arith.constant 0 : i32
    %c0_i32_0 = arith.constant 0 : i32
    %c0_i32_1 = arith.constant 0 : i32
    %c0_i32_2 = arith.constant 0 : i32
    return %c0_i32, %c0_i32_0, %c0_i32_1 : i32, i32, i32
  }
  func.func @transform_14(%arg0: i32) -> (i32, i32, i32) {
    %c0_i32 = arith.constant 0 : i32
    %c0_i32_0 = arith.constant 0 : i32
    %c0_i32_1 = arith.constant 0 : i32
    %c0_i32_2 = arith.constant 0 : i32
    return %c0_i32, %c0_i32_0, %c0_i32_1 : i32, i32, i32
  }
  func.func @transform_15(%arg0: i32) -> (i32, i32, i32) {
    %c0_i32 = arith.constant 0 : i32
    %c0_i32_0 = arith.constant 0 : i32
    %c0_i32_1 = arith.constant 0 : i32
    %c0_i32_2 = arith.constant 0 : i32
    return %c0_i32, %c0_i32_0, %c0_i32_1 : i32, i32, i32
  }
  func.func @transform_16(%arg0: i32) -> (i32, i32, i32) {
    %c0_i32 = arith.constant 0 : i32
    %c0_i32_0 = arith.constant 0 : i32
    %c0_i32_1 = arith.constant 0 : i32
    %c0_i32_2 = arith.constant 0 : i32
    return %c0_i32, %c0_i32_0, %c0_i32_1 : i32, i32, i32
  }
  func.func @transform_17(%arg0: i32) -> (i32, i32, i32) {
    %c0_i32 = arith.constant 0 : i32
    %c0_i32_0 = arith.constant 0 : i32
    %c0_i32_1 = arith.constant 0 : i32
    %c0_i32_2 = arith.constant 0 : i32
    return %c0_i32, %c0_i32_0, %c0_i32_1 : i32, i32, i32
  }
  func.func @transform_18(%arg0: i32) -> (i32, i32) {
    %c0_i32 = arith.constant 0 : i32
    %c0_i32_0 = arith.constant 0 : i32
    %c0_i32_1 = arith.constant 0 : i32
    return %c0_i32, %c0_i32_0 : i32, i32
  }
  func.func @transform_19(%arg0: i32) -> (i32, i32) {
    %c0_i32 = arith.constant 0 : i32
    %c0_i32_0 = arith.constant 0 : i32
    %c0_i32_1 = arith.constant 0 : i32
    return %c0_i32, %c0_i32_0 : i32, i32
  }
  func.func @transform_20(%arg0: i32) -> (i32, i32) {
    %c0_i32 = arith.constant 0 : i32
    %c0_i32_0 = arith.constant 0 : i32
    %c0_i32_1 = arith.constant 0 : i32
    return %c0_i32, %c0_i32_0 : i32, i32
  }
  func.func @transform_21(%arg0: i32) -> (i32, i32, i32) {
    %c0_i32 = arith.constant 0 : i32
    %c0_i32_0 = arith.constant 0 : i32
    %c0_i32_1 = arith.constant 0 : i32
    return %arg0, %c0_i32, %c0_i32_0 : i32, i32, i32
  }
}

</mosaic_0001>

<bundles_post_ra>
// kernel: full_model_forward.4
= control target key start
LH: loop header
LB: loop body
LE: loop exit
PB: predicated region body
PF: predicated region fallthrough
CT: control target
= control target key end

     0   :  { %vm93_vm0 = vcmask 261120   ;;  %v2934_v7 = vmov 0.0   ;;  %vm2935_vm1 = vmmov 0   ;;  %s2936_s27 = smov 120   ;;  %s2937_s28 = smov 96   ;;  %vm209_vm2 = vcmask 64512   ;;  %s3576_s0 = inlined_call_operand.vmem [shape: f32[1,8,32], index: 0, kind: input, shape index: {}]   ;;  %s3577_s4 = inlined_call_operand.vmem [shape: f32[2,32,96], index: 4, kind: input, shape index: {}]   ;;  %s3578_s2 = inlined_call_operand.vmem [shape: f32[2,1,32], index: 2, kind: input, shape index: {}]   ;;  %s3579_s3 = inlined_call_operand.vmem [shape: f32[2,1,32], index: 3, kind: input, shape index: {}]   ;;  %s3580_s5 = inlined_call_operand.vmem [shape: f32[2,1,96], index: 5, kind: input, shape index: {}]   ;;  %s3581_s6 = inlined_call_operand.vmem [shape: f32[2,32,32], index: 6, kind: input, shape index: {}]   ;;  %s3582_s7 = inlined_call_operand.vmem [shape: f32[2,1,32], index: 7, kind: input, shape index: {}]   ;;  %s3583_s10 = inlined_call_operand.vmem [shape: f32[2,32,128], index: 10, kind: input, shape index: {}]   ;;  %s3584_s8 = inlined_call_operand.vmem [shape: f32[2,1,32], index: 8, kind: input, shape index: {}]   ;;  %s3585_s9 = inlined_call_operand.vmem [shape: f32[2,1,32], index: 9, kind: input, shape index: {}]   ;;  %s3586_s12 = inlined_call_operand.vmem [shape: f32[2,128,32], index: 12, kind: input, shape index: {}]   ;;  %s3587_s11 = inlined_call_operand.vmem [shape: f32[2,1,128], index: 11, kind: input, shape index: {}]   ;;  %s3588_s13 = inlined_call_operand.vmem [shape: f32[2,1,32], index: 13, kind: input, shape index: {}]   ;;  %s3589_s1 = inlined_call_operand.vmem [shape: f32[1,8], index: 1, kind: input, shape index: {}]   ;;  %s3590_s16 = inlined_call_operand.vmem [shape: f32[32,32], index: 16, kind: input, shape index: {}]   ;;  %s3591_s14 = inlined_call_operand.vmem [shape: f32[1,32], index: 14, kind: input, shape index: {}]   ;;  %s3592_s15 = inlined_call_operand.vmem [shape: f32[1,32], index: 15, kind: input, shape index: {}]   ;;  %s3593_s17 = inlined_call_operand.vmem [shape: f32[1,32], index: 17, kind: output, shape index: {}]  }
   0x1   :  { %3603 = sst [smem:[#allocation2_spill]] %s3576_s0  ;;  %2636 = vmatprep.subr.mxu1 %v2934_v7  ;;  %2644 = vmatprep.mubr.msk.f32.mxu1 %vm2935_vm1, %v2934_v7  ;;  %v2447_v16 = vld [vmem:[%s3578_s2] ss:$0 sm:$0xff]  ;;  %s2938_s0 = smov 88   ;;  %v201_v32 = vlaneseq  ;;  %vm887_vm4 = vcmask 130048   ;;  %vm889_vm5 = vcmask 195584  }
   0x2   :  { %3604 = sst [smem:[#allocation3_spill]] %s3577_s4  ;;  %2657 = vmatprep.subr.mxu0 %v2934_v7  ;;  %2659 = vmatprep.mubr.msk.f32.mxu0 %vm2935_vm1, %v2934_v7  ;;  %v2448_v18 = vld [vmem:[%s3579_s3] ss:$0 sm:$0xff]  ;;  %s2939_s30 = smov 80   ;;  %vm2349_vm6 = vcmask 253952  }
   0x3   :  { %s3605_s26 = sld [smem:[#allocation2_spill]]  ;;  %v2449_v21 = vld [vmem:[%s3580_s5] ss:$0 sm:$0xff]  ;;  %s2940_s18 = smov 112   ;;  %v202_v33 = vshrl.u32 %v201_v32, 7  ;;  %v204_v34 = vand.u32 127, %v201_v32 }
   0x4   :  { %s3606_s29 = sld [smem:[#allocation3_spill]]  ;;  %s3597_s19 = smov 72  }
   0x5   :  { %s3602_s4 = smov 104   ;;  %vm3120_vm3 = vcmp.le.s32.totalorder %v204_v34, %v202_v33  ;;  %s2943_s20 = smov 64   ;;  %v65_v33 = vld [vmem:[%s3581_s6 + $0x8] sm:$0xff] }
   0x6   :  { %s3596_s21 = smov 48   ;;  %s3595_s22 = smov 40  }
   0x7   :  { %s3601_s23 = smov 56   ;;  %s3616_s25 = smov 24  }
   0x9   :  { %v3043_v0 = vld [vmem:[%s3605_s26] sm:$0xff] }
   0xa   :  { %v94_v1 = vsel %vm93_vm0, %v3043_v0, 0.0  ;;  %v62_v8 = vld [vmem:[%s3606_s29 + $0x18] sm:$0xff]  ;;  %v61_v9 = vld [vmem:[%s3606_s29 + $0x10] sm:$0xff]  ;;  %v60_v10 = vld [vmem:[%s3606_s29 + $0x8] sm:$0xff] }
   0xb   :  { %95 = vadd.xlane.f32.xlu0 %v94_v1  ;;  %2637 = vmatpush3.msra.mxu1 %v62_v8  ;;  %v59_v11 = vld [vmem:[%s3606_s29] sm:$0xff] }
   0xc   :  { %2638 = vmatprep.subr.mxu1 %v2934_v7 }
   0xd   :  { %2639 = vmatpush3.msra.mxu1 %v61_v9 }
   0xe   :  { %2640 = vmatprep.subr.mxu1 %v2934_v7 }
   0xf   :  { %2641 = vmatpush3.msra.mxu1 %v60_v10 }
  0x10   :  { %2642 = vmatprep.subr.mxu1 %v2934_v7 }
  0x11   :  { %2643 = vmatpush3.msra.mxu1 %v59_v11 }
  0x12   :  { %2647 = vmatprep.subr.mxu1 %v2934_v7 }
  0x94   :  { %v96_v2 = vpop.xlane.xlu0 %95 }
  0x95   :  { %v98_v3 = vmul.f32 0.03125, %v96_v2 }
  0x97   :  { %v99_v4 = vsub.f32 %v3043_v0, %v98_v3 }
  0x99   :  { %v100_v5 = vmul.f32 %v99_v4, %v99_v4 }
  0x9b   :  { %v101_v6 = vsel %vm93_vm0, %v100_v5, 0.0 }
  0x9c   :  { %102 = vadd.xlane.f32.xlu0 %v101_v6 }
 0x125   :  { %v103_v12 = vpop.xlane.xlu0 %102 }
 0x126   :  { %v104_v13 = vmul.f32 0.03125, %v103_v12 }
 0x128   :  { %v105_v14 = vadd.f32 1e-05, %v104_v13 }
 0x12a   :  { %2884 = vrsqrt.f32 %v105_v14 }
 0x137   :  { %v2885_v15 = vpop.eup %2884 }
 0x138   :  { %v107_v17 = vmul.f32 %v2885_v15, %v99_v4 }
 0x13a   :  { %v114_v19 = vmul.f32 %v2447_v16, %v107_v17 }
 0x13c   :  { %v121_v20 = vadd.f32 %v2448_v18, %v114_v19 }
 0x13e   :  { %2645 = vmatmul.mubr.msk.f32.vlgmr.msra.gmra.mxu1 %vm93_vm0, %v121_v20 }
 0x13f   :  { %2649 = vmatprep.mubr.msk.f32.mxu1 %vm2935_vm1, %v2934_v7 }
 0x1fe   :  { %v197_v22 = vpop.f32.mrf.mxu1 }
 0x1ff   :  { %v3083_v23 = vadd.f32 %v2449_v21, %v197_v22 }
 0x200   :  { %v2646_v24 = vpop.f32.mrf.mxu1 }
 0x201   :  { %373 = vrot.lane.b32.xlu0 %v3083_v23, %s2936_s27  ;;  %207 = vrot.lane.b32.xlu1 %v3083_v23, %s2937_s28 }
 0x205   :  { %375 = vrot.lane.b32.xlu1 %v3083_v23, %s2938_s0 }
 0x209   :  { %542 = vrot.lane.b32.xlu1 %v3083_v23, %s2939_s30 }
 0x20d   :  { %540 = vrot.lane.b32.xlu1 %v3083_v23, %s2940_s18 }
 0x211   :  { %709 = vrot.lane.b32.xlu1 %v3083_v23, %s3597_s19  ;;  %s3599_s19 = smov 16  }
 0x215   :  { %707 = vrot.lane.b32.xlu1 %v3083_v23, %s3602_s4 }
 0x273   :  { %v208_v25 = vpop.permute.xlu1 %207  ;;  %v374_v27 = vpop.permute.xlu0 %373 }
 0x274   :  { %2648 = vmatpush3.xpose.msk.msra.mxu1 %vm209_vm2, %v208_v25 }
 0x275   :  { %2652 = vmatprep.subr.mxu1 %v2934_v7 }
 0x277   :  { %2650 = vmatmul.mubr.msk.f32.vlgmr.msra.gmra.mxu1 %vm209_vm2, %v3083_v23  ;;  %v376_v26 = vpop.permute.xlu1 %375 }
 0x278   :  { %2658 = vmatpush3.xpose.msk.msra.mxu0 %vm209_vm2, %v376_v26  ;;  %2654 = vmatprep.mubr.msk.f32.mxu1 %vm2935_vm1, %v2934_v7 }
 0x279   :  { %2667 = vmatprep.subr.mxu0 %v2934_v7 }
 0x27b   :  { %2660 = vmatmul.mubr.msk.f32.vlgmr.msra.gmra.mxu0 %vm209_vm2, %v374_v27  ;;  %v543_v28 = vpop.permute.xlu1 %542 }
 0x27c   :  { %2668 = vmatpush3.xpose.msk.msra.mxu0 %vm209_vm2, %v543_v28  ;;  %2669 = vmatprep.mubr.msk.f32.mxu0 %vm2935_vm1, %v2934_v7 }
 0x27d   :  { %2677 = vmatprep.subr.mxu0 %v2934_v7 }
 0x27f   :  { %v541_v29 = vpop.permute.xlu1 %540 }
 0x280   :  { %2670 = vmatmul.mubr.msk.f32.vlgmr.msra.gmra.mxu0 %vm209_vm2, %v541_v29 }
 0x281   :  { %2679 = vmatprep.mubr.msk.f32.mxu0 %vm2935_vm1, %v2934_v7 }
 0x283   :  { %v710_v30 = vpop.permute.xlu1 %709 }
 0x284   :  { %2678 = vmatpush3.xpose.msk.msra.mxu0 %vm209_vm2, %v710_v30  ;;  %v67_v30 = vld [vmem:[%s3581_s6 + $0x18] sm:$0xff] }
 0x285   :  { %2687 = vmatprep.subr.mxu0 %v2934_v7 }
 0x287   :  { %v708_v31 = vpop.permute.xlu1 %707 }
 0x288   :  { %2680 = vmatmul.mubr.msk.f32.vlgmr.msra.gmra.mxu0 %vm209_vm2, %v708_v31  ;;  %v66_v31 = vld [vmem:[%s3581_s6 + $0x10] sm:$0xff] }
 0x289   :  { %2695 = vmatprep.mubr.msk.f32.mxu0 %vm2935_vm1, %v2934_v7  ;;  %2688 = vmatpush3.msra.mxu0 %v67_v30 }
 0x28a   :  { %2689 = vmatprep.subr.mxu0 %v2934_v7 }
 0x28b   :  { %2690 = vmatpush3.msra.mxu0 %v66_v31 }
 0x28c   :  { %2691 = vmatprep.subr.mxu0 %v2934_v7 }
 0x28d   :  { %2692 = vmatpush3.msra.mxu0 %v65_v33 }
 0x28e   :  { %2693 = vmatprep.subr.mxu0 %v2934_v7 }
 0x337   :  { %v280_v35 = vpop.f32.mrf.mxu1 }
 0x338   :  { %v284_v37 = vmul.f32 0.35355338, %v280_v35  ;;  %v64_v35 = vld [vmem:[%s3581_s6] sm:$0xff] }
 0x339   :  { %v2651_v38 = vpop.f32.mrf.mxu1  ;;  %2694 = vmatpush3.msra.mxu0 %v64_v35 }
 0x33a   :  { %v285_v39 = vsel %vm3120_vm3, %v284_v37, -1e+30  ;;  %2709 = vmatprep.subr.mxu0 %v2934_v7 }
 0x33b   :  { %v447_v40 = vpop.f32.mrf.mxu0  ;;  %v286_v41 = vsel %vm209_vm2, %v285_v39, -inf }
 0x33c   :  { %v451_v42 = vmul.f32 0.35355338, %v447_v40  ;;  %287 = vmax.xlane.f32.xlu1 %v286_v41 }
 0x33d   :  { %v2661_v43 = vpop.f32.mrf.mxu0 }
 0x33e   :  { %v452_v44 = vsel %vm3120_vm3, %v451_v42, -1e+30 }
 0x33f   :  { %v453_v45 = vsel %vm209_vm2, %v452_v44, -inf }
 0x340   :  { %454 = vmax.xlane.f32.xlu0 %v453_v45  ;;  %v614_v46 = vpop.f32.mrf.mxu0 }
 0x341   :  { %v618_v47 = vmul.f32 0.35355338, %v614_v46 }
 0x342   :  { %v2671_v48 = vpop.f32.mrf.mxu0 }
 0x343   :  { %v619_v49 = vsel %vm3120_vm3, %v618_v47, -1e+30 }
 0x344   :  { %v620_v50 = vsel %vm209_vm2, %v619_v49, -inf }
 0x345   :  { %621 = vmax.xlane.f32.xlu1 %v620_v50 }
 0x348   :  { %v781_v51 = vpop.f32.mrf.mxu0 }
 0x349   :  { %v785_v52 = vmul.f32 0.35355338, %v781_v51 }
 0x34a   :  { %v2681_v53 = vpop.f32.mrf.mxu0 }
 0x34b   :  { %v786_v54 = vsel %vm3120_vm3, %v785_v52, -1e+30 }
 0x34c   :  { %v787_v55 = vsel %vm209_vm2, %v786_v54, -inf }
 0x34d   :  { %788 = vmax.xlane.f32.xlu0 %v787_v55 }
 0x356   :  { %297 = vrot.lane.b32.xlu1 %v3083_v23, %s2943_s20 }
 0x3c5   :  { %v288_v56 = vpop.xlane.xlu1 %287 }
 0x3c6   :  { %v289_v57 = vsub.f32 %v285_v39, %v288_v56 }
 0x3c8   :  { %v290_v58 = vmul.f32 1.442695, %v289_v57 }
 0x3c9   :  { %v455_v59 = vpop.xlane.xlu0 %454 }
 0x3ca   :  { %2886 = vpow2.f32 %v290_v58  ;;  %v456_v60 = vsub.f32 %v452_v44, %v455_v59 }
 0x3cc   :  { %v457_v61 = vmul.f32 1.442695, %v456_v60  ;;  %v74_v60 = vld [vmem:[%s3583_s10 + $0x18] sm:$0xff] }
 0x3ce   :  { %2888 = vpow2.f32 %v457_v61  ;;  %v622_v62 = vpop.xlane.xlu1 %621  ;;  %v72_v61 = vld [vmem:[%s3583_s10 + $0x8] sm:$0xff] }
 0x3cf   :  { %v623_v63 = vsub.f32 %v619_v49, %v622_v62  ;;  %v2464_v49 = vld [vmem:[%s3582_s7] ss:$0 sm:$0xff] }
 0x3d0   :  { %v71_v62 = vld [vmem:[%s3583_s10] sm:$0xff] }
 0x3d1   :  { %v624_v1 = vmul.f32 1.442695, %v623_v63 }
 0x3d2   :  { %v298_v2 = vpop.permute.xlu1 %297 }
 0x3d3   :  { %2890 = vpow2.f32 %v624_v1  ;;  %2653 = vmatpush3.msra.mxu1 %v298_v2 }
 0x3d4   :  { %2662 = vmatprep.subr.mxu1 %v2934_v7 }
 0x3d6   :  { %v789_v3 = vpop.xlane.xlu0 %788 }
 0x3d7   :  { %v2887_v4 = vpop.eup %2886  ;;  %v790_v5 = vsub.f32 %v786_v54, %v789_v3 }
 0x3d8   :  { %v292_v6 = vsel %vm209_vm2, %v2887_v4, 0.0 }
 0x3d9   :  { %v791_v8 = vmul.f32 1.442695, %v790_v5  ;;  %293 = vadd.xlane.f32.xlu1 %v292_v6  ;;  %v2466_v6 = vld [vmem:[%s3585_s9] ss:$0 sm:$0xff] }
 0x3db   :  { %v2889_v9 = vpop.eup %2888  ;;  %2892 = vpow2.f32 %v791_v8 }
 0x3dc   :  { %v459_v10 = vsel %vm209_vm2, %v2889_v9, 0.0 }
 0x3dd   :  { %460 = vadd.xlane.f32.xlu0 %v459_v10  ;;  %v91_v10 = vld [vmem:[%s3586_s12 + $0x78] sm:$0xff] }
 0x3e0   :  { %v2891_v11 = vpop.eup %2890 }
 0x3e1   :  { %v626_v12 = vsel %vm209_vm2, %v2891_v11, 0.0 }
 0x3e2   :  { %627 = vadd.xlane.f32.xlu1 %v626_v12  ;;  %v89_v12 = vld [vmem:[%s3586_s12 + $0x68] sm:$0xff] }
 0x3e8   :  { %v2893_v13 = vpop.eup %2892 }
 0x3e9   :  { %v793_v14 = vsel %vm209_vm2, %v2893_v13, 0.0 }
 0x3ea   :  { %794 = vadd.xlane.f32.xlu0 %v793_v14  ;;  %v87_v14 = vld [vmem:[%s3586_s12 + $0x58] sm:$0xff] }
 0x3f3   :  { %631 = vrot.lane.b32.xlu1 %v3083_v23, %s3596_s21  ;;  %s3598_s21 = smov 24  }
 0x3f7   :  { %798 = vrot.lane.b32.xlu1 %v3083_v23, %s3595_s22  ;;  %s3600_s22 = smov 8  }
 0x400   :  { %464 = vrot.lane.b32.xlu0 %v3083_v23, %s3601_s23 }
 0x462   :  { %v294_v15 = vpop.xlane.xlu1 %293 }
 0x463   :  { %2894 = vrcp.f32 %v294_v15  ;;  %v86_v15 = vld [vmem:[%s3586_s12 + $0x50] sm:$0xff] }
 0x466   :  { %v461_v16 = vpop.xlane.xlu0 %460 }
 0x467   :  { %2896 = vrcp.f32 %v461_v16  ;;  %v85_v16 = vld [vmem:[%s3586_s12 + $0x48] sm:$0xff] }
 0x46b   :  { %v628_v17 = vpop.xlane.xlu1 %627 }
 0x46c   :  { %2898 = vrcp.f32 %v628_v17  ;;  %v84_v17 = vld [vmem:[%s3586_s12 + $0x40] sm:$0xff] }
 0x46f   :  { %v632_v22 = vpop.permute.xlu1 %631 }
 0x470   :  { %v2895_v18 = vpop.eup %2894 }
 0x471   :  { %v296_v19 = vmul.f32 %v2895_v18, %v2887_v4  ;;  %v2465_v4 = vld [vmem:[%s3584_s8] ss:$0 sm:$0xff]  ;;  %v83_v18 = vld [vmem:[%s3586_s12 + $0x38] sm:$0xff] }
 0x473   :  { %v795_v20 = vpop.xlane.xlu0 %794  ;;  %2655 = vmatmul.mubr.msk.f32.vlgmr.msra.gmra.mxu1 %vm209_vm2, %v296_v19  ;;  %v799_v27 = vpop.permute.xlu1 %798  ;;  %v82_v19 = vld [vmem:[%s3586_s12 + $0x30] sm:$0xff] }
 0x474   :  { %v2897_v21 = vpop.eup %2896  ;;  %2900 = vrcp.f32 %v795_v20  ;;  %2664 = vmatprep.mubr.msk.f32.mxu1 %vm2935_vm1, %v2934_v7  ;;  %v81_v20 = vld [vmem:[%s3586_s12 + $0x28] sm:$0xff] }
 0x475   :  { %v463_v25 = vmul.f32 %v2897_v21, %v2889_v9  ;;  %v80_v21 = vld [vmem:[%s3586_s12 + $0x20] sm:$0xff] }
 0x477   :  { %v465_v24 = vpop.permute.xlu0 %464 }
 0x478   :  { %2663 = vmatpush3.msra.mxu1 %v465_v24  ;;  %v78_v24 = vld [vmem:[%s3586_s12 + $0x10] sm:$0xff] }
 0x479   :  { %v2899_v23 = vpop.eup %2898  ;;  %2665 = vmatmul.mubr.msk.f32.vlgmr.msra.gmra.mxu1 %vm209_vm2, %v463_v25  ;;  %2672 = vmatprep.subr.mxu1 %v2934_v7  ;;  %v77_v25 = vld [vmem:[%s3586_s12 + $0x8] sm:$0xff] }
 0x47a   :  { %2673 = vmatpush3.msra.mxu1 %v632_v22  ;;  %2674 = vmatprep.mubr.msk.f32.mxu1 %vm2935_vm1, %v2934_v7  ;;  %v630_v26 = vmul.f32 %v2899_v23, %v2891_v11  ;;  %v90_v11 = vld [vmem:[%s3586_s12 + $0x70] sm:$0xff]  ;;  %v79_v22 = vld [vmem:[%s3586_s12 + $0x18] sm:$0xff]  ;;  %v76_v23 = vld [vmem:[%s3586_s12] sm:$0xff] }
 0x47b   :  { %2682 = vmatprep.subr.mxu1 %v2934_v7 }
 0x47d   :  { %2675 = vmatmul.mubr.msk.f32.vlgmr.msra.gmra.mxu1 %vm209_vm2, %v630_v26  ;;  %v2467_v26 = vld [vmem:[%s3587_s11] ss:$0 sm:$0xff] }
 0x47e   :  { %2683 = vmatpush3.msra.mxu1 %v799_v27  ;;  %2684 = vmatprep.mubr.msk.f32.mxu1 %vm2935_vm1, %v2934_v7 }
 0x47f   :  { %2698 = vmatprep.subr.mxu1 %v2934_v7 }
 0x481   :  { %v2901_v28 = vpop.eup %2900 }
 0x482   :  { %v797_v29 = vmul.f32 %v2901_v28, %v2893_v13  ;;  %v88_v13 = vld [vmem:[%s3586_s12 + $0x60] sm:$0xff] }
 0x484   :  { %2685 = vmatmul.mubr.msk.f32.vlgmr.msra.gmra.mxu1 %vm209_vm2, %v797_v29 }
 0x485   :  { %2706 = vmatprep.mubr.msk.f32.mxu1 %vm2935_vm1, %v2934_v7  ;;  %2699 = vmatpush3.msra.mxu1 %v74_v60 }
 0x486   :  { %2700 = vmatprep.subr.mxu1 %v2934_v7 }
 0x533   :  { %v369_v32 = vpop.f32.mrf.mxu1 }
 0x535   :  { %v2656_v34 = vpop.f32.mrf.mxu1 }
 0x539   :  { %v536_v37 = vpop.f32.mrf.mxu1 }
 0x53a   :  { %875 = vrot.lane.b32.xlu0 %v536_v37, %s3600_s22  ;;  %v2470_v37 = vld [vmem:[%s3588_s13] ss:$0 sm:$0xff] }
 0x53b   :  { %v2666_v38 = vpop.f32.mrf.mxu1 }
 0x53d   :  { %v703_v39 = vpop.f32.mrf.mxu1 }
 0x53e   :  { %879 = vrot.lane.b32.xlu1 %v703_v39, %s3599_s19 }
 0x53f   :  { %v2676_v40 = vpop.f32.mrf.mxu1 }
 0x544   :  { %v870_v41 = vpop.f32.mrf.mxu1 }
 0x545   :  { %883 = vrot.lane.b32.xlu0 %v870_v41, %s3598_s21  ;;  %s3615_s21 = smov 16  }
 0x546   :  { %v2686_v42 = vpop.f32.mrf.mxu1 }
 0x5ac   :  { %v876_v43 = vpop.permute.xlu0 %875 }
 0x5ad   :  { %v886_v45 = vsel %vm209_vm2, %v369_v32, %v876_v43 }
 0x5b0   :  { %v880_v44 = vpop.permute.xlu1 %879 }
 0x5b1   :  { %v888_v46 = vsel %vm887_vm4, %v886_v45, %v880_v44 }
 0x5b7   :  { %v884_v47 = vpop.permute.xlu0 %883 }
 0x5b8   :  { %v890_v48 = vsel %vm889_vm5, %v888_v46, %v884_v47 }
 0x5b9   :  { %2696 = vmatmul.mubr.msk.f32.vlgmr.msra.gmra.mxu0 %vm93_vm0, %v890_v48  ;;  %v2476_v48 = vld [vmem:[%s3606_s29 + $0x38] sm:$0xff] }
 0x5ba   :  { %2741 = vmatprep.mubr.msk.f32.mxu0 %vm2935_vm1, %v2934_v7  ;;  %2710 = vmatpush3.msra.mxu0 %v91_v10 }
 0x5bb   :  { %2711 = vmatprep.subr.mxu0 %v2934_v7 }
 0x5bc   :  { %2712 = vmatpush3.msra.mxu0 %v90_v11 }
 0x5bd   :  { %2713 = vmatprep.subr.mxu0 %v2934_v7 }
 0x5be   :  { %2714 = vmatpush3.msra.mxu0 %v89_v12 }
 0x5bf   :  { %2715 = vmatprep.subr.mxu0 %v2934_v7 }
 0x5c0   :  { %2716 = vmatpush3.msra.mxu0 %v88_v13 }
 0x5c1   :  { %2717 = vmatprep.subr.mxu0 %v2934_v7 }
 0x5c2   :  { %2718 = vmatpush3.msra.mxu0 %v87_v14 }
 0x5c3   :  { %2719 = vmatprep.subr.mxu0 %v2934_v7 }
 0x5c4   :  { %2720 = vmatpush3.msra.mxu0 %v86_v15 }
 0x5c5   :  { %2721 = vmatprep.subr.mxu0 %v2934_v7 }
 0x5c6   :  { %2722 = vmatpush3.msra.mxu0 %v85_v16 }
 0x5c7   :  { %2723 = vmatprep.subr.mxu0 %v2934_v7 }
 0x5c8   :  { %2724 = vmatpush3.msra.mxu0 %v84_v17 }
 0x5c9   :  { %2725 = vmatprep.subr.mxu0 %v2934_v7 }
 0x5ca   :  { %2726 = vmatpush3.msra.mxu0 %v83_v18 }
 0x5cb   :  { %2727 = vmatprep.subr.mxu0 %v2934_v7 }
 0x5cc   :  { %2728 = vmatpush3.msra.mxu0 %v82_v19 }
 0x5cd   :  { %2729 = vmatprep.subr.mxu0 %v2934_v7 }
 0x5ce   :  { %2730 = vmatpush3.msra.mxu0 %v81_v20 }
 0x5cf   :  { %2731 = vmatprep.subr.mxu0 %v2934_v7 }
 0x5d0   :  { %2732 = vmatpush3.msra.mxu0 %v80_v21 }
 0x5d1   :  { %2733 = vmatprep.subr.mxu0 %v2934_v7 }
 0x5d2   :  { %2734 = vmatpush3.msra.mxu0 %v79_v22 }
 0x5d3   :  { %2735 = vmatprep.subr.mxu0 %v2934_v7 }
 0x5d4   :  { %2736 = vmatpush3.msra.mxu0 %v78_v24 }
 0x5d5   :  { %2737 = vmatprep.subr.mxu0 %v2934_v7 }
 0x5d6   :  { %2738 = vmatpush3.msra.mxu0 %v77_v25 }
 0x5d7   :  { %2739 = vmatprep.subr.mxu0 %v2934_v7 }
 0x5d8   :  { %2740 = vmatpush3.msra.mxu0 %v76_v23 }
 0x5d9   :  { %2785 = vmatprep.subr.mxu0 %v2934_v7 }
 0x679   :  { %v960_v50 = vpop.f32.mrf.mxu0 }
 0x67a   :  { %v964_v51 = vadd.f32 %v960_v50, %v3043_v0  ;;  %v73_v0 = vld [vmem:[%s3583_s10 + $0x10] sm:$0xff]  ;;  %v2474_v50 = vld [vmem:[%s3606_s29 + $0x28] sm:$0xff] }
 0x67b   :  { %v2697_v52 = vpop.f32.mrf.mxu0  ;;  %2701 = vmatpush3.msra.mxu1 %v73_v0  ;;  %v2509_v0 = vld [vmem:[%s3580_s5 + $0x1] ss:$0 sm:$0xff]  ;;  %s3611_s5 = smov 72  }
 0x67c   :  { %v3193_v53 = vadd.f32 %v2464_v49, %v964_v51  ;;  %2702 = vmatprep.subr.mxu1 %v2934_v7  ;;  %v2475_v49 = vld [vmem:[%s3606_s29 + $0x30] sm:$0xff]  ;;  %v2473_v51 = vld [vmem:[%s3606_s29 + $0x20] sm:$0xff] }
 0x67d   :  { %2703 = vmatpush3.msra.mxu1 %v72_v61 }
 0x67e   :  { %v972_v54 = vsel %vm93_vm0, %v3193_v53, 0.0  ;;  %2704 = vmatprep.subr.mxu1 %v2934_v7 }
 0x67f   :  { %973 = vadd.xlane.f32.xlu1 %v972_v54  ;;  %2705 = vmatpush3.msra.mxu1 %v71_v62 }
 0x680   :  { %2744 = vmatprep.subr.mxu1 %v2934_v7 }
 0x708   :  { %v974_v55 = vpop.xlane.xlu1 %973 }
 0x709   :  { %v975_v56 = vmul.f32 0.03125, %v974_v55 }
 0x70b   :  { %v976_v57 = vsub.f32 %v3193_v53, %v975_v56  ;;  %v2507_v56 = vld [vmem:[%s3578_s2 + $0x1] ss:$0 sm:$0xff]  ;;  %s3609_s2 = smov 104  }
 0x70d   :  { %v977_v58 = vmul.f32 %v976_v57, %v976_v57 }
 0x70f   :  { %v978_v59 = vsel %vm93_vm0, %v977_v58, 0.0  ;;  %v2508_v58 = vld [vmem:[%s3579_s3 + $0x1] ss:$0 sm:$0xff]  ;;  %s3610_s3 = smov 56  }
 0x710   :  { %979 = vadd.xlane.f32.xlu0 %v978_v59 }
 0x799   :  { %v980_v63 = vpop.xlane.xlu0 %979 }
 0x79a   :  { %v981_v1 = vmul.f32 0.03125, %v980_v63 }
 0x79c   :  { %v982_v2 = vadd.f32 1e-05, %v981_v1 }
 0x79e   :  { %2902 = vrsqrt.f32 %v982_v2 }
 0x7ab   :  { %v2903_v3 = vpop.eup %2902 }
 0x7ac   :  { %v984_v5 = vmul.f32 %v2903_v3, %v976_v57 }
 0x7ae   :  { %v991_v8 = vmul.f32 %v2465_v4, %v984_v5 }
 0x7b0   :  { %v998_v9 = vadd.f32 %v2466_v6, %v991_v8 }
 0x7b2   :  { %2707 = vmatmul.mubr.msk.f32.vlgmr.msra.gmra.mxu1 %vm93_vm0, %v998_v9 }
 0x7b3   :  { %2752 = vmatprep.mubr.msk.f32.mxu1 %vm2935_vm1, %v2934_v7  ;;  %2745 = vmatpush3.msra.mxu1 %v2476_v48 }
 0x7b4   :  { %2746 = vmatprep.subr.mxu1 %v2934_v7 }
 0x7b5   :  { %2747 = vmatpush3.msra.mxu1 %v2475_v49 }
 0x7b6   :  { %2748 = vmatprep.subr.mxu1 %v2934_v7 }
 0x7b7   :  { %2749 = vmatpush3.msra.mxu1 %v2474_v50 }
 0x7b8   :  { %2750 = vmatprep.subr.mxu1 %v2934_v7 }
 0x7b9   :  { %2751 = vmatpush3.msra.mxu1 %v2473_v51 }
 0x7ba   :  { %2755 = vmatprep.subr.mxu1 %v2934_v7 }
 0x872   :  { %v1074_v27 = vpop.f32.mrf.mxu1 }
 0x873   :  { %v1075_v28 = vadd.f32 %v2467_v26, %v1074_v27 }
 0x874   :  { %v2708_v29 = vpop.f32.mrf.mxu1 }
 0x875   :  { %v2469_v30 = vmul.f32 -1.702, %v1075_v28 }
 0x877   :  { %v1080_v31 = vmul.f32 1.442695, %v2469_v30 }
 0x879   :  { %2904 = vpow2.f32 %v1080_v31 }
 0x886   :  { %v2905_v32 = vpop.eup %2904 }
 0x887   :  { %v1082_v33 = vadd.f32 1.0, %v2905_v32 }
 0x889   :  { %2906 = vrcp.f32 %v1082_v33 }
 0x896   :  { %v2907_v34 = vpop.eup %2906 }
 0x897   :  { %v1085_v35 = vmul.f32 %v2907_v34, %v1075_v28 }
 0x899   :  { %2742 = vmatmul.mubr.f32.vlgmr.msra.gmra.mxu0 %v1085_v35 }
 0x89a   :  { %2787 = vmatprep.mubr.msk.f32.mxu0 %vm2935_vm1, %v2934_v7 }
 0x959   :  { %v1152_v38 = vpop.f32.mrf.mxu0 }
 0x95a   :  { %v1156_v39 = vadd.f32 %v1152_v38, %v3193_v53 }
 0x95b   :  { %v2743_v40 = vpop.f32.mrf.mxu0 }
 0x95c   :  { %v3297_v41 = vadd.f32 %v2470_v37, %v1156_v39 }
 0x95e   :  { %v1212_v42 = vsel %vm93_vm0, %v3297_v41, 0.0 }
 0x95f   :  { %1213 = vadd.xlane.f32.xlu0 %v1212_v42 }
 0x9e8   :  { %v1214_v43 = vpop.xlane.xlu0 %1213 }
 0x9e9   :  { %v1215_v44 = vmul.f32 0.03125, %v1214_v43 }
 0x9eb   :  { %v1216_v45 = vsub.f32 %v3297_v41, %v1215_v44 }
 0x9ed   :  { %v1217_v46 = vmul.f32 %v1216_v45, %v1216_v45 }
 0x9ef   :  { %v1218_v47 = vsel %vm93_vm0, %v1217_v46, 0.0 }
 0x9f0   :  { %1219 = vadd.xlane.f32.xlu1 %v1218_v47 }
 0xa79   :  { %v1220_v52 = vpop.xlane.xlu1 %1219 }
 0xa7a   :  { %v1221_v53 = vmul.f32 0.03125, %v1220_v52 }
 0xa7c   :  { %v1222_v54 = vadd.f32 1e-05, %v1221_v53 }
 0xa7e   :  { %2908 = vrsqrt.f32 %v1222_v54 }
 0xa8b   :  { %v2909_v55 = vpop.eup %2908 }
 0xa8c   :  { %v1224_v57 = vmul.f32 %v2909_v55, %v1216_v45 }
 0xa8e   :  { %v1231_v59 = vmul.f32 %v2507_v56, %v1224_v57 }
 0xa90   :  { %v1238_v60 = vadd.f32 %v2508_v58, %v1231_v59 }
 0xa92   :  { %2753 = vmatmul.mubr.msk.f32.vlgmr.msra.gmra.mxu1 %vm93_vm0, %v1238_v60 }
 0xa93   :  { %2757 = vmatprep.mubr.msk.f32.mxu1 %vm2935_vm1, %v2934_v7 }
 0xb52   :  { %v1314_v61 = vpop.f32.mrf.mxu1 }
 0xb53   :  { %v3331_v62 = vadd.f32 %v2509_v0, %v1314_v61 }
 0xb54   :  { %v2754_v63 = vpop.f32.mrf.mxu1 }
 0xb55   :  { %1319 = vrot.lane.b32.xlu0 %v3331_v62, %s2937_s28  ;;  %s3613_s28 = smov 8  }
 0xb59   :  { %1486 = vrot.lane.b32.xlu0 %v3331_v62, %s2938_s0  ;;  %s3614_s0 = smov 40  }
 0xb5d   :  { %1484 = vrot.lane.b32.xlu0 %v3331_v62, %s2936_s27  ;;  %s3612_s27 = smov 48  }
 0xbc7   :  { %v1320_v1 = vpop.permute.xlu0 %1319 }
 0xbc8   :  { %2756 = vmatpush3.xpose.msk.msra.mxu1 %vm209_vm2, %v1320_v1 }
 0xbc9   :  { %2760 = vmatprep.subr.mxu1 %v2934_v7 }
 0xbcb   :  { %2758 = vmatmul.mubr.msk.f32.vlgmr.msra.gmra.mxu1 %vm209_vm2, %v3331_v62  ;;  %v1487_v16 = vpop.permute.xlu0 %1486 }
 0xbcc   :  { %2762 = vmatprep.mubr.msk.f32.mxu1 %vm2935_vm1, %v2934_v7 }
 0xbcf   :  { %v1485_v18 = vpop.permute.xlu0 %1484 }
 0xc8b   :  { %v1391_v2 = vpop.f32.mrf.mxu1 }
 0xc8c   :  { %v1395_v3 = vmul.f32 0.35355338, %v1391_v2 }
 0xc8d   :  { %v2759_v4 = vpop.f32.mrf.mxu1 }
 0xc8e   :  { %v1396_v5 = vsel %vm3120_vm3, %v1395_v3, -1e+30 }
 0xc8f   :  { %v1397_v6 = vsel %vm209_vm2, %v1396_v5, -inf }
 0xc90   :  { %1398 = vmax.xlane.f32.xlu1 %v1397_v6 }
 0xd19   :  { %v1399_v8 = vpop.xlane.xlu1 %1398 }
 0xd1a   :  { %v1400_v9 = vsub.f32 %v1396_v5, %v1399_v8  ;;  %v2480_v8 = vld [vmem:[%s3581_s6 + $0x30] sm:$0xff] }
 0xd1c   :  { %v1401_v10 = vmul.f32 1.442695, %v1400_v9  ;;  %v2479_v9 = vld [vmem:[%s3581_s6 + $0x28] sm:$0xff] }
 0xd1e   :  { %2910 = vpow2.f32 %v1401_v10  ;;  %v2478_v10 = vld [vmem:[%s3581_s6 + $0x20] sm:$0xff] }
 0xd2b   :  { %v2911_v11 = vpop.eup %2910 }
 0xd2c   :  { %v1403_v12 = vsel %vm209_vm2, %v2911_v11, 0.0 }
 0xd2d   :  { %1404 = vadd.xlane.f32.xlu1 %v1403_v12 }
 0xd3e   :  { %1408 = vrot.lane.b32.xlu1 %v3331_v62, %s2943_s20 }
 0xdb6   :  { %v1405_v13 = vpop.xlane.xlu1 %1404 }
 0xdb7   :  { %2912 = vrcp.f32 %v1405_v13 }
 0xdba   :  { %v1409_v14 = vpop.permute.xlu1 %1408 }
 0xdbb   :  { %2761 = vmatpush3.msra.mxu1 %v1409_v14 }
 0xdbc   :  { %2765 = vmatprep.subr.mxu1 %v2934_v7 }
 0xdc4   :  { %v2913_v15 = vpop.eup %2912 }
 0xdc5   :  { %v1407_v17 = vmul.f32 %v2913_v15, %v2911_v11 }
 0xdc7   :  { %2763 = vmatmul.mubr.msk.f32.vlgmr.msra.gmra.mxu1 %vm209_vm2, %v1407_v17 }
 0xdc8   :  { %2766 = vmatpush3.xpose.msk.msra.mxu1 %vm209_vm2, %v1487_v16  ;;  %2767 = vmatprep.mubr.msk.f32.mxu1 %vm2935_vm1, %v2934_v7 }
 0xdc9   :  { %2770 = vmatprep.subr.mxu1 %v2934_v7 }
 0xdcb   :  { %2768 = vmatmul.mubr.msk.f32.vlgmr.msra.gmra.mxu1 %vm209_vm2, %v1485_v18 }
 0xdcc   :  { %2772 = vmatprep.mubr.msk.f32.mxu1 %vm2935_vm1, %v2934_v7 }
 0xe87   :  { %v3360_v19 = vpop.f32.mrf.mxu1 }
 0xe89   :  { %v2764_v20 = vpop.f32.mrf.mxu1 }
 0xe8b   :  { %v1558_v21 = vpop.f32.mrf.mxu1 }
 0xe8c   :  { %v1562_v22 = vmul.f32 0.35355338, %v1558_v21 }
 0xe8d   :  { %v2769_v24 = vpop.f32.mrf.mxu1 }
 0xe8e   :  { %v1563_v25 = vsel %vm3120_vm3, %v1562_v22, -1e+30  ;;  %v2524_v22 = vld [vmem:[%s3582_s7 + $0x1] ss:$0 sm:$0xff] }
 0xe8f   :  { %v1564_v23 = vsel %vm209_vm2, %v1563_v25, -inf }
 0xe90   :  { %1565 = vmax.xlane.f32.xlu1 %v1564_v23 }
 0xea1   :  { %1653 = vrot.lane.b32.xlu1 %v3331_v62, %s2939_s30 }
 0xea5   :  { %1651 = vrot.lane.b32.xlu1 %v3331_v62, %s2940_s18 }
 0xea9   :  { %1818 = vrot.lane.b32.xlu1 %v3331_v62, %s3609_s2 }
 0xf19   :  { %v1566_v26 = vpop.xlane.xlu1 %1565 }
 0xf1a   :  { %v1567_v27 = vsub.f32 %v1563_v25, %v1566_v26 }
 0xf1c   :  { %v1568_v28 = vmul.f32 1.442695, %v1567_v27 }
 0xf1d   :  { %v1654_v31 = vpop.permute.xlu1 %1653 }
 0xf1e   :  { %2914 = vpow2.f32 %v1568_v28 }
 0xf21   :  { %v1652_v34 = vpop.permute.xlu1 %1651 }
 0xf25   :  { %v1819_v37 = vpop.permute.xlu1 %1818 }
 0xf2b   :  { %v2915_v29 = vpop.eup %2914 }
 0xf2c   :  { %v1570_v30 = vsel %vm209_vm2, %v2915_v29, 0.0 }
 0xf2d   :  { %1571 = vadd.xlane.f32.xlu0 %v1570_v30 }
 0xf43   :  { %1575 = vrot.lane.b32.xlu0 %v3331_v62, %s3610_s3 }
 0xf47   :  { %1820 = vrot.lane.b32.xlu0 %v3331_v62, %s3611_s5 }
 0xfb6   :  { %v1572_v32 = vpop.xlane.xlu0 %1571 }
 0xfb7   :  { %2916 = vrcp.f32 %v1572_v32  ;;  %v2488_v32 = vld [vmem:[%s3583_s10 + $0x38] sm:$0xff] }
 0xfba   :  { %v1576_v33 = vpop.permute.xlu0 %1575 }
 0xfbb   :  { %2771 = vmatpush3.msra.mxu1 %v1576_v33  ;;  %v2486_v33 = vld [vmem:[%s3583_s10 + $0x28] sm:$0xff] }
 0xfbc   :  { %2775 = vmatprep.subr.mxu1 %v2934_v7 }
 0xfbe   :  { %v1821_v35 = vpop.permute.xlu0 %1820 }
 0xfbf   :  { %2786 = vmatpush3.xpose.msk.msra.mxu0 %vm209_vm2, %v1821_v35 }
 0xfc0   :  { %2795 = vmatprep.subr.mxu0 %v2934_v7 }
 0xfc2   :  { %2788 = vmatmul.mubr.msk.f32.vlgmr.msra.gmra.mxu0 %vm209_vm2, %v1819_v37 }
 0xfc3   :  { %2803 = vmatprep.mubr.msk.f32.mxu0 %vm2935_vm1, %v2934_v7 }
 0xfc4   :  { %v2917_v38 = vpop.eup %2916 }
 0xfc5   :  { %v1574_v39 = vmul.f32 %v2917_v38, %v2915_v29 }
 0xfc7   :  { %2773 = vmatmul.mubr.msk.f32.vlgmr.msra.gmra.mxu1 %vm209_vm2, %v1574_v39 }
 0xfc8   :  { %2776 = vmatpush3.xpose.msk.msra.mxu1 %vm209_vm2, %v1654_v31  ;;  %2777 = vmatprep.mubr.msk.f32.mxu1 %vm2935_vm1, %v2934_v7 }
 0xfc9   :  { %2780 = vmatprep.subr.mxu1 %v2934_v7 }
 0xfcb   :  { %2778 = vmatmul.mubr.msk.f32.vlgmr.msra.gmra.mxu1 %vm209_vm2, %v1652_v34  ;;  %v2485_v34 = vld [vmem:[%s3583_s10 + $0x20] sm:$0xff] }
 0xfcc   :  { %2782 = vmatprep.mubr.msk.f32.mxu1 %vm2935_vm1, %v2934_v7 }
0x1082   :  { %v1892_v40 = vpop.f32.mrf.mxu0 }
0x1083   :  { %v1896_v42 = vmul.f32 0.35355338, %v1892_v40  ;;  %v2525_v40 = vld [vmem:[%s3584_s8 + $0x1] ss:$0 sm:$0xff] }
0x1084   :  { %v2789_v43 = vpop.f32.mrf.mxu0 }
0x1085   :  { %v1897_v44 = vsel %vm3120_vm3, %v1896_v42, -1e+30  ;;  %v2526_v43 = vld [vmem:[%s3585_s9 + $0x1] ss:$0 sm:$0xff] }
0x1086   :  { %v1898_v45 = vsel %vm209_vm2, %v1897_v44, -inf }
0x1087   :  { %1899 = vmax.xlane.f32.xlu1 %v1898_v45  ;;  %v1647_v46 = vpop.f32.mrf.mxu1 }
0x1089   :  { %v2774_v47 = vpop.f32.mrf.mxu1 }
0x108a   :  { %v2504_v47 = vld [vmem:[%s3586_s12 + $0xf0] sm:$0xff] }
0x108b   :  { %v1725_v48 = vpop.f32.mrf.mxu1 }
0x108c   :  { %v1729_v49 = vmul.f32 0.35355338, %v1725_v48  ;;  %v2503_v48 = vld [vmem:[%s3586_s12 + $0xe8] sm:$0xff] }
0x108d   :  { %v2779_v50 = vpop.f32.mrf.mxu1 }
0x108e   :  { %v1730_v51 = vsel %vm3120_vm3, %v1729_v49, -1e+30  ;;  %v2502_v49 = vld [vmem:[%s3586_s12 + $0xe0] sm:$0xff]  ;;  %v2501_v50 = vld [vmem:[%s3586_s12 + $0xd8] sm:$0xff] }
0x108f   :  { %v1731_v52 = vsel %vm209_vm2, %v1730_v51, -inf }
0x1090   :  { %1732 = vmax.xlane.f32.xlu0 %v1731_v52  ;;  %v2499_v52 = vld [vmem:[%s3586_s12 + $0xc8] sm:$0xff] }
0x1098   :  { %1742 = vrot.lane.b32.xlu1 %v3331_v62, %s3612_s27 }
0x109c   :  { %1986 = vrot.lane.b32.xlu1 %v1647_v46, %s3613_s28  ;;  %v2505_v46 = vld [vmem:[%s3586_s12 + $0xf8] sm:$0xff] }
0x1110   :  { %v1900_v53 = vpop.xlane.xlu1 %1899 }
0x1111   :  { %v1901_v54 = vsub.f32 %v1897_v44, %v1900_v53  ;;  %v2498_v53 = vld [vmem:[%s3586_s12 + $0xc0] sm:$0xff] }
0x1113   :  { %v1902_v55 = vmul.f32 1.442695, %v1901_v54  ;;  %v2497_v54 = vld [vmem:[%s3586_s12 + $0xb8] sm:$0xff] }
0x1114   :  { %v1743_v56 = vpop.permute.xlu1 %1742 }
0x1115   :  { %2918 = vpow2.f32 %v1902_v55  ;;  %2781 = vmatpush3.msra.mxu1 %v1743_v56  ;;  %v2496_v55 = vld [vmem:[%s3586_s12 + $0xb0] sm:$0xff]  ;;  %v2495_v56 = vld [vmem:[%s3586_s12 + $0xa8] sm:$0xff] }
0x1116   :  { %2790 = vmatprep.subr.mxu1 %v2934_v7 }
0x1118   :  { %v1987_v15 = vpop.permute.xlu1 %1986 }
0x1119   :  { %v1733_v57 = vpop.xlane.xlu0 %1732  ;;  %v1997_v17 = vsel %vm209_vm2, %v3360_v19, %v1987_v15 }
0x111a   :  { %v1734_v58 = vsub.f32 %v1730_v51, %v1733_v57  ;;  %v2500_v51 = vld [vmem:[%s3586_s12 + $0xd0] sm:$0xff]  ;;  %v2494_v57 = vld [vmem:[%s3586_s12 + $0xa0] sm:$0xff] }
0x111c   :  { %v1735_v36 = vmul.f32 1.442695, %v1734_v58  ;;  %v2493_v58 = vld [vmem:[%s3586_s12 + $0x98] sm:$0xff] }
0x111e   :  { %2920 = vpow2.f32 %v1735_v36  ;;  %v2492_v36 = vld [vmem:[%s3586_s12 + $0x90] sm:$0xff] }
0x1122   :  { %v2919_v59 = vpop.eup %2918 }
0x1123   :  { %v1904_v60 = vsel %vm209_vm2, %v2919_v59, 0.0 }
0x1124   :  { %1905 = vadd.xlane.f32.xlu0 %v1904_v60  ;;  %v2490_v60 = vld [vmem:[%s3586_s12 + $0x80] sm:$0xff] }
0x112b   :  { %v2921_v0 = vpop.eup %2920 }
0x112c   :  { %v1737_v61 = vsel %vm209_vm2, %v2921_v0, 0.0 }
0x112d   :  { %1738 = vadd.xlane.f32.xlu0 %v1737_v61 }
0x1143   :  { %1909 = vrot.lane.b32.xlu0 %v3331_v62, %s3614_s0  ;;  %v2481_v62 = vld [vmem:[%s3581_s6 + $0x38] sm:$0xff] }
0x1144   :  { %2796 = vmatpush3.msra.mxu0 %v2481_v62 }
0x1145   :  { %2797 = vmatprep.subr.mxu0 %v2934_v7 }
0x1146   :  { %2798 = vmatpush3.msra.mxu0 %v2480_v8  ;;  %v2530_v8 = vld [vmem:[%s3588_s13 + $0x1] ss:$0 sm:$0xff] }
0x1147   :  { %2799 = vmatprep.subr.mxu0 %v2934_v7 }
0x1148   :  { %2800 = vmatpush3.msra.mxu0 %v2479_v9 }
0x1149   :  { %2801 = vmatprep.subr.mxu0 %v2934_v7 }
0x114a   :  { %2802 = vmatpush3.msra.mxu0 %v2478_v10 }
0x114b   :  { %2817 = vmatprep.subr.mxu0 %v2934_v7 }
0x11ad   :  { %v1906_v63 = vpop.xlane.xlu0 %1905 }
0x11b6   :  { %v1739_v1 = vpop.xlane.xlu0 %1738 }
0x11b7   :  { %2922 = vrcp.f32 %v1739_v1 }
0x11b8   :  { %2924 = vrcp.f32 %v1906_v63 }
0x11ba   :  { %v1910_v5 = vpop.permute.xlu0 %1909 }
0x11c4   :  { %v2923_v2 = vpop.eup %2922 }
0x11c5   :  { %v1741_v3 = vmul.f32 %v2923_v2, %v2921_v0  ;;  %v2925_v4 = vpop.eup %2924  ;;  %v2527_v0 = vld [vmem:[%s3587_s11 + $0x1] ss:$0 sm:$0xff] }
0x11c6   :  { %v1908_v6 = vmul.f32 %v2925_v4, %v2919_v59  ;;  %v2491_v59 = vld [vmem:[%s3586_s12 + $0x88] sm:$0xff] }
0x11c7   :  { %2783 = vmatmul.mubr.msk.f32.vlgmr.msra.gmra.mxu1 %vm209_vm2, %v1741_v3 }
0x11c8   :  { %2791 = vmatpush3.msra.mxu1 %v1910_v5  ;;  %2792 = vmatprep.mubr.msk.f32.mxu1 %vm2935_vm1, %v2934_v7 }
0x11c9   :  { %2806 = vmatprep.subr.mxu1 %v2934_v7 }
0x11cb   :  { %2793 = vmatmul.mubr.msk.f32.vlgmr.msra.gmra.mxu1 %vm209_vm2, %v1908_v6 }
0x11cc   :  { %2814 = vmatprep.mubr.msk.f32.mxu1 %vm2935_vm1, %v2934_v7  ;;  %2807 = vmatpush3.msra.mxu1 %v2488_v32  ;;  %v2348_v32 = vld [vmem:[%s3592_s15] sm:$0x1] }
0x11cd   :  { %2808 = vmatprep.subr.mxu1 %v2934_v7 }
0x1287   :  { %v1814_v11 = vpop.f32.mrf.mxu1 }
0x1288   :  { %1990 = vrot.lane.b32.xlu1 %v1814_v11, %s3615_s21 }
0x1289   :  { %v2784_v12 = vpop.f32.mrf.mxu1 }
0x128b   :  { %v1981_v13 = vpop.f32.mrf.mxu1 }
0x128c   :  { %1994 = vrot.lane.b32.xlu0 %v1981_v13, %s3616_s25  ;;  %v2273_v13 = vld [vmem:[%s3589_s1] sm:$0x1] }
0x128d   :  { %v2794_v14 = vpop.f32.mrf.mxu1 }
0x12fa   :  { %v1991_v16 = vpop.permute.xlu1 %1990 }
0x12fb   :  { %v1998_v18 = vsel %vm887_vm4, %v1997_v17, %v1991_v16 }
0x12fe   :  { %v1995_v20 = vpop.permute.xlu0 %1994 }
0x12ff   :  { %v1999_v21 = vsel %vm889_vm5, %v1998_v18, %v1995_v20 }
0x1300   :  { %2804 = vmatmul.mubr.msk.f32.vlgmr.msra.gmra.mxu0 %vm93_vm0, %v1999_v21 }
0x1301   :  { %2849 = vmatprep.mubr.msk.f32.mxu0 %vm2935_vm1, %v2934_v7  ;;  %2818 = vmatpush3.msra.mxu0 %v2505_v46 }
0x1302   :  { %2819 = vmatprep.subr.mxu0 %v2934_v7 }
0x1303   :  { %2820 = vmatpush3.msra.mxu0 %v2504_v47 }
0x1304   :  { %2821 = vmatprep.subr.mxu0 %v2934_v7 }
0x1305   :  { %2822 = vmatpush3.msra.mxu0 %v2503_v48 }
0x1306   :  { %2823 = vmatprep.subr.mxu0 %v2934_v7 }
0x1307   :  { %2824 = vmatpush3.msra.mxu0 %v2502_v49 }
0x1308   :  { %2825 = vmatprep.subr.mxu0 %v2934_v7 }
0x1309   :  { %2826 = vmatpush3.msra.mxu0 %v2501_v50 }
0x130a   :  { %2827 = vmatprep.subr.mxu0 %v2934_v7 }
0x130b   :  { %2828 = vmatpush3.msra.mxu0 %v2500_v51 }
0x130c   :  { %2829 = vmatprep.subr.mxu0 %v2934_v7 }
0x130d   :  { %2830 = vmatpush3.msra.mxu0 %v2499_v52 }
0x130e   :  { %2831 = vmatprep.subr.mxu0 %v2934_v7 }
0x130f   :  { %2832 = vmatpush3.msra.mxu0 %v2498_v53 }
0x1310   :  { %2833 = vmatprep.subr.mxu0 %v2934_v7 }
0x1311   :  { %2834 = vmatpush3.msra.mxu0 %v2497_v54 }
0x1312   :  { %2835 = vmatprep.subr.mxu0 %v2934_v7 }
0x1313   :  { %2836 = vmatpush3.msra.mxu0 %v2496_v55 }
0x1314   :  { %2837 = vmatprep.subr.mxu0 %v2934_v7 }
0x1315   :  { %2838 = vmatpush3.msra.mxu0 %v2495_v56 }
0x1316   :  { %2839 = vmatprep.subr.mxu0 %v2934_v7 }
0x1317   :  { %2840 = vmatpush3.msra.mxu0 %v2494_v57 }
0x1318   :  { %2841 = vmatprep.subr.mxu0 %v2934_v7 }
0x1319   :  { %2842 = vmatpush3.msra.mxu0 %v2493_v58 }
0x131a   :  { %2843 = vmatprep.subr.mxu0 %v2934_v7 }
0x131b   :  { %2844 = vmatpush3.msra.mxu0 %v2492_v36 }
0x131c   :  { %2845 = vmatprep.subr.mxu0 %v2934_v7 }
0x131d   :  { %2846 = vmatpush3.msra.mxu0 %v2491_v59 }
0x131e   :  { %2847 = vmatprep.subr.mxu0 %v2934_v7 }
0x131f   :  { %2848 = vmatpush3.msra.mxu0 %v2490_v60 }
0x13c0   :  { %v2069_v24 = vpop.f32.mrf.mxu0 }
0x13c1   :  { %v2073_v25 = vadd.f32 %v2069_v24, %v3297_v41  ;;  %v2487_v41 = vld [vmem:[%s3583_s10 + $0x30] sm:$0xff]  ;;  %v2368_v24 = vld [vmem:[%s3590_s16 + $0x18] sm:$0xff] }
0x13c2   :  { %v2805_v23 = vpop.f32.mrf.mxu0  ;;  %2809 = vmatpush3.msra.mxu1 %v2487_v41 }
0x13c3   :  { %v3440_v26 = vadd.f32 %v2524_v22, %v2073_v25  ;;  %2810 = vmatprep.subr.mxu1 %v2934_v7  ;;  %v2367_v25 = vld [vmem:[%s3590_s16 + $0x10] sm:$0xff]  ;;  %v2366_v23 = vld [vmem:[%s3590_s16 + $0x8] sm:$0xff] }
0x13c4   :  { %2811 = vmatpush3.msra.mxu1 %v2486_v33 }
0x13c5   :  { %v2081_v19 = vsel %vm93_vm0, %v3440_v26, 0.0  ;;  %2812 = vmatprep.subr.mxu1 %v2934_v7 }
0x13c6   :  { %2082 = vadd.xlane.f32.xlu1 %v2081_v19  ;;  %2813 = vmatpush3.msra.mxu1 %v2485_v34 }
0x13c7   :  { %2852 = vmatprep.subr.mxu1 %v2934_v7 }
0x144f   :  { %v2083_v27 = vpop.xlane.xlu1 %2082 }
0x1450   :  { %v2084_v28 = vmul.f32 0.03125, %v2083_v27 }
0x1452   :  { %v2085_v29 = vsub.f32 %v3440_v26, %v2084_v28 }
0x1454   :  { %v2086_v30 = vmul.f32 %v2085_v29, %v2085_v29 }
0x1456   :  { %v2087_v31 = vsel %vm93_vm0, %v2086_v30, 0.0  ;;  %v2347_v30 = vld [vmem:[%s3591_s14] sm:$0x1] }
0x1457   :  { %2088 = vadd.xlane.f32.xlu0 %v2087_v31 }
0x14e0   :  { %v2089_v35 = vpop.xlane.xlu0 %2088 }
0x14e1   :  { %v2090_v37 = vmul.f32 0.03125, %v2089_v35 }
0x14e3   :  { %v2091_v38 = vadd.f32 1e-05, %v2090_v37 }
0x14e5   :  { %2926 = vrsqrt.f32 %v2091_v38 }
0x14f2   :  { %v2927_v39 = vpop.eup %2926 }
0x14f3   :  { %v2093_v42 = vmul.f32 %v2927_v39, %v2085_v29 }
0x14f5   :  { %v2100_v44 = vmul.f32 %v2525_v40, %v2093_v42 }
0x14f7   :  { %v2107_v45 = vadd.f32 %v2526_v43, %v2100_v44 }
0x14f9   :  { %2815 = vmatmul.mubr.msk.f32.vlgmr.msra.gmra.mxu1 %vm93_vm0, %v2107_v45 }
0x14fa   :  { %2854 = vmatprep.mubr.msk.f32.mxu1 %vm2935_vm1, %v2934_v7 }
0x15b9   :  { %v2183_v61 = vpop.f32.mrf.mxu1 }
0x15ba   :  { %v2184_v63 = vadd.f32 %v2527_v0, %v2183_v61 }
0x15bb   :  { %v2816_v1 = vpop.f32.mrf.mxu1 }
0x15bc   :  { %v2529_v2 = vmul.f32 -1.702, %v2184_v63 }
0x15be   :  { %v2189_v3 = vmul.f32 1.442695, %v2529_v2 }
0x15c0   :  { %2928 = vpow2.f32 %v2189_v3 }
0x15cd   :  { %v2929_v4 = vpop.eup %2928 }
0x15ce   :  { %v2191_v5 = vadd.f32 1.0, %v2929_v4 }
0x15d0   :  { %2930 = vrcp.f32 %v2191_v5 }
0x15dd   :  { %v2931_v6 = vpop.eup %2930 }
0x15de   :  { %v2194_v62 = vmul.f32 %v2931_v6, %v2184_v63 }
0x15e0   :  { %2850 = vmatmul.mubr.f32.vlgmr.msra.gmra.mxu0 %v2194_v62 }
0x16a0   :  { %v2261_v9 = vpop.f32.mrf.mxu0 }
0x16a1   :  { %v2265_v10 = vadd.f32 %v2261_v9, %v3440_v26  ;;  %v2365_v26 = vld [vmem:[%s3590_s16] sm:$0xff] }
0x16a2   :  { %v2851_v11 = vpop.f32.mrf.mxu0 }
0x16a3   :  { %v2272_v12 = vadd.f32 %v2530_v8, %v2265_v10 }
0x16a5   :  { %2853 = vmatpush3.msra.mxu1 %v2272_v12 }
0x16a6   :  { %2855 = vmatmul.mubr.msk.f32.vlgmr.msra.gmra.mxu1 %vm209_vm2, %v2273_v13  ;;  %2857 = vmatprep.subr.mxu1 %v2934_v7 }
0x16a7   :  { %2865 = vmatprep.mubr.msk.f32.mxu1 %vm2935_vm1, %v2934_v7  ;;  %2858 = vmatpush3.msra.mxu1 %v2368_v24 }
0x16a8   :  { %2859 = vmatprep.subr.mxu1 %v2934_v7 }
0x16a9   :  { %2860 = vmatpush3.msra.mxu1 %v2367_v25 }
0x16aa   :  { %2861 = vmatprep.subr.mxu1 %v2934_v7 }
0x16ab   :  { %2862 = vmatpush3.msra.mxu1 %v2366_v23 }
0x16ac   :  { %2863 = vmatprep.subr.mxu1 %v2934_v7 }
0x16ad   :  { %2864 = vmatpush3.msra.mxu1 %v2365_v26 }
0x1766   :  { %v2343_v14 = vpop.f32.mrf.mxu1 }
0x1767   :  { %v2350_v15 = vsel %vm2349_vm6, %v2343_v14, 0.0 }
0x1768   :  { %2351 = vadd.xlane.f32.xlu0 %v2350_v15  ;;  %v2856_v16 = vpop.f32.mrf.mxu1 }
0x17f1   :  { %v2352_v17 = vpop.xlane.xlu0 %2351 }
0x17f2   :  { %v2353_v18 = vmul.f32 0.03125, %v2352_v17 }
0x17f4   :  { %v2354_v20 = vsub.f32 %v2343_v14, %v2353_v18 }
0x17f6   :  { %v2355_v21 = vmul.f32 %v2354_v20, %v2354_v20 }
0x17f8   :  { %v2356_v22 = vsel %vm2349_vm6, %v2355_v21, 0.0 }
0x17f9   :  { %2357 = vadd.xlane.f32.xlu1 %v2356_v22 }
0x1882   :  { %v2358_v19 = vpop.xlane.xlu1 %2357 }
0x1883   :  { %v2359_v27 = vmul.f32 0.03125, %v2358_v19 }
0x1885   :  { %v2360_v28 = vadd.f32 1e-05, %v2359_v27 }
0x1887   :  { %2932 = vrsqrt.f32 %v2360_v28 }
0x1894   :  { %v2933_v29 = vpop.eup %2932 }
0x1895   :  { %v2362_v31 = vmul.f32 %v2933_v29, %v2354_v20 }
0x1897   :  { %v2363_v41 = vmul.f32 %v2362_v31, %v2347_v30 }
0x1899   :  { %v2364_v33 = vadd.f32 %v2363_v41, %v2348_v32 }
0x189b   :  { %2866 = vmatmul.mubr.msk.f32.vlgmr.msra.gmra.mxu1 %vm93_vm0, %v2364_v33 }
0x195b   :  { %v2438_v7 = vpop.f32.mrf.mxu1 }
0x195c   :  { %2442 = vst.msk [vmem:[%s3593_s17] sm:$0x1] %vm2349_vm6, %v2438_v7 }
0x195d   :  { %v2867_v34 = vpop.f32.mrf.mxu1 }

// kernel: full_model_forward.3
= control target key start
LH: loop header
LB: loop body
LE: loop exit
PB: predicated region body
PF: predicated region fallthrough
CT: control target
= control target key end

     0   :  { %s6387_s0 = inlined_call_operand.vmem [shape: f32[2,16,48], index: 0, kind: input, shape index: {}]   ;;  %s6388_s1 = inlined_call_operand.vmem [shape: f32[48,32], index: 1, kind: input, shape index: {}]   ;;  %s6389_s2 = inlined_call_operand.vmem [shape: f32[1,32], index: 2, kind: input, shape index: {}]   ;;  %s6390_s3 = inlined_call_operand.vmem [shape: f32[17,32], index: 3, kind: input, shape index: {}]   ;;  %s6391_s4 = inlined_call_operand.vmem [shape: f32[1,32], index: 4, kind: input, shape index: {}]   ;;  %s6392_s5 = inlined_call_operand.vmem [shape: f32[1,32], index: 5, kind: input, shape index: {}]   ;;  %s6393_s6 = inlined_call_operand.vmem [shape: f32[2,1,32], index: 6, kind: input, shape index: {}]   ;;  %s6394_s7 = inlined_call_operand.vmem [shape: f32[2,1,32], index: 7, kind: input, shape index: {}]   ;;  %s6395_s8 = inlined_call_operand.vmem [shape: f32[2,32,96], index: 8, kind: input, shape index: {}]   ;;  %s6396_s9 = inlined_call_operand.vmem [shape: f32[2,1,96], index: 9, kind: input, shape index: {}]   ;;  %s6397_s10 = inlined_call_operand.vmem [shape: f32[2,32,32], index: 10, kind: input, shape index: {}]   ;;  %s6398_s11 = inlined_call_operand.vmem [shape: f32[2,1,32], index: 11, kind: input, shape index: {}]   ;;  %s6399_s12 = inlined_call_operand.vmem [shape: f32[2,1,32], index: 12, kind: input, shape index: {}]   ;;  %s6400_s13 = inlined_call_operand.vmem [shape: f32[2,1,32], index: 13, kind: input, shape index: {}]   ;;  %s6401_s14 = inlined_call_operand.vmem [shape: f32[2,32,128], index: 14, kind: input, shape index: {}]   ;;  %s6402_s15 = inlined_call_operand.vmem [shape: f32[2,1,128], index: 15, kind: input, shape index: {}]   ;;  %s6403_s16 = inlined_call_operand.vmem [shape: f32[2,128,32], index: 16, kind: input, shape index: {}]   ;;  %s6404_s17 = inlined_call_operand.vmem [shape: f32[2,1,32], index: 17, kind: input, shape index: {}]   ;;  %s6405_s18 = inlined_call_operand.vmem [shape: f32[1,32], index: 18, kind: input, shape index: {}]   ;;  %s6406_s19 = inlined_call_operand.vmem [shape: f32[1,32], index: 19, kind: input, shape index: {}]   ;;  %s6407_s20 = inlined_call_operand.vmem [shape: f32[32,32], index: 20, kind: input, shape index: {}]   ;;  %s6408_s21 = inlined_call_operand.vmem [shape: f32[2,16,32], index: 21, kind: output, shape index: {}]  }
   0x1   :  { %6434 = sst [smem:[#allocation2_spill]] %s6387_s0 }
   0x2   :  { %6435 = sst [smem:[#allocation3_spill]] %s6388_s1 }
   0x3   :  { %6436 = sst [smem:[#allocation4_spill]] %s6389_s2  ;;  %s5272_s2 = smov 0  }
   0x4   :  { %6437 = sst [smem:[#allocation5_spill]] %s6390_s3 }
   0x5   :  { %6438 = sst [smem:[#allocation6_spill]] %s6391_s4 }
   0x6   :  { %6439 = sst [smem:[#allocation7_spill]] %s6392_s5 }
   0x7 LB: > { %s4139_s25 = sadd.s32 4294967295, %s5144_s2   ;;  %p4143_p0 = scmp.ge.s32.totalorder %s5144_s2, 1  ;;  %s5144_s2 = sphi %s5272_s2, %s31_s2  }
   0x8   : > { %p587_p1 = scmp.lt.s32.totalorder %s5144_s2, 3 }
   0xa   : > { %p588_p2 = pnand %p4143_p0, %p587_p1 }
   0xb   : > { %s6440_s3 = sld [smem:[#allocation3_spill]] (!%p588_p2)  ;;  %p647_p3 = scmp.lt.s32.totalorder (!%p588_p2), %s4139_s25, 1 }
   0xc   : > { %591 = sbr.rel (%p588_p2) target bundleno = 6719 (0x1a3f), region = 104  ;;  %s6441_s24 = sld [smem:[#allocation2_spill]] (!%p588_p2) }
   0xd   : > { %s6442_s5 = sld [smem:[#allocation5_spill]] (!%p588_p2)  ;;  %s5148_s0 = smov (!%p588_p2), 96  }
   0xe   : > { %s6444_s30 = sld [smem:[#allocation6_spill]] (!%p588_p2)  ;;  %s6418_s4 = smov (!%p588_p2), 64  }
   0xf   : > { %s5151_s23 = smov (!%p588_p2), 120   ;;  %s6424_s1 = smov (!%p588_p2), 112  }
  0x10   : > { %s6426_s27 = smov (!%p588_p2), 80   ;;  %s6422_s28 = smov (!%p588_p2), 72  }
  0x11   : > { %v667_v0 = vld [vmem:[%s6440_s3 + $0x28] sm:$0xff]  ;;  %v666_v1 = vld [vmem:[%s6440_s3 + $0x20] sm:$0xff]  ;;  %v665_v2 = vld [vmem:[%s6440_s3 + $0x18] sm:$0xff]  ;;  %s6459_s25 = smov (!%p647_p3, %s4139_s25), 1  ;;  %vm668_vm0 = vcmask 392192   ;;  %vm761_vm1 = vcmask 253952  }
  0x12   : > { %4506 = vmatprep.subr.mxu1 %v667_v0  ;;  %v664_v3 = vld [vmem:[%s6440_s3 + $0x10] sm:$0xff]  ;;  %s6411_s22 = sshll.u32 %s6459_s25, 4  ;;  %v663_v4 = vld [vmem:[%s6440_s3 + $0x8] sm:$0xff]  ;;  %v662_v6 = vld [vmem:[%s6440_s3] sm:$0xff]  ;;  %vm754_vm2 = vcmask 261120   ;;  %vm5147_vm3 = vmmov 0  }
  0x13   : > { %4507 = vmatpush3.msra.mxu1 %v667_v0  ;;  %s651_s26 = scalar_lea.vmem %s6441_s24, %s6411_s22  ;;  %v661_v8 = vld [vmem:[%s6442_s5 + $0x10] sm:$0x1]  ;;  %s6443_s24 = sld [smem:[#allocation4_spill]]  ;;  %v659_v13 = vld [vmem:[%s6442_s5] sm:$0xff]  ;;  %v660_v14 = vld [vmem:[%s6442_s5 + $0x8] sm:$0xff]  ;;  %vm1011_vm4 = vcmask 64512  }
  0x14   : > { %4508 = vmatprep.subr.mxu1 %v666_v1  ;;  %v657_v5 = vld [vmem:[%s651_s26] sm:$0xff]  ;;  %v658_v7 = vld [vmem:[%s651_s26 + $0x8] sm:$0xff]  ;;  %vm1107_vm5 = vcmask 138240   ;;  %vm1114_vm6 = vcmask 131072   ;;  %vm1159_vm7 = vcmask 1040384   ;;  %s6416_s26 = smov 56  }
  0x15   : > { %4509 = vmatpush3.msra.mxu1 %v666_v1  ;;  %4518 = vmatprep.mubr.msk.f32.mxu1 %vm668_vm0, %v657_v5  ;;  %v4150_v45 = vld [vmem:[%s6444_s30] ss:$0 sm:$0xff]  ;;  %s5150_s30 = smov 88   ;;  %s6414_s29 = smov 48   ;;  %vm1998_vm8 = vcmask 130048   ;;  %vm2002_vm9 = vcmask 195584  }
  0x16   : > { %4510 = vmatprep.subr.mxu1 %v665_v2  ;;  %s6412_s22 = smov 40  }
  0x17   : > { %4511 = vmatpush3.msra.mxu1 %v665_v2 }
  0x18   : > { %4512 = vmatprep.subr.mxu1 %v664_v3 }
  0x19   : > { %4513 = vmatpush3.msra.mxu1 %v664_v3  ;;  %v750_v9 = vld [vmem:[%s6443_s24] sm:$0x1]  ;;  %s6445_s24 = sld [smem:[#allocation7_spill]] }
  0x1a   : > { %4514 = vmatprep.subr.mxu1 %v663_v4  ;;  %v751_v10 = vadd.f32 %v750_v9, %v661_v8 }
  0x1b   : > { %4515 = vmatpush3.msra.mxu1 %v663_v4 }
  0x1c   : > { %4516 = vmatprep.subr.mxu1 %v662_v6  ;;  %v762_v11 = vsel %vm761_vm1, %v751_v10, 0.0 }
  0x1d   : > { %4517 = vmatpush3.msra.mxu1 %v662_v6  ;;  %763 = vadd.xlane.f32.xlu1 %v762_v11 }
  0x1e   : > { %4519 = vmatmul.mubr.msk.f32.vlgmr.msra.gmra.mxu1 %vm668_vm0, %v658_v7 }
  0x1f   : > { %v4151_v47 = vld [vmem:[%s6445_s24] ss:$0 sm:$0xff]  ;;  %s6420_s24 = smov 104  }
  0xa6   : > { %v764_v20 = vpop.xlane.xlu1 %763 }
  0xa7   : > { %v768_v21 = vmul.f32 0.03125, %v764_v20 }
  0xa9   : > { %v771_v24 = vsub.f32 %v751_v10, %v768_v21 }
  0xab   : > { %v774_v29 = vmul.f32 %v771_v24, %v771_v24 }
  0xad   : > { %v781_v32 = vsel %vm761_vm1, %v774_v29, 0.0  ;;  %v4153_v29 = vld [vmem:[%s6394_s7] ss:$0 sm:$0xff] }
  0xde   : > { %v4520_v12 = vpop.f32.mrf.mxu1 }
  0xdf   : > { %v747_v17 = vadd.f32 %v4520_v12, %v660_v14  ;;  %v819_v12 = vld [vmem:[%s6395_s8 + $0x18] sm:$0xff]  ;;  %v818_v14 = vld [vmem:[%s6395_s8 + $0x10] sm:$0xff] }
  0xe0   : > { %v741_v15 = vpop.f32.mrf.mxu1 }
  0xe1   : > { %v742_v16 = vadd.f32 %v741_v15, %v659_v13  ;;  %v758_v19 = vsel %vm754_vm2, %v747_v17, 0.0  ;;  %v5146_v13 = vmov 0.0   ;;  %v817_v15 = vld [vmem:[%s6395_s8 + $0x8] sm:$0xff] }
  0xe2   : > { %4521 = vmatprep.subr.mxu1 %v5146_v13  ;;  %4529 = vmatprep.mubr.msk.f32.mxu1 %vm5147_vm3, %v5146_v13 }
  0xe3   : > { %v755_v18 = vsel %vm754_vm2, %v742_v16, 0.0  ;;  %4522 = vmatpush3.msra.mxu1 %v819_v12  ;;  %4553 = vmatprep.subr.mxu0 %v5146_v13 }
  0xe4   : > { %756 = vadd.xlane.f32.xlu0 %v755_v18  ;;  %4523 = vmatprep.subr.mxu1 %v5146_v13 }
  0xe5   : > { %4559 = vmatprep.mubr.msk.f32.mxu0 %vm5147_vm3, %v5146_v13  ;;  %4524 = vmatpush3.msra.mxu1 %v818_v14 }
  0xe6   : > { %4525 = vmatprep.subr.mxu1 %v5146_v13 }
  0xe7   : > { %4526 = vmatpush3.msra.mxu1 %v817_v15 }
  0xe8   : > { %759 = vadd.xlane.f32.xlu0 %v758_v19  ;;  %4527 = vmatprep.subr.mxu1 %v5146_v13 }
 0x16d   : > { %v757_v22 = vpop.xlane.xlu0 %756 }
 0x16e   : > { %v766_v23 = vmul.f32 0.03125, %v757_v22 }
 0x170   : > { %v769_v25 = vsub.f32 %v742_v16, %v766_v23  ;;  %v816_v16 = vld [vmem:[%s6395_s8] sm:$0xff] }
 0x171   : > { %v760_v26 = vpop.xlane.xlu0 %759  ;;  %4528 = vmatpush3.msra.mxu1 %v816_v16 }
 0x172   : > { %v767_v27 = vmul.f32 0.03125, %v760_v26  ;;  %v772_v28 = vmul.f32 %v769_v25, %v769_v25  ;;  %4538 = vmatprep.subr.mxu1 %v5146_v13 }
 0x174   : > { %v770_v30 = vsub.f32 %v747_v17, %v767_v27  ;;  %v775_v31 = vsel %vm754_vm2, %v772_v28, 0.0  ;;  %v4152_v27 = vld [vmem:[%s6393_s6] ss:$0 sm:$0xff] }
 0x175   : > { %776 = vadd.xlane.f32.xlu1 %v775_v31 }
 0x176   : > { %v773_v33 = vmul.f32 %v770_v30, %v770_v30 }
 0x178   : > { %v778_v34 = vsel %vm754_vm2, %v773_v33, 0.0 }
 0x179   : > { %782 = vadd.xlane.f32.xlu1 %v781_v32  ;;  %779 = vadd.xlane.f32.xlu0 %v778_v34 }
 0x1fe   : > { %v777_v35 = vpop.xlane.xlu1 %776 }
 0x1ff   : > { %v784_v36 = vmul.f32 0.03125, %v777_v35 }
 0x201   : > { %v787_v37 = vadd.f32 1e-05, %v784_v36 }
 0x202   : > { %v783_v38 = vpop.xlane.xlu1 %782  ;;  %v780_v39 = vpop.xlane.xlu0 %779 }
 0x203   : > { %4980 = vrsqrt.f32 %v787_v37  ;;  %v786_v40 = vmul.f32 0.03125, %v783_v38  ;;  %v785_v41 = vmul.f32 0.03125, %v780_v39 }
 0x205   : > { %v789_v42 = vadd.f32 1e-05, %v786_v40  ;;  %v788_v43 = vadd.f32 1e-05, %v785_v41 }
 0x207   : > { %4982 = vrsqrt.f32 %v789_v42  ;;  %v4154_v42 = vld [vmem:[%s6396_s9] ss:$0 sm:$0xff] }
 0x208   : > { %4984 = vrsqrt.f32 %v788_v43 }
 0x210   : > { %v4981_v44 = vpop.eup %4980 }
 0x211   : > { %v793_v46 = vmul.f32 %v4981_v44, %v769_v25 }
 0x213   : > { %v802_v48 = vmul.f32 %v4150_v45, %v793_v46 }
 0x214   : > { %v4983_v49 = vpop.eup %4982 }
 0x215   : > { %v4985_v50 = vpop.eup %4984  ;;  %v5330_v51 = vadd.f32 %v4151_v47, %v802_v48  ;;  %v795_v52 = vmul.f32 %v4983_v49, %v771_v24 }
 0x216   : > { %v794_v53 = vmul.f32 %v4985_v50, %v770_v30 }
 0x217   : > { %v850_v54 = vsel %vm754_vm2, %v5330_v51, 0.0  ;;  %v804_v55 = vmul.f32 %v4150_v45, %v795_v52 }
 0x218   : > { %851 = vadd.xlane.f32.xlu0 %v850_v54  ;;  %v803_v56 = vmul.f32 %v4150_v45, %v794_v53 }
 0x219   : > { %v5334_v57 = vadd.f32 %v4151_v47, %v804_v55 }
 0x21a   : > { %v5336_v58 = vadd.f32 %v4151_v47, %v803_v56 }
 0x21b   : > { %v856_v59 = vsel %vm761_vm1, %v5334_v57, 0.0 }
 0x21c   : > { %857 = vadd.xlane.f32.xlu0 %v856_v59  ;;  %v853_v60 = vsel %vm754_vm2, %v5336_v58, 0.0 }
 0x21d   : > { %854 = vadd.xlane.f32.xlu1 %v853_v60 }
 0x2a1   : > { %v852_v61 = vpop.xlane.xlu0 %851 }
 0x2a2   : > { %v859_v62 = vmul.f32 0.03125, %v852_v61 }
 0x2a4   : > { %v862_v63 = vsub.f32 %v5330_v51, %v859_v62 }
 0x2a5   : > { %v858_v0 = vpop.xlane.xlu0 %857 }
 0x2a6   : > { %v855_v1 = vpop.xlane.xlu1 %854  ;;  %v861_v2 = vmul.f32 0.03125, %v858_v0  ;;  %v865_v3 = vmul.f32 %v862_v63, %v862_v63 }
 0x2a7   : > { %v860_v4 = vmul.f32 0.03125, %v855_v1 }
 0x2a8   : > { %v864_v5 = vsub.f32 %v5334_v57, %v861_v2  ;;  %v868_v6 = vsel %vm754_vm2, %v865_v3, 0.0 }
 0x2a9   : > { %v863_v7 = vsub.f32 %v5336_v58, %v860_v4  ;;  %869 = vadd.xlane.f32.xlu1 %v868_v6 }
 0x2aa   : > { %v867_v8 = vmul.f32 %v864_v5, %v864_v5 }
 0x2ab   : > { %v866_v9 = vmul.f32 %v863_v7, %v863_v7 }
 0x2ac   : > { %v874_v10 = vsel %vm761_vm1, %v867_v8, 0.0 }
 0x2ad   : > { %v871_v11 = vsel %vm754_vm2, %v866_v9, 0.0  ;;  %875 = vadd.xlane.f32.xlu1 %v874_v10 }
 0x2ae   : > { %872 = vadd.xlane.f32.xlu0 %v871_v11 }
 0x332   : > { %v870_v17 = vpop.xlane.xlu1 %869 }
 0x333   : > { %v877_v18 = vmul.f32 0.03125, %v870_v17 }
 0x335   : > { %v880_v19 = vadd.f32 1e-05, %v877_v18 }
 0x336   : > { %v876_v20 = vpop.xlane.xlu1 %875 }
 0x337   : > { %4986 = vrsqrt.f32 %v880_v19  ;;  %v879_v21 = vmul.f32 0.03125, %v876_v20  ;;  %v873_v22 = vpop.xlane.xlu0 %872 }
 0x338   : > { %v878_v23 = vmul.f32 0.03125, %v873_v22 }
 0x339   : > { %v882_v24 = vadd.f32 1e-05, %v879_v21 }
 0x33a   : > { %v881_v25 = vadd.f32 1e-05, %v878_v23 }
 0x33b   : > { %4988 = vrsqrt.f32 %v882_v24 }
 0x33c   : > { %4990 = vrsqrt.f32 %v881_v25 }
 0x344   : > { %v4987_v26 = vpop.eup %4986 }
 0x345   : > { %v886_v28 = vmul.f32 %v4987_v26, %v862_v63 }
 0x347   : > { %v895_v30 = vmul.f32 %v4152_v27, %v886_v28 }
 0x348   : > { %v4989_v31 = vpop.eup %4988 }
 0x349   : > { %v4991_v32 = vpop.eup %4990  ;;  %v904_v33 = vadd.f32 %v4153_v29, %v895_v30  ;;  %v888_v35 = vmul.f32 %v4989_v31, %v864_v5 }
 0x34a   : > { %v887_v34 = vmul.f32 %v4991_v32, %v863_v7 }
 0x34b   : > { %4530 = vmatmul.mubr.msk.f32.vlgmr.msra.gmra.mxu1 %vm754_vm2, %v904_v33  ;;  %v897_v38 = vmul.f32 %v4152_v27, %v888_v35 }
 0x34c   : > { %4532 = vmatprep.mubr.msk.f32.mxu1 %vm5147_vm3, %v5146_v13  ;;  %v896_v36 = vmul.f32 %v4152_v27, %v887_v34 }
 0x34d   : > { %v906_v39 = vadd.f32 %v4153_v29, %v897_v38 }
 0x34e   : > { %v905_v37 = vadd.f32 %v4153_v29, %v896_v36 }
 0x350   : > { %4533 = vmatmul.mubr.msk.f32.gmra.mxu1 %vm754_vm2, %v905_v37 }
 0x351   : > { %4535 = vmatprep.mubr.msk.f32.mxu1 %vm5147_vm3, %v5146_v13 }
 0x354   : > { %4536 = vmatmul.mubr.msk.f32.gmra.mxu1 %vm754_vm2, %v906_v39 }
 0x355   : > { %4544 = vmatprep.mubr.msk.f32.mxu1 %vm5147_vm3, %v5146_v13 }
 0x40b   : > { %v988_v40 = vpop.f32.mrf.mxu1 }
 0x40c   : > { %v5392_v47 = vadd.f32 %v4154_v42, %v988_v40 }
 0x40d   : > { %v4531_v41 = vpop.f32.mrf.mxu1 }
 0x410   : > { %v993_v43 = vpop.f32.mrf.mxu1 }
 0x411   : > { %v5388_v44 = vadd.f32 %v4154_v42, %v993_v43 }
 0x412   : > { %v4534_v45 = vpop.f32.mrf.mxu1 }
 0x413   : > { %1007 = vrot.lane.b32.xlu1 %v5388_v44, %s5148_s0 }
 0x414   : > { %v998_v46 = vpop.f32.mrf.mxu1 }
 0x415   : > { %v5394_v48 = vadd.f32 %v4154_v42, %v998_v46 }
 0x416   : > { %v4537_v49 = vpop.f32.mrf.mxu1 }
 0x417   : > { %1005 = vrot.lane.b32.xlu1 %v5392_v47, %s5148_s0  ;;  %1009 = vrot.lane.b32.xlu0 %v5394_v48, %s5148_s0 }
 0x485   : > { %v1008_v52 = vpop.permute.xlu1 %1007 }
 0x489   : > { %v1010_v50 = vpop.permute.xlu0 %1009  ;;  %v1006_v53 = vpop.permute.xlu1 %1005 }
 0x48a   : > { %4539 = vmatpush3.xpose.msk.msra.mxu1 %vm1011_vm4, %v1010_v50 }
 0x48b   : > { %4540 = vmatprep.subr.mxu1 %v5146_v13 }
 0x48e   : > { %4541 = vmatpush3.xpose.msk.msra.mxu1 %vm1011_vm4, %v1008_v52 }
 0x48f   : > { %4542 = vmatprep.subr.mxu1 %v5146_v13 }
 0x492   : > { %4543 = vmatpush3.xpose.msk.msra.mxu1 %vm1011_vm4, %v1006_v53 }
 0x493   : > { %4583 = vmatprep.subr.mxu1 %v5146_v13 }
 0x495   : > { %4545 = vmatmul.mubr.msk.f32.vlgmr.msra.gmra.mxu1 %vm1011_vm4, %v5392_v47 }
 0x496   : > { %4547 = vmatprep.mubr.msk.f32.mxu1 %vm5147_vm3, %v5146_v13 }
 0x499   : > { %4548 = vmatmul.mubr.msk.f32.gmra.mxu1 %vm1011_vm4, %v5388_v44 }
 0x49a   : > { %4550 = vmatprep.mubr.msk.f32.mxu1 %vm5147_vm3, %v5146_v13 }
 0x49d   : > { %4551 = vmatmul.mubr.msk.f32.gmra.mxu1 %vm1011_vm4, %v5394_v48 }
 0x49e   : > { %4589 = vmatprep.mubr.msk.f32.mxu1 %vm5147_vm3, %v5146_v13 }
 0x555   : > { %v1090_v54 = vpop.f32.mrf.mxu1 }
 0x556   : > { %v1104_v55 = vmul.f32 0.35355338, %v1090_v54 }
 0x557   : > { %v4546_v56 = vpop.f32.mrf.mxu1 }
 0x558   : > { %v1108_v59 = vsel %vm1107_vm5, %v1104_v55, -inf }
 0x559   : > { %1109 = vmax.xlane.f32.xlu1 %v1108_v59  ;;  %v1095_v60 = vpop.f32.mrf.mxu1 }
 0x55a   : > { %v1105_v61 = vmul.f32 0.35355338, %v1095_v60 }
 0x55b   : > { %v4549_v62 = vpop.f32.mrf.mxu1 }
 0x55c   : > { %v1111_v63 = vsel %vm1107_vm5, %v1105_v61, -inf }
 0x55d   : > { %1112 = vmax.xlane.f32.xlu0 %v1111_v63  ;;  %v1100_v0 = vpop.f32.mrf.mxu1 }
 0x55e   : > { %v1106_v1 = vmul.f32 0.35355338, %v1100_v0 }
 0x55f   : > { %v4552_v2 = vpop.f32.mrf.mxu1 }
 0x560   : > { %v1115_v3 = vsel %vm1114_vm6, %v1106_v1, -inf }
 0x561   : > { %1116 = vmax.xlane.f32.xlu0 %v1115_v3 }
 0x56a   : > { %1146 = vrot.lane.b32.xlu1 %v5394_v48, %s6418_s4 }
 0x56e   : > { %1142 = vrot.lane.b32.xlu1 %v5392_v47, %s6418_s4 }
 0x572   : > { %1252 = vrot.lane.b32.xlu1 %v5394_v48, %s5150_s30 }
 0x576   : > { %1250 = vrot.lane.b32.xlu1 %v5388_v44, %s5150_s30 }
 0x5e2   : > { %v1110_v4 = vpop.xlane.xlu1 %1109 }
 0x5e3   : > { %v1118_v5 = vsub.f32 %v1104_v55, %v1110_v4 }
 0x5e5   : > { %v1121_v6 = vmul.f32 1.442695, %v1118_v5 }
 0x5e6   : > { %v1147_v7 = vpop.permute.xlu1 %1146  ;;  %v1113_v8 = vpop.xlane.xlu0 %1112 }
 0x5e7   : > { %4992 = vpow2.f32 %v1121_v6  ;;  %v1119_v9 = vsub.f32 %v1105_v61, %v1113_v8  ;;  %4554 = vmatpush3.msk.msra.mxu0 %vm1159_vm7, %v1147_v7 }
 0x5e8   : > { %4555 = vmatprep.subr.mxu0 %v5146_v13 }
 0x5e9   : > { %v1123_v10 = vmul.f32 1.442695, %v1119_v9 }
 0x5ea   : > { %v1117_v16 = vpop.xlane.xlu0 %1116  ;;  %v1143_v21 = vpop.permute.xlu1 %1142 }
 0x5eb   : > { %4994 = vpow2.f32 %v1123_v10  ;;  %v1120_v17 = vsub.f32 %v1106_v1, %v1117_v16 }
 0x5ed   : > { %v1125_v18 = vmul.f32 1.442695, %v1120_v17 }
 0x5ee   : > { %v1253_v22 = vpop.permute.xlu1 %1252 }
 0x5ef   : > { %4996 = vpow2.f32 %v1125_v18 }
 0x5f2   : > { %v1251_v23 = vpop.permute.xlu1 %1250 }
 0x5f4   : > { %v4993_v11 = vpop.eup %4992 }
 0x5f5   : > { %v1127_v12 = vsel %vm1107_vm5, %v4993_v11, 0.0 }
 0x5f6   : > { %1128 = vadd.xlane.f32.xlu0 %v1127_v12 }
 0x5f8   : > { %v4995_v14 = vpop.eup %4994 }
 0x5f9   : > { %v1130_v15 = vsel %vm1107_vm5, %v4995_v14, 0.0 }
 0x5fa   : > { %1131 = vadd.xlane.f32.xlu1 %v1130_v15 }
 0x5fc   : > { %v4997_v19 = vpop.eup %4996 }
 0x5fd   : > { %v1133_v20 = vsel %vm1114_vm6, %v4997_v19, 0.0 }
 0x60b   : > { %1242 = vrot.lane.b32.xlu1 %v5392_v47, %s5151_s23 }
 0x60c   : > { %1144 = vrot.lane.b32.xlu0 %v5388_v44, %s6418_s4  ;;  %s6428_s4 = smov 24  }
 0x60f   : > { %1244 = vrot.lane.b32.xlu1 %v5388_v44, %s5151_s23 }
 0x613   : > { %1246 = vrot.lane.b32.xlu1 %v5394_v48, %s5151_s23 }
 0x617   : > { %1481 = vrot.lane.b32.xlu1 %v5392_v47, %s6424_s1 }
 0x61b   : > { %1483 = vrot.lane.b32.xlu1 %v5388_v44, %s6424_s1 }
 0x61f   : > { %1485 = vrot.lane.b32.xlu1 %v5394_v48, %s6424_s1  ;;  %s6446_s1 = smov 80  }
 0x623   : > { %1720 = vrot.lane.b32.xlu1 %v5392_v47, %s6420_s24 }
 0x627   : > { %1724 = vrot.lane.b32.xlu1 %v5394_v48, %s6420_s24 }
 0x62b   : > { %1134 = vadd.xlane.f32.xlu0 %v1133_v20 }
 0x641   : > { %1248 = vrot.lane.b32.xlu0 %v5392_v47, %s5150_s30 }
 0x645   : > { %1491 = vrot.lane.b32.xlu0 %v5394_v48, %s6426_s27 }
 0x649   : > { %1489 = vrot.lane.b32.xlu0 %v5388_v44, %s6426_s27 }
 0x64d   : > { %1487 = vrot.lane.b32.xlu0 %v5392_v47, %s6426_s27  ;;  %s6430_s27 = smov 16  }
 0x651   : > { %1730 = vrot.lane.b32.xlu0 %v5394_v48, %s6422_s28 }
 0x655   : > { %1728 = vrot.lane.b32.xlu0 %v5388_v44, %s6422_s28 }
 0x659   : > { %1726 = vrot.lane.b32.xlu0 %v5392_v47, %s6422_s28  ;;  %s6454_s28 = smov 8  }
 0x65d   : > { %1722 = vrot.lane.b32.xlu0 %v5388_v44, %s6420_s24  ;;  %s6450_s24 = smov 64  }
 0x67f   : > { %v1129_v24 = vpop.xlane.xlu0 %1128 }
 0x680   : > { %4998 = vrcp.f32 %v1129_v24 }
 0x683   : > { %v1132_v25 = vpop.xlane.xlu1 %1131  ;;  %v1145_v26 = vpop.permute.xlu0 %1144 }
 0x684   : > { %5000 = vrcp.f32 %v1132_v25  ;;  %4556 = vmatpush3.msra.mxu0 %v1145_v26 }
 0x685   : > { %4557 = vmatprep.subr.mxu0 %v5146_v13 }
 0x686   : > { %4558 = vmatpush3.msra.mxu0 %v1143_v21 }
 0x687   : > { %4568 = vmatprep.subr.mxu0 %v5146_v13  ;;  %v1243_v33 = vpop.permute.xlu1 %1242 }
 0x68b   : > { %v1245_v36 = vpop.permute.xlu1 %1244 }
 0x68d   : > { %v4999_v27 = vpop.eup %4998 }
 0x68e   : > { %v1139_v28 = vmul.f32 %v4999_v27, %v4993_v11 }
 0x68f   : > { %v1247_v39 = vpop.permute.xlu1 %1246 }
 0x690   : > { %4560 = vmatmul.mubr.msk.f32.vlgmr.msra.gmra.mxu0 %vm1107_vm5, %v1139_v28 }
 0x691   : > { %v5001_v29 = vpop.eup %5000  ;;  %4569 = vmatpush3.xpose.msk.msra.mxu0 %vm1011_vm4, %v1253_v22  ;;  %4562 = vmatprep.mubr.msk.f32.mxu0 %vm5147_vm3, %v5146_v13 }
 0x692   : > { %4570 = vmatprep.subr.mxu0 %v5146_v13  ;;  %v1140_v30 = vmul.f32 %v5001_v29, %v4995_v14 }
 0x693   : > { %v1482_v41 = vpop.permute.xlu1 %1481 }
 0x694   : > { %4563 = vmatmul.mubr.msk.f32.gmra.mxu0 %vm1107_vm5, %v1140_v30 }
 0x695   : > { %4571 = vmatpush3.xpose.msk.msra.mxu0 %vm1011_vm4, %v1251_v23  ;;  %4565 = vmatprep.mubr.msk.f32.mxu0 %vm5147_vm3, %v5146_v13 }
 0x696   : > { %4572 = vmatprep.subr.mxu0 %v5146_v13 }
 0x697   : > { %v1484_v43 = vpop.permute.xlu1 %1483 }
 0x69b   : > { %v1486_v46 = vpop.permute.xlu1 %1485 }
 0x69f   : > { %v1721_v50 = vpop.permute.xlu1 %1720 }
 0x6a3   : > { %v1725_v53 = vpop.permute.xlu1 %1724 }
 0x6b4   : > { %v1135_v31 = vpop.xlane.xlu0 %1134 }
 0x6b5   : > { %5002 = vrcp.f32 %v1135_v31 }
 0x6b8   : > { %v1249_v32 = vpop.permute.xlu0 %1248 }
 0x6b9   : > { %4573 = vmatpush3.xpose.msk.msra.mxu0 %vm1011_vm4, %v1249_v32 }
 0x6ba   : > { %4598 = vmatprep.subr.mxu0 %v5146_v13 }
 0x6bc   : > { %v1492_v34 = vpop.permute.xlu0 %1491 }
 0x6c0   : > { %v1490_v38 = vpop.permute.xlu0 %1489 }
 0x6c2   : > { %v5003_v35 = vpop.eup %5002 }
 0x6c3   : > { %v1141_v37 = vmul.f32 %v5003_v35, %v4997_v19 }
 0x6c4   : > { %v1488_v40 = vpop.permute.xlu0 %1487 }
 0x6c5   : > { %4566 = vmatmul.mubr.msk.f32.gmra.mxu0 %vm1107_vm5, %v1141_v37 }
 0x6c6   : > { %4574 = vmatprep.mubr.msk.f32.mxu0 %vm5147_vm3, %v5146_v13 }
 0x6c8   : > { %v1731_v42 = vpop.permute.xlu0 %1730 }
 0x6c9   : > { %4575 = vmatmul.mubr.msk.f32.vlgmr.msra.gmra.mxu0 %vm1011_vm4, %v1243_v33 }
 0x6ca   : > { %4599 = vmatpush3.xpose.msk.msra.mxu0 %vm1011_vm4, %v1492_v34  ;;  %4577 = vmatprep.mubr.msk.f32.mxu0 %vm5147_vm3, %v5146_v13 }
 0x6cb   : > { %4600 = vmatprep.subr.mxu0 %v5146_v13 }
 0x6cc   : > { %v1729_v45 = vpop.permute.xlu0 %1728 }
 0x6cd   : > { %4578 = vmatmul.mubr.msk.f32.gmra.mxu0 %vm1011_vm4, %v1245_v36 }
 0x6ce   : > { %4601 = vmatpush3.xpose.msk.msra.mxu0 %vm1011_vm4, %v1490_v38  ;;  %4580 = vmatprep.mubr.msk.f32.mxu0 %vm5147_vm3, %v5146_v13 }
 0x6cf   : > { %4602 = vmatprep.subr.mxu0 %v5146_v13 }
 0x6d0   : > { %v1727_v49 = vpop.permute.xlu0 %1726 }
 0x6d1   : > { %4581 = vmatmul.mubr.msk.f32.gmra.mxu0 %vm1011_vm4, %v1247_v39 }
 0x6d2   : > { %4603 = vmatpush3.xpose.msk.msra.mxu0 %vm1011_vm4, %v1488_v40  ;;  %4604 = vmatprep.mubr.msk.f32.mxu0 %vm5147_vm3, %v5146_v13 }
 0x6d3   : > { %4628 = vmatprep.subr.mxu0 %v5146_v13 }
 0x6d4   : > { %v1723_v52 = vpop.permute.xlu0 %1722 }
 0x6d5   : > { %4605 = vmatmul.mubr.msk.f32.vlgmr.msra.gmra.mxu0 %vm1011_vm4, %v1482_v41 }
 0x6d6   : > { %4629 = vmatpush3.xpose.msk.msra.mxu0 %vm1011_vm4, %v1731_v42  ;;  %4607 = vmatprep.mubr.msk.f32.mxu0 %vm5147_vm3, %v5146_v13 }
 0x6d7   : > { %4630 = vmatprep.subr.mxu0 %v5146_v13 }
 0x6d9   : > { %4608 = vmatmul.mubr.msk.f32.gmra.mxu0 %vm1011_vm4, %v1484_v43 }
 0x6da   : > { %4631 = vmatpush3.xpose.msk.msra.mxu0 %vm1011_vm4, %v1729_v45  ;;  %4610 = vmatprep.mubr.msk.f32.mxu0 %vm5147_vm3, %v5146_v13 }
 0x6db   : > { %4632 = vmatprep.subr.mxu0 %v5146_v13 }
 0x6dd   : > { %4611 = vmatmul.mubr.msk.f32.gmra.mxu0 %vm1011_vm4, %v1486_v46 }
 0x6de   : > { %4633 = vmatpush3.xpose.msk.msra.mxu0 %vm1011_vm4, %v1727_v49  ;;  %4634 = vmatprep.mubr.msk.f32.mxu0 %vm5147_vm3, %v5146_v13 }
 0x6df   : > { %4658 = vmatprep.subr.mxu0 %v5146_v13 }
 0x6e1   : > { %4635 = vmatmul.mubr.msk.f32.vlgmr.msra.gmra.mxu0 %vm1011_vm4, %v1721_v50 }
 0x6e2   : > { %4637 = vmatprep.mubr.msk.f32.mxu0 %vm5147_vm3, %v5146_v13 }
 0x6e5   : > { %4638 = vmatmul.mubr.msk.f32.gmra.mxu0 %vm1011_vm4, %v1723_v52 }
 0x6e6   : > { %4640 = vmatprep.mubr.msk.f32.mxu0 %vm5147_vm3, %v5146_v13 }
 0x6e9   : > { %4641 = vmatmul.mubr.msk.f32.gmra.mxu0 %vm1011_vm4, %v1725_v53 }
 0x6ea   : > { %4666 = vmatprep.mubr.msk.f32.mxu0 %vm5147_vm3, %v5146_v13 }
 0x750   : > { %v5524_v54 = vpop.f32.mrf.mxu0 }
 0x752   : > { %v4561_v55 = vpop.f32.mrf.mxu0 }
 0x754   : > { %v5526_v56 = vpop.f32.mrf.mxu0 }
 0x756   : > { %v4564_v59 = vpop.f32.mrf.mxu0 }
 0x785   : > { %v5528_v60 = vpop.f32.mrf.mxu0 }
 0x787   : > { %v4567_v61 = vpop.f32.mrf.mxu0 }
 0x789   : > { %v1332_v62 = vpop.f32.mrf.mxu0 }
 0x78a   : > { %v1346_v63 = vmul.f32 0.35355338, %v1332_v62 }
 0x78b   : > { %v4576_v0 = vpop.f32.mrf.mxu0 }
 0x78c   : > { %v1349_v1 = vsel %vm1107_vm5, %v1346_v63, -inf }
 0x78d   : > { %1350 = vmax.xlane.f32.xlu0 %v1349_v1  ;;  %v1337_v2 = vpop.f32.mrf.mxu0 }
 0x78e   : > { %v1347_v3 = vmul.f32 0.35355338, %v1337_v2 }
 0x78f   : > { %v4579_v4 = vpop.f32.mrf.mxu0 }
 0x790   : > { %v1352_v5 = vsel %vm1107_vm5, %v1347_v3, -inf }
 0x791   : > { %1353 = vmax.xlane.f32.xlu1 %v1352_v5  ;;  %v1342_v6 = vpop.f32.mrf.mxu0 }
 0x792   : > { %v5532_v7 = vmul.f32 0.35355338, %v1342_v6 }
 0x793   : > { %v4582_v8 = vpop.f32.mrf.mxu0 }
 0x794   : > { %v1355_v9 = vsel %vm1114_vm6, %v5532_v7, -inf }
 0x795   : > { %1356 = vmax.xlane.f32.xlu0 %v1355_v9  ;;  %v1571_v10 = vpop.f32.mrf.mxu0 }
 0x796   : > { %v1585_v11 = vmul.f32 0.35355338, %v1571_v10 }
 0x797   : > { %v4606_v12 = vpop.f32.mrf.mxu0 }
 0x798   : > { %v1588_v14 = vsel %vm1107_vm5, %v1585_v11, -inf }
 0x799   : > { %1589 = vmax.xlane.f32.xlu0 %v1588_v14  ;;  %v1576_v15 = vpop.f32.mrf.mxu0 }
 0x79a   : > { %v5537_v16 = vmul.f32 0.35355338, %v1576_v15 }
 0x79b   : > { %v4609_v17 = vpop.f32.mrf.mxu0 }
 0x79c   : > { %v1591_v18 = vsel %vm1107_vm5, %v5537_v16, -inf }
 0x79d   : > { %1592 = vmax.xlane.f32.xlu0 %v1591_v18  ;;  %v1581_v19 = vpop.f32.mrf.mxu0 }
 0x79e   : > { %v1587_v20 = vmul.f32 0.35355338, %v1581_v19 }
 0x79f   : > { %v4612_v21 = vpop.f32.mrf.mxu0 }
 0x7a0   : > { %v1594_v22 = vsel %vm1114_vm6, %v1587_v20, -inf }
 0x7a1   : > { %1595 = vmax.xlane.f32.xlu1 %v1594_v22  ;;  %v1810_v23 = vpop.f32.mrf.mxu0 }
 0x7a2   : > { %v1824_v24 = vmul.f32 0.35355338, %v1810_v23 }
 0x7a3   : > { %v4636_v25 = vpop.f32.mrf.mxu0 }
 0x7a4   : > { %v1827_v26 = vsel %vm1107_vm5, %v1824_v24, -inf }
 0x7a5   : > { %1828 = vmax.xlane.f32.xlu0 %v1827_v26  ;;  %v1815_v27 = vpop.f32.mrf.mxu0 }
 0x7a6   : > { %v5543_v28 = vmul.f32 0.35355338, %v1815_v27 }
 0x7a7   : > { %v4639_v29 = vpop.f32.mrf.mxu0 }
 0x7a8   : > { %v1830_v30 = vsel %vm1107_vm5, %v5543_v28, -inf }
 0x7a9   : > { %1831 = vmax.xlane.f32.xlu1 %v1830_v30  ;;  %v1820_v31 = vpop.f32.mrf.mxu0 }
 0x7aa   : > { %v1826_v32 = vmul.f32 0.35355338, %v1820_v31 }
 0x7ab   : > { %v4642_v33 = vpop.f32.mrf.mxu0 }
 0x7ac   : > { %v1833_v34 = vsel %vm1114_vm6, %v1826_v32, -inf }
 0x7ad   : > { %1834 = vmax.xlane.f32.xlu0 %v1833_v34 }
 0x7ba   : > { %1386 = vrot.lane.b32.xlu1 %v5394_v48, %s6416_s26 }
 0x7be   : > { %1382 = vrot.lane.b32.xlu1 %v5392_v47, %s6416_s26 }
 0x7c2   : > { %1625 = vrot.lane.b32.xlu1 %v5394_v48, %s6414_s29 }
 0x7c3   : > { %1384 = vrot.lane.b32.xlu0 %v5388_v44, %s6416_s26 }
 0x7c6   : > { %1621 = vrot.lane.b32.xlu1 %v5392_v47, %s6414_s29 }
 0x7c7   : > { %1623 = vrot.lane.b32.xlu0 %v5388_v44, %s6414_s29 }
 0x816   : > { %v1351_v35 = vpop.xlane.xlu0 %1350 }
 0x817   : > { %v1358_v36 = vsub.f32 %v1346_v63, %v1351_v35 }
 0x819   : > { %v1361_v37 = vmul.f32 1.442695, %v1358_v36 }
 0x81a   : > { %v1354_v38 = vpop.xlane.xlu1 %1353 }
 0x81b   : > { %5004 = vpow2.f32 %v1361_v37  ;;  %v1359_v39 = vsub.f32 %v1347_v3, %v1354_v38 }
 0x81d   : > { %v1363_v40 = vmul.f32 1.442695, %v1359_v39 }
 0x81e   : > { %v1357_v41 = vpop.xlane.xlu0 %1356 }
 0x81f   : > { %5006 = vpow2.f32 %v1363_v40 }
 0x822   : > { %v1590_v42 = vpop.xlane.xlu0 %1589 }
 0x823   : > { %v1597_v43 = vsub.f32 %v1585_v11, %v1590_v42 }
 0x825   : > { %v1600_v45 = vmul.f32 1.442695, %v1597_v43 }
 0x826   : > { %v1593_v50 = vpop.xlane.xlu0 %1592 }
 0x827   : > { %5008 = vpow2.f32 %v1600_v45 }
 0x828   : > { %v5560_v46 = vpop.eup %5004 }
 0x829   : > { %v1367_v49 = vsel %vm1107_vm5, %v5560_v46, 0.0 }
 0x82a   : > { %v1596_v52 = vpop.xlane.xlu1 %1595  ;;  %1368 = vadd.xlane.f32.xlu1 %v1367_v49 }
 0x82b   : > { %v1599_v53 = vsub.f32 %v1587_v20, %v1596_v52  ;;  %v1598_v20 = vsub.f32 %v5537_v16, %v1593_v50 }
 0x82c   : > { %v5564_v55 = vpop.eup %5006 }
 0x82d   : > { %v1604_v59 = vmul.f32 1.442695, %v1599_v53  ;;  %v1370_v61 = vsel %vm1107_vm5, %v5564_v55, 0.0  ;;  %v1602_v21 = vmul.f32 1.442695, %v1598_v20 }
 0x82e   : > { %1371 = vadd.xlane.f32.xlu0 %v1370_v61  ;;  %v1829_v62 = vpop.xlane.xlu0 %1828 }
 0x82f   : > { %5010 = vpow2.f32 %v1604_v59  ;;  %v1836_v63 = vsub.f32 %v1824_v24, %v1829_v62 }
 0x831   : > { %v1839_v0 = vmul.f32 1.442695, %v1836_v63 }
 0x832   : > { %v1832_v1 = vpop.xlane.xlu1 %1831 }
 0x833   : > { %5012 = vpow2.f32 %v1839_v0  ;;  %v1837_v22 = vsub.f32 %v5543_v28, %v1832_v1 }
 0x834   : > { %v5568_v2 = vpop.eup %5008 }
 0x835   : > { %v1606_v3 = vsel %vm1107_vm5, %v5568_v2, 0.0  ;;  %v1841_v23 = vmul.f32 1.442695, %v1837_v22 }
 0x836   : > { %v1387_v4 = vpop.permute.xlu1 %1386  ;;  %1607 = vadd.xlane.f32.xlu0 %v1606_v3  ;;  %v1835_v5 = vpop.xlane.xlu0 %1834 }
 0x837   : > { %v1838_v6 = vsub.f32 %v1826_v32, %v1835_v5  ;;  %4584 = vmatpush3.msk.msra.mxu1 %vm1159_vm7, %v1387_v4 }
 0x838   : > { %4585 = vmatprep.subr.mxu1 %v5146_v13 }
 0x839   : > { %v1843_v8 = vmul.f32 1.442695, %v1838_v6 }
 0x83a   : > { %v1385_v9 = vpop.permute.xlu0 %1384  ;;  %v1383_v11 = vpop.permute.xlu1 %1382 }
 0x83b   : > { %5014 = vpow2.f32 %v1843_v8  ;;  %1864 = vrot.lane.b32.xlu1 %v5394_v48, %s6412_s22  ;;  %4586 = vmatpush3.msra.mxu1 %v1385_v9  ;;  %v1360_v48 = vsub.f32 %v5532_v7, %v1357_v41  ;;  %v824_v9 = vld [vmem:[%s6397_s10 + $0x18] sm:$0xff] }
 0x83c   : > { %v5576_v10 = vpop.eup %5010  ;;  %4587 = vmatprep.subr.mxu1 %v5146_v13  ;;  %4659 = vmatpush3.msra.mxu0 %v824_v9 }
 0x83d   : > { %4588 = vmatpush3.msra.mxu1 %v1383_v11  ;;  %v1612_v12 = vsel %vm1114_vm6, %v5576_v10, 0.0  ;;  %v1365_v19 = vmul.f32 1.442695, %v1360_v48  ;;  %4660 = vmatprep.subr.mxu0 %v5146_v13  ;;  %v822_v11 = vld [vmem:[%s6397_s10 + $0x8] sm:$0xff]  ;;  %v821_v48 = vld [vmem:[%s6397_s10] sm:$0xff] }
 0x83e   : > { %1613 = vadd.xlane.f32.xlu0 %v1612_v12  ;;  %4613 = vmatprep.subr.mxu1 %v5146_v13  ;;  %v1626_v28 = vpop.permute.xlu1 %1625  ;;  %v1624_v30 = vpop.permute.xlu0 %1623 }
 0x83f   : > { %5016 = vpow2.f32 %v1365_v19 }
 0x840   : > { %v5582_v14 = vpop.eup %5012  ;;  %5018 = vpow2.f32 %v1602_v21 }
 0x841   : > { %v1845_v15 = vsel %vm1107_vm5, %v5582_v14, 0.0  ;;  %5020 = vpow2.f32 %v1841_v23 }
 0x842   : > { %1846 = vadd.xlane.f32.xlu0 %v1845_v15  ;;  %v1622_v29 = vpop.permute.xlu1 %1621 }
 0x848   : > { %v5587_v17 = vpop.eup %5014 }
 0x849   : > { %v1851_v18 = vsel %vm1114_vm6, %v5587_v17, 0.0 }
 0x84a   : > { %1852 = vadd.xlane.f32.xlu0 %v1851_v18 }
 0x84c   : > { %v5017_v24 = vpop.eup %5016 }
 0x84d   : > { %v1373_v25 = vsel %vm1114_vm6, %v5017_v24, 0.0  ;;  %v5019_v7 = vpop.eup %5018 }
 0x84e   : > { %v1609_v26 = vsel %vm1107_vm5, %v5019_v7, 0.0  ;;  %v5597_v27 = vpop.eup %5020 }
 0x84f   : > { %v1848_v16 = vsel %vm1107_vm5, %v5597_v27, 0.0 }
 0x85f   : > { %1374 = vadd.xlane.f32.xlu1 %v1373_v25 }
 0x860   : > { %1860 = vrot.lane.b32.xlu0 %v5392_v47, %s6412_s22 }
 0x863   : > { %1610 = vadd.xlane.f32.xlu1 %v1609_v26 }
 0x867   : > { %1849 = vadd.xlane.f32.xlu1 %v1848_v16 }
 0x878   : > { %1862 = vrot.lane.b32.xlu1 %v5388_v44, %s6412_s22  ;;  %s6432_s22 = smov 8  }
 0x8b3   : > { %v1369_v31 = vpop.xlane.xlu1 %1368 }
 0x8b4   : > { %5022 = vrcp.f32 %v1369_v31 }
 0x8b7   : > { %v1372_v32 = vpop.xlane.xlu0 %1371  ;;  %v1865_v35 = vpop.permute.xlu1 %1864 }
 0x8b8   : > { %5024 = vrcp.f32 %v1372_v32 }
 0x8bf   : > { %v1608_v36 = vpop.xlane.xlu0 %1607 }
 0x8c1   : > { %v5023_v47 = vpop.eup %5022 }
 0x8c2   : > { %v1379_v33 = vmul.f32 %v5023_v47, %v5560_v46 }
 0x8c4   : > { %4590 = vmatmul.mubr.msk.f32.vlgmr.msra.gmra.mxu1 %vm1107_vm5, %v1379_v33 }
 0x8c5   : > { %v5025_v34 = vpop.eup %5024  ;;  %4614 = vmatpush3.msk.msra.mxu1 %vm1159_vm7, %v1626_v28  ;;  %4592 = vmatprep.mubr.msk.f32.mxu1 %vm5147_vm3, %v5146_v13 }
 0x8c6   : > { %4615 = vmatprep.subr.mxu1 %v5146_v13  ;;  %v1380_v44 = vmul.f32 %v5025_v34, %v5564_v55 }
 0x8c7   : > { %4616 = vmatpush3.msra.mxu1 %v1624_v30  ;;  %v1614_v39 = vpop.xlane.xlu0 %1613 }
 0x8c8   : > { %4617 = vmatprep.subr.mxu1 %v5146_v13  ;;  %4593 = vmatmul.mubr.msk.f32.gmra.mxu1 %vm1107_vm5, %v1380_v44 }
 0x8c9   : > { %4618 = vmatpush3.msra.mxu1 %v1622_v29  ;;  %4595 = vmatprep.mubr.msk.f32.mxu1 %vm5147_vm3, %v5146_v13 }
 0x8ca   : > { %4643 = vmatprep.subr.mxu1 %v5146_v13 }
 0x8cb   : > { %v1847_v40 = vpop.xlane.xlu0 %1846 }
 0x8d3   : > { %v1853_v49 = vpop.xlane.xlu0 %1852 }
 0x8d7   : > { %v1861_v59 = vpop.permute.xlu0 %1860 }
 0x8e8   : > { %v1375_v37 = vpop.xlane.xlu1 %1374 }
 0x8e9   : > { %5026 = vrcp.f32 %v1375_v37 }
 0x8ea   : > { %5028 = vrcp.f32 %v1608_v36 }
 0x8ec   : > { %v1611_v38 = vpop.xlane.xlu1 %1610 }
 0x8ed   : > { %5030 = vrcp.f32 %v1611_v38 }
 0x8ee   : > { %5032 = vrcp.f32 %v1614_v39 }
 0x8ef   : > { %5034 = vrcp.f32 %v1847_v40  ;;  %v4201_v40 = vld [vmem:[%s6398_s11] ss:$0 sm:$0xff] }
 0x8f0   : > { %v1850_v45 = vpop.xlane.xlu1 %1849 }
 0x8f1   : > { %5036 = vrcp.f32 %v1850_v45 }
 0x8f2   : > { %5038 = vrcp.f32 %v1853_v49 }
 0x8f4   : > { %v1863_v52 = vpop.permute.xlu1 %1862 }
 0x8f6   : > { %v5027_v41 = vpop.eup %5026 }
 0x8f7   : > { %v1381_v42 = vmul.f32 %v5027_v41, %v5017_v24  ;;  %v5029_v43 = vpop.eup %5028 }
 0x8f8   : > { %v1618_v46 = vmul.f32 %v5029_v43, %v5568_v2 }
 0x8f9   : > { %4596 = vmatmul.mubr.msk.f32.gmra.mxu1 %vm1107_vm5, %v1381_v42 }
 0x8fa   : > { %4619 = vmatprep.mubr.msk.f32.mxu1 %vm5147_vm3, %v5146_v13  ;;  %v5031_v50 = vpop.eup %5030 }
 0x8fb   : > { %v1619_v53 = vmul.f32 %v5031_v50, %v5019_v7  ;;  %v5033_v55 = vpop.eup %5032 }
 0x8fc   : > { %v1620_v61 = vmul.f32 %v5033_v55, %v5576_v10  ;;  %v5035_v62 = vpop.eup %5034  ;;  %v823_v10 = vld [vmem:[%s6397_s10 + $0x10] sm:$0xff] }
 0x8fd   : > { %4620 = vmatmul.mubr.msk.f32.vlgmr.msra.gmra.mxu1 %vm1107_vm5, %v1618_v46  ;;  %v1857_v63 = vmul.f32 %v5035_v62, %v5582_v14  ;;  %4661 = vmatpush3.msra.mxu0 %v823_v10 }
 0x8fe   : > { %4644 = vmatpush3.msk.msra.mxu1 %vm1159_vm7, %v1865_v35  ;;  %4622 = vmatprep.mubr.msk.f32.mxu1 %vm5147_vm3, %v5146_v13  ;;  %v5037_v0 = vpop.eup %5036 }
 0x8ff   : > { %4645 = vmatprep.subr.mxu1 %v5146_v13  ;;  %v1858_v1 = vmul.f32 %v5037_v0, %v5597_v27  ;;  %v5039_v2 = vpop.eup %5038  ;;  %4662 = vmatprep.subr.mxu0 %v5146_v13 }
 0x900   : > { %4646 = vmatpush3.msra.mxu1 %v1863_v52  ;;  %v1859_v3 = vmul.f32 %v5039_v2, %v5587_v17  ;;  %4663 = vmatpush3.msra.mxu0 %v822_v11 }
 0x901   : > { %4647 = vmatprep.subr.mxu1 %v5146_v13  ;;  %4623 = vmatmul.mubr.msk.f32.gmra.mxu1 %vm1107_vm5, %v1619_v53 }
 0x902   : > { %4648 = vmatpush3.msra.mxu1 %v1861_v59  ;;  %4625 = vmatprep.mubr.msk.f32.mxu1 %vm5147_vm3, %v5146_v13 }
 0x903   : > { %4675 = vmatprep.subr.mxu1 %v5146_v13  ;;  %4664 = vmatprep.subr.mxu0 %v5146_v13 }
 0x904   : > { %4665 = vmatpush3.msra.mxu0 %v821_v48  ;;  %v829_v48 = vld [vmem:[%s6401_s14 + $0x8] sm:$0xff] }
 0x905   : > { %4626 = vmatmul.mubr.msk.f32.gmra.mxu1 %vm1107_vm5, %v1620_v61  ;;  %4692 = vmatprep.subr.mxu0 %v5146_v13 }
 0x906   : > { %4649 = vmatprep.mubr.msk.f32.mxu1 %vm5147_vm3, %v5146_v13 }
 0x909   : > { %4650 = vmatmul.mubr.msk.f32.vlgmr.msra.gmra.mxu1 %vm1107_vm5, %v1857_v63 }
 0x90a   : > { %4652 = vmatprep.mubr.msk.f32.mxu1 %vm5147_vm3, %v5146_v13 }
 0x90d   : > { %4653 = vmatmul.mubr.msk.f32.gmra.mxu1 %vm1107_vm5, %v1858_v1 }
 0x90e   : > { %4655 = vmatprep.mubr.msk.f32.mxu1 %vm5147_vm3, %v5146_v13 }
 0x911   : > { %4656 = vmatmul.mubr.msk.f32.gmra.mxu1 %vm1107_vm5, %v1859_v3 }
 0x912   : > { %4683 = vmatprep.mubr.msk.f32.mxu1 %vm5147_vm3, %v5146_v13 }
 0x984   : > { %v1467_v4 = vpop.f32.mrf.mxu1 }
 0x985   : > { %1962 = vrot.lane.b32.xlu1 %v1467_v4, %s6432_s22 }
 0x986   : > { %v4591_v5 = vpop.f32.mrf.mxu1 }
 0x988   : > { %v1472_v6 = vpop.f32.mrf.mxu1 }
 0x989   : > { %1964 = vrot.lane.b32.xlu0 %v1472_v6, %s6432_s22 }
 0x98a   : > { %v4594_v8 = vpop.f32.mrf.mxu1 }
 0x9b9   : > { %v1477_v12 = vpop.f32.mrf.mxu1 }
 0x9bb   : > { %v4597_v14 = vpop.f32.mrf.mxu1 }
 0x9bc   : > { %v831_v14 = vld [vmem:[%s6401_s14 + $0x18] sm:$0xff] }
 0x9bd   : > { %v1706_v15 = vpop.f32.mrf.mxu1  ;;  %4676 = vmatpush3.msra.mxu1 %v831_v14 }
 0x9be   : > { %1974 = vrot.lane.b32.xlu0 %v1706_v15, %s6430_s27  ;;  %4677 = vmatprep.subr.mxu1 %v5146_v13  ;;  %v830_v15 = vld [vmem:[%s6401_s14 + $0x10] sm:$0xff] }
 0x9bf   : > { %v4621_v17 = vpop.f32.mrf.mxu1  ;;  %4678 = vmatpush3.msra.mxu1 %v830_v15 }
 0x9c0   : > { %4679 = vmatprep.subr.mxu1 %v5146_v13  ;;  %v828_v17 = vld [vmem:[%s6401_s14] sm:$0xff] }
 0x9c1   : > { %v1711_v18 = vpop.f32.mrf.mxu1  ;;  %4680 = vmatpush3.msra.mxu1 %v829_v48 }
 0x9c2   : > { %1976 = vrot.lane.b32.xlu1 %v1711_v18, %s6430_s27  ;;  %4681 = vmatprep.subr.mxu1 %v5146_v13 }
 0x9c3   : > { %v4624_v19 = vpop.f32.mrf.mxu1  ;;  %4682 = vmatpush3.msra.mxu1 %v828_v17 }
 0x9c4   : > { %4733 = vmatprep.subr.mxu1 %v5146_v13 }
 0x9c5   : > { %v1716_v20 = vpop.f32.mrf.mxu1 }
 0x9c7   : > { %v4627_v21 = vpop.f32.mrf.mxu1 }
 0x9c9   : > { %v1945_v22 = vpop.f32.mrf.mxu1 }
 0x9ca   : > { %1986 = vrot.lane.b32.xlu1 %v1945_v22, %s6428_s4 }
 0x9cb   : > { %v4651_v23 = vpop.f32.mrf.mxu1 }
 0x9cd   : > { %v1950_v24 = vpop.f32.mrf.mxu1 }
 0x9ce   : > { %1966 = vrot.lane.b32.xlu1 %v1477_v12, %s6432_s22  ;;  %1988 = vrot.lane.b32.xlu0 %v1950_v24, %s6428_s4  ;;  %s6451_s22 = smov 56  }
 0x9cf   : > { %v4654_v25 = vpop.f32.mrf.mxu1 }
 0x9d1   : > { %v1955_v7 = vpop.f32.mrf.mxu1 }
 0x9d2   : > { %1978 = vrot.lane.b32.xlu0 %v1716_v20, %s6430_s27  ;;  %1990 = vrot.lane.b32.xlu1 %v1955_v7, %s6428_s4  ;;  %s6452_s27 = smov 48   ;;  %s6453_s4 = smov 40  }
 0x9d3   : > { %v4657_v26 = vpop.f32.mrf.mxu1 }
 0x9f7   : > { %v1963_v27 = vpop.permute.xlu1 %1962 }
 0x9f8   : > { %v1995_v30 = vsel %vm1011_vm4, %v5524_v54, %v1963_v27  ;;  %v4202_v27 = vld [vmem:[%s6399_s12] ss:$0 sm:$0xff] }
 0x9fb   : > { %v1965_v16 = vpop.permute.xlu0 %1964 }
 0x9fc   : > { %v1996_v33 = vsel %vm1011_vm4, %v5526_v56, %v1965_v16 }
 0xa30   : > { %v1975_v29 = vpop.permute.xlu0 %1974 }
 0xa31   : > { %v1999_v31 = vsel %vm1998_vm8, %v1995_v30, %v1975_v29 }
 0xa34   : > { %v1977_v28 = vpop.permute.xlu1 %1976 }
 0xa35   : > { %v2000_v34 = vsel %vm1998_vm8, %v1996_v33, %v1977_v28  ;;  %v4203_v28 = vld [vmem:[%s6400_s13] ss:$0 sm:$0xff] }
 0xa3c   : > { %v1987_v32 = vpop.permute.xlu1 %1986 }
 0xa3d   : > { %v2003_v47 = vsel %vm2002_vm9, %v1999_v31, %v1987_v32 }
 0xa3e   : > { %4667 = vmatmul.mubr.msk.f32.vlgmr.msra.gmra.mxu0 %vm754_vm2, %v2003_v47 }
 0xa3f   : > { %4669 = vmatprep.mubr.msk.f32.mxu0 %vm5147_vm3, %v5146_v13 }
 0xa40   : > { %v1967_v44 = vpop.permute.xlu1 %1966  ;;  %v1989_v35 = vpop.permute.xlu0 %1988 }
 0xa41   : > { %v2004_v36 = vsel %vm2002_vm9, %v2000_v34, %v1989_v35  ;;  %v1997_v54 = vsel %vm1011_vm4, %v5528_v60, %v1967_v44 }
 0xa42   : > { %4670 = vmatmul.mubr.msk.f32.gmra.mxu0 %vm754_vm2, %v2004_v36 }
 0xa43   : > { %4672 = vmatprep.mubr.msk.f32.mxu0 %vm5147_vm3, %v5146_v13 }
 0xa44   : > { %v1979_v37 = vpop.permute.xlu0 %1978  ;;  %v1991_v38 = vpop.permute.xlu1 %1990 }
 0xa45   : > { %v2001_v56 = vsel %vm1998_vm8, %v1997_v54, %v1979_v37  ;;  %v848_v54 = vld [vmem:[%s6403_s16 + $0x78] sm:$0xff]  ;;  %v847_v37 = vld [vmem:[%s6403_s16 + $0x70] sm:$0xff] }
 0xa46   : > { %v2005_v39 = vsel %vm2002_vm9, %v2001_v56, %v1991_v38  ;;  %4693 = vmatpush3.msra.mxu0 %v848_v54  ;;  %v846_v38 = vld [vmem:[%s6403_s16 + $0x68] sm:$0xff]  ;;  %v845_v56 = vld [vmem:[%s6403_s16 + $0x60] sm:$0xff] }
 0xa47   : > { %4673 = vmatmul.mubr.msk.f32.gmra.mxu0 %vm754_vm2, %v2005_v39  ;;  %4694 = vmatprep.subr.mxu0 %v5146_v13  ;;  %v844_v39 = vld [vmem:[%s6403_s16 + $0x58] sm:$0xff] }
 0xa48   : > { %4724 = vmatprep.mubr.msk.f32.mxu0 %vm5147_vm3, %v5146_v13  ;;  %4695 = vmatpush3.msra.mxu0 %v847_v37 }
 0xa49   : > { %4696 = vmatprep.subr.mxu0 %v5146_v13 }
 0xa4a   : > { %4697 = vmatpush3.msra.mxu0 %v846_v38 }
 0xa4b   : > { %4698 = vmatprep.subr.mxu0 %v5146_v13 }
 0xa4c   : > { %4699 = vmatpush3.msra.mxu0 %v845_v56 }
 0xa4d   : > { %4700 = vmatprep.subr.mxu0 %v5146_v13 }
 0xa4e   : > { %4701 = vmatpush3.msra.mxu0 %v844_v39 }
 0xa4f   : > { %4702 = vmatprep.subr.mxu0 %v5146_v13 }
 0xafe   : > { %v2081_v41 = vpop.f32.mrf.mxu0 }
 0xaff   : > { %v2095_v42 = vadd.f32 %v2081_v41, %v5330_v51  ;;  %v842_v41 = vld [vmem:[%s6403_s16 + $0x48] sm:$0xff] }
 0xb00   : > { %v4668_v43 = vpop.f32.mrf.mxu0 }
 0xb01   : > { %v5695_v60 = vadd.f32 %v4201_v40, %v2095_v42  ;;  %v841_v42 = vld [vmem:[%s6403_s16 + $0x40] sm:$0xff]  ;;  %v840_v43 = vld [vmem:[%s6403_s16 + $0x38] sm:$0xff] }
 0xb02   : > { %v2086_v45 = vpop.f32.mrf.mxu0 }
 0xb03   : > { %v2096_v46 = vadd.f32 %v2086_v45, %v5336_v58  ;;  %v2107_v49 = vsel %vm754_vm2, %v5695_v60, 0.0  ;;  %v839_v45 = vld [vmem:[%s6403_s16 + $0x30] sm:$0xff] }
 0xb04   : > { %2108 = vadd.xlane.f32.xlu0 %v2107_v49  ;;  %v4671_v50 = vpop.f32.mrf.mxu0  ;;  %v837_v49 = vld [vmem:[%s6403_s16 + $0x20] sm:$0xff] }
 0xb05   : > { %v5700_v52 = vadd.f32 %v4201_v40, %v2096_v46  ;;  %v838_v46 = vld [vmem:[%s6403_s16 + $0x28] sm:$0xff]  ;;  %v836_v50 = vld [vmem:[%s6403_s16 + $0x18] sm:$0xff] }
 0xb07   : > { %v2091_v53 = vpop.f32.mrf.mxu0  ;;  %v2110_v55 = vsel %vm754_vm2, %v5700_v52, 0.0 }
 0xb08   : > { %v2097_v59 = vadd.f32 %v2091_v53, %v5334_v57  ;;  %2111 = vadd.xlane.f32.xlu1 %v2110_v55  ;;  %v835_v53 = vld [vmem:[%s6403_s16 + $0x10] sm:$0xff]  ;;  %v834_v55 = vld [vmem:[%s6403_s16 + $0x8] sm:$0xff] }
 0xb09   : > { %v4674_v51 = vpop.f32.mrf.mxu0 }
 0xb0a   : > { %v5705_v61 = vadd.f32 %v4201_v40, %v2097_v59  ;;  %v843_v40 = vld [vmem:[%s6403_s16 + $0x50] sm:$0xff]  ;;  %v833_v59 = vld [vmem:[%s6403_s16] sm:$0xff] }
 0xb0b   : > { %4703 = vmatpush3.msra.mxu0 %v843_v40  ;;  %v4204_v51 = vld [vmem:[%s6402_s15] ss:$0 sm:$0xff] }
 0xb0c   : > { %v2113_v58 = vsel %vm761_vm1, %v5705_v61, 0.0  ;;  %4704 = vmatprep.subr.mxu0 %v5146_v13 }
 0xb0d   : > { %2114 = vadd.xlane.f32.xlu0 %v2113_v58  ;;  %4705 = vmatpush3.msra.mxu0 %v842_v41 }
 0xb0e   : > { %4706 = vmatprep.subr.mxu0 %v5146_v13 }
 0xb0f   : > { %4707 = vmatpush3.msra.mxu0 %v841_v42 }
 0xb10   : > { %4708 = vmatprep.subr.mxu0 %v5146_v13 }
 0xb11   : > { %4709 = vmatpush3.msra.mxu0 %v840_v43 }
 0xb12   : > { %4710 = vmatprep.subr.mxu0 %v5146_v13 }
 0xb13   : > { %4711 = vmatpush3.msra.mxu0 %v839_v45 }
 0xb14   : > { %4712 = vmatprep.subr.mxu0 %v5146_v13 }
 0xb15   : > { %4713 = vmatpush3.msra.mxu0 %v838_v46 }
 0xb16   : > { %4714 = vmatprep.subr.mxu0 %v5146_v13 }
 0xb17   : > { %4715 = vmatpush3.msra.mxu0 %v837_v49 }
 0xb18   : > { %4716 = vmatprep.subr.mxu0 %v5146_v13 }
 0xb19   : > { %4717 = vmatpush3.msra.mxu0 %v836_v50  ;;  %v4217_v50 = vld [vmem:[%s6395_s8 + $0x38] sm:$0xff] }
 0xb1a   : > { %4718 = vmatprep.subr.mxu0 %v5146_v13 }
 0xb1b   : > { %4719 = vmatpush3.msra.mxu0 %v835_v53  ;;  %v4216_v53 = vld [vmem:[%s6395_s8 + $0x30] sm:$0xff] }
 0xb1c   : > { %4720 = vmatprep.subr.mxu0 %v5146_v13 }
 0xb1d   : > { %4721 = vmatpush3.msra.mxu0 %v834_v55  ;;  %v4215_v55 = vld [vmem:[%s6395_s8 + $0x28] sm:$0xff] }
 0xb1e   : > { %4722 = vmatprep.subr.mxu0 %v5146_v13 }
 0xb1f   : > { %4723 = vmatpush3.msra.mxu0 %v833_v59  ;;  %v4214_v59 = vld [vmem:[%s6395_s8 + $0x20] sm:$0xff] }
 0xb20   : > { %4780 = vmatprep.subr.mxu0 %v5146_v13 }
 0xb8d   : > { %v2109_v62 = vpop.xlane.xlu0 %2108 }
 0xb8e   : > { %v2116_v63 = vmul.f32 0.03125, %v2109_v62 }
 0xb90   : > { %v2119_v0 = vsub.f32 %v5695_v60, %v2116_v63 }
 0xb91   : > { %v2112_v1 = vpop.xlane.xlu1 %2111 }
 0xb92   : > { %v2117_v2 = vmul.f32 0.03125, %v2112_v1  ;;  %v2122_v3 = vmul.f32 %v2119_v0, %v2119_v0 }
 0xb94   : > { %v2120_v4 = vsub.f32 %v5700_v52, %v2117_v2  ;;  %v2125_v5 = vsel %vm754_vm2, %v2122_v3, 0.0 }
 0xb95   : > { %2126 = vadd.xlane.f32.xlu0 %v2125_v5 }
 0xb96   : > { %v2115_v57 = vpop.xlane.xlu0 %2114  ;;  %v2123_v6 = vmul.f32 %v2120_v4, %v2120_v4 }
 0xb97   : > { %v2118_v8 = vmul.f32 0.03125, %v2115_v57 }
 0xb98   : > { %v2128_v9 = vsel %vm754_vm2, %v2123_v6, 0.0 }
 0xb99   : > { %v2121_v10 = vsub.f32 %v5705_v61, %v2118_v8  ;;  %2129 = vadd.xlane.f32.xlu0 %v2128_v9 }
 0xb9b   : > { %v2124_v11 = vmul.f32 %v2121_v10, %v2121_v10 }
 0xb9d   : > { %v2131_v12 = vsel %vm761_vm1, %v2124_v11, 0.0 }
 0xb9e   : > { %2132 = vadd.xlane.f32.xlu1 %v2131_v12 }
 0xc1e   : > { %v2127_v18 = vpop.xlane.xlu0 %2126 }
 0xc1f   : > { %v2134_v19 = vmul.f32 0.03125, %v2127_v18 }
 0xc21   : > { %v2137_v20 = vadd.f32 1e-05, %v2134_v19 }
 0xc22   : > { %v2130_v21 = vpop.xlane.xlu0 %2129 }
 0xc23   : > { %5040 = vrsqrt.f32 %v2137_v20  ;;  %v2135_v22 = vmul.f32 0.03125, %v2130_v21 }
 0xc25   : > { %v2138_v23 = vadd.f32 1e-05, %v2135_v22 }
 0xc27   : > { %5042 = vrsqrt.f32 %v2138_v23  ;;  %v2133_v24 = vpop.xlane.xlu1 %2132 }
 0xc28   : > { %v2136_v25 = vmul.f32 0.03125, %v2133_v24 }
 0xc2a   : > { %v2139_v7 = vadd.f32 1e-05, %v2136_v25  ;;  %v4211_v25 = vld [vmem:[%s6404_s17] ss:$0 sm:$0xff] }
 0xc2c   : > { %5044 = vrsqrt.f32 %v2139_v7 }
 0xc30   : > { %v5041_v26 = vpop.eup %5040 }
 0xc31   : > { %v2143_v16 = vmul.f32 %v5041_v26, %v2119_v0 }
 0xc33   : > { %v2152_v29 = vmul.f32 %v4202_v27, %v2143_v16 }
 0xc34   : > { %v5043_v30 = vpop.eup %5042 }
 0xc35   : > { %v2161_v31 = vadd.f32 %v4203_v28, %v2152_v29  ;;  %v2144_v32 = vmul.f32 %v5043_v30, %v2120_v4 }
 0xc37   : > { %4684 = vmatmul.mubr.msk.f32.vlgmr.msra.gmra.mxu1 %vm754_vm2, %v2161_v31  ;;  %v2153_v47 = vmul.f32 %v4202_v27, %v2144_v32 }
 0xc38   : > { %4686 = vmatprep.mubr.msk.f32.mxu1 %vm5147_vm3, %v5146_v13  ;;  %4734 = vmatpush3.msra.mxu1 %v4217_v50 }
 0xc39   : > { %v5045_v33 = vpop.eup %5044  ;;  %v2162_v34 = vadd.f32 %v4203_v28, %v2153_v47  ;;  %4735 = vmatprep.subr.mxu1 %v5146_v13 }
 0xc3a   : > { %v2145_v44 = vmul.f32 %v5045_v33, %v2121_v10  ;;  %4736 = vmatpush3.msra.mxu1 %v4216_v53 }
 0xc3b   : > { %4687 = vmatmul.mubr.msk.f32.gmra.mxu1 %vm754_vm2, %v2162_v34  ;;  %4737 = vmatprep.subr.mxu1 %v5146_v13 }
 0xc3c   : > { %4689 = vmatprep.mubr.msk.f32.mxu1 %vm5147_vm3, %v5146_v13  ;;  %v2154_v35 = vmul.f32 %v4202_v27, %v2145_v44  ;;  %4738 = vmatpush3.msra.mxu1 %v4215_v55 }
 0xc3d   : > { %4739 = vmatprep.subr.mxu1 %v5146_v13 }
 0xc3e   : > { %v2163_v36 = vadd.f32 %v4203_v28, %v2154_v35  ;;  %4740 = vmatpush3.msra.mxu1 %v4214_v59 }
 0xc3f   : > { %4750 = vmatprep.subr.mxu1 %v5146_v13 }
 0xc40   : > { %4690 = vmatmul.mubr.msk.f32.gmra.mxu1 %vm754_vm2, %v2163_v36 }
 0xc41   : > { %4741 = vmatprep.mubr.msk.f32.mxu1 %vm5147_vm3, %v5146_v13 }
 0xcf7   : > { %v2245_v58 = vpop.f32.mrf.mxu1 }
 0xcf8   : > { %v2246_v62 = vadd.f32 %v4204_v51, %v2245_v58 }
 0xcf9   : > { %v4685_v63 = vpop.f32.mrf.mxu1 }
 0xcfa   : > { %v4208_v0 = vmul.f32 -1.702, %v2246_v62 }
 0xcfb   : > { %v2250_v1 = vpop.f32.mrf.mxu1 }
 0xcfc   : > { %v2265_v2 = vmul.f32 1.442695, %v4208_v0  ;;  %v2251_v3 = vadd.f32 %v4204_v51, %v2250_v1 }
 0xcfd   : > { %v4688_v4 = vpop.f32.mrf.mxu1 }
 0xcfe   : > { %5046 = vpow2.f32 %v2265_v2  ;;  %v4209_v5 = vmul.f32 -1.702, %v2251_v3 }
 0xd00   : > { %v2267_v57 = vmul.f32 1.442695, %v4209_v5  ;;  %v2255_v6 = vpop.f32.mrf.mxu1 }
 0xd01   : > { %v2256_v8 = vadd.f32 %v4204_v51, %v2255_v6 }
 0xd02   : > { %5048 = vpow2.f32 %v2267_v57  ;;  %v4691_v9 = vpop.f32.mrf.mxu1  ;;  %v4248_v57 = vld [vmem:[%s6393_s6 + $0x1] ss:$0 sm:$0xff] }
 0xd03   : > { %v4210_v10 = vmul.f32 -1.702, %v2256_v8 }
 0xd05   : > { %v2269_v11 = vmul.f32 1.442695, %v4210_v10 }
 0xd07   : > { %5050 = vpow2.f32 %v2269_v11 }
 0xd0b   : > { %v5047_v12 = vpop.eup %5046 }
 0xd0c   : > { %v2271_v14 = vadd.f32 1.0, %v5047_v12 }
 0xd0e   : > { %5052 = vrcp.f32 %v2271_v14 }
 0xd0f   : > { %v5049_v15 = vpop.eup %5048 }
 0xd10   : > { %v2272_v48 = vadd.f32 1.0, %v5049_v15 }
 0xd12   : > { %5054 = vrcp.f32 %v2272_v48 }
 0xd14   : > { %v5051_v17 = vpop.eup %5050 }
 0xd15   : > { %v2273_v18 = vadd.f32 1.0, %v5051_v17 }
 0xd17   : > { %5056 = vrcp.f32 %v2273_v18 }
 0xd1b   : > { %v5053_v19 = vpop.eup %5052 }
 0xd1c   : > { %v2280_v20 = vmul.f32 %v5053_v19, %v2246_v62 }
 0xd1e   : > { %4725 = vmatmul.mubr.f32.vlgmr.msra.gmra.mxu0 %v2280_v20 }
 0xd1f   : > { %v5055_v21 = vpop.eup %5054  ;;  %4727 = vmatprep.mubr.msk.f32.mxu0 %vm5147_vm3, %v5146_v13 }
 0xd20   : > { %v2281_v22 = vmul.f32 %v5055_v21, %v2251_v3 }
 0xd22   : > { %4728 = vmatmul.mubr.f32.gmra.mxu0 %v2281_v22  ;;  %v4250_v22 = vld [vmem:[%s6396_s9 + $0x1] ss:$0 sm:$0xff] }
 0xd23   : > { %4730 = vmatprep.mubr.msk.f32.mxu0 %vm5147_vm3, %v5146_v13 }
 0xd24   : > { %v5057_v23 = vpop.eup %5056 }
 0xd25   : > { %v2282_v24 = vmul.f32 %v5057_v23, %v2256_v8  ;;  %v4249_v8 = vld [vmem:[%s6394_s7 + $0x1] ss:$0 sm:$0xff] }
 0xd27   : > { %4731 = vmatmul.mubr.f32.gmra.mxu0 %v2282_v24 }
 0xd28   : > { %4786 = vmatprep.mubr.msk.f32.mxu0 %vm5147_vm3, %v5146_v13 }
 0xdde   : > { %v2349_v7 = vpop.f32.mrf.mxu0 }
 0xddf   : > { %v2363_v26 = vadd.f32 %v2349_v7, %v5695_v60 }
 0xde0   : > { %v4726_v27 = vpop.f32.mrf.mxu0 }
 0xde1   : > { %v5823_v16 = vadd.f32 %v4211_v25, %v2363_v26 }
 0xde2   : > { %v2354_v28 = vpop.f32.mrf.mxu0 }
 0xde3   : > { %v2364_v29 = vadd.f32 %v2354_v28, %v5700_v52  ;;  %v2423_v30 = vsel %vm754_vm2, %v5823_v16, 0.0 }
 0xde4   : > { %2424 = vadd.xlane.f32.xlu0 %v2423_v30  ;;  %v4729_v31 = vpop.f32.mrf.mxu0 }
 0xde5   : > { %v5828_v32 = vadd.f32 %v4211_v25, %v2364_v29 }
 0xde7   : > { %v2359_v47 = vpop.f32.mrf.mxu0  ;;  %v2426_v33 = vsel %vm754_vm2, %v5828_v32, 0.0 }
 0xde8   : > { %v2365_v34 = vadd.f32 %v2359_v47, %v5705_v61  ;;  %2427 = vadd.xlane.f32.xlu1 %v2426_v33 }
 0xde9   : > { %v4732_v60 = vpop.f32.mrf.mxu0 }
 0xdea   : > { %v5833_v44 = vadd.f32 %v4211_v25, %v2365_v34 }
 0xdec   : > { %v2429_v52 = vsel %vm761_vm1, %v5833_v44, 0.0 }
 0xded   : > { %2430 = vadd.xlane.f32.xlu0 %v2429_v52 }
 0xe6d   : > { %v2425_v35 = vpop.xlane.xlu0 %2424 }
 0xe6e   : > { %v2432_v36 = vmul.f32 0.03125, %v2425_v35 }
 0xe70   : > { %v2435_v54 = vsub.f32 %v5823_v16, %v2432_v36 }
 0xe71   : > { %v2428_v37 = vpop.xlane.xlu1 %2427 }
 0xe72   : > { %v2433_v38 = vmul.f32 0.03125, %v2428_v37  ;;  %v2438_v56 = vmul.f32 %v2435_v54, %v2435_v54 }
 0xe74   : > { %v2436_v39 = vsub.f32 %v5828_v32, %v2433_v38  ;;  %v2441_v40 = vsel %vm754_vm2, %v2438_v56, 0.0 }
 0xe75   : > { %2442 = vadd.xlane.f32.xlu1 %v2441_v40 }
 0xe76   : > { %v2431_v61 = vpop.xlane.xlu0 %2430  ;;  %v2439_v41 = vmul.f32 %v2436_v39, %v2436_v39 }
 0xe77   : > { %v2434_v42 = vmul.f32 0.03125, %v2431_v61 }
 0xe78   : > { %v2444_v43 = vsel %vm754_vm2, %v2439_v41, 0.0 }
 0xe79   : > { %v2437_v45 = vsub.f32 %v5833_v44, %v2434_v42  ;;  %2445 = vadd.xlane.f32.xlu0 %v2444_v43 }
 0xe7b   : > { %v2440_v46 = vmul.f32 %v2437_v45, %v2437_v45 }
 0xe7d   : > { %v2447_v49 = vsel %vm761_vm1, %v2440_v46, 0.0 }
 0xe7e   : > { %2448 = vadd.xlane.f32.xlu1 %v2447_v49 }
 0xefe   : > { %v2443_v51 = vpop.xlane.xlu1 %2442 }
 0xeff   : > { %v2450_v58 = vmul.f32 0.03125, %v2443_v51 }
 0xf01   : > { %v2453_v62 = vadd.f32 1e-05, %v2450_v58 }
 0xf02   : > { %v2446_v63 = vpop.xlane.xlu0 %2445 }
 0xf03   : > { %5058 = vrsqrt.f32 %v2453_v62  ;;  %v2451_v0 = vmul.f32 0.03125, %v2446_v63 }
 0xf05   : > { %v2454_v1 = vadd.f32 1e-05, %v2451_v0 }
 0xf07   : > { %5060 = vrsqrt.f32 %v2454_v1  ;;  %v2449_v2 = vpop.xlane.xlu1 %2448 }
 0xf08   : > { %v2452_v3 = vmul.f32 0.03125, %v2449_v2 }
 0xf0a   : > { %v2455_v4 = vadd.f32 1e-05, %v2452_v3 }
 0xf0c   : > { %5062 = vrsqrt.f32 %v2455_v4 }
 0xf10   : > { %v5059_v5 = vpop.eup %5058 }
 0xf11   : > { %v2459_v6 = vmul.f32 %v5059_v5, %v2435_v54 }
 0xf13   : > { %v2468_v9 = vmul.f32 %v4248_v57, %v2459_v6 }
 0xf14   : > { %v5061_v10 = vpop.eup %5060 }
 0xf15   : > { %v2477_v11 = vadd.f32 %v4249_v8, %v2468_v9  ;;  %v2460_v12 = vmul.f32 %v5061_v10, %v2436_v39 }
 0xf17   : > { %4742 = vmatmul.mubr.msk.f32.vlgmr.msra.gmra.mxu1 %vm754_vm2, %v2477_v11  ;;  %v2469_v14 = vmul.f32 %v4248_v57, %v2460_v12 }
 0xf18   : > { %4744 = vmatprep.mubr.msk.f32.mxu1 %vm5147_vm3, %v5146_v13 }
 0xf19   : > { %v5063_v15 = vpop.eup %5062  ;;  %v2478_v48 = vadd.f32 %v4249_v8, %v2469_v14 }
 0xf1a   : > { %v2461_v17 = vmul.f32 %v5063_v15, %v2437_v45 }
 0xf1b   : > { %4745 = vmatmul.mubr.msk.f32.gmra.mxu1 %vm754_vm2, %v2478_v48 }
 0xf1c   : > { %4747 = vmatprep.mubr.msk.f32.mxu1 %vm5147_vm3, %v5146_v13  ;;  %v2470_v18 = vmul.f32 %v4248_v57, %v2461_v17 }
 0xf1e   : > { %v2479_v19 = vadd.f32 %v4249_v8, %v2470_v18 }
 0xf20   : > { %4748 = vmatmul.mubr.msk.f32.gmra.mxu1 %vm754_vm2, %v2479_v19 }
 0xf21   : > { %4756 = vmatprep.mubr.msk.f32.mxu1 %vm5147_vm3, %v5146_v13 }
 0xfd7   : > { %v2561_v20 = vpop.f32.mrf.mxu1 }
 0xfd8   : > { %v5881_v7 = vadd.f32 %v4250_v22, %v2561_v20 }
 0xfd9   : > { %v4743_v21 = vpop.f32.mrf.mxu1 }
 0xfdb   : > { %v2566_v23 = vpop.f32.mrf.mxu1 }
 0xfdc   : > { %v5877_v24 = vadd.f32 %v4250_v22, %v2566_v23 }
 0xfdd   : > { %v4746_v25 = vpop.f32.mrf.mxu1 }
 0xfde   : > { %2580 = vrot.lane.b32.xlu1 %v5877_v24, %s5148_s0 }
 0xfe0   : > { %v2571_v26 = vpop.f32.mrf.mxu1 }
 0xfe1   : > { %v5883_v27 = vadd.f32 %v4250_v22, %v2571_v26 }
 0xfe2   : > { %2578 = vrot.lane.b32.xlu1 %v5881_v7, %s5148_s0  ;;  %v4749_v28 = vpop.f32.mrf.mxu1 }
 0xfe3   : > { %2582 = vrot.lane.b32.xlu0 %v5883_v27, %s5148_s0  ;;  %s6447_s0 = smov 112  }
 0xfe6   : > { %2821 = vrot.lane.b32.xlu1 %v5883_v27, %s5150_s30 }
 0xfe7   : > { %2819 = vrot.lane.b32.xlu0 %v5877_v24, %s5150_s30 }
 0xfea   : > { %2817 = vrot.lane.b32.xlu1 %v5881_v7, %s5150_s30  ;;  %s6448_s30 = smov 72  }
 0xfeb   : > { %2811 = vrot.lane.b32.xlu0 %v5881_v7, %s5151_s23 }
 0xfee   : > { %3060 = vrot.lane.b32.xlu1 %v5883_v27, %s6446_s1 }
 0xfef   : > { %2813 = vrot.lane.b32.xlu0 %v5877_v24, %s5151_s23 }
 0xff2   : > { %3058 = vrot.lane.b32.xlu1 %v5877_v24, %s6446_s1 }
 0xff3   : > { %2815 = vrot.lane.b32.xlu0 %v5883_v27, %s5151_s23  ;;  %s6449_s23 = smov 104  }
 0xff6   : > { %3056 = vrot.lane.b32.xlu1 %v5881_v7, %s6446_s1 }
 0xff7   : > { %3050 = vrot.lane.b32.xlu0 %v5881_v7, %s6447_s0 }
 0xffa   : > { %3299 = vrot.lane.b32.xlu1 %v5883_v27, %s6448_s30 }
 0xffb   : > { %3052 = vrot.lane.b32.xlu0 %v5877_v24, %s6447_s0 }
 0xffe   : > { %3297 = vrot.lane.b32.xlu1 %v5877_v24, %s6448_s30 }
 0xfff   : > { %3054 = vrot.lane.b32.xlu0 %v5883_v27, %s6447_s0 }
0x1002   : > { %3295 = vrot.lane.b32.xlu1 %v5881_v7, %s6448_s30 }
0x1003   : > { %3289 = vrot.lane.b32.xlu0 %v5881_v7, %s6449_s23 }
0x1006   : > { %3291 = vrot.lane.b32.xlu1 %v5877_v24, %s6449_s23 }
0x100a   : > { %2716 = vrot.lane.b32.xlu1 %v5883_v27, %s6450_s24 }
0x1050   : > { %v2581_v29 = vpop.permute.xlu1 %2580 }
0x1054   : > { %v2579_v30 = vpop.permute.xlu1 %2578 }
0x1055   : > { %v2583_v31 = vpop.permute.xlu0 %2582 }
0x1056   : > { %4751 = vmatpush3.xpose.msk.msra.mxu1 %vm1011_vm4, %v2583_v31 }
0x1057   : > { %4752 = vmatprep.subr.mxu1 %v5146_v13 }
0x1058   : > { %v2822_v47 = vpop.permute.xlu1 %2821 }
0x1059   : > { %4781 = vmatpush3.xpose.msk.msra.mxu0 %vm1011_vm4, %v2822_v47  ;;  %v2820_v33 = vpop.permute.xlu0 %2819 }
0x105a   : > { %4753 = vmatpush3.xpose.msk.msra.mxu1 %vm1011_vm4, %v2581_v29  ;;  %4782 = vmatprep.subr.mxu0 %v5146_v13 }
0x105b   : > { %4754 = vmatprep.subr.mxu1 %v5146_v13 }
0x105c   : > { %v2818_v34 = vpop.permute.xlu1 %2817 }
0x105d   : > { %4783 = vmatpush3.xpose.msk.msra.mxu0 %vm1011_vm4, %v2820_v33  ;;  %v2812_v60 = vpop.permute.xlu0 %2811 }
0x105e   : > { %4755 = vmatpush3.xpose.msk.msra.mxu1 %vm1011_vm4, %v2579_v30  ;;  %4784 = vmatprep.subr.mxu0 %v5146_v13 }
0x105f   : > { %4765 = vmatprep.subr.mxu1 %v5146_v13 }
0x1060   : > { %v3061_v52 = vpop.permute.xlu1 %3060 }
0x1061   : > { %4757 = vmatmul.mubr.msk.f32.vlgmr.msra.gmra.mxu1 %vm1011_vm4, %v5881_v7  ;;  %4785 = vmatpush3.xpose.msk.msra.mxu0 %vm1011_vm4, %v2818_v34  ;;  %v2814_v35 = vpop.permute.xlu0 %2813 }
0x1062   : > { %4759 = vmatprep.mubr.msk.f32.mxu1 %vm5147_vm3, %v5146_v13  ;;  %4810 = vmatprep.subr.mxu0 %v5146_v13 }
0x1064   : > { %v3059_v36 = vpop.permute.xlu1 %3058  ;;  %4787 = vmatmul.mubr.msk.f32.vlgmr.msra.gmra.mxu0 %vm1011_vm4, %v2812_v60 }
0x1065   : > { %4760 = vmatmul.mubr.msk.f32.gmra.mxu1 %vm1011_vm4, %v5877_v24  ;;  %4811 = vmatpush3.xpose.msk.msra.mxu0 %vm1011_vm4, %v3061_v52  ;;  %v2816_v54 = vpop.permute.xlu0 %2815 }
0x1066   : > { %4789 = vmatprep.mubr.msk.f32.mxu0 %vm5147_vm3, %v5146_v13  ;;  %4762 = vmatprep.mubr.msk.f32.mxu1 %vm5147_vm3, %v5146_v13 }
0x1067   : > { %4812 = vmatprep.subr.mxu0 %v5146_v13 }
0x1068   : > { %v3057_v37 = vpop.permute.xlu1 %3056  ;;  %4790 = vmatmul.mubr.msk.f32.gmra.mxu0 %vm1011_vm4, %v2814_v35 }
0x1069   : > { %4763 = vmatmul.mubr.msk.f32.gmra.mxu1 %vm1011_vm4, %v5883_v27  ;;  %4813 = vmatpush3.xpose.msk.msra.mxu0 %vm1011_vm4, %v3059_v36  ;;  %v3051_v38 = vpop.permute.xlu0 %3050 }
0x106a   : > { %4792 = vmatprep.mubr.msk.f32.mxu0 %vm5147_vm3, %v5146_v13  ;;  %4814 = vmatprep.subr.mxu0 %v5146_v13 }
0x106b   : > { %4771 = vmatprep.mubr.msk.f32.mxu1 %vm5147_vm3, %v5146_v13 }
0x106c   : > { %v3300_v56 = vpop.permute.xlu1 %3299  ;;  %4793 = vmatmul.mubr.msk.f32.gmra.mxu0 %vm1011_vm4, %v2816_v54 }
0x106d   : > { %4815 = vmatpush3.xpose.msk.msra.mxu0 %vm1011_vm4, %v3057_v37  ;;  %4816 = vmatprep.mubr.msk.f32.mxu0 %vm5147_vm3, %v5146_v13  ;;  %v3053_v39 = vpop.permute.xlu0 %3052 }
0x106e   : > { %4840 = vmatprep.subr.mxu0 %v5146_v13 }
0x1070   : > { %v3298_v40 = vpop.permute.xlu1 %3297  ;;  %4817 = vmatmul.mubr.msk.f32.vlgmr.msra.gmra.mxu0 %vm1011_vm4, %v3051_v38 }
0x1071   : > { %4841 = vmatpush3.xpose.msk.msra.mxu0 %vm1011_vm4, %v3300_v56  ;;  %4819 = vmatprep.mubr.msk.f32.mxu0 %vm5147_vm3, %v5146_v13  ;;  %v3055_v41 = vpop.permute.xlu0 %3054 }
0x1072   : > { %4842 = vmatprep.subr.mxu0 %v5146_v13 }
0x1074   : > { %v3296_v61 = vpop.permute.xlu1 %3295  ;;  %4820 = vmatmul.mubr.msk.f32.gmra.mxu0 %vm1011_vm4, %v3053_v39 }
0x1075   : > { %4843 = vmatpush3.xpose.msk.msra.mxu0 %vm1011_vm4, %v3298_v40  ;;  %4822 = vmatprep.mubr.msk.f32.mxu0 %vm5147_vm3, %v5146_v13  ;;  %v3290_v43 = vpop.permute.xlu0 %3289 }
0x1076   : > { %4844 = vmatprep.subr.mxu0 %v5146_v13 }
0x1078   : > { %v3292_v42 = vpop.permute.xlu1 %3291  ;;  %4823 = vmatmul.mubr.msk.f32.gmra.mxu0 %vm1011_vm4, %v3055_v41 }
0x1079   : > { %4845 = vmatpush3.xpose.msk.msra.mxu0 %vm1011_vm4, %v3296_v61  ;;  %4846 = vmatprep.mubr.msk.f32.mxu0 %vm5147_vm3, %v5146_v13 }
0x107a   : > { %4870 = vmatprep.subr.mxu0 %v5146_v13 }
0x107c   : > { %v2717_v45 = vpop.permute.xlu1 %2716  ;;  %4847 = vmatmul.mubr.msk.f32.vlgmr.msra.gmra.mxu0 %vm1011_vm4, %v3290_v43 }
0x107d   : > { %4766 = vmatpush3.msk.msra.mxu1 %vm1159_vm7, %v2717_v45  ;;  %4849 = vmatprep.mubr.msk.f32.mxu0 %vm5147_vm3, %v5146_v13 }
0x107e   : > { %4767 = vmatprep.subr.mxu1 %v5146_v13 }
0x1080   : > { %4850 = vmatmul.mubr.msk.f32.gmra.mxu0 %vm1011_vm4, %v3292_v42 }
0x1081   : > { %4852 = vmatprep.mubr.msk.f32.mxu0 %vm5147_vm3, %v5146_v13 }
0x1121   : > { %v2662_v46 = vpop.f32.mrf.mxu1 }
0x1122   : > { %v2676_v49 = vmul.f32 0.35355338, %v2662_v46 }
0x1123   : > { %v4758_v50 = vpop.f32.mrf.mxu1 }
0x1124   : > { %v2901_v53 = vpop.f32.mrf.mxu0  ;;  %v2679_v55 = vsel %vm1107_vm5, %v2676_v49, -inf }
0x1125   : > { %v2915_v59 = vmul.f32 0.35355338, %v2901_v53  ;;  %2680 = vmax.xlane.f32.xlu0 %v2679_v55  ;;  %v2667_v51 = vpop.f32.mrf.mxu1 }
0x1126   : > { %v2677_v58 = vmul.f32 0.35355338, %v2667_v51  ;;  %v4788_v62 = vpop.f32.mrf.mxu0 }
0x1127   : > { %v4761_v63 = vpop.f32.mrf.mxu1  ;;  %v2918_v0 = vsel %vm1107_vm5, %v2915_v59, -inf }
0x1128   : > { %v2906_v1 = vpop.f32.mrf.mxu0  ;;  %v2682_v2 = vsel %vm1107_vm5, %v2677_v58, -inf }
0x1129   : > { %v2916_v3 = vmul.f32 0.35355338, %v2906_v1  ;;  %2919 = vmax.xlane.f32.xlu0 %v2918_v0  ;;  %2683 = vmax.xlane.f32.xlu1 %v2682_v2  ;;  %v2672_v4 = vpop.f32.mrf.mxu1 }
0x112a   : > { %v4791_v5 = vpop.f32.mrf.mxu0  ;;  %v2678_v8 = vmul.f32 0.35355338, %v2672_v4 }
0x112b   : > { %v4764_v57 = vpop.f32.mrf.mxu1  ;;  %v2921_v6 = vsel %vm1107_vm5, %v2916_v3, -inf }
0x112c   : > { %v2911_v9 = vpop.f32.mrf.mxu0  ;;  %v2685_v12 = vsel %vm1114_vm6, %v2678_v8, -inf }
0x112d   : > { %2922 = vmax.xlane.f32.xlu0 %v2921_v6  ;;  %v5996_v23 = vmul.f32 0.35355338, %v2911_v9 }
0x112e   : > { %v4794_v10 = vpop.f32.mrf.mxu0 }
0x112f   : > { %v2924_v26 = vsel %vm1114_vm6, %v5996_v23, -inf }
0x1130   : > { %v3140_v11 = vpop.f32.mrf.mxu0 }
0x1131   : > { %2686 = vmax.xlane.f32.xlu0 %v2685_v12  ;;  %v6002_v28 = vmul.f32 0.35355338, %v3140_v11 }
0x1132   : > { %v4818_v14 = vpop.f32.mrf.mxu0 }
0x1133   : > { %v3157_v33 = vsel %vm1107_vm5, %v6002_v28, -inf }
0x1134   : > { %v3145_v15 = vpop.f32.mrf.mxu0 }
0x1135   : > { %v5998_v25 = vmul.f32 0.35355338, %v3145_v15 }
0x1136   : > { %v4821_v48 = vpop.f32.mrf.mxu0 }
0x1137   : > { %v3160_v30 = vsel %vm1107_vm5, %v5998_v25, -inf }
0x1138   : > { %v3150_v17 = vpop.f32.mrf.mxu0 }
0x1139   : > { %v6008_v31 = vmul.f32 0.35355338, %v3150_v17 }
0x113a   : > { %v4824_v18 = vpop.f32.mrf.mxu0  ;;  %2712 = vrot.lane.b32.xlu1 %v5881_v7, %s6450_s24 }
0x113b   : > { %v3163_v60 = vsel %vm1114_vm6, %v6008_v31, -inf }
0x113c   : > { %v3379_v19 = vpop.f32.mrf.mxu0 }
0x113d   : > { %v6004_v29 = vmul.f32 0.35355338, %v3379_v19 }
0x113e   : > { %v4848_v20 = vpop.f32.mrf.mxu0 }
0x113f   : > { %v3396_v47 = vsel %vm1107_vm5, %v6004_v29, -inf }
0x1140   : > { %v3384_v21 = vpop.f32.mrf.mxu0 }
0x1141   : > { %v6014_v34 = vmul.f32 0.35355338, %v3384_v21 }
0x1142   : > { %v4851_v22 = vpop.f32.mrf.mxu0 }
0x1143   : > { %v3399_v52 = vsel %vm1107_vm5, %v6014_v34, -inf }
0x1147   : > { %2714 = vrot.lane.b32.xlu0 %v5877_v24, %s6450_s24  ;;  %s6457_s24 = sshll.u32 %s6459_s25, 4 }
0x1148   : > { %s656_s29 = scalar_lea.vmem %s6408_s21, %s6457_s24 }
0x115e   : > { %2925 = vmax.xlane.f32.xlu1 %v2924_v26 }
0x1162   : > { %3161 = vmax.xlane.f32.xlu1 %v3160_v30 }
0x1166   : > { %3397 = vmax.xlane.f32.xlu1 %v3396_v47  ;;  %3158 = vmax.xlane.f32.xlu0 %v3157_v33 }
0x116a   : > { %3164 = vmax.xlane.f32.xlu0 %v3163_v60 }
0x116e   : > { %3400 = vmax.xlane.f32.xlu0 %v3399_v52 }
0x1177   : > { %2955 = vrot.lane.b32.xlu1 %v5883_v27, %s6451_s22 }
0x1184   : > { %2953 = vrot.lane.b32.xlu0 %v5877_v24, %s6451_s22 }
0x11ae   : > { %v2681_v35 = vpop.xlane.xlu0 %2680 }
0x11af   : > { %v2688_v36 = vsub.f32 %v2676_v49, %v2681_v35 }
0x11b1   : > { %v2691_v54 = vmul.f32 1.442695, %v2688_v36 }
0x11b2   : > { %v2920_v37 = vpop.xlane.xlu0 %2919  ;;  %v2684_v38 = vpop.xlane.xlu1 %2683 }
0x11b3   : > { %5064 = vpow2.f32 %v2691_v54  ;;  %v2927_v56 = vsub.f32 %v2915_v59, %v2920_v37  ;;  %v2689_v39 = vsub.f32 %v2677_v58, %v2684_v38 }
0x11b5   : > { %v2930_v40 = vmul.f32 1.442695, %v2927_v56  ;;  %v2693_v61 = vmul.f32 1.442695, %v2689_v39 }
0x11b6   : > { %v2923_v41 = vpop.xlane.xlu0 %2922  ;;  %v2713_v55 = vpop.permute.xlu1 %2712 }
0x11b7   : > { %5066 = vpow2.f32 %v2930_v40  ;;  %v2928_v42 = vsub.f32 %v2916_v3, %v2923_v41 }
0x11b8   : > { %5068 = vpow2.f32 %v2693_v61 }
0x11b9   : > { %v2932_v43 = vmul.f32 1.442695, %v2928_v42 }
0x11ba   : > { %v2687_v45 = vpop.xlane.xlu0 %2686 }
0x11bb   : > { %5070 = vpow2.f32 %v2932_v43  ;;  %v2690_v46 = vsub.f32 %v2678_v8, %v2687_v45 }
0x11bd   : > { %v2695_v50 = vmul.f32 1.442695, %v2690_v46 }
0x11be   : > { %v2715_v53 = vpop.permute.xlu0 %2714 }
0x11bf   : > { %5072 = vpow2.f32 %v2695_v50  ;;  %4768 = vmatpush3.msra.mxu1 %v2715_v53 }
0x11c0   : > { %v6024_v49 = vpop.eup %5064  ;;  %4769 = vmatprep.subr.mxu1 %v5146_v13 }
0x11c1   : > { %4770 = vmatpush3.msra.mxu1 %v2713_v55  ;;  %v2697_v59 = vsel %vm1107_vm5, %v6024_v49, 0.0 }
0x11c2   : > { %2698 = vadd.xlane.f32.xlu1 %v2697_v59  ;;  %4795 = vmatprep.subr.mxu1 %v5146_v13 }
0x11c4   : > { %v6030_v51 = vpop.eup %5066 }
0x11c5   : > { %v2936_v58 = vsel %vm1107_vm5, %v6030_v51, 0.0  ;;  %v6034_v62 = vpop.eup %5068 }
0x11c6   : > { %2937 = vadd.xlane.f32.xlu0 %v2936_v58  ;;  %v2700_v1 = vsel %vm1107_vm5, %v6034_v62, 0.0 }
0x11c8   : > { %v6036_v63 = vpop.eup %5070 }
0x11c9   : > { %v2939_v0 = vsel %vm1107_vm5, %v6036_v63, 0.0 }
0x11ca   : > { %2940 = vadd.xlane.f32.xlu1 %v2939_v0  ;;  %2701 = vadd.xlane.f32.xlu0 %v2700_v1 }
0x11cc   : > { %v6042_v2 = vpop.eup %5072 }
0x11cd   : > { %v2703_v3 = vsel %vm1114_vm6, %v6042_v2, 0.0 }
0x11ce   : > { %2704 = vadd.xlane.f32.xlu1 %v2703_v3 }
0x11e7   : > { %v2926_v4 = vpop.xlane.xlu1 %2925 }
0x11e8   : > { %v2929_v5 = vsub.f32 %v5996_v23, %v2926_v4 }
0x11ea   : > { %v2934_v57 = vmul.f32 1.442695, %v2929_v5 }
0x11eb   : > { %v3162_v6 = vpop.xlane.xlu1 %3161 }
0x11ec   : > { %5074 = vpow2.f32 %v2934_v57  ;;  %v3167_v8 = vsub.f32 %v5998_v25, %v3162_v6 }
0x11ee   : > { %v3171_v9 = vmul.f32 1.442695, %v3167_v8 }
0x11ef   : > { %v3159_v10 = vpop.xlane.xlu0 %3158  ;;  %v3398_v11 = vpop.xlane.xlu1 %3397 }
0x11f0   : > { %5076 = vpow2.f32 %v3171_v9  ;;  %v3166_v12 = vsub.f32 %v6002_v28, %v3159_v10  ;;  %v3405_v15 = vsub.f32 %v6004_v29, %v3398_v11 }
0x11f2   : > { %v3169_v14 = vmul.f32 1.442695, %v3166_v12  ;;  %v3408_v19 = vmul.f32 1.442695, %v3405_v15 }
0x11f3   : > { %v3165_v48 = vpop.xlane.xlu0 %3164  ;;  %v2956_v35 = vpop.permute.xlu1 %2955 }
0x11f4   : > { %v3168_v17 = vsub.f32 %v6008_v31, %v3165_v48  ;;  %5078 = vpow2.f32 %v3169_v14 }
0x11f6   : > { %v3173_v18 = vmul.f32 1.442695, %v3168_v17 }
0x11f7   : > { %v3401_v47 = vpop.xlane.xlu0 %3400 }
0x11f8   : > { %5080 = vpow2.f32 %v3173_v18  ;;  %v3406_v33 = vsub.f32 %v6014_v34, %v3401_v47  ;;  %v4222_v47 = vld [vmem:[%s6397_s10 + $0x38] sm:$0xff] }
0x11f9   : > { %v6051_v20 = vpop.eup %5074  ;;  %5082 = vpow2.f32 %v3408_v19  ;;  %4871 = vmatpush3.msra.mxu0 %v4222_v47 }
0x11fa   : > { %v2942_v21 = vsel %vm1114_vm6, %v6051_v20, 0.0  ;;  %v3410_v60 = vmul.f32 1.442695, %v3406_v33  ;;  %v4221_v33 = vld [vmem:[%s6397_s10 + $0x30] sm:$0xff]  ;;  %4872 = vmatprep.subr.mxu0 %v5146_v13 }
0x11fb   : > { %2943 = vadd.xlane.f32.xlu0 %v2942_v21  ;;  %v2954_v36 = vpop.permute.xlu0 %2953  ;;  %4873 = vmatpush3.msra.mxu0 %v4221_v33  ;;  %v4226_v33 = vld [vmem:[%s6401_s14 + $0x20] sm:$0xff] }
0x11fc   : > { %5084 = vpow2.f32 %v3410_v60  ;;  %v4220_v60 = vld [vmem:[%s6397_s10 + $0x28] sm:$0xff]  ;;  %4874 = vmatprep.subr.mxu0 %v5146_v13 }
0x11fd   : > { %v6055_v22 = vpop.eup %5076  ;;  %4875 = vmatpush3.msra.mxu0 %v4220_v60 }
0x11fe   : > { %v3178_v23 = vsel %vm1107_vm5, %v6055_v22, 0.0  ;;  %4876 = vmatprep.subr.mxu0 %v5146_v13 }
0x11ff   : > { %3179 = vadd.xlane.f32.xlu1 %v3178_v23 }
0x1201   : > { %v6059_v25 = vpop.eup %5078 }
0x1202   : > { %v3175_v26 = vsel %vm1107_vm5, %v6059_v25, 0.0 }
0x1203   : > { %3176 = vadd.xlane.f32.xlu0 %v3175_v26 }
0x1205   : > { %v6063_v28 = vpop.eup %5080 }
0x1206   : > { %v3181_v29 = vsel %vm1114_vm6, %v6063_v28, 0.0  ;;  %v6067_v30 = vpop.eup %5082 }
0x1207   : > { %3182 = vadd.xlane.f32.xlu0 %v3181_v29  ;;  %v3414_v31 = vsel %vm1107_vm5, %v6067_v30, 0.0 }
0x1209   : > { %v6082_v52 = vpop.eup %5084 }
0x120a   : > { %v3417_v34 = vsel %vm1107_vm5, %v6082_v52, 0.0 }
0x120b   : > { %3415 = vadd.xlane.f32.xlu0 %v3414_v31 }
0x1210   : > { %2951 = vrot.lane.b32.xlu1 %v5881_v7, %s6451_s22 }
0x1221   : > { %3194 = vrot.lane.b32.xlu0 %v5883_v27, %s6452_s27 }
0x1225   : > { %3192 = vrot.lane.b32.xlu0 %v5877_v24, %s6452_s27 }
0x1229   : > { %3190 = vrot.lane.b32.xlu0 %v5881_v7, %s6452_s27  ;;  %s6455_s27 = smov 16  }
0x122d   : > { %3433 = vrot.lane.b32.xlu0 %v5883_v27, %s6453_s4 }
0x1231   : > { %3431 = vrot.lane.b32.xlu0 %v5877_v24, %s6453_s4 }
0x1234   : > { %3418 = vadd.xlane.f32.xlu1 %v3417_v34 }
0x1235   : > { %3429 = vrot.lane.b32.xlu0 %v5881_v7, %s6453_s4  ;;  %s6456_s4 = smov 24  }
0x1239   : > { %3293 = vrot.lane.b32.xlu0 %v5883_v27, %s6449_s23 }
0x124b   : > { %v2699_v54 = vpop.xlane.xlu1 %2698 }
0x124c   : > { %5086 = vrcp.f32 %v2699_v54 }
0x124f   : > { %v2938_v37 = vpop.xlane.xlu0 %2937 }
0x1253   : > { %v2941_v38 = vpop.xlane.xlu1 %2940  ;;  %v2702_v56 = vpop.xlane.xlu0 %2701 }
0x1254   : > { %5088 = vrcp.f32 %v2702_v56 }
0x1257   : > { %v2705_v39 = vpop.xlane.xlu1 %2704 }
0x1258   : > { %5090 = vrcp.f32 %v2705_v39 }
0x1259   : > { %v5087_v24 = vpop.eup %5086  ;;  %5092 = vrcp.f32 %v2938_v37 }
0x125a   : > { %v2709_v40 = vmul.f32 %v5087_v24, %v6024_v49  ;;  %5094 = vrcp.f32 %v2941_v38 }
0x125c   : > { %4772 = vmatmul.mubr.msk.f32.vlgmr.msra.gmra.mxu1 %vm1107_vm5, %v2709_v40 }
0x125d   : > { %4796 = vmatpush3.msk.msra.mxu1 %vm1159_vm7, %v2956_v35  ;;  %4774 = vmatprep.mubr.msk.f32.mxu1 %vm5147_vm3, %v5146_v13 }
0x125e   : > { %4797 = vmatprep.subr.mxu1 %v5146_v13 }
0x125f   : > { %4798 = vmatpush3.msra.mxu1 %v2954_v36 }
0x1260   : > { %4799 = vmatprep.subr.mxu1 %v5146_v13 }
0x1261   : > { %v5089_v7 = vpop.eup %5088 }
0x1262   : > { %v2710_v27 = vmul.f32 %v5089_v7, %v6034_v62 }
0x1264   : > { %4775 = vmatmul.mubr.msk.f32.gmra.mxu1 %vm1107_vm5, %v2710_v27 }
0x1265   : > { %v5091_v61 = vpop.eup %5090  ;;  %4777 = vmatprep.mubr.msk.f32.mxu1 %vm5147_vm3, %v5146_v13 }
0x1266   : > { %v2711_v41 = vmul.f32 %v5091_v61, %v6042_v2  ;;  %v5093_v45 = vpop.eup %5092 }
0x1267   : > { %v2948_v46 = vmul.f32 %v5093_v45, %v6030_v51  ;;  %v5095_v53 = vpop.eup %5094 }
0x1268   : > { %4778 = vmatmul.mubr.msk.f32.gmra.mxu1 %vm1107_vm5, %v2711_v41  ;;  %v2949_v55 = vmul.f32 %v5095_v53, %v6036_v63 }
0x1269   : > { %4801 = vmatprep.mubr.msk.f32.mxu1 %vm5147_vm3, %v5146_v13 }
0x1284   : > { %v2944_v42 = vpop.xlane.xlu0 %2943 }
0x1285   : > { %5096 = vrcp.f32 %v2944_v42 }
0x1288   : > { %v3180_v43 = vpop.xlane.xlu1 %3179 }
0x128c   : > { %v2952_v50 = vpop.permute.xlu1 %2951  ;;  %v3177_v49 = vpop.xlane.xlu0 %3176 }
0x128d   : > { %4800 = vmatpush3.msra.mxu1 %v2952_v50  ;;  %5098 = vrcp.f32 %v3177_v49 }
0x128e   : > { %4802 = vmatmul.mubr.msk.f32.vlgmr.msra.gmra.mxu1 %vm1107_vm5, %v2948_v46  ;;  %4825 = vmatprep.subr.mxu1 %v5146_v13  ;;  %5100 = vrcp.f32 %v3180_v43 }
0x128f   : > { %4804 = vmatprep.mubr.msk.f32.mxu1 %vm5147_vm3, %v5146_v13 }
0x1290   : > { %v3183_v59 = vpop.xlane.xlu0 %3182 }
0x1291   : > { %5102 = vrcp.f32 %v3183_v59 }
0x1292   : > { %v5097_v58 = vpop.eup %5096  ;;  %4805 = vmatmul.mubr.msk.f32.gmra.mxu1 %vm1107_vm5, %v2949_v55 }
0x1293   : > { %4807 = vmatprep.mubr.msk.f32.mxu1 %vm5147_vm3, %v5146_v13  ;;  %v2950_v51 = vmul.f32 %v5097_v58, %v6051_v20 }
0x1294   : > { %v3416_v62 = vpop.xlane.xlu0 %3415 }
0x1295   : > { %5104 = vrcp.f32 %v3416_v62 }
0x1296   : > { %4808 = vmatmul.mubr.msk.f32.gmra.mxu1 %vm1107_vm5, %v2950_v51 }
0x1297   : > { %4831 = vmatprep.mubr.msk.f32.mxu1 %vm5147_vm3, %v5146_v13 }
0x1298   : > { %v3195_v0 = vpop.permute.xlu0 %3194 }
0x1299   : > { %4826 = vmatpush3.msk.msra.mxu1 %vm1159_vm7, %v3195_v0 }
0x129a   : > { %4827 = vmatprep.subr.mxu1 %v5146_v13  ;;  %v5099_v1 = vpop.eup %5098 }
0x129b   : > { %v3187_v2 = vmul.f32 %v5099_v1, %v6059_v25  ;;  %v5101_v4 = vpop.eup %5100 }
0x129c   : > { %v3193_v63 = vpop.permute.xlu0 %3192  ;;  %v3188_v57 = vmul.f32 %v5101_v4, %v6055_v22 }
0x129d   : > { %4828 = vmatpush3.msra.mxu1 %v3193_v63 }
0x129e   : > { %4829 = vmatprep.subr.mxu1 %v5146_v13  ;;  %v5103_v6 = vpop.eup %5102 }
0x129f   : > { %v3189_v9 = vmul.f32 %v5103_v6, %v6063_v28 }
0x12a0   : > { %v3191_v3 = vpop.permute.xlu0 %3190 }
0x12a1   : > { %4830 = vmatpush3.msra.mxu1 %v3191_v3 }
0x12a2   : > { %4832 = vmatmul.mubr.msk.f32.vlgmr.msra.gmra.mxu1 %vm1107_vm5, %v3187_v2  ;;  %4855 = vmatprep.subr.mxu1 %v5146_v13  ;;  %v5105_v10 = vpop.eup %5104 }
0x12a3   : > { %4834 = vmatprep.mubr.msk.f32.mxu1 %vm5147_vm3, %v5146_v13  ;;  %v3426_v11 = vmul.f32 %v5105_v10, %v6067_v30 }
0x12a4   : > { %v3434_v5 = vpop.permute.xlu0 %3433 }
0x12a5   : > { %4856 = vmatpush3.msk.msra.mxu1 %vm1159_vm7, %v3434_v5  ;;  %v6196_v5 = vld [vmem:[%s6398_s11 + $0x1] ss:$0 sm:$0xff] }
0x12a6   : > { %4835 = vmatmul.mubr.msk.f32.gmra.mxu1 %vm1107_vm5, %v3188_v57  ;;  %4857 = vmatprep.subr.mxu1 %v5146_v13 }
0x12a7   : > { %4837 = vmatprep.mubr.msk.f32.mxu1 %vm5147_vm3, %v5146_v13 }
0x12a8   : > { %v3432_v8 = vpop.permute.xlu0 %3431 }
0x12a9   : > { %4858 = vmatpush3.msra.mxu1 %v3432_v8 }
0x12aa   : > { %4838 = vmatmul.mubr.msk.f32.gmra.mxu1 %vm1107_vm5, %v3189_v9  ;;  %4859 = vmatprep.subr.mxu1 %v5146_v13 }
0x12ab   : > { %4861 = vmatprep.mubr.msk.f32.mxu1 %vm5147_vm3, %v5146_v13 }
0x12ac   : > { %v3430_v12 = vpop.permute.xlu0 %3429 }
0x12ad   : > { %4860 = vmatpush3.msra.mxu1 %v3430_v12 }
0x12ae   : > { %4862 = vmatmul.mubr.msk.f32.vlgmr.msra.gmra.mxu1 %vm1107_vm5, %v3426_v11  ;;  %4887 = vmatprep.subr.mxu1 %v5146_v13 }
0x12af   : > { %4864 = vmatprep.mubr.msk.f32.mxu1 %vm5147_vm3, %v5146_v13 }
0x12b0   : > { %v3294_v14 = vpop.permute.xlu0 %3293 }
0x12b1   : > { %4853 = vmatmul.mubr.msk.f32.gmra.mxu0 %vm1011_vm4, %v3294_v14 }
0x12b2   : > { %4878 = vmatprep.mubr.msk.f32.mxu0 %vm5147_vm3, %v5146_v13 }
0x12bd   : > { %v3419_v15 = vpop.xlane.xlu1 %3418 }
0x12be   : > { %5106 = vrcp.f32 %v3419_v15 }
0x12cb   : > { %v5107_v48 = vpop.eup %5106 }
0x12cc   : > { %v3427_v17 = vmul.f32 %v5107_v48, %v6082_v52  ;;  %v4219_v52 = vld [vmem:[%s6397_s10 + $0x20] sm:$0xff] }
0x12cd   : > { %4877 = vmatpush3.msra.mxu0 %v4219_v52 }
0x12ce   : > { %4865 = vmatmul.mubr.msk.f32.gmra.mxu1 %vm1107_vm5, %v3427_v17  ;;  %4904 = vmatprep.subr.mxu0 %v5146_v13 }
0x12cf   : > { %4867 = vmatprep.mubr.msk.f32.mxu1 %vm5147_vm3, %v5146_v13 }
0x131c   : > { %v2797_v18 = vpop.f32.mrf.mxu1 }
0x131e   : > { %v4773_v19 = vpop.f32.mrf.mxu1 }
0x1324   : > { %v2802_v20 = vpop.f32.mrf.mxu1 }
0x1326   : > { %v4776_v21 = vpop.f32.mrf.mxu1 }
0x1328   : > { %v6151_v22 = vpop.f32.mrf.mxu1 }
0x132a   : > { %v4779_v23 = vpop.f32.mrf.mxu1 }
0x134e   : > { %v3036_v25 = vpop.f32.mrf.mxu1 }
0x134f   : > { %3531 = vrot.lane.b32.xlu1 %v3036_v25, %s6454_s28 }
0x1350   : > { %v4803_v26 = vpop.f32.mrf.mxu1 }
0x1352   : > { %v3041_v28 = vpop.f32.mrf.mxu1 }
0x1353   : > { %3533 = vrot.lane.b32.xlu0 %v3041_v28, %s6454_s28  ;;  %v4229_v28 = vld [vmem:[%s6401_s14 + $0x38] sm:$0xff] }
0x1354   : > { %v4806_v29 = vpop.f32.mrf.mxu1  ;;  %4888 = vmatpush3.msra.mxu1 %v4229_v28 }
0x1355   : > { %4889 = vmatprep.subr.mxu1 %v5146_v13 }
0x1356   : > { %v6155_v30 = vpop.f32.mrf.mxu1 }
0x1358   : > { %v4809_v31 = vpop.f32.mrf.mxu1 }
0x1359   : > { %v4228_v31 = vld [vmem:[%s6401_s14 + $0x30] sm:$0xff] }
0x135a   : > { %4890 = vmatpush3.msra.mxu1 %v4228_v31 }
0x135b   : > { %4891 = vmatprep.subr.mxu1 %v5146_v13 }
0x1362   : > { %v3275_v34 = vpop.f32.mrf.mxu1 }
0x1363   : > { %3543 = vrot.lane.b32.xlu0 %v3275_v34, %s6455_s27 }
0x1364   : > { %v4833_v35 = vpop.f32.mrf.mxu1 }
0x1366   : > { %v3280_v36 = vpop.f32.mrf.mxu1 }
0x1367   : > { %3545 = vrot.lane.b32.xlu0 %v3280_v36, %s6455_s27 }
0x1368   : > { %v4836_v54 = vpop.f32.mrf.mxu1 }
0x136a   : > { %v6175_v37 = vpop.f32.mrf.mxu1 }
0x136c   : > { %v4839_v38 = vpop.f32.mrf.mxu1 }
0x136d   : > { %v6240_v38 = vld [vmem:[%s6399_s12 + $0x1] ss:$0 sm:$0xff] }
0x136e   : > { %v3514_v56 = vpop.f32.mrf.mxu1 }
0x136f   : > { %3555 = vrot.lane.b32.xlu0 %v3514_v56, %s6456_s4 }
0x1370   : > { %v4863_v39 = vpop.f32.mrf.mxu1 }
0x1371   : > { %v3389_v24 = vpop.f32.mrf.mxu0  ;;  %v6245_v39 = vld [vmem:[%s6400_s13 + $0x1] ss:$0 sm:$0xff] }
0x1372   : > { %v3395_v40 = vmul.f32 0.35355338, %v3389_v24 }
0x1373   : > { %v4854_v7 = vpop.f32.mrf.mxu0 }
0x1374   : > { %v3402_v27 = vsel %vm1114_vm6, %v3395_v40, -inf }
0x1375   : > { %3403 = vmax.xlane.f32.xlu1 %v3402_v27 }
0x138e   : > { %v3519_v61 = vpop.f32.mrf.mxu1 }
0x138f   : > { %3557 = vrot.lane.b32.xlu0 %v3519_v61, %s6456_s4 }
0x1390   : > { %v4866_v41 = vpop.f32.mrf.mxu1 }
0x13c1   : > { %v3532_v45 = vpop.permute.xlu1 %3531 }
0x13c2   : > { %v3564_v50 = vsel %vm1011_vm4, %v2797_v18, %v3532_v45 }
0x13c5   : > { %v3534_v42 = vpop.permute.xlu0 %3533 }
0x13c6   : > { %v3565_v58 = vsel %vm1011_vm4, %v2802_v20, %v3534_v42 }
0x13d5   : > { %v3544_v43 = vpop.permute.xlu0 %3543 }
0x13d6   : > { %v3567_v53 = vsel %vm1998_vm8, %v3564_v50, %v3544_v43 }
0x13d9   : > { %v3546_v46 = vpop.permute.xlu0 %3545 }
0x13da   : > { %v3568_v62 = vsel %vm1998_vm8, %v3565_v58, %v3546_v46  ;;  %v4244_v58 = vld [vmem:[%s6403_s16 + $0xe8] sm:$0xff] }
0x13e1   : > { %v3556_v49 = vpop.permute.xlu0 %3555 }
0x13e2   : > { %v3570_v55 = vsel %vm2002_vm9, %v3567_v53, %v3556_v49 }
0x13e3   : > { %4879 = vmatmul.mubr.msk.f32.vlgmr.msra.gmra.mxu0 %vm754_vm2, %v3570_v55 }
0x13e4   : > { %4881 = vmatprep.mubr.msk.f32.mxu0 %vm5147_vm3, %v5146_v13 }
0x13fe   : > { %v3404_v59 = vpop.xlane.xlu1 %3403 }
0x13ff   : > { %v3407_v51 = vsub.f32 %v3395_v40, %v3404_v59  ;;  %v4245_v59 = vld [vmem:[%s6403_s16 + $0xf0] sm:$0xff] }
0x1401   : > { %v3558_v0 = vpop.permute.xlu0 %3557  ;;  %v3412_v63 = vmul.f32 1.442695, %v3407_v51  ;;  %v4243_v51 = vld [vmem:[%s6403_s16 + $0xe0] sm:$0xff] }
0x1402   : > { %v3571_v1 = vsel %vm2002_vm9, %v3568_v62, %v3558_v0  ;;  %v4242_v62 = vld [vmem:[%s6403_s16 + $0xd8] sm:$0xff]  ;;  %v4241_v0 = vld [vmem:[%s6403_s16 + $0xd0] sm:$0xff] }
0x1403   : > { %4882 = vmatmul.mubr.msk.f32.gmra.mxu0 %vm754_vm2, %v3571_v1  ;;  %5108 = vpow2.f32 %v3412_v63  ;;  %v4240_v63 = vld [vmem:[%s6403_s16 + $0xc8] sm:$0xff]  ;;  %v4239_v1 = vld [vmem:[%s6403_s16 + $0xc0] sm:$0xff] }
0x1404   : > { %4884 = vmatprep.mubr.msk.f32.mxu0 %vm5147_vm3, %v5146_v13 }
0x1410   : > { %v5109_v2 = vpop.eup %5108 }
0x1411   : > { %v3420_v3 = vsel %vm1114_vm6, %v5109_v2, 0.0 }
0x1412   : > { %3421 = vadd.xlane.f32.xlu0 %v3420_v3  ;;  %v4237_v3 = vld [vmem:[%s6403_s16 + $0xb0] sm:$0xff] }
0x149b   : > { %v3422_v4 = vpop.xlane.xlu0 %3421 }
0x149c   : > { %5110 = vrcp.f32 %v3422_v4  ;;  %v4236_v4 = vld [vmem:[%s6403_s16 + $0xa8] sm:$0xff] }
0x14a3   : > { %v3648_v57 = vpop.f32.mrf.mxu0 }
0x14a4   : > { %v3662_v6 = vadd.f32 %v3648_v57, %v5823_v16  ;;  %v4235_v57 = vld [vmem:[%s6403_s16 + $0xa0] sm:$0xff] }
0x14a5   : > { %v4880_v8 = vpop.f32.mrf.mxu0 }
0x14a6   : > { %v6200_v9 = vadd.f32 %v6196_v5, %v3662_v6  ;;  %v4234_v6 = vld [vmem:[%s6403_s16 + $0x98] sm:$0xff]  ;;  %v4233_v8 = vld [vmem:[%s6403_s16 + $0x90] sm:$0xff] }
0x14a8   : > { %v3674_v10 = vsel %vm754_vm2, %v6200_v9, 0.0 }
0x14a9   : > { %v5111_v11 = vpop.eup %5110  ;;  %3675 = vadd.xlane.f32.xlu0 %v3674_v10  ;;  %v4232_v10 = vld [vmem:[%s6403_s16 + $0x88] sm:$0xff] }
0x14aa   : > { %v3428_v12 = vmul.f32 %v5111_v11, %v5109_v2  ;;  %v4238_v2 = vld [vmem:[%s6403_s16 + $0xb8] sm:$0xff]  ;;  %v4231_v11 = vld [vmem:[%s6403_s16 + $0x80] sm:$0xff] }
0x14ac   : > { %4868 = vmatmul.mubr.msk.f32.gmra.mxu1 %vm1107_vm5, %v3428_v12  ;;  %v6330_v12 = vld [vmem:[%s6402_s15 + $0x1] ss:$0 sm:$0xff] }
0x14ad   : > { %4895 = vmatprep.mubr.msk.f32.mxu1 %vm5147_vm3, %v5146_v13 }
0x14c3   : > { %v3653_v14 = vpop.f32.mrf.mxu0 }
0x14c4   : > { %v3663_v15 = vadd.f32 %v3653_v14, %v5828_v32 }
0x14c5   : > { %v4883_v48 = vpop.f32.mrf.mxu0 }
0x14c6   : > { %v6209_v16 = vadd.f32 %v6196_v5, %v3663_v15 }
0x14c8   : > { %v3677_v17 = vsel %vm754_vm2, %v6209_v16, 0.0 }
0x14c9   : > { %3678 = vadd.xlane.f32.xlu1 %v3677_v17 }
0x1532   : > { %v3676_v18 = vpop.xlane.xlu0 %3675 }
0x1533   : > { %v3683_v19 = vmul.f32 0.03125, %v3676_v18 }
0x1535   : > { %v3686_v20 = vsub.f32 %v6200_v9, %v3683_v19 }
0x1537   : > { %v3689_v21 = vmul.f32 %v3686_v20, %v3686_v20 }
0x1539   : > { %v3692_v23 = vsel %vm754_vm2, %v3689_v21, 0.0 }
0x153a   : > { %3693 = vadd.xlane.f32.xlu0 %v3692_v23 }
0x1550   : > { %3535 = vrot.lane.b32.xlu0 %v6155_v30, %s6454_s28  ;;  %v4227_v30 = vld [vmem:[%s6401_s14 + $0x28] sm:$0xff] }
0x1551   : > { %4892 = vmatpush3.msra.mxu1 %v4227_v30 }
0x1552   : > { %v3679_v32 = vpop.xlane.xlu1 %3678  ;;  %4893 = vmatprep.subr.mxu1 %v5146_v13 }
0x1553   : > { %v3684_v25 = vmul.f32 0.03125, %v3679_v32  ;;  %4894 = vmatpush3.msra.mxu1 %v4226_v33 }
0x1555   : > { %v3687_v26 = vsub.f32 %v6209_v16, %v3684_v25 }
0x1557   : > { %v3690_v29 = vmul.f32 %v3687_v26, %v3687_v26 }
0x1559   : > { %v3695_v47 = vsel %vm754_vm2, %v3690_v29, 0.0 }
0x155a   : > { %3696 = vadd.xlane.f32.xlu1 %v3695_v47 }
0x156b   : > { %3547 = vrot.lane.b32.xlu1 %v6175_v37, %s6455_s27 }
0x156c   : > { %v3524_v60 = vpop.f32.mrf.mxu1 }
0x156e   : > { %v4869_v52 = vpop.f32.mrf.mxu1 }
0x156f   : > { %3559 = vrot.lane.b32.xlu1 %v3524_v60, %s6456_s4 }
0x15c3   : > { %v3694_v34 = vpop.xlane.xlu0 %3693 }
0x15c4   : > { %v3701_v35 = vmul.f32 0.03125, %v3694_v34 }
0x15c6   : > { %v3704_v36 = vadd.f32 1e-05, %v3701_v35 }
0x15c7   : > { %v3536_v61 = vpop.permute.xlu0 %3535 }
0x15c8   : > { %5112 = vrsqrt.f32 %v3704_v36  ;;  %v3566_v42 = vsel %vm1011_vm4, %v6151_v22, %v3536_v61  ;;  %v4246_v22 = vld [vmem:[%s6403_s16 + $0xf8] sm:$0xff] }
0x15c9   : > { %4905 = vmatpush3.msra.mxu0 %v4246_v22 }
0x15ca   : > { %4906 = vmatprep.subr.mxu0 %v5146_v13 }
0x15cb   : > { %4907 = vmatpush3.msra.mxu0 %v4245_v59 }
0x15cc   : > { %4908 = vmatprep.subr.mxu0 %v5146_v13 }
0x15cd   : > { %4909 = vmatpush3.msra.mxu0 %v4244_v58 }
0x15ce   : > { %4910 = vmatprep.subr.mxu0 %v5146_v13 }
0x15cf   : > { %4911 = vmatpush3.msra.mxu0 %v4243_v51 }
0x15d0   : > { %4912 = vmatprep.subr.mxu0 %v5146_v13 }
0x15d1   : > { %4913 = vmatpush3.msra.mxu0 %v4242_v62 }
0x15d2   : > { %4914 = vmatprep.subr.mxu0 %v5146_v13 }
0x15d3   : > { %4915 = vmatpush3.msra.mxu0 %v4241_v0 }
0x15d4   : > { %4916 = vmatprep.subr.mxu0 %v5146_v13 }
0x15d5   : > { %v5113_v54 = vpop.eup %5112  ;;  %4917 = vmatpush3.msra.mxu0 %v4240_v63 }
0x15d6   : > { %v3710_v56 = vmul.f32 %v5113_v54, %v3686_v20  ;;  %4918 = vmatprep.subr.mxu0 %v5146_v13 }
0x15d7   : > { %4919 = vmatpush3.msra.mxu0 %v4239_v1 }
0x15d8   : > { %v3719_v37 = vmul.f32 %v6240_v38, %v3710_v56  ;;  %4920 = vmatprep.subr.mxu0 %v5146_v13 }
0x15d9   : > { %4921 = vmatpush3.msra.mxu0 %v4238_v2 }
0x15da   : > { %v3728_v24 = vadd.f32 %v6245_v39, %v3719_v37  ;;  %4922 = vmatprep.subr.mxu0 %v5146_v13 }
0x15db   : > { %4923 = vmatpush3.msra.mxu0 %v4237_v3 }
0x15dc   : > { %4896 = vmatmul.mubr.msk.f32.vlgmr.msra.gmra.mxu1 %vm754_vm2, %v3728_v24  ;;  %4924 = vmatprep.subr.mxu0 %v5146_v13  ;;  %v4307_v24 = vld [vmem:[%s6404_s17 + $0x1] ss:$0 sm:$0xff] }
0x15dd   : > { %4898 = vmatprep.mubr.msk.f32.mxu1 %vm5147_vm3, %v5146_v13  ;;  %4925 = vmatpush3.msra.mxu0 %v4236_v4 }
0x15de   : > { %4926 = vmatprep.subr.mxu0 %v5146_v13 }
0x15df   : > { %4927 = vmatpush3.msra.mxu0 %v4235_v57  ;;  %v3984_v57 = vld [vmem:[%s6407_s20 + $0x8] sm:$0xff] }
0x15e0   : > { %4928 = vmatprep.subr.mxu0 %v5146_v13 }
0x15e1   : > { %4929 = vmatpush3.msra.mxu0 %v4234_v6  ;;  %v3983_v6 = vld [vmem:[%s6407_s20] sm:$0xff] }
0x15e2   : > { %4930 = vmatprep.subr.mxu0 %v5146_v13 }
0x15e3   : > { %v3697_v40 = vpop.xlane.xlu1 %3696  ;;  %4931 = vmatpush3.msra.mxu0 %v4233_v8 }
0x15e4   : > { %v3702_v7 = vmul.f32 0.03125, %v3697_v40  ;;  %4932 = vmatprep.subr.mxu0 %v5146_v13 }
0x15e5   : > { %4933 = vmatpush3.msra.mxu0 %v4232_v10 }
0x15e6   : > { %v3705_v27 = vadd.f32 1e-05, %v3702_v7  ;;  %4934 = vmatprep.subr.mxu0 %v5146_v13 }
0x15e7   : > { %v3548_v41 = vpop.permute.xlu1 %3547  ;;  %4935 = vmatpush3.msra.mxu0 %v4231_v11 }
0x15e8   : > { %5114 = vrsqrt.f32 %v3705_v27  ;;  %v3569_v43 = vsel %vm1998_vm8, %v3566_v42, %v3548_v41 }
0x15eb   : > { %v3560_v45 = vpop.permute.xlu1 %3559 }
0x15ec   : > { %v3572_v46 = vsel %vm2002_vm9, %v3569_v43, %v3560_v45 }
0x15ed   : > { %4885 = vmatmul.mubr.msk.f32.gmra.mxu0 %vm754_vm2, %v3572_v46 }
0x15ee   : > { %4936 = vmatprep.mubr.msk.f32.mxu0 %vm5147_vm3, %v5146_v13 }
0x15f5   : > { %v5115_v50 = vpop.eup %5114 }
0x15f6   : > { %v3711_v53 = vmul.f32 %v5115_v50, %v3687_v26 }
0x15f8   : > { %v3720_v49 = vmul.f32 %v6240_v38, %v3711_v53 }
0x15fa   : > { %v3729_v55 = vadd.f32 %v6245_v39, %v3720_v49 }
0x15fc   : > { %4899 = vmatmul.mubr.msk.f32.gmra.mxu1 %vm754_vm2, %v3729_v55 }
0x15fd   : > { %4901 = vmatprep.mubr.msk.f32.mxu1 %vm5147_vm3, %v5146_v13 }
0x169c   : > { %v3812_v14 = vpop.f32.mrf.mxu1 }
0x169d   : > { %v3813_v15 = vadd.f32 %v6330_v12, %v3812_v14 }
0x169e   : > { %v4897_v48 = vpop.f32.mrf.mxu1 }
0x169f   : > { %v4304_v17 = vmul.f32 -1.702, %v3813_v15 }
0x16a1   : > { %v3832_v18 = vmul.f32 1.442695, %v4304_v17 }
0x16a3   : > { %5116 = vpow2.f32 %v3832_v18 }
0x16ad   : > { %v3658_v19 = vpop.f32.mrf.mxu0 }
0x16ae   : > { %v3664_v20 = vadd.f32 %v3658_v19, %v5833_v44 }
0x16af   : > { %v4886_v21 = vpop.f32.mrf.mxu0 }
0x16b0   : > { %v3673_v23 = vadd.f32 %v6196_v5, %v3664_v20  ;;  %v5117_v32 = vpop.eup %5116  ;;  %v4308_v20 = vld [vmem:[%s6405_s18] ss:$0 sm:$0xff] }
0x16b1   : > { %v3838_v25 = vadd.f32 1.0, %v5117_v32 }
0x16b2   : > { %v3680_v26 = vsel %vm761_vm1, %v3673_v23, 0.0 }
0x16b3   : > { %3681 = vadd.xlane.f32.xlu0 %v3680_v26  ;;  %5118 = vrcp.f32 %v3838_v25 }
0x16bc   : > { %v3817_v28 = vpop.f32.mrf.mxu1 }
0x16bd   : > { %v3818_v29 = vadd.f32 %v6330_v12, %v3817_v28 }
0x16be   : > { %v4900_v31 = vpop.f32.mrf.mxu1 }
0x16bf   : > { %v4305_v47 = vmul.f32 -1.702, %v3818_v29 }
0x16c0   : > { %v5119_v30 = vpop.eup %5118 }
0x16c1   : > { %v3834_v33 = vmul.f32 1.442695, %v4305_v47  ;;  %v3847_v60 = vmul.f32 %v5119_v30, %v3813_v15 }
0x16c3   : > { %5120 = vpow2.f32 %v3834_v33  ;;  %4937 = vmatmul.mubr.f32.vlgmr.msra.gmra.mxu0 %v3847_v60 }
0x16c4   : > { %4939 = vmatprep.mubr.msk.f32.mxu0 %vm5147_vm3, %v5146_v13 }
0x16d0   : > { %v5121_v44 = vpop.eup %5120 }
0x16d1   : > { %v3839_v5 = vadd.f32 1.0, %v5121_v44 }
0x16d3   : > { %5122 = vrcp.f32 %v3839_v5 }
0x16e0   : > { %v5123_v52 = vpop.eup %5122 }
0x16e1   : > { %v3848_v34 = vmul.f32 %v5123_v52, %v3818_v29 }
0x16e3   : > { %4940 = vmatmul.mubr.f32.gmra.mxu0 %v3848_v34 }
0x16e4   : > { %4942 = vmatprep.mubr.msk.f32.mxu0 %vm5147_vm3, %v5146_v13 }
0x173c   : > { %v3682_v35 = vpop.xlane.xlu0 %3681 }
0x173d   : > { %v3685_v36 = vmul.f32 0.03125, %v3682_v35 }
0x173f   : > { %v3688_v54 = vsub.f32 %v3673_v23, %v3685_v36  ;;  %v4309_v23 = vld [vmem:[%s6406_s19] ss:$0 sm:$0xff] }
0x1741   : > { %v3691_v56 = vmul.f32 %v3688_v54, %v3688_v54 }
0x1743   : > { %v3698_v37 = vsel %vm761_vm1, %v3691_v56, 0.0 }
0x1744   : > { %3699 = vadd.xlane.f32.xlu1 %v3698_v37 }
0x1783   : > { %v3916_v40 = vpop.f32.mrf.mxu0 }
0x1784   : > { %v3929_v7 = vadd.f32 %v3916_v40, %v6200_v9 }
0x1785   : > { %v4938_v27 = vpop.f32.mrf.mxu0 }
0x1786   : > { %v3937_v61 = vadd.f32 %v4307_v24, %v3929_v7 }
0x1788   : > { %v3941_v41 = vsel %vm754_vm2, %v3937_v61, 0.0 }
0x1789   : > { %3942 = vadd.xlane.f32.xlu0 %v3941_v41 }
0x17a3   : > { %v3921_v13 = vpop.f32.mrf.mxu0 }
0x17a4   : > { %v3930_v42 = vadd.f32 %v3921_v13, %v6209_v16 }
0x17a5   : > { %v4941_v43 = vpop.f32.mrf.mxu0 }
0x17a6   : > { %v3938_v45 = vadd.f32 %v4307_v24, %v3930_v42 }
0x17a8   : > { %v3944_v46 = vsel %vm754_vm2, %v3938_v45, 0.0 }
0x17a9   : > { %3945 = vadd.xlane.f32.xlu0 %v3944_v46 }
0x17cd   : > { %v3700_v50 = vpop.xlane.xlu1 %3699 }
0x17ce   : > { %v3703_v53 = vmul.f32 0.03125, %v3700_v50 }
0x17d0   : > { %v3706_v49 = vadd.f32 1e-05, %v3703_v53 }
0x17d2   : > { %5124 = vrsqrt.f32 %v3706_v49 }
0x17df   : > { %v5125_v55 = vpop.eup %5124 }
0x17e0   : > { %v3712_v22 = vmul.f32 %v5125_v55, %v3688_v54 }
0x17e2   : > { %v3721_v9 = vmul.f32 %v6240_v38, %v3712_v22  ;;  %v3986_v38 = vld [vmem:[%s6407_s20 + $0x18] sm:$0xff] }
0x17e3   : > { %4945 = vmatprep.subr.mxu1 %v3986_v38 }
0x17e4   : > { %v3730_v59 = vadd.f32 %v6245_v39, %v3721_v9  ;;  %4946 = vmatpush3.msra.mxu1 %v3986_v38  ;;  %v3985_v39 = vld [vmem:[%s6407_s20 + $0x10] sm:$0xff] }
0x17e5   : > { %4947 = vmatprep.subr.mxu1 %v3985_v39 }
0x17e6   : > { %4902 = vmatmul.mubr.msk.f32.gmra.mxu1 %vm754_vm2, %v3730_v59 }
0x17e7   : > { %4948 = vmatpush3.msra.mxu1 %v3985_v39 }
0x17e8   : > { %4949 = vmatprep.subr.mxu1 %v3984_v57 }
0x17e9   : > { %4950 = vmatpush3.msra.mxu1 %v3984_v57 }
0x17ea   : > { %4951 = vmatprep.subr.mxu1 %v3983_v6 }
0x17eb   : > { %4952 = vmatpush3.msra.mxu1 %v3983_v6 }
0x1812   : > { %v3943_v58 = vpop.xlane.xlu0 %3942 }
0x1813   : > { %v3947_v51 = vmul.f32 0.03125, %v3943_v58 }
0x1815   : > { %v3949_v16 = vsub.f32 %v3937_v61, %v3947_v51 }
0x1817   : > { %v3951_v62 = vmul.f32 %v3949_v16, %v3949_v16 }
0x1819   : > { %v3953_v0 = vsel %vm754_vm2, %v3951_v62, 0.0 }
0x181a   : > { %3954 = vadd.xlane.f32.xlu1 %v3953_v0 }
0x1832   : > { %v3946_v63 = vpop.xlane.xlu0 %3945 }
0x1833   : > { %v3948_v1 = vmul.f32 0.03125, %v3946_v63 }
0x1835   : > { %v3950_v2 = vsub.f32 %v3938_v45, %v3948_v1 }
0x1837   : > { %v3952_v3 = vmul.f32 %v3950_v2, %v3950_v2 }
0x1839   : > { %v3956_v4 = vsel %vm754_vm2, %v3952_v3, 0.0 }
0x183a   : > { %3957 = vadd.xlane.f32.xlu0 %v3956_v4 }
0x18a3   : > { %v3955_v8 = vpop.xlane.xlu1 %3954 }
0x18a4   : > { %v3959_v10 = vmul.f32 0.03125, %v3955_v8 }
0x18a6   : > { %v3822_v11 = vpop.f32.mrf.mxu1  ;;  %v3961_v14 = vadd.f32 1e-05, %v3959_v10 }
0x18a7   : > { %v3823_v15 = vadd.f32 %v6330_v12, %v3822_v11 }
0x18a8   : > { %v4903_v48 = vpop.f32.mrf.mxu1  ;;  %5126 = vrsqrt.f32 %v3961_v14 }
0x18a9   : > { %v4306_v17 = vmul.f32 -1.702, %v3823_v15 }
0x18ab   : > { %v3836_v18 = vmul.f32 1.442695, %v4306_v17 }
0x18ad   : > { %5128 = vpow2.f32 %v3836_v18 }
0x18b5   : > { %v5127_v19 = vpop.eup %5126 }
0x18b6   : > { %v3965_v21 = vmul.f32 %v5127_v19, %v3949_v16 }
0x18b8   : > { %v3973_v32 = vmul.f32 %v4308_v20, %v3965_v21 }
0x18ba   : > { %v5129_v25 = vpop.eup %5128  ;;  %v3981_v28 = vadd.f32 %v4309_v23, %v3973_v32 }
0x18bb   : > { %v3840_v26 = vadd.f32 1.0, %v5129_v25 }
0x18bc   : > { %4953 = vmatprep.mubr.msk.f32.mxu1 %vm754_vm2, %v3981_v28 }
0x18bd   : > { %5130 = vrcp.f32 %v3840_v26 }
0x18c3   : > { %v3958_v12 = vpop.xlane.xlu0 %3957 }
0x18c4   : > { %v3960_v29 = vmul.f32 0.03125, %v3958_v12 }
0x18c6   : > { %v3962_v31 = vadd.f32 1e-05, %v3960_v29 }
0x18c8   : > { %5132 = vrsqrt.f32 %v3962_v31 }
0x18ca   : > { %v5131_v47 = vpop.eup %5130 }
0x18cb   : > { %v3849_v30 = vmul.f32 %v5131_v47, %v3823_v15 }
0x18cd   : > { %4943 = vmatmul.mubr.f32.gmra.mxu0 %v3849_v30 }
0x18d5   : > { %v5133_v33 = vpop.eup %5132 }
0x18d6   : > { %v3966_v60 = vmul.f32 %v5133_v33, %v3950_v2 }
0x18d8   : > { %v3974_v44 = vmul.f32 %v4308_v20, %v3966_v60 }
0x18da   : > { %v3982_v5 = vadd.f32 %v4309_v23, %v3974_v44 }
0x18dc   : > { %4954 = vmatmul.mubr.msk.f32.vlgmr.msra.gmra.mxu1 %vm754_vm2, %v3982_v5 }
0x198d   : > { %v3926_v52 = vpop.f32.mrf.mxu0 }
0x198f   : > { %v4944_v34 = vpop.f32.mrf.mxu0 }
0x199c   : > { %v4955_v35 = vpop.f32.mrf.mxu1 }
0x199d   : > { %v4069_v36 = vmul.f32 %v4955_v35, %v4955_v35 }
0x199e   : > { %v4059_v54 = vpop.f32.mrf.mxu1 }
0x199f   : > { %v4068_v56 = vmul.f32 %v4059_v54, %v4059_v54  ;;  %v4073_v37 = vsel %vm754_vm2, %v4069_v36, 0.0 }
0x19a0   : > { %4074 = vadd.xlane.f32.xlu0 %v4073_v37 }
0x19a1   : > { %v4070_v24 = vsel %vm754_vm2, %v4068_v56, 0.0 }
0x19a2   : > { %4071 = vadd.xlane.f32.xlu1 %v4070_v24 }
0x1a29   : > { %v4075_v40 = vpop.xlane.xlu0 %4074 }
0x1a2a   : > { %v4077_v7 = vadd.f32 1e-12, %v4075_v40 }
0x1a2b   : > { %v4072_v27 = vpop.xlane.xlu1 %4071 }
0x1a2c   : > { %5134 = vrsqrt.f32 %v4077_v7  ;;  %v4076_v61 = vadd.f32 1e-12, %v4072_v27 }
0x1a2e   : > { %5136 = vrsqrt.f32 %v4076_v61 }
0x1a39   : > { %v5135_v41 = vpop.eup %5134 }
0x1a3a   : > { %v4081_v13 = vmul.f32 %v5135_v41, %v4955_v35 }
0x1a3b   : > { %v5137_v42 = vpop.eup %5136 }
0x1a3c   : > { %4083 = vst.msk [vmem:[%s656_s29 + $0x8] sm:$0xff] %vm754_vm2, %v4081_v13  ;;  %v4080_v43 = vmul.f32 %v5137_v42, %v4059_v54 }
0x1a3e   : > { %4082 = vst.msk [vmem:[%s656_s29] sm:$0xff] %vm754_vm2, %v4080_v43 }
0x1a3f PF: > { %s31_s2 = sadd.s32 1, %s5144_s2  }
0x1a40   : > { %p28_p4 = scmp.ge.s32.totalorder %s31_s2, 4  }
0x1a42   :  { %30 = sbr.rel (!%p28_p4) target bundleno = 7 (0x7), region = 146 }

// kernel: full_model_forward.5
= control target key start
LH: loop header
LB: loop body
LE: loop exit
PB: predicated region body
PF: predicated region fallthrough
CT: control target
= control target key end

     0   :  { %s7694_s0 = inlined_call_operand.vmem [shape: f32[2,16,32], index: 0, kind: input, shape index: {}]   ;;  %s7695_s1 = inlined_call_operand.vmem [shape: f32[1,32], index: 1, kind: input, shape index: {}]   ;;  %s7696_s2 = inlined_call_operand.vmem [shape: f32[32,32], index: 2, kind: input, shape index: {}]   ;;  %s7697_s3 = inlined_call_operand.vmem [shape: f32[1,32], index: 3, kind: input, shape index: {}]   ;;  %s7698_s4 = inlined_call_operand.vmem [shape: f32[32,32], index: 4, kind: input, shape index: {}]   ;;  %s7699_s5 = inlined_call_operand.vmem [shape: f32[1,32], index: 5, kind: input, shape index: {}]   ;;  %s7700_s6 = inlined_call_operand.vmem [shape: f32[2,1,32], index: 6, kind: input, shape index: {}]   ;;  %s7701_s7 = inlined_call_operand.vmem [shape: f32[2,1,32], index: 7, kind: input, shape index: {}]   ;;  %s7702_s8 = inlined_call_operand.vmem [shape: f32[2,32,96], index: 8, kind: input, shape index: {}]   ;;  %s7703_s9 = inlined_call_operand.vmem [shape: f32[2,1,96], index: 9, kind: input, shape index: {}]   ;;  %s7704_s10 = inlined_call_operand.vmem [shape: f32[2,32,32], index: 10, kind: input, shape index: {}]   ;;  %s7705_s11 = inlined_call_operand.vmem [shape: f32[2,1,32], index: 11, kind: input, shape index: {}]   ;;  %s7706_s12 = inlined_call_operand.vmem [shape: f32[2,1,32], index: 12, kind: input, shape index: {}]   ;;  %s7707_s13 = inlined_call_operand.vmem [shape: f32[2,1,32], index: 13, kind: input, shape index: {}]   ;;  %s7708_s14 = inlined_call_operand.vmem [shape: f32[2,32,128], index: 14, kind: input, shape index: {}]   ;;  %s7709_s15 = inlined_call_operand.vmem [shape: f32[2,1,128], index: 15, kind: input, shape index: {}]   ;;  %s7710_s16 = inlined_call_operand.vmem [shape: f32[2,128,32], index: 16, kind: input, shape index: {}]   ;;  %s7711_s17 = inlined_call_operand.vmem [shape: f32[2,1,32], index: 17, kind: input, shape index: {}]   ;;  %s7712_s18 = inlined_call_operand.vmem [shape: f32[1,32], index: 18, kind: input, shape index: {}]   ;;  %s7713_s19 = inlined_call_operand.vmem [shape: f32[1,32], index: 19, kind: input, shape index: {}]   ;;  %s7714_s20 = inlined_call_operand.vmem [shape: f32[256,16], index: 20, kind: input, shape index: {}]   ;;  %s7715_s21 = inlined_call_operand.vmem [shape: f32[2,1,256], index: 21, kind: output, shape index: {}]  }
   0x1   :  { %7740 = sst [smem:[#allocation2_spill]] %s7694_s0 }
   0x2   :  { %7741 = sst [smem:[#allocation3_spill]] %s7695_s1 }
   0x3   :  { %7742 = sst [smem:[#allocation4_spill]] %s7696_s2  ;;  %s6216_s2 = smov 0  }
   0x4   :  { %7743 = sst [smem:[#allocation5_spill]] %s7697_s3 }
   0x5   :  { %7744 = sst [smem:[#allocation6_spill]] %s7698_s4 }
   0x6   :  { %7745 = sst [smem:[#allocation7_spill]] %s7699_s5 }
   0x7 LB: > { %s4849_s25 = sadd.s32 4294967295, %s6087_s2   ;;  %p4853_p0 = scmp.ge.s32.totalorder %s6087_s2, 1  ;;  %s6087_s2 = sphi %s6216_s2, %s31_s2  }
   0x8   : > { %p587_p1 = scmp.lt.s32.totalorder %s6087_s2, 3 }
   0xa   : > { %p588_p2 = pnand %p4853_p0, %p587_p1 }
   0xb   : > { %s7746_s3 = sld [smem:[#allocation4_spill]] (!%p588_p2)  ;;  %p646_p3 = scmp.lt.s32.totalorder (!%p588_p2), %s4849_s25, 1 }
   0xc   : > { %591 = sbr.rel (%p588_p2) target bundleno = 6828 (0x1aac), region = 104  ;;  %s7747_s0 = sld [smem:[#allocation6_spill]] (!%p588_p2) }
   0xd   : > { %s7748_s5 = sld [smem:[#allocation2_spill]] (!%p588_p2)  ;;  %s6091_s26 = smov (!%p588_p2), 96  }
   0xe   : > { %s7749_s27 = sld [smem:[#allocation3_spill]] (!%p588_p2)  ;;  %s6093_s28 = smov (!%p588_p2), 88  }
   0xf   : > { %s7750_s4 = sld [smem:[#allocation7_spill]] (!%p588_p2)  ;;  %s7726_s30 = smov (!%p588_p2), 104  }
  0x10   : > { %s7722_s23 = smov (!%p588_p2), 56   ;;  %s7720_s1 = smov (!%p588_p2), 48  }
  0x11   : > { %v660_v0 = vld [vmem:[%s7746_s3 + $0x18] sm:$0xff]  ;;  %v659_v2 = vld [vmem:[%s7746_s3 + $0x10] sm:$0xff]  ;;  %v6089_v3 = vmov 0.0   ;;  %v658_v5 = vld [vmem:[%s7746_s3 + $0x8] sm:$0xff]  ;;  %s7764_s25 = smov (!%p646_p3, %s4849_s25), 1  ;;  %vm668_vm0 = vcmask 261120  }
  0x12   : > { %v754_v1 = vld [vmem:[%s7747_s0 + $0x18] sm:$0xff]  ;;  %5342 = vmatprep.subr.mxu0 %v660_v0  ;;  %5353 = vmatprep.subr.mxu1 %v6089_v3  ;;  %v753_v4 = vld [vmem:[%s7747_s0 + $0x10] sm:$0xff]  ;;  %v752_v6 = vld [vmem:[%s7747_s0 + $0x8] sm:$0xff]  ;;  %s5086_s29 = sshll.u32 %s7764_s25, 4  ;;  %vm6090_vm1 = vmmov 0   ;;  %vm871_vm2 = vcmask 253952  }
  0x13   : > { %5343 = vmatpush3.msra.mxu0 %v660_v0  ;;  %5354 = vmatpush3.msra.mxu1 %v754_v1  ;;  %v657_v7 = vld [vmem:[%s7746_s3] sm:$0xff]  ;;  %s650_s22 = scalar_lea.vmem %s7748_s5, %s5086_s29  ;;  %v834_v39 = vld [vmem:[%s7702_s8 + $0x18] sm:$0xff]  ;;  %v833_v40 = vld [vmem:[%s7702_s8 + $0x10] sm:$0xff]  ;;  %vm1028_vm3 = vcmask 64512   ;;  %vm1124_vm4 = vcmask 138240   ;;  %vm1131_vm5 = vcmask 131072  }
  0x14   : > { %5344 = vmatprep.subr.mxu0 %v659_v2  ;;  %5355 = vmatprep.subr.mxu1 %v6089_v3  ;;  %v655_v8 = vld [vmem:[%s650_s22] sm:$0xff]  ;;  %v656_v10 = vld [vmem:[%s650_s22 + $0x8] sm:$0xff]  ;;  %s7751_s22 = sld [smem:[#allocation5_spill]]  ;;  %vm1176_vm6 = vcmask 1040384   ;;  %s6094_s29 = smov 120   ;;  %vm2015_vm7 = vcmask 130048  }
  0x15   : > { %5345 = vmatpush3.msra.mxu0 %v659_v2  ;;  %5356 = vmatpush3.msra.mxu1 %v753_v4  ;;  %v751_v9 = vld [vmem:[%s7747_s0] sm:$0xff]  ;;  %v832_v41 = vld [vmem:[%s7702_s8 + $0x8] sm:$0xff]  ;;  %s7732_s5 = smov 80   ;;  %s7718_s24 = smov 40   ;;  %vm2019_vm8 = vcmask 195584  }
  0x16   : > { %5346 = vmatprep.subr.mxu0 %v658_v5  ;;  %5357 = vmatprep.subr.mxu1 %v6089_v3  ;;  %v750_v11 = vld [vmem:[%s7749_s27] sm:$0x1]  ;;  %s7724_s27 = smov 64  }
  0x17   : > { %5347 = vmatpush3.msra.mxu0 %v658_v5  ;;  %5358 = vmatpush3.msra.mxu1 %v752_v6  ;;  %v755_v12 = vld [vmem:[%s7750_s4] sm:$0x1]  ;;  %s7730_s4 = smov 112  }
  0x18   : > { %5348 = vmatprep.subr.mxu0 %v657_v7  ;;  %5359 = vmatprep.subr.mxu1 %v6089_v3  ;;  %v831_v42 = vld [vmem:[%s7702_s8] sm:$0xff] }
  0x19   : > { %5349 = vmatpush3.msra.mxu0 %v657_v7  ;;  %5350 = vmatprep.mubr.msk.f32.mxu0 %vm668_vm0, %v655_v8  ;;  %v4861_v53 = vld [vmem:[%s7700_s6] ss:$0 sm:$0xff] }
  0x1a   : > { %5360 = vmatpush3.msra.mxu1 %v751_v9  ;;  %5361 = vmatprep.mubr.msk.f32.mxu1 %vm6090_vm1, %v6089_v3  ;;  %v4857_v16 = vld [vmem:[%s7751_s22] ss:$0 sm:$0xff]  ;;  %s7728_s22 = smov 72  }
  0x1b   : > { %5351 = vmatmul.mubr.msk.f32.vlgmr.msra.gmra.mxu0 %vm668_vm0, %v656_v10  ;;  %5362 = vmatmul.mubr.msk.f32.vlgmr.msra.gmra.mxu1 %vm668_vm0, %v750_v11  ;;  %v4862_v55 = vld [vmem:[%s7701_s7] ss:$0 sm:$0xff] }
  0x1c   : > { %5364 = vmatprep.subr.mxu1 %v6089_v3  ;;  %5372 = vmatprep.mubr.msk.f32.mxu1 %vm6090_vm1, %v6089_v3  ;;  %v4863_v5 = vld [vmem:[%s7703_s9] ss:$0 sm:$0xff] }
  0x1d   : > { %5426 = vmatprep.subr.mxu0 %v6089_v3  ;;  %5432 = vmatprep.mubr.msk.f32.mxu0 %vm6090_vm1, %v6089_v3 }
  0x1e   : > { %5365 = vmatpush3.msra.mxu1 %v834_v39 }
  0x1f   : > { %5366 = vmatprep.subr.mxu1 %v6089_v3 }
  0x20   : > { %5367 = vmatpush3.msra.mxu1 %v833_v40 }
  0x21   : > { %5368 = vmatprep.subr.mxu1 %v6089_v3 }
  0x22   : > { %5369 = vmatpush3.msra.mxu1 %v832_v41 }
  0x23   : > { %5370 = vmatprep.subr.mxu1 %v6089_v3 }
  0x24   : > { %5371 = vmatpush3.msra.mxu1 %v831_v42 }
  0x25   : > { %5381 = vmatprep.subr.mxu1 %v6089_v3 }
  0xdb   : > { %v5352_v13 = vpop.f32.mrf.mxu0  ;;  %v825_v14 = vpop.f32.mrf.mxu1 }
  0xdc   : > { %v6275_v15 = vadd.f32 %v825_v14, %v755_v12  ;;  %v6284_v21 = vadd.f32 %v5352_v13, %v4857_v16 }
  0xdd   : > { %v741_v17 = vpop.f32.mrf.mxu0  ;;  %v5363_v18 = vpop.f32.mrf.mxu1 }
  0xde   : > { %v6280_v19 = vadd.f32 %v4857_v16, %v741_v17  ;;  %v872_v20 = vsel %vm871_vm2, %v6275_v15, 0.0  ;;  %v868_v23 = vsel %vm668_vm0, %v6284_v21, 0.0 }
  0xdf   : > { %873 = vadd.xlane.f32.xlu1 %v872_v20 }
  0xe0   : > { %v865_v22 = vsel %vm668_vm0, %v6280_v19, 0.0 }
  0xe1   : > { %866 = vadd.xlane.f32.xlu0 %v865_v22 }
  0xe5   : > { %869 = vadd.xlane.f32.xlu0 %v868_v23 }
 0x168   : > { %v874_v24 = vpop.xlane.xlu1 %873 }
 0x169   : > { %v878_v25 = vmul.f32 0.03125, %v874_v24 }
 0x16a   : > { %v867_v26 = vpop.xlane.xlu0 %866 }
 0x16b   : > { %v876_v27 = vmul.f32 0.03125, %v867_v26  ;;  %v881_v28 = vsub.f32 %v6275_v15, %v878_v25 }
 0x16d   : > { %v879_v29 = vsub.f32 %v6280_v19, %v876_v27  ;;  %v884_v35 = vmul.f32 %v881_v28, %v881_v28 }
 0x16e   : > { %v870_v30 = vpop.xlane.xlu0 %869 }
 0x16f   : > { %v877_v31 = vmul.f32 0.03125, %v870_v30  ;;  %v882_v32 = vmul.f32 %v879_v29, %v879_v29  ;;  %v891_v37 = vsel %vm871_vm2, %v884_v35, 0.0 }
 0x171   : > { %v880_v33 = vsub.f32 %v6284_v21, %v877_v31  ;;  %v885_v34 = vsel %vm668_vm0, %v882_v32, 0.0 }
 0x172   : > { %886 = vadd.xlane.f32.xlu1 %v885_v34 }
 0x173   : > { %v883_v36 = vmul.f32 %v880_v33, %v880_v33 }
 0x175   : > { %v888_v38 = vsel %vm668_vm0, %v883_v36, 0.0 }
 0x176   : > { %892 = vadd.xlane.f32.xlu1 %v891_v37  ;;  %889 = vadd.xlane.f32.xlu0 %v888_v38 }
 0x1fb   : > { %v887_v43 = vpop.xlane.xlu1 %886 }
 0x1fc   : > { %v894_v44 = vmul.f32 0.03125, %v887_v43 }
 0x1fe   : > { %v897_v45 = vadd.f32 1e-05, %v894_v44 }
 0x1ff   : > { %v893_v46 = vpop.xlane.xlu1 %892  ;;  %v890_v47 = vpop.xlane.xlu0 %889 }
 0x200   : > { %5865 = vrsqrt.f32 %v897_v45  ;;  %v896_v48 = vmul.f32 0.03125, %v893_v46  ;;  %v895_v49 = vmul.f32 0.03125, %v890_v47 }
 0x202   : > { %v899_v50 = vadd.f32 1e-05, %v896_v48  ;;  %v898_v51 = vadd.f32 1e-05, %v895_v49 }
 0x204   : > { %5867 = vrsqrt.f32 %v899_v50 }
 0x205   : > { %5869 = vrsqrt.f32 %v898_v51 }
 0x20d   : > { %v5866_v52 = vpop.eup %5865 }
 0x20e   : > { %v903_v54 = vmul.f32 %v5866_v52, %v879_v29 }
 0x210   : > { %v912_v56 = vmul.f32 %v4861_v53, %v903_v54 }
 0x211   : > { %v5868_v57 = vpop.eup %5867 }
 0x212   : > { %v5870_v58 = vpop.eup %5869  ;;  %v921_v59 = vadd.f32 %v4862_v55, %v912_v56  ;;  %v905_v61 = vmul.f32 %v5868_v57, %v881_v28 }
 0x213   : > { %v904_v60 = vmul.f32 %v5870_v58, %v880_v33 }
 0x214   : > { %5373 = vmatmul.mubr.msk.f32.vlgmr.msra.gmra.mxu1 %vm668_vm0, %v921_v59  ;;  %v914_v0 = vmul.f32 %v4861_v53, %v905_v61 }
 0x215   : > { %5375 = vmatprep.mubr.msk.f32.mxu1 %vm6090_vm1, %v6089_v3  ;;  %v913_v62 = vmul.f32 %v4861_v53, %v904_v60 }
 0x216   : > { %v923_v1 = vadd.f32 %v4862_v55, %v914_v0 }
 0x217   : > { %v922_v63 = vadd.f32 %v4862_v55, %v913_v62 }
 0x219   : > { %5376 = vmatmul.mubr.msk.f32.gmra.mxu1 %vm668_vm0, %v922_v63 }
 0x21a   : > { %5378 = vmatprep.mubr.msk.f32.mxu1 %vm6090_vm1, %v6089_v3 }
 0x21d   : > { %5379 = vmatmul.mubr.msk.f32.gmra.mxu1 %vm668_vm0, %v923_v1 }
 0x21e   : > { %5387 = vmatprep.mubr.msk.f32.mxu1 %vm6090_vm1, %v6089_v3 }
 0x2d4   : > { %v1005_v2 = vpop.f32.mrf.mxu1 }
 0x2d5   : > { %v6334_v10 = vadd.f32 %v4863_v5, %v1005_v2 }
 0x2d6   : > { %v5374_v4 = vpop.f32.mrf.mxu1 }
 0x2d9   : > { %v1010_v6 = vpop.f32.mrf.mxu1 }
 0x2da   : > { %v6330_v7 = vadd.f32 %v4863_v5, %v1010_v6 }
 0x2db   : > { %v5377_v8 = vpop.f32.mrf.mxu1 }
 0x2dc   : > { %1024 = vrot.lane.b32.xlu1 %v6330_v7, %s6091_s26 }
 0x2dd   : > { %v1015_v9 = vpop.f32.mrf.mxu1 }
 0x2de   : > { %v6336_v11 = vadd.f32 %v4863_v5, %v1015_v9 }
 0x2df   : > { %v5380_v12 = vpop.f32.mrf.mxu1 }
 0x2e0   : > { %1022 = vrot.lane.b32.xlu1 %v6334_v10, %s6091_s26  ;;  %1026 = vrot.lane.b32.xlu0 %v6336_v11, %s6091_s26 }
 0x34e   : > { %v1025_v14 = vpop.permute.xlu1 %1024 }
 0x352   : > { %v1027_v13 = vpop.permute.xlu0 %1026  ;;  %v1023_v16 = vpop.permute.xlu1 %1022 }
 0x353   : > { %5382 = vmatpush3.xpose.msk.msra.mxu1 %vm1028_vm3, %v1027_v13 }
 0x354   : > { %5383 = vmatprep.subr.mxu1 %v6089_v3 }
 0x357   : > { %5384 = vmatpush3.xpose.msk.msra.mxu1 %vm1028_vm3, %v1025_v14 }
 0x358   : > { %5385 = vmatprep.subr.mxu1 %v6089_v3 }
 0x35b   : > { %5386 = vmatpush3.xpose.msk.msra.mxu1 %vm1028_vm3, %v1023_v16 }
 0x35c   : > { %5396 = vmatprep.subr.mxu1 %v6089_v3 }
 0x35e   : > { %5388 = vmatmul.mubr.msk.f32.vlgmr.msra.gmra.mxu1 %vm1028_vm3, %v6334_v10 }
 0x35f   : > { %5390 = vmatprep.mubr.msk.f32.mxu1 %vm6090_vm1, %v6089_v3 }
 0x362   : > { %5391 = vmatmul.mubr.msk.f32.gmra.mxu1 %vm1028_vm3, %v6330_v7 }
 0x363   : > { %5393 = vmatprep.mubr.msk.f32.mxu1 %vm6090_vm1, %v6089_v3 }
 0x366   : > { %5394 = vmatmul.mubr.msk.f32.gmra.mxu1 %vm1028_vm3, %v6336_v11 }
 0x367   : > { %5402 = vmatprep.mubr.msk.f32.mxu1 %vm6090_vm1, %v6089_v3 }
 0x41e   : > { %v1107_v17 = vpop.f32.mrf.mxu1 }
 0x41f   : > { %v1121_v18 = vmul.f32 0.35355338, %v1107_v17 }
 0x420   : > { %v5389_v20 = vpop.f32.mrf.mxu1 }
 0x421   : > { %v1125_v22 = vsel %vm1124_vm4, %v1121_v18, -inf }
 0x422   : > { %1126 = vmax.xlane.f32.xlu1 %v1125_v22  ;;  %v1112_v23 = vpop.f32.mrf.mxu1 }
 0x423   : > { %v1122_v24 = vmul.f32 0.35355338, %v1112_v23 }
 0x424   : > { %v5392_v25 = vpop.f32.mrf.mxu1 }
 0x425   : > { %v1128_v26 = vsel %vm1124_vm4, %v1122_v24, -inf }
 0x426   : > { %1129 = vmax.xlane.f32.xlu0 %v1128_v26  ;;  %v1117_v27 = vpop.f32.mrf.mxu1 }
 0x427   : > { %v1123_v28 = vmul.f32 0.35355338, %v1117_v27 }
 0x428   : > { %v5395_v29 = vpop.f32.mrf.mxu1 }
 0x429   : > { %v1132_v30 = vsel %vm1131_vm5, %v1123_v28, -inf }
 0x42a   : > { %1133 = vmax.xlane.f32.xlu0 %v1132_v30 }
 0x433   : > { %1163 = vrot.lane.b32.xlu1 %v6336_v11, %s7724_s27 }
 0x437   : > { %1159 = vrot.lane.b32.xlu1 %v6334_v10, %s7724_s27 }
 0x43b   : > { %1269 = vrot.lane.b32.xlu1 %v6336_v11, %s6093_s28 }
 0x43f   : > { %1267 = vrot.lane.b32.xlu1 %v6330_v7, %s6093_s28 }
 0x4ab   : > { %v1127_v31 = vpop.xlane.xlu1 %1126 }
 0x4ac   : > { %v1135_v32 = vsub.f32 %v1121_v18, %v1127_v31 }
 0x4ae   : > { %v1138_v33 = vmul.f32 1.442695, %v1135_v32 }
 0x4af   : > { %v1164_v34 = vpop.permute.xlu1 %1163  ;;  %v1130_v35 = vpop.xlane.xlu0 %1129 }
 0x4b0   : > { %5871 = vpow2.f32 %v1138_v33  ;;  %v1136_v36 = vsub.f32 %v1122_v24, %v1130_v35  ;;  %5397 = vmatpush3.msk.msra.mxu1 %vm1176_vm6, %v1164_v34 }
 0x4b1   : > { %5398 = vmatprep.subr.mxu1 %v6089_v3 }
 0x4b2   : > { %v1140_v37 = vmul.f32 1.442695, %v1136_v36 }
 0x4b3   : > { %v1134_v42 = vpop.xlane.xlu0 %1133  ;;  %v1160_v47 = vpop.permute.xlu1 %1159 }
 0x4b4   : > { %5873 = vpow2.f32 %v1140_v37  ;;  %v1137_v43 = vsub.f32 %v1123_v28, %v1134_v42 }
 0x4b6   : > { %v1142_v44 = vmul.f32 1.442695, %v1137_v43 }
 0x4b7   : > { %v1270_v48 = vpop.permute.xlu1 %1269 }
 0x4b8   : > { %5875 = vpow2.f32 %v1142_v44 }
 0x4bb   : > { %v1268_v49 = vpop.permute.xlu1 %1267 }
 0x4bd   : > { %v5872_v38 = vpop.eup %5871 }
 0x4be   : > { %v1144_v39 = vsel %vm1124_vm4, %v5872_v38, 0.0 }
 0x4bf   : > { %1145 = vadd.xlane.f32.xlu0 %v1144_v39 }
 0x4c1   : > { %v5874_v40 = vpop.eup %5873 }
 0x4c2   : > { %v1147_v41 = vsel %vm1124_vm4, %v5874_v40, 0.0 }
 0x4c3   : > { %1148 = vadd.xlane.f32.xlu1 %v1147_v41 }
 0x4c5   : > { %v5876_v45 = vpop.eup %5875 }
 0x4c6   : > { %v1150_v46 = vsel %vm1131_vm5, %v5876_v45, 0.0 }
 0x4d4   : > { %1259 = vrot.lane.b32.xlu1 %v6334_v10, %s6094_s29 }
 0x4d5   : > { %1161 = vrot.lane.b32.xlu0 %v6330_v7, %s7724_s27  ;;  %s7734_s27 = smov 24  }
 0x4d8   : > { %1261 = vrot.lane.b32.xlu1 %v6330_v7, %s6094_s29 }
 0x4dc   : > { %1263 = vrot.lane.b32.xlu1 %v6336_v11, %s6094_s29 }
 0x4e0   : > { %1498 = vrot.lane.b32.xlu1 %v6334_v10, %s7730_s4 }
 0x4e4   : > { %1500 = vrot.lane.b32.xlu1 %v6330_v7, %s7730_s4 }
 0x4e8   : > { %1502 = vrot.lane.b32.xlu1 %v6336_v11, %s7730_s4  ;;  %s7752_s4 = smov 80  }
 0x4ec   : > { %1737 = vrot.lane.b32.xlu1 %v6334_v10, %s7726_s30 }
 0x4f0   : > { %1741 = vrot.lane.b32.xlu1 %v6336_v11, %s7726_s30 }
 0x4f4   : > { %1151 = vadd.xlane.f32.xlu0 %v1150_v46 }
 0x50a   : > { %1265 = vrot.lane.b32.xlu0 %v6334_v10, %s6093_s28 }
 0x50e   : > { %1508 = vrot.lane.b32.xlu0 %v6336_v11, %s7732_s5 }
 0x512   : > { %1506 = vrot.lane.b32.xlu0 %v6330_v7, %s7732_s5 }
 0x516   : > { %1504 = vrot.lane.b32.xlu0 %v6334_v10, %s7732_s5  ;;  %s7736_s5 = smov 16  }
 0x51a   : > { %1747 = vrot.lane.b32.xlu0 %v6336_v11, %s7728_s22 }
 0x51e   : > { %1745 = vrot.lane.b32.xlu0 %v6330_v7, %s7728_s22 }
 0x522   : > { %1743 = vrot.lane.b32.xlu0 %v6334_v10, %s7728_s22  ;;  %s7760_s22 = smov 8  }
 0x526   : > { %1739 = vrot.lane.b32.xlu0 %v6330_v7, %s7726_s30  ;;  %s7756_s30 = smov 64  }
 0x548   : > { %v1146_v50 = vpop.xlane.xlu0 %1145 }
 0x549   : > { %5877 = vrcp.f32 %v1146_v50 }
 0x54c   : > { %v1149_v51 = vpop.xlane.xlu1 %1148  ;;  %v1162_v52 = vpop.permute.xlu0 %1161 }
 0x54d   : > { %5879 = vrcp.f32 %v1149_v51  ;;  %5399 = vmatpush3.msra.mxu1 %v1162_v52 }
 0x54e   : > { %5400 = vmatprep.subr.mxu1 %v6089_v3 }
 0x54f   : > { %5401 = vmatpush3.msra.mxu1 %v1160_v47 }
 0x550   : > { %5411 = vmatprep.subr.mxu1 %v6089_v3  ;;  %v1260_v59 = vpop.permute.xlu1 %1259 }
 0x554   : > { %v1262_v62 = vpop.permute.xlu1 %1261 }
 0x556   : > { %v5878_v53 = vpop.eup %5877 }
 0x557   : > { %v1156_v54 = vmul.f32 %v5878_v53, %v5872_v38 }
 0x558   : > { %v1264_v1 = vpop.permute.xlu1 %1263 }
 0x559   : > { %5403 = vmatmul.mubr.msk.f32.vlgmr.msra.gmra.mxu1 %vm1124_vm4, %v1156_v54 }
 0x55a   : > { %v5880_v55 = vpop.eup %5879  ;;  %5412 = vmatpush3.xpose.msk.msra.mxu1 %vm1028_vm3, %v1270_v48  ;;  %5405 = vmatprep.mubr.msk.f32.mxu1 %vm6090_vm1, %v6089_v3 }
 0x55b   : > { %5413 = vmatprep.subr.mxu1 %v6089_v3  ;;  %v1157_v56 = vmul.f32 %v5880_v55, %v5874_v40 }
 0x55c   : > { %v1499_v4 = vpop.permute.xlu1 %1498 }
 0x55d   : > { %5406 = vmatmul.mubr.msk.f32.gmra.mxu1 %vm1124_vm4, %v1157_v56 }
 0x55e   : > { %5414 = vmatpush3.xpose.msk.msra.mxu1 %vm1028_vm3, %v1268_v49  ;;  %5408 = vmatprep.mubr.msk.f32.mxu1 %vm6090_vm1, %v6089_v3 }
 0x55f   : > { %5415 = vmatprep.subr.mxu1 %v6089_v3 }
 0x560   : > { %v1501_v6 = vpop.permute.xlu1 %1500 }
 0x564   : > { %v1503_v9 = vpop.permute.xlu1 %1502 }
 0x568   : > { %v1738_v13 = vpop.permute.xlu1 %1737 }
 0x56c   : > { %v1742_v16 = vpop.permute.xlu1 %1741 }
 0x57d   : > { %v1152_v57 = vpop.xlane.xlu0 %1151 }
 0x57e   : > { %5881 = vrcp.f32 %v1152_v57 }
 0x581   : > { %v1266_v58 = vpop.permute.xlu0 %1265 }
 0x582   : > { %5416 = vmatpush3.xpose.msk.msra.mxu1 %vm1028_vm3, %v1266_v58 }
 0x583   : > { %5441 = vmatprep.subr.mxu1 %v6089_v3 }
 0x585   : > { %v1509_v60 = vpop.permute.xlu0 %1508 }
 0x589   : > { %v1507_v0 = vpop.permute.xlu0 %1506 }
 0x58b   : > { %v5882_v61 = vpop.eup %5881 }
 0x58c   : > { %v1158_v63 = vmul.f32 %v5882_v61, %v5876_v45 }
 0x58d   : > { %v1505_v2 = vpop.permute.xlu0 %1504 }
 0x58e   : > { %5409 = vmatmul.mubr.msk.f32.gmra.mxu1 %vm1124_vm4, %v1158_v63 }
 0x58f   : > { %5417 = vmatprep.mubr.msk.f32.mxu1 %vm6090_vm1, %v6089_v3 }
 0x591   : > { %v1748_v5 = vpop.permute.xlu0 %1747 }
 0x592   : > { %5418 = vmatmul.mubr.msk.f32.vlgmr.msra.gmra.mxu1 %vm1028_vm3, %v1260_v59 }
 0x593   : > { %5442 = vmatpush3.xpose.msk.msra.mxu1 %vm1028_vm3, %v1509_v60  ;;  %5420 = vmatprep.mubr.msk.f32.mxu1 %vm6090_vm1, %v6089_v3 }
 0x594   : > { %5443 = vmatprep.subr.mxu1 %v6089_v3 }
 0x595   : > { %v1746_v8 = vpop.permute.xlu0 %1745 }
 0x596   : > { %5421 = vmatmul.mubr.msk.f32.gmra.mxu1 %vm1028_vm3, %v1262_v62 }
 0x597   : > { %5444 = vmatpush3.xpose.msk.msra.mxu1 %vm1028_vm3, %v1507_v0  ;;  %5423 = vmatprep.mubr.msk.f32.mxu1 %vm6090_vm1, %v6089_v3 }
 0x598   : > { %5445 = vmatprep.subr.mxu1 %v6089_v3 }
 0x599   : > { %v1744_v12 = vpop.permute.xlu0 %1743 }
 0x59a   : > { %5424 = vmatmul.mubr.msk.f32.gmra.mxu1 %vm1028_vm3, %v1264_v1 }
 0x59b   : > { %5446 = vmatpush3.xpose.msk.msra.mxu1 %vm1028_vm3, %v1505_v2  ;;  %5447 = vmatprep.mubr.msk.f32.mxu1 %vm6090_vm1, %v6089_v3 }
 0x59c   : > { %5471 = vmatprep.subr.mxu1 %v6089_v3 }
 0x59d   : > { %v1740_v14 = vpop.permute.xlu0 %1739 }
 0x59e   : > { %5448 = vmatmul.mubr.msk.f32.vlgmr.msra.gmra.mxu1 %vm1028_vm3, %v1499_v4 }
 0x59f   : > { %5472 = vmatpush3.xpose.msk.msra.mxu1 %vm1028_vm3, %v1748_v5  ;;  %5450 = vmatprep.mubr.msk.f32.mxu1 %vm6090_vm1, %v6089_v3 }
 0x5a0   : > { %5473 = vmatprep.subr.mxu1 %v6089_v3 }
 0x5a2   : > { %5451 = vmatmul.mubr.msk.f32.gmra.mxu1 %vm1028_vm3, %v1501_v6 }
 0x5a3   : > { %5474 = vmatpush3.xpose.msk.msra.mxu1 %vm1028_vm3, %v1746_v8  ;;  %5453 = vmatprep.mubr.msk.f32.mxu1 %vm6090_vm1, %v6089_v3 }
 0x5a4   : > { %5475 = vmatprep.subr.mxu1 %v6089_v3 }
 0x5a6   : > { %5454 = vmatmul.mubr.msk.f32.gmra.mxu1 %vm1028_vm3, %v1503_v9 }
 0x5a7   : > { %5476 = vmatpush3.xpose.msk.msra.mxu1 %vm1028_vm3, %v1744_v12  ;;  %5477 = vmatprep.mubr.msk.f32.mxu1 %vm6090_vm1, %v6089_v3 }
 0x5a8   : > { %5501 = vmatprep.subr.mxu1 %v6089_v3 }
 0x5aa   : > { %5478 = vmatmul.mubr.msk.f32.vlgmr.msra.gmra.mxu1 %vm1028_vm3, %v1738_v13 }
 0x5ab   : > { %5480 = vmatprep.mubr.msk.f32.mxu1 %vm6090_vm1, %v6089_v3 }
 0x5ae   : > { %5481 = vmatmul.mubr.msk.f32.gmra.mxu1 %vm1028_vm3, %v1740_v14 }
 0x5af   : > { %5483 = vmatprep.mubr.msk.f32.mxu1 %vm6090_vm1, %v6089_v3 }
 0x5b2   : > { %5484 = vmatmul.mubr.msk.f32.gmra.mxu1 %vm1028_vm3, %v1742_v16 }
 0x5b3   : > { %5509 = vmatprep.mubr.msk.f32.mxu1 %vm6090_vm1, %v6089_v3 }
 0x619   : > { %v6466_v17 = vpop.f32.mrf.mxu1 }
 0x61b   : > { %v5404_v18 = vpop.f32.mrf.mxu1 }
 0x61d   : > { %v6468_v20 = vpop.f32.mrf.mxu1 }
 0x61f   : > { %v5407_v22 = vpop.f32.mrf.mxu1 }
 0x64e   : > { %v6470_v23 = vpop.f32.mrf.mxu1 }
 0x650   : > { %v5410_v24 = vpop.f32.mrf.mxu1 }
 0x652   : > { %v1349_v25 = vpop.f32.mrf.mxu1 }
 0x653   : > { %v1363_v26 = vmul.f32 0.35355338, %v1349_v25 }
 0x654   : > { %v5419_v27 = vpop.f32.mrf.mxu1 }
 0x655   : > { %v1366_v28 = vsel %vm1124_vm4, %v1363_v26, -inf }
 0x656   : > { %1367 = vmax.xlane.f32.xlu0 %v1366_v28  ;;  %v1354_v29 = vpop.f32.mrf.mxu1 }
 0x657   : > { %v1364_v30 = vmul.f32 0.35355338, %v1354_v29 }
 0x658   : > { %v5422_v31 = vpop.f32.mrf.mxu1 }
 0x659   : > { %v1369_v32 = vsel %vm1124_vm4, %v1364_v30, -inf }
 0x65a   : > { %1370 = vmax.xlane.f32.xlu1 %v1369_v32  ;;  %v1359_v33 = vpop.f32.mrf.mxu1 }
 0x65b   : > { %v6474_v34 = vmul.f32 0.35355338, %v1359_v33 }
 0x65c   : > { %v5425_v35 = vpop.f32.mrf.mxu1 }
 0x65d   : > { %v1372_v36 = vsel %vm1131_vm5, %v6474_v34, -inf }
 0x65e   : > { %1373 = vmax.xlane.f32.xlu0 %v1372_v36  ;;  %v1588_v37 = vpop.f32.mrf.mxu1 }
 0x65f   : > { %v1602_v38 = vmul.f32 0.35355338, %v1588_v37 }
 0x660   : > { %v5449_v39 = vpop.f32.mrf.mxu1 }
 0x661   : > { %v1605_v40 = vsel %vm1124_vm4, %v1602_v38, -inf }
 0x662   : > { %1606 = vmax.xlane.f32.xlu0 %v1605_v40  ;;  %v1593_v41 = vpop.f32.mrf.mxu1 }
 0x663   : > { %v6479_v42 = vmul.f32 0.35355338, %v1593_v41 }
 0x664   : > { %v5452_v43 = vpop.f32.mrf.mxu1 }
 0x665   : > { %v1608_v44 = vsel %vm1124_vm4, %v6479_v42, -inf }
 0x666   : > { %1609 = vmax.xlane.f32.xlu0 %v1608_v44  ;;  %v1598_v45 = vpop.f32.mrf.mxu1 }
 0x667   : > { %v1604_v46 = vmul.f32 0.35355338, %v1598_v45 }
 0x668   : > { %v5455_v47 = vpop.f32.mrf.mxu1 }
 0x669   : > { %v1611_v48 = vsel %vm1131_vm5, %v1604_v46, -inf }
 0x66a   : > { %1612 = vmax.xlane.f32.xlu1 %v1611_v48  ;;  %v1827_v49 = vpop.f32.mrf.mxu1 }
 0x66b   : > { %v1841_v50 = vmul.f32 0.35355338, %v1827_v49 }
 0x66c   : > { %v5479_v51 = vpop.f32.mrf.mxu1 }
 0x66d   : > { %v1844_v52 = vsel %vm1124_vm4, %v1841_v50, -inf }
 0x66e   : > { %1845 = vmax.xlane.f32.xlu0 %v1844_v52  ;;  %v1832_v53 = vpop.f32.mrf.mxu1 }
 0x66f   : > { %v6485_v54 = vmul.f32 0.35355338, %v1832_v53 }
 0x670   : > { %v5482_v55 = vpop.f32.mrf.mxu1 }
 0x671   : > { %v1847_v56 = vsel %vm1124_vm4, %v6485_v54, -inf }
 0x672   : > { %1848 = vmax.xlane.f32.xlu1 %v1847_v56  ;;  %v1837_v57 = vpop.f32.mrf.mxu1 }
 0x673   : > { %v1843_v58 = vmul.f32 0.35355338, %v1837_v57 }
 0x674   : > { %v5485_v59 = vpop.f32.mrf.mxu1 }
 0x675   : > { %v1850_v60 = vsel %vm1131_vm5, %v1843_v58, -inf }
 0x676   : > { %1851 = vmax.xlane.f32.xlu0 %v1850_v60 }
 0x683   : > { %1403 = vrot.lane.b32.xlu1 %v6336_v11, %s7722_s23 }
 0x687   : > { %1399 = vrot.lane.b32.xlu1 %v6334_v10, %s7722_s23 }
 0x68b   : > { %1642 = vrot.lane.b32.xlu1 %v6336_v11, %s7720_s1 }
 0x68c   : > { %1401 = vrot.lane.b32.xlu0 %v6330_v7, %s7722_s23 }
 0x68f   : > { %1638 = vrot.lane.b32.xlu1 %v6334_v10, %s7720_s1 }
 0x690   : > { %1640 = vrot.lane.b32.xlu0 %v6330_v7, %s7720_s1 }
 0x6df   : > { %v1368_v61 = vpop.xlane.xlu0 %1367 }
 0x6e0   : > { %v1375_v62 = vsub.f32 %v1363_v26, %v1368_v61 }
 0x6e2   : > { %v1378_v63 = vmul.f32 1.442695, %v1375_v62 }
 0x6e3   : > { %v1371_v0 = vpop.xlane.xlu1 %1370 }
 0x6e4   : > { %5883 = vpow2.f32 %v1378_v63  ;;  %v1376_v1 = vsub.f32 %v1364_v30, %v1371_v0 }
 0x6e6   : > { %v1380_v2 = vmul.f32 1.442695, %v1376_v1 }
 0x6e7   : > { %v1374_v4 = vpop.xlane.xlu0 %1373 }
 0x6e8   : > { %5885 = vpow2.f32 %v1380_v2 }
 0x6eb   : > { %v1607_v5 = vpop.xlane.xlu0 %1606 }
 0x6ec   : > { %v1614_v6 = vsub.f32 %v1602_v38, %v1607_v5 }
 0x6ee   : > { %v1617_v8 = vmul.f32 1.442695, %v1614_v6 }
 0x6ef   : > { %v1610_v13 = vpop.xlane.xlu0 %1609 }
 0x6f0   : > { %5887 = vpow2.f32 %v1617_v8 }
 0x6f1   : > { %v6502_v9 = vpop.eup %5883 }
 0x6f2   : > { %v1384_v12 = vsel %vm1124_vm4, %v6502_v9, 0.0 }
 0x6f3   : > { %v1613_v14 = vpop.xlane.xlu1 %1612  ;;  %1385 = vadd.xlane.f32.xlu1 %v1384_v12 }
 0x6f4   : > { %v1616_v16 = vsub.f32 %v1604_v46, %v1613_v14  ;;  %v1615_v46 = vsub.f32 %v6479_v42, %v1610_v13 }
 0x6f5   : > { %v6506_v18 = vpop.eup %5885 }
 0x6f6   : > { %v1621_v22 = vmul.f32 1.442695, %v1616_v16  ;;  %v1387_v24 = vsel %vm1124_vm4, %v6506_v18, 0.0  ;;  %v1619_v47 = vmul.f32 1.442695, %v1615_v46 }
 0x6f7   : > { %v1846_v25 = vpop.xlane.xlu0 %1845  ;;  %1388 = vadd.xlane.f32.xlu0 %v1387_v24 }
 0x6f8   : > { %5889 = vpow2.f32 %v1621_v22  ;;  %v1853_v26 = vsub.f32 %v1841_v50, %v1846_v25 }
 0x6fa   : > { %v1856_v27 = vmul.f32 1.442695, %v1853_v26 }
 0x6fb   : > { %v1849_v28 = vpop.xlane.xlu1 %1848 }
 0x6fc   : > { %5891 = vpow2.f32 %v1856_v27  ;;  %v1854_v48 = vsub.f32 %v6485_v54, %v1849_v28 }
 0x6fd   : > { %v6510_v29 = vpop.eup %5887 }
 0x6fe   : > { %v1623_v30 = vsel %vm1124_vm4, %v6510_v29, 0.0  ;;  %v1858_v49 = vmul.f32 1.442695, %v1854_v48 }
 0x6ff   : > { %v1404_v31 = vpop.permute.xlu1 %1403  ;;  %1624 = vadd.xlane.f32.xlu0 %v1623_v30  ;;  %v1852_v32 = vpop.xlane.xlu0 %1851 }
 0x700   : > { %v1855_v33 = vsub.f32 %v1843_v58, %v1852_v32  ;;  %5427 = vmatpush3.msk.msra.mxu0 %vm1176_vm6, %v1404_v31 }
 0x701   : > { %5428 = vmatprep.subr.mxu0 %v6089_v3 }
 0x702   : > { %v1860_v35 = vmul.f32 1.442695, %v1855_v33 }
 0x703   : > { %v1402_v36 = vpop.permute.xlu0 %1401  ;;  %v1400_v38 = vpop.permute.xlu1 %1399 }
 0x704   : > { %5893 = vpow2.f32 %v1860_v35  ;;  %1881 = vrot.lane.b32.xlu1 %v6336_v11, %s7718_s24  ;;  %5429 = vmatpush3.msra.mxu0 %v1402_v36  ;;  %v1377_v11 = vsub.f32 %v6474_v34, %v1374_v4  ;;  %v839_v36 = vld [vmem:[%s7704_s10 + $0x18] sm:$0xff] }
 0x705   : > { %v6518_v37 = vpop.eup %5889  ;;  %5430 = vmatprep.subr.mxu0 %v6089_v3  ;;  %5502 = vmatpush3.msra.mxu1 %v839_v36 }
 0x706   : > { %5431 = vmatpush3.msra.mxu0 %v1400_v38  ;;  %v1629_v39 = vsel %vm1131_vm5, %v6518_v37, 0.0  ;;  %v1382_v45 = vmul.f32 1.442695, %v1377_v11  ;;  %5503 = vmatprep.subr.mxu1 %v6089_v3  ;;  %v837_v38 = vld [vmem:[%s7704_s10 + $0x8] sm:$0xff]  ;;  %v836_v11 = vld [vmem:[%s7704_s10] sm:$0xff] }
 0x707   : > { %1630 = vadd.xlane.f32.xlu0 %v1629_v39  ;;  %5456 = vmatprep.subr.mxu0 %v6089_v3  ;;  %v1643_v54 = vpop.permute.xlu1 %1642  ;;  %v1641_v56 = vpop.permute.xlu0 %1640 }
 0x708   : > { %5895 = vpow2.f32 %v1382_v45 }
 0x709   : > { %v6524_v40 = vpop.eup %5891  ;;  %5897 = vpow2.f32 %v1619_v47 }
 0x70a   : > { %v1862_v41 = vsel %vm1124_vm4, %v6524_v40, 0.0  ;;  %5899 = vpow2.f32 %v1858_v49 }
 0x70b   : > { %1863 = vadd.xlane.f32.xlu0 %v1862_v41  ;;  %v1639_v55 = vpop.permute.xlu1 %1638 }
 0x711   : > { %v6529_v43 = vpop.eup %5893 }
 0x712   : > { %v1868_v44 = vsel %vm1131_vm5, %v6529_v43, 0.0 }
 0x713   : > { %1869 = vadd.xlane.f32.xlu0 %v1868_v44 }
 0x715   : > { %v5896_v50 = vpop.eup %5895 }
 0x716   : > { %v1390_v51 = vsel %vm1131_vm5, %v5896_v50, 0.0  ;;  %v5898_v34 = vpop.eup %5897 }
 0x717   : > { %v1626_v52 = vsel %vm1124_vm4, %v5898_v34, 0.0  ;;  %v6539_v53 = vpop.eup %5899 }
 0x718   : > { %v1865_v42 = vsel %vm1124_vm4, %v6539_v53, 0.0 }
 0x728   : > { %1391 = vadd.xlane.f32.xlu1 %v1390_v51 }
 0x729   : > { %1877 = vrot.lane.b32.xlu0 %v6334_v10, %s7718_s24 }
 0x72c   : > { %1627 = vadd.xlane.f32.xlu1 %v1626_v52 }
 0x730   : > { %1866 = vadd.xlane.f32.xlu1 %v1865_v42 }
 0x741   : > { %1879 = vrot.lane.b32.xlu1 %v6330_v7, %s7718_s24  ;;  %s7738_s24 = smov 8  }
 0x77c   : > { %v1386_v57 = vpop.xlane.xlu1 %1385 }
 0x77d   : > { %5901 = vrcp.f32 %v1386_v57 }
 0x780   : > { %v1389_v58 = vpop.xlane.xlu0 %1388  ;;  %v1882_v61 = vpop.permute.xlu1 %1881 }
 0x781   : > { %5903 = vrcp.f32 %v1389_v58 }
 0x788   : > { %v1625_v62 = vpop.xlane.xlu0 %1624 }
 0x78a   : > { %v5902_v10 = vpop.eup %5901 }
 0x78b   : > { %v1396_v59 = vmul.f32 %v5902_v10, %v6502_v9 }
 0x78d   : > { %5433 = vmatmul.mubr.msk.f32.vlgmr.msra.gmra.mxu0 %vm1124_vm4, %v1396_v59 }
 0x78e   : > { %v5904_v60 = vpop.eup %5903  ;;  %5457 = vmatpush3.msk.msra.mxu0 %vm1176_vm6, %v1643_v54  ;;  %5435 = vmatprep.mubr.msk.f32.mxu0 %vm6090_vm1, %v6089_v3 }
 0x78f   : > { %5458 = vmatprep.subr.mxu0 %v6089_v3  ;;  %v1397_v7 = vmul.f32 %v5904_v60, %v6506_v18 }
 0x790   : > { %5459 = vmatpush3.msra.mxu0 %v1641_v56  ;;  %v1631_v1 = vpop.xlane.xlu0 %1630 }
 0x791   : > { %5460 = vmatprep.subr.mxu0 %v6089_v3  ;;  %5436 = vmatmul.mubr.msk.f32.gmra.mxu0 %vm1124_vm4, %v1397_v7 }
 0x792   : > { %5461 = vmatpush3.msra.mxu0 %v1639_v55  ;;  %5438 = vmatprep.mubr.msk.f32.mxu0 %vm6090_vm1, %v6089_v3 }
 0x793   : > { %5486 = vmatprep.subr.mxu0 %v6089_v3 }
 0x794   : > { %v1864_v2 = vpop.xlane.xlu0 %1863 }
 0x79c   : > { %v1870_v12 = vpop.xlane.xlu0 %1869 }
 0x7a0   : > { %v1878_v22 = vpop.permute.xlu0 %1877 }
 0x7b1   : > { %v1392_v63 = vpop.xlane.xlu1 %1391 }
 0x7b2   : > { %5905 = vrcp.f32 %v1392_v63 }
 0x7b3   : > { %5907 = vrcp.f32 %v1625_v62 }
 0x7b5   : > { %v1628_v0 = vpop.xlane.xlu1 %1627 }
 0x7b6   : > { %5909 = vrcp.f32 %v1628_v0 }
 0x7b7   : > { %5911 = vrcp.f32 %v1631_v1 }
 0x7b8   : > { %5913 = vrcp.f32 %v1864_v2  ;;  %v4910_v2 = vld [vmem:[%s7705_s11] ss:$0 sm:$0xff] }
 0x7b9   : > { %v1867_v8 = vpop.xlane.xlu1 %1866 }
 0x7ba   : > { %5915 = vrcp.f32 %v1867_v8 }
 0x7bb   : > { %5917 = vrcp.f32 %v1870_v12 }
 0x7bd   : > { %v1880_v14 = vpop.permute.xlu1 %1879 }
 0x7bf   : > { %v5906_v4 = vpop.eup %5905 }
 0x7c0   : > { %v1398_v5 = vmul.f32 %v5906_v4, %v5896_v50  ;;  %v5908_v6 = vpop.eup %5907 }
 0x7c1   : > { %v1635_v9 = vmul.f32 %v5908_v6, %v6510_v29 }
 0x7c2   : > { %5439 = vmatmul.mubr.msk.f32.gmra.mxu0 %vm1124_vm4, %v1398_v5 }
 0x7c3   : > { %5462 = vmatprep.mubr.msk.f32.mxu0 %vm6090_vm1, %v6089_v3  ;;  %v5910_v13 = vpop.eup %5909 }
 0x7c4   : > { %v1636_v16 = vmul.f32 %v5910_v13, %v5898_v34  ;;  %v5912_v18 = vpop.eup %5911 }
 0x7c5   : > { %v1637_v24 = vmul.f32 %v5912_v18, %v6518_v37  ;;  %v5914_v25 = vpop.eup %5913  ;;  %v838_v37 = vld [vmem:[%s7704_s10 + $0x10] sm:$0xff] }
 0x7c6   : > { %5463 = vmatmul.mubr.msk.f32.vlgmr.msra.gmra.mxu0 %vm1124_vm4, %v1635_v9  ;;  %v1874_v26 = vmul.f32 %v5914_v25, %v6524_v40  ;;  %5504 = vmatpush3.msra.mxu1 %v838_v37 }
 0x7c7   : > { %5487 = vmatpush3.msk.msra.mxu0 %vm1176_vm6, %v1882_v61  ;;  %5465 = vmatprep.mubr.msk.f32.mxu0 %vm6090_vm1, %v6089_v3  ;;  %v5916_v27 = vpop.eup %5915 }
 0x7c8   : > { %5488 = vmatprep.subr.mxu0 %v6089_v3  ;;  %v1875_v28 = vmul.f32 %v5916_v27, %v6539_v53  ;;  %v5918_v29 = vpop.eup %5917  ;;  %5505 = vmatprep.subr.mxu1 %v6089_v3 }
 0x7c9   : > { %5489 = vmatpush3.msra.mxu0 %v1880_v14  ;;  %v1876_v30 = vmul.f32 %v5918_v29, %v6529_v43  ;;  %5506 = vmatpush3.msra.mxu1 %v837_v38 }
 0x7ca   : > { %5490 = vmatprep.subr.mxu0 %v6089_v3  ;;  %5466 = vmatmul.mubr.msk.f32.gmra.mxu0 %vm1124_vm4, %v1636_v16 }
 0x7cb   : > { %5491 = vmatpush3.msra.mxu0 %v1878_v22  ;;  %5468 = vmatprep.mubr.msk.f32.mxu0 %vm6090_vm1, %v6089_v3 }
 0x7cc   : > { %5518 = vmatprep.subr.mxu0 %v6089_v3  ;;  %5507 = vmatprep.subr.mxu1 %v6089_v3 }
 0x7cd   : > { %5508 = vmatpush3.msra.mxu1 %v836_v11  ;;  %v844_v11 = vld [vmem:[%s7708_s14 + $0x8] sm:$0xff] }
 0x7ce   : > { %5469 = vmatmul.mubr.msk.f32.gmra.mxu0 %vm1124_vm4, %v1637_v24  ;;  %5535 = vmatprep.subr.mxu1 %v6089_v3 }
 0x7cf   : > { %5492 = vmatprep.mubr.msk.f32.mxu0 %vm6090_vm1, %v6089_v3 }
 0x7d2   : > { %5493 = vmatmul.mubr.msk.f32.vlgmr.msra.gmra.mxu0 %vm1124_vm4, %v1874_v26 }
 0x7d3   : > { %5495 = vmatprep.mubr.msk.f32.mxu0 %vm6090_vm1, %v6089_v3 }
 0x7d6   : > { %5496 = vmatmul.mubr.msk.f32.gmra.mxu0 %vm1124_vm4, %v1875_v28 }
 0x7d7   : > { %5498 = vmatprep.mubr.msk.f32.mxu0 %vm6090_vm1, %v6089_v3 }
 0x7da   : > { %5499 = vmatmul.mubr.msk.f32.gmra.mxu0 %vm1124_vm4, %v1876_v30 }
 0x7db   : > { %5526 = vmatprep.mubr.msk.f32.mxu0 %vm6090_vm1, %v6089_v3 }
 0x84d   : > { %v1484_v31 = vpop.f32.mrf.mxu0 }
 0x84e   : > { %1979 = vrot.lane.b32.xlu1 %v1484_v31, %s7738_s24 }
 0x84f   : > { %v5434_v32 = vpop.f32.mrf.mxu0 }
 0x851   : > { %v1489_v33 = vpop.f32.mrf.mxu0 }
 0x852   : > { %1981 = vrot.lane.b32.xlu0 %v1489_v33, %s7738_s24 }
 0x853   : > { %v5437_v35 = vpop.f32.mrf.mxu0 }
 0x882   : > { %v1494_v39 = vpop.f32.mrf.mxu0 }
 0x884   : > { %v5440_v40 = vpop.f32.mrf.mxu0 }
 0x885   : > { %v846_v40 = vld [vmem:[%s7708_s14 + $0x18] sm:$0xff] }
 0x886   : > { %v1723_v41 = vpop.f32.mrf.mxu0  ;;  %5519 = vmatpush3.msra.mxu0 %v846_v40 }
 0x887   : > { %1991 = vrot.lane.b32.xlu0 %v1723_v41, %s7736_s5  ;;  %5520 = vmatprep.subr.mxu0 %v6089_v3  ;;  %v845_v41 = vld [vmem:[%s7708_s14 + $0x10] sm:$0xff] }
 0x888   : > { %v5464_v43 = vpop.f32.mrf.mxu0  ;;  %5521 = vmatpush3.msra.mxu0 %v845_v41 }
 0x889   : > { %5522 = vmatprep.subr.mxu0 %v6089_v3  ;;  %v843_v43 = vld [vmem:[%s7708_s14] sm:$0xff] }
 0x88a   : > { %v1728_v44 = vpop.f32.mrf.mxu0  ;;  %5523 = vmatpush3.msra.mxu0 %v844_v11 }
 0x88b   : > { %1993 = vrot.lane.b32.xlu1 %v1728_v44, %s7736_s5  ;;  %5524 = vmatprep.subr.mxu0 %v6089_v3 }
 0x88c   : > { %v5467_v45 = vpop.f32.mrf.mxu0  ;;  %5525 = vmatpush3.msra.mxu0 %v843_v43 }
 0x88d   : > { %5576 = vmatprep.subr.mxu0 %v6089_v3 }
 0x88e   : > { %v1733_v46 = vpop.f32.mrf.mxu0 }
 0x890   : > { %v5470_v47 = vpop.f32.mrf.mxu0 }
 0x892   : > { %v1962_v48 = vpop.f32.mrf.mxu0 }
 0x893   : > { %2003 = vrot.lane.b32.xlu1 %v1962_v48, %s7734_s27 }
 0x894   : > { %v5494_v49 = vpop.f32.mrf.mxu0 }
 0x896   : > { %v1967_v50 = vpop.f32.mrf.mxu0 }
 0x897   : > { %1983 = vrot.lane.b32.xlu1 %v1494_v39, %s7738_s24  ;;  %2005 = vrot.lane.b32.xlu0 %v1967_v50, %s7734_s27  ;;  %s7758_s24 = smov 48  }
 0x898   : > { %v5497_v51 = vpop.f32.mrf.mxu0 }
 0x89a   : > { %v1972_v34 = vpop.f32.mrf.mxu0 }
 0x89b   : > { %1995 = vrot.lane.b32.xlu0 %v1733_v46, %s7736_s5  ;;  %2007 = vrot.lane.b32.xlu1 %v1972_v34, %s7734_s27  ;;  %s7757_s5 = smov 56   ;;  %s7759_s27 = smov 40  }
 0x89c   : > { %v5500_v52 = vpop.f32.mrf.mxu0 }
 0x8c0   : > { %v1980_v53 = vpop.permute.xlu1 %1979 }
 0x8c1   : > { %v2012_v56 = vsel %vm1028_vm3, %v6466_v17, %v1980_v53  ;;  %v4911_v53 = vld [vmem:[%s7706_s12] ss:$0 sm:$0xff] }
 0x8c4   : > { %v1982_v42 = vpop.permute.xlu0 %1981 }
 0x8c5   : > { %v2013_v59 = vsel %vm1028_vm3, %v6468_v20, %v1982_v42 }
 0x8f9   : > { %v1992_v55 = vpop.permute.xlu0 %1991 }
 0x8fa   : > { %v2016_v57 = vsel %vm2015_vm7, %v2012_v56, %v1992_v55 }
 0x8fd   : > { %v1994_v54 = vpop.permute.xlu1 %1993 }
 0x8fe   : > { %v2017_v60 = vsel %vm2015_vm7, %v2013_v59, %v1994_v54  ;;  %v4912_v54 = vld [vmem:[%s7707_s13] ss:$0 sm:$0xff] }
 0x905   : > { %v2004_v58 = vpop.permute.xlu1 %2003 }
 0x906   : > { %v2020_v10 = vsel %vm2019_vm8, %v2016_v57, %v2004_v58 }
 0x907   : > { %5510 = vmatmul.mubr.msk.f32.vlgmr.msra.gmra.mxu1 %vm668_vm0, %v2020_v10 }
 0x908   : > { %5512 = vmatprep.mubr.msk.f32.mxu1 %vm6090_vm1, %v6089_v3 }
 0x909   : > { %v1984_v7 = vpop.permute.xlu1 %1983  ;;  %v2006_v61 = vpop.permute.xlu0 %2005 }
 0x90a   : > { %v2021_v62 = vsel %vm2019_vm8, %v2017_v60, %v2006_v61  ;;  %v2014_v17 = vsel %vm1028_vm3, %v6470_v23, %v1984_v7 }
 0x90b   : > { %5513 = vmatmul.mubr.msk.f32.gmra.mxu1 %vm668_vm0, %v2021_v62 }
 0x90c   : > { %5515 = vmatprep.mubr.msk.f32.mxu1 %vm6090_vm1, %v6089_v3 }
 0x90d   : > { %v2008_v63 = vpop.permute.xlu1 %2007  ;;  %v1996_v0 = vpop.permute.xlu0 %1995 }
 0x90e   : > { %v2018_v20 = vsel %vm2015_vm7, %v2014_v17, %v1996_v0  ;;  %v863_v17 = vld [vmem:[%s7710_s16 + $0x78] sm:$0xff]  ;;  %v861_v0 = vld [vmem:[%s7710_s16 + $0x68] sm:$0xff] }
 0x90f   : > { %v2022_v1 = vsel %vm2019_vm8, %v2018_v20, %v2008_v63  ;;  %5536 = vmatpush3.msra.mxu1 %v863_v17  ;;  %v862_v63 = vld [vmem:[%s7710_s16 + $0x70] sm:$0xff]  ;;  %v860_v20 = vld [vmem:[%s7710_s16 + $0x60] sm:$0xff] }
 0x910   : > { %5516 = vmatmul.mubr.msk.f32.gmra.mxu1 %vm668_vm0, %v2022_v1  ;;  %5537 = vmatprep.subr.mxu1 %v6089_v3  ;;  %v859_v1 = vld [vmem:[%s7710_s16 + $0x58] sm:$0xff] }
 0x911   : > { %5567 = vmatprep.mubr.msk.f32.mxu1 %vm6090_vm1, %v6089_v3  ;;  %5538 = vmatpush3.msra.mxu1 %v862_v63 }
 0x912   : > { %5539 = vmatprep.subr.mxu1 %v6089_v3 }
 0x913   : > { %5540 = vmatpush3.msra.mxu1 %v861_v0 }
 0x914   : > { %5541 = vmatprep.subr.mxu1 %v6089_v3 }
 0x915   : > { %5542 = vmatpush3.msra.mxu1 %v860_v20 }
 0x916   : > { %5543 = vmatprep.subr.mxu1 %v6089_v3 }
 0x917   : > { %5544 = vmatpush3.msra.mxu1 %v859_v1 }
 0x918   : > { %5545 = vmatprep.subr.mxu1 %v6089_v3 }
 0x9c7   : > { %v2098_v4 = vpop.f32.mrf.mxu1 }
 0x9c8   : > { %v2112_v5 = vadd.f32 %v2098_v4, %v6280_v19  ;;  %v857_v4 = vld [vmem:[%s7710_s16 + $0x48] sm:$0xff] }
 0x9c9   : > { %v5511_v6 = vpop.f32.mrf.mxu1 }
 0x9ca   : > { %v6637_v23 = vadd.f32 %v4910_v2, %v2112_v5  ;;  %v856_v5 = vld [vmem:[%s7710_s16 + $0x40] sm:$0xff]  ;;  %v855_v6 = vld [vmem:[%s7710_s16 + $0x38] sm:$0xff] }
 0x9cb   : > { %v2103_v8 = vpop.f32.mrf.mxu1 }
 0x9cc   : > { %v2113_v9 = vadd.f32 %v2103_v8, %v6284_v21  ;;  %v2124_v12 = vsel %vm668_vm0, %v6637_v23, 0.0  ;;  %v854_v8 = vld [vmem:[%s7710_s16 + $0x30] sm:$0xff] }
 0x9cd   : > { %2125 = vadd.xlane.f32.xlu0 %v2124_v12  ;;  %v5514_v13 = vpop.f32.mrf.mxu1  ;;  %v852_v12 = vld [vmem:[%s7710_s16 + $0x20] sm:$0xff] }
 0x9ce   : > { %v6642_v14 = vadd.f32 %v4910_v2, %v2113_v9  ;;  %v853_v9 = vld [vmem:[%s7710_s16 + $0x28] sm:$0xff]  ;;  %v851_v13 = vld [vmem:[%s7710_s16 + $0x18] sm:$0xff] }
 0x9d0   : > { %v2108_v16 = vpop.f32.mrf.mxu1  ;;  %v2127_v18 = vsel %vm668_vm0, %v6642_v14, 0.0 }
 0x9d1   : > { %v2114_v22 = vadd.f32 %v2108_v16, %v6275_v15  ;;  %2128 = vadd.xlane.f32.xlu1 %v2127_v18  ;;  %v850_v16 = vld [vmem:[%s7710_s16 + $0x10] sm:$0xff]  ;;  %v849_v18 = vld [vmem:[%s7710_s16 + $0x8] sm:$0xff] }
 0x9d2   : > { %v5517_v19 = vpop.f32.mrf.mxu1 }
 0x9d3   : > { %v6647_v24 = vadd.f32 %v4910_v2, %v2114_v22  ;;  %v858_v2 = vld [vmem:[%s7710_s16 + $0x50] sm:$0xff]  ;;  %v848_v22 = vld [vmem:[%s7710_s16] sm:$0xff] }
 0x9d4   : > { %5546 = vmatpush3.msra.mxu1 %v858_v2  ;;  %v4913_v19 = vld [vmem:[%s7709_s15] ss:$0 sm:$0xff] }
 0x9d5   : > { %v2130_v21 = vsel %vm871_vm2, %v6647_v24, 0.0  ;;  %5547 = vmatprep.subr.mxu1 %v6089_v3 }
 0x9d6   : > { %2131 = vadd.xlane.f32.xlu0 %v2130_v21  ;;  %5548 = vmatpush3.msra.mxu1 %v857_v4 }
 0x9d7   : > { %5549 = vmatprep.subr.mxu1 %v6089_v3 }
 0x9d8   : > { %5550 = vmatpush3.msra.mxu1 %v856_v5 }
 0x9d9   : > { %5551 = vmatprep.subr.mxu1 %v6089_v3 }
 0x9da   : > { %5552 = vmatpush3.msra.mxu1 %v855_v6 }
 0x9db   : > { %5553 = vmatprep.subr.mxu1 %v6089_v3 }
 0x9dc   : > { %5554 = vmatpush3.msra.mxu1 %v854_v8 }
 0x9dd   : > { %5555 = vmatprep.subr.mxu1 %v6089_v3 }
 0x9de   : > { %5556 = vmatpush3.msra.mxu1 %v853_v9 }
 0x9df   : > { %5557 = vmatprep.subr.mxu1 %v6089_v3 }
 0x9e0   : > { %5558 = vmatpush3.msra.mxu1 %v852_v12 }
 0x9e1   : > { %5559 = vmatprep.subr.mxu1 %v6089_v3 }
 0x9e2   : > { %5560 = vmatpush3.msra.mxu1 %v851_v13  ;;  %v4926_v13 = vld [vmem:[%s7702_s8 + $0x38] sm:$0xff] }
 0x9e3   : > { %5561 = vmatprep.subr.mxu1 %v6089_v3 }
 0x9e4   : > { %5562 = vmatpush3.msra.mxu1 %v850_v16  ;;  %v4925_v16 = vld [vmem:[%s7702_s8 + $0x30] sm:$0xff] }
 0x9e5   : > { %5563 = vmatprep.subr.mxu1 %v6089_v3 }
 0x9e6   : > { %5564 = vmatpush3.msra.mxu1 %v849_v18  ;;  %v4924_v18 = vld [vmem:[%s7702_s8 + $0x28] sm:$0xff] }
 0x9e7   : > { %5565 = vmatprep.subr.mxu1 %v6089_v3 }
 0x9e8   : > { %5566 = vmatpush3.msra.mxu1 %v848_v22  ;;  %v4923_v22 = vld [vmem:[%s7702_s8 + $0x20] sm:$0xff] }
 0x9e9   : > { %5623 = vmatprep.subr.mxu1 %v6089_v3 }
 0xa56   : > { %v2126_v25 = vpop.xlane.xlu0 %2125 }
 0xa57   : > { %v2133_v26 = vmul.f32 0.03125, %v2126_v25 }
 0xa59   : > { %v2136_v27 = vsub.f32 %v6637_v23, %v2133_v26 }
 0xa5a   : > { %v2129_v28 = vpop.xlane.xlu1 %2128 }
 0xa5b   : > { %v2134_v29 = vmul.f32 0.03125, %v2129_v28  ;;  %v2139_v30 = vmul.f32 %v2136_v27, %v2136_v27 }
 0xa5d   : > { %v2137_v31 = vsub.f32 %v6642_v14, %v2134_v29  ;;  %v2142_v32 = vsel %vm668_vm0, %v2139_v30, 0.0 }
 0xa5e   : > { %2143 = vadd.xlane.f32.xlu0 %v2142_v32 }
 0xa5f   : > { %v2132_v15 = vpop.xlane.xlu0 %2131  ;;  %v2140_v33 = vmul.f32 %v2137_v31, %v2137_v31 }
 0xa60   : > { %v2135_v35 = vmul.f32 0.03125, %v2132_v15 }
 0xa61   : > { %v2145_v36 = vsel %vm668_vm0, %v2140_v33, 0.0 }
 0xa62   : > { %v2138_v37 = vsub.f32 %v6647_v24, %v2135_v35  ;;  %2146 = vadd.xlane.f32.xlu0 %v2145_v36 }
 0xa64   : > { %v2141_v38 = vmul.f32 %v2138_v37, %v2138_v37 }
 0xa66   : > { %v2148_v39 = vsel %vm871_vm2, %v2141_v38, 0.0 }
 0xa67   : > { %2149 = vadd.xlane.f32.xlu1 %v2148_v39 }
 0xae7   : > { %v2144_v44 = vpop.xlane.xlu0 %2143 }
 0xae8   : > { %v2151_v45 = vmul.f32 0.03125, %v2144_v44 }
 0xaea   : > { %v2154_v46 = vadd.f32 1e-05, %v2151_v45 }
 0xaeb   : > { %v2147_v47 = vpop.xlane.xlu0 %2146 }
 0xaec   : > { %5919 = vrsqrt.f32 %v2154_v46  ;;  %v2152_v48 = vmul.f32 0.03125, %v2147_v47 }
 0xaee   : > { %v2155_v49 = vadd.f32 1e-05, %v2152_v48 }
 0xaf0   : > { %5921 = vrsqrt.f32 %v2155_v49  ;;  %v2150_v50 = vpop.xlane.xlu1 %2149 }
 0xaf1   : > { %v2153_v51 = vmul.f32 0.03125, %v2150_v50 }
 0xaf3   : > { %v2156_v34 = vadd.f32 1e-05, %v2153_v51  ;;  %v4920_v51 = vld [vmem:[%s7711_s17] ss:$0 sm:$0xff] }
 0xaf5   : > { %5923 = vrsqrt.f32 %v2156_v34 }
 0xaf9   : > { %v5920_v52 = vpop.eup %5919 }
 0xafa   : > { %v2160_v42 = vmul.f32 %v5920_v52, %v2136_v27 }
 0xafc   : > { %v2169_v55 = vmul.f32 %v4911_v53, %v2160_v42 }
 0xafd   : > { %v5922_v56 = vpop.eup %5921 }
 0xafe   : > { %v2178_v57 = vadd.f32 %v4912_v54, %v2169_v55  ;;  %v2161_v58 = vmul.f32 %v5922_v56, %v2137_v31 }
 0xb00   : > { %5527 = vmatmul.mubr.msk.f32.vlgmr.msra.gmra.mxu0 %vm668_vm0, %v2178_v57  ;;  %v2170_v10 = vmul.f32 %v4911_v53, %v2161_v58 }
 0xb01   : > { %5529 = vmatprep.mubr.msk.f32.mxu0 %vm6090_vm1, %v6089_v3  ;;  %5577 = vmatpush3.msra.mxu0 %v4926_v13 }
 0xb02   : > { %v5924_v59 = vpop.eup %5923  ;;  %v2179_v60 = vadd.f32 %v4912_v54, %v2170_v10  ;;  %5578 = vmatprep.subr.mxu0 %v6089_v3 }
 0xb03   : > { %v2162_v7 = vmul.f32 %v5924_v59, %v2138_v37  ;;  %5579 = vmatpush3.msra.mxu0 %v4925_v16 }
 0xb04   : > { %5530 = vmatmul.mubr.msk.f32.gmra.mxu0 %vm668_vm0, %v2179_v60  ;;  %5580 = vmatprep.subr.mxu0 %v6089_v3 }
 0xb05   : > { %5532 = vmatprep.mubr.msk.f32.mxu0 %vm6090_vm1, %v6089_v3  ;;  %v2171_v61 = vmul.f32 %v4911_v53, %v2162_v7  ;;  %5581 = vmatpush3.msra.mxu0 %v4924_v18 }
 0xb06   : > { %5582 = vmatprep.subr.mxu0 %v6089_v3 }
 0xb07   : > { %v2180_v62 = vadd.f32 %v4912_v54, %v2171_v61  ;;  %5583 = vmatpush3.msra.mxu0 %v4923_v22 }
 0xb08   : > { %5593 = vmatprep.subr.mxu0 %v6089_v3 }
 0xb09   : > { %5533 = vmatmul.mubr.msk.f32.gmra.mxu0 %vm668_vm0, %v2180_v62 }
 0xb0a   : > { %5584 = vmatprep.mubr.msk.f32.mxu0 %vm6090_vm1, %v6089_v3 }
 0xbc0   : > { %v2262_v21 = vpop.f32.mrf.mxu0 }
 0xbc1   : > { %v2263_v25 = vadd.f32 %v4913_v19, %v2262_v21 }
 0xbc2   : > { %v5528_v26 = vpop.f32.mrf.mxu0 }
 0xbc3   : > { %v4917_v27 = vmul.f32 -1.702, %v2263_v25 }
 0xbc4   : > { %v2267_v28 = vpop.f32.mrf.mxu0 }
 0xbc5   : > { %v2282_v29 = vmul.f32 1.442695, %v4917_v27  ;;  %v2268_v30 = vadd.f32 %v4913_v19, %v2267_v28 }
 0xbc6   : > { %v5531_v31 = vpop.f32.mrf.mxu0 }
 0xbc7   : > { %5925 = vpow2.f32 %v2282_v29  ;;  %v4918_v32 = vmul.f32 -1.702, %v2268_v30 }
 0xbc9   : > { %v2284_v15 = vmul.f32 1.442695, %v4918_v32  ;;  %v2272_v33 = vpop.f32.mrf.mxu0 }
 0xbca   : > { %v2273_v35 = vadd.f32 %v4913_v19, %v2272_v33 }
 0xbcb   : > { %5927 = vpow2.f32 %v2284_v15  ;;  %v5534_v36 = vpop.f32.mrf.mxu0  ;;  %v4957_v15 = vld [vmem:[%s7700_s6 + $0x1] ss:$0 sm:$0xff] }
 0xbcc   : > { %v4919_v37 = vmul.f32 -1.702, %v2273_v35 }
 0xbce   : > { %v2286_v38 = vmul.f32 1.442695, %v4919_v37 }
 0xbd0   : > { %5929 = vpow2.f32 %v2286_v38 }
 0xbd4   : > { %v5926_v39 = vpop.eup %5925 }
 0xbd5   : > { %v2288_v40 = vadd.f32 1.0, %v5926_v39 }
 0xbd7   : > { %5931 = vrcp.f32 %v2288_v40 }
 0xbd8   : > { %v5928_v41 = vpop.eup %5927 }
 0xbd9   : > { %v2289_v11 = vadd.f32 1.0, %v5928_v41 }
 0xbdb   : > { %5933 = vrcp.f32 %v2289_v11 }
 0xbdd   : > { %v5930_v43 = vpop.eup %5929 }
 0xbde   : > { %v2290_v44 = vadd.f32 1.0, %v5930_v43 }
 0xbe0   : > { %5935 = vrcp.f32 %v2290_v44 }
 0xbe4   : > { %v5932_v45 = vpop.eup %5931 }
 0xbe5   : > { %v2297_v46 = vmul.f32 %v5932_v45, %v2263_v25 }
 0xbe7   : > { %5568 = vmatmul.mubr.f32.vlgmr.msra.gmra.mxu1 %v2297_v46 }
 0xbe8   : > { %v5934_v47 = vpop.eup %5933  ;;  %5570 = vmatprep.mubr.msk.f32.mxu1 %vm6090_vm1, %v6089_v3 }
 0xbe9   : > { %v2298_v48 = vmul.f32 %v5934_v47, %v2268_v30 }
 0xbeb   : > { %5571 = vmatmul.mubr.f32.gmra.mxu1 %v2298_v48  ;;  %v4959_v48 = vld [vmem:[%s7703_s9 + $0x1] ss:$0 sm:$0xff] }
 0xbec   : > { %5573 = vmatprep.mubr.msk.f32.mxu1 %vm6090_vm1, %v6089_v3 }
 0xbed   : > { %v5936_v49 = vpop.eup %5935 }
 0xbee   : > { %v2299_v50 = vmul.f32 %v5936_v49, %v2273_v35  ;;  %v4958_v35 = vld [vmem:[%s7701_s7 + $0x1] ss:$0 sm:$0xff] }
 0xbf0   : > { %5574 = vmatmul.mubr.f32.gmra.mxu1 %v2299_v50 }
 0xbf1   : > { %5629 = vmatprep.mubr.msk.f32.mxu1 %vm6090_vm1, %v6089_v3 }
 0xca7   : > { %v2366_v34 = vpop.f32.mrf.mxu1 }
 0xca8   : > { %v2380_v52 = vadd.f32 %v2366_v34, %v6637_v23 }
 0xca9   : > { %v5569_v53 = vpop.f32.mrf.mxu1 }
 0xcaa   : > { %v6765_v42 = vadd.f32 %v4920_v51, %v2380_v52 }
 0xcab   : > { %v2371_v54 = vpop.f32.mrf.mxu1 }
 0xcac   : > { %v2381_v55 = vadd.f32 %v2371_v54, %v6642_v14  ;;  %v2440_v56 = vsel %vm668_vm0, %v6765_v42, 0.0 }
 0xcad   : > { %2441 = vadd.xlane.f32.xlu0 %v2440_v56  ;;  %v5572_v57 = vpop.f32.mrf.mxu1 }
 0xcae   : > { %v6770_v58 = vadd.f32 %v4920_v51, %v2381_v55 }
 0xcb0   : > { %v2376_v10 = vpop.f32.mrf.mxu1  ;;  %v2443_v59 = vsel %vm668_vm0, %v6770_v58, 0.0 }
 0xcb1   : > { %v2382_v60 = vadd.f32 %v2376_v10, %v6647_v24  ;;  %2444 = vadd.xlane.f32.xlu1 %v2443_v59 }
 0xcb2   : > { %v5575_v23 = vpop.f32.mrf.mxu1 }
 0xcb3   : > { %v6775_v7 = vadd.f32 %v4920_v51, %v2382_v60 }
 0xcb5   : > { %v2446_v14 = vsel %vm871_vm2, %v6775_v7, 0.0 }
 0xcb6   : > { %2447 = vadd.xlane.f32.xlu0 %v2446_v14 }
 0xd36   : > { %v2442_v61 = vpop.xlane.xlu0 %2441 }
 0xd37   : > { %v2449_v62 = vmul.f32 0.03125, %v2442_v61 }
 0xd39   : > { %v2452_v17 = vsub.f32 %v6765_v42, %v2449_v62 }
 0xd3a   : > { %v2445_v63 = vpop.xlane.xlu1 %2444 }
 0xd3b   : > { %v2450_v0 = vmul.f32 0.03125, %v2445_v63  ;;  %v2455_v20 = vmul.f32 %v2452_v17, %v2452_v17 }
 0xd3d   : > { %v2453_v1 = vsub.f32 %v6770_v58, %v2450_v0  ;;  %v2458_v2 = vsel %vm668_vm0, %v2455_v20, 0.0 }
 0xd3e   : > { %2459 = vadd.xlane.f32.xlu1 %v2458_v2 }
 0xd3f   : > { %v2448_v24 = vpop.xlane.xlu0 %2447  ;;  %v2456_v4 = vmul.f32 %v2453_v1, %v2453_v1 }
 0xd40   : > { %v2451_v5 = vmul.f32 0.03125, %v2448_v24 }
 0xd41   : > { %v2461_v6 = vsel %vm668_vm0, %v2456_v4, 0.0 }
 0xd42   : > { %v2454_v8 = vsub.f32 %v6775_v7, %v2451_v5  ;;  %2462 = vadd.xlane.f32.xlu0 %v2461_v6 }
 0xd44   : > { %v2457_v9 = vmul.f32 %v2454_v8, %v2454_v8 }
 0xd46   : > { %v2464_v12 = vsel %vm871_vm2, %v2457_v9, 0.0 }
 0xd47   : > { %2465 = vadd.xlane.f32.xlu1 %v2464_v12 }
 0xdc7   : > { %v2460_v19 = vpop.xlane.xlu1 %2459 }
 0xdc8   : > { %v2467_v21 = vmul.f32 0.03125, %v2460_v19 }
 0xdca   : > { %v2470_v25 = vadd.f32 1e-05, %v2467_v21 }
 0xdcb   : > { %v2463_v26 = vpop.xlane.xlu0 %2462 }
 0xdcc   : > { %5937 = vrsqrt.f32 %v2470_v25  ;;  %v2468_v27 = vmul.f32 0.03125, %v2463_v26 }
 0xdce   : > { %v2471_v28 = vadd.f32 1e-05, %v2468_v27 }
 0xdd0   : > { %5939 = vrsqrt.f32 %v2471_v28  ;;  %v2466_v29 = vpop.xlane.xlu1 %2465 }
 0xdd1   : > { %v2469_v30 = vmul.f32 0.03125, %v2466_v29 }
 0xdd3   : > { %v2472_v31 = vadd.f32 1e-05, %v2469_v30 }
 0xdd5   : > { %5941 = vrsqrt.f32 %v2472_v31 }
 0xdd9   : > { %v5938_v32 = vpop.eup %5937 }
 0xdda   : > { %v2476_v33 = vmul.f32 %v5938_v32, %v2452_v17 }
 0xddc   : > { %v2485_v36 = vmul.f32 %v4957_v15, %v2476_v33 }
 0xddd   : > { %v5940_v37 = vpop.eup %5939 }
 0xdde   : > { %v2494_v38 = vadd.f32 %v4958_v35, %v2485_v36  ;;  %v2477_v39 = vmul.f32 %v5940_v37, %v2453_v1 }
 0xde0   : > { %5585 = vmatmul.mubr.msk.f32.vlgmr.msra.gmra.mxu0 %vm668_vm0, %v2494_v38  ;;  %v2486_v40 = vmul.f32 %v4957_v15, %v2477_v39 }
 0xde1   : > { %5587 = vmatprep.mubr.msk.f32.mxu0 %vm6090_vm1, %v6089_v3 }
 0xde2   : > { %v5942_v41 = vpop.eup %5941  ;;  %v2495_v11 = vadd.f32 %v4958_v35, %v2486_v40 }
 0xde3   : > { %v2478_v43 = vmul.f32 %v5942_v41, %v2454_v8 }
 0xde4   : > { %5588 = vmatmul.mubr.msk.f32.gmra.mxu0 %vm668_vm0, %v2495_v11 }
 0xde5   : > { %5590 = vmatprep.mubr.msk.f32.mxu0 %vm6090_vm1, %v6089_v3  ;;  %v2487_v44 = vmul.f32 %v4957_v15, %v2478_v43 }
 0xde7   : > { %v2496_v45 = vadd.f32 %v4958_v35, %v2487_v44 }
 0xde9   : > { %5591 = vmatmul.mubr.msk.f32.gmra.mxu0 %vm668_vm0, %v2496_v45 }
 0xdea   : > { %5599 = vmatprep.mubr.msk.f32.mxu0 %vm6090_vm1, %v6089_v3 }
 0xea0   : > { %v2578_v46 = vpop.f32.mrf.mxu0 }
 0xea1   : > { %v6823_v34 = vadd.f32 %v4959_v48, %v2578_v46 }
 0xea2   : > { %v5586_v47 = vpop.f32.mrf.mxu0 }
 0xea4   : > { %v2583_v49 = vpop.f32.mrf.mxu0 }
 0xea5   : > { %v6819_v50 = vadd.f32 %v4959_v48, %v2583_v49 }
 0xea6   : > { %v5589_v51 = vpop.f32.mrf.mxu0 }
 0xea7   : > { %2597 = vrot.lane.b32.xlu1 %v6819_v50, %s6091_s26 }
 0xea9   : > { %v2588_v52 = vpop.f32.mrf.mxu0 }
 0xeaa   : > { %v6825_v53 = vadd.f32 %v4959_v48, %v2588_v52 }
 0xeab   : > { %2595 = vrot.lane.b32.xlu1 %v6823_v34, %s6091_s26  ;;  %v5592_v54 = vpop.f32.mrf.mxu0 }
 0xeac   : > { %2599 = vrot.lane.b32.xlu0 %v6825_v53, %s6091_s26  ;;  %s7753_s26 = smov 112  }
 0xeaf   : > { %2838 = vrot.lane.b32.xlu1 %v6825_v53, %s6093_s28 }
 0xeb0   : > { %2836 = vrot.lane.b32.xlu0 %v6819_v50, %s6093_s28 }
 0xeb3   : > { %2834 = vrot.lane.b32.xlu1 %v6823_v34, %s6093_s28  ;;  %s7754_s28 = smov 72  }
 0xeb4   : > { %2828 = vrot.lane.b32.xlu0 %v6823_v34, %s6094_s29 }
 0xeb7   : > { %3077 = vrot.lane.b32.xlu1 %v6825_v53, %s7752_s4 }
 0xeb8   : > { %2830 = vrot.lane.b32.xlu0 %v6819_v50, %s6094_s29 }
 0xebb   : > { %3075 = vrot.lane.b32.xlu1 %v6819_v50, %s7752_s4 }
 0xebc   : > { %2832 = vrot.lane.b32.xlu0 %v6825_v53, %s6094_s29  ;;  %s7755_s29 = smov 104  }
 0xebf   : > { %3073 = vrot.lane.b32.xlu1 %v6823_v34, %s7752_s4 }
 0xec0   : > { %3067 = vrot.lane.b32.xlu0 %v6823_v34, %s7753_s26 }
 0xec3   : > { %3316 = vrot.lane.b32.xlu1 %v6825_v53, %s7754_s28 }
 0xec4   : > { %3069 = vrot.lane.b32.xlu0 %v6819_v50, %s7753_s26 }
 0xec7   : > { %3314 = vrot.lane.b32.xlu1 %v6819_v50, %s7754_s28 }
 0xec8   : > { %3071 = vrot.lane.b32.xlu0 %v6825_v53, %s7753_s26 }
 0xecb   : > { %3312 = vrot.lane.b32.xlu1 %v6823_v34, %s7754_s28 }
 0xecc   : > { %3306 = vrot.lane.b32.xlu0 %v6823_v34, %s7755_s29 }
 0xecf   : > { %3308 = vrot.lane.b32.xlu1 %v6819_v50, %s7755_s29 }
 0xed0   : > { %2731 = vrot.lane.b32.xlu0 %v6819_v50, %s7756_s30 }
 0xed3   : > { %3310 = vrot.lane.b32.xlu1 %v6825_v53, %s7755_s29 }
 0xed4   : > { %2729 = vrot.lane.b32.xlu0 %v6823_v34, %s7756_s30 }
 0xed8   : > { %2733 = vrot.lane.b32.xlu0 %v6825_v53, %s7756_s30  ;;  %s7761_s30 = smov 16  }
 0xf19   : > { %v2598_v55 = vpop.permute.xlu1 %2597 }
 0xf1d   : > { %v2596_v56 = vpop.permute.xlu1 %2595 }
 0xf1e   : > { %v2600_v57 = vpop.permute.xlu0 %2599 }
 0xf1f   : > { %5594 = vmatpush3.xpose.msk.msra.mxu0 %vm1028_vm3, %v2600_v57 }
 0xf20   : > { %5595 = vmatprep.subr.mxu0 %v6089_v3 }
 0xf21   : > { %v2839_v10 = vpop.permute.xlu1 %2838 }
 0xf22   : > { %5624 = vmatpush3.xpose.msk.msra.mxu1 %vm1028_vm3, %v2839_v10  ;;  %v2837_v59 = vpop.permute.xlu0 %2836 }
 0xf23   : > { %5596 = vmatpush3.xpose.msk.msra.mxu0 %vm1028_vm3, %v2598_v55  ;;  %5625 = vmatprep.subr.mxu1 %v6089_v3 }
 0xf24   : > { %5597 = vmatprep.subr.mxu0 %v6089_v3 }
 0xf25   : > { %v2835_v60 = vpop.permute.xlu1 %2834 }
 0xf26   : > { %5626 = vmatpush3.xpose.msk.msra.mxu1 %vm1028_vm3, %v2837_v59  ;;  %v2829_v23 = vpop.permute.xlu0 %2828 }
 0xf27   : > { %5598 = vmatpush3.xpose.msk.msra.mxu0 %vm1028_vm3, %v2596_v56  ;;  %5627 = vmatprep.subr.mxu1 %v6089_v3 }
 0xf28   : > { %5608 = vmatprep.subr.mxu0 %v6089_v3 }
 0xf29   : > { %v3078_v14 = vpop.permute.xlu1 %3077 }
 0xf2a   : > { %5600 = vmatmul.mubr.msk.f32.vlgmr.msra.gmra.mxu0 %vm1028_vm3, %v6823_v34  ;;  %5628 = vmatpush3.xpose.msk.msra.mxu1 %vm1028_vm3, %v2835_v60  ;;  %v2831_v61 = vpop.permute.xlu0 %2830 }
 0xf2b   : > { %5602 = vmatprep.mubr.msk.f32.mxu0 %vm6090_vm1, %v6089_v3  ;;  %5653 = vmatprep.subr.mxu1 %v6089_v3 }
 0xf2d   : > { %v3076_v62 = vpop.permute.xlu1 %3075  ;;  %5630 = vmatmul.mubr.msk.f32.vlgmr.msra.gmra.mxu1 %vm1028_vm3, %v2829_v23 }
 0xf2e   : > { %5603 = vmatmul.mubr.msk.f32.gmra.mxu0 %vm1028_vm3, %v6819_v50  ;;  %5654 = vmatpush3.xpose.msk.msra.mxu1 %vm1028_vm3, %v3078_v14  ;;  %v2833_v17 = vpop.permute.xlu0 %2832 }
 0xf2f   : > { %5632 = vmatprep.mubr.msk.f32.mxu1 %vm6090_vm1, %v6089_v3  ;;  %5605 = vmatprep.mubr.msk.f32.mxu0 %vm6090_vm1, %v6089_v3 }
 0xf30   : > { %5655 = vmatprep.subr.mxu1 %v6089_v3 }
 0xf31   : > { %v3074_v63 = vpop.permute.xlu1 %3073  ;;  %5633 = vmatmul.mubr.msk.f32.gmra.mxu1 %vm1028_vm3, %v2831_v61 }
 0xf32   : > { %5606 = vmatmul.mubr.msk.f32.gmra.mxu0 %vm1028_vm3, %v6825_v53  ;;  %5656 = vmatpush3.xpose.msk.msra.mxu1 %vm1028_vm3, %v3076_v62  ;;  %v3068_v0 = vpop.permute.xlu0 %3067 }
 0xf33   : > { %5635 = vmatprep.mubr.msk.f32.mxu1 %vm6090_vm1, %v6089_v3  ;;  %5657 = vmatprep.subr.mxu1 %v6089_v3 }
 0xf34   : > { %5614 = vmatprep.mubr.msk.f32.mxu0 %vm6090_vm1, %v6089_v3 }
 0xf35   : > { %v3317_v20 = vpop.permute.xlu1 %3316  ;;  %5636 = vmatmul.mubr.msk.f32.gmra.mxu1 %vm1028_vm3, %v2833_v17 }
 0xf36   : > { %5658 = vmatpush3.xpose.msk.msra.mxu1 %vm1028_vm3, %v3074_v63  ;;  %v3070_v1 = vpop.permute.xlu0 %3069  ;;  %5659 = vmatprep.mubr.msk.f32.mxu1 %vm6090_vm1, %v6089_v3 }
 0xf37   : > { %5683 = vmatprep.subr.mxu1 %v6089_v3 }
 0xf39   : > { %5660 = vmatmul.mubr.msk.f32.vlgmr.msra.gmra.mxu1 %vm1028_vm3, %v3068_v0  ;;  %v3315_v2 = vpop.permute.xlu1 %3314 }
 0xf3a   : > { %5684 = vmatpush3.xpose.msk.msra.mxu1 %vm1028_vm3, %v3317_v20  ;;  %v3072_v24 = vpop.permute.xlu0 %3071  ;;  %5662 = vmatprep.mubr.msk.f32.mxu1 %vm6090_vm1, %v6089_v3 }
 0xf3b   : > { %5685 = vmatprep.subr.mxu1 %v6089_v3 }
 0xf3d   : > { %5663 = vmatmul.mubr.msk.f32.gmra.mxu1 %vm1028_vm3, %v3070_v1  ;;  %v3313_v5 = vpop.permute.xlu1 %3312 }
 0xf3e   : > { %5686 = vmatpush3.xpose.msk.msra.mxu1 %vm1028_vm3, %v3315_v2  ;;  %v3307_v4 = vpop.permute.xlu0 %3306  ;;  %5665 = vmatprep.mubr.msk.f32.mxu1 %vm6090_vm1, %v6089_v3 }
 0xf3f   : > { %5687 = vmatprep.subr.mxu1 %v6089_v3 }
 0xf41   : > { %5666 = vmatmul.mubr.msk.f32.gmra.mxu1 %vm1028_vm3, %v3072_v24  ;;  %v3309_v8 = vpop.permute.xlu1 %3308 }
 0xf42   : > { %5688 = vmatpush3.xpose.msk.msra.mxu1 %vm1028_vm3, %v3313_v5  ;;  %v2732_v6 = vpop.permute.xlu0 %2731  ;;  %5689 = vmatprep.mubr.msk.f32.mxu1 %vm6090_vm1, %v6089_v3 }
 0xf43   : > { %5713 = vmatprep.subr.mxu1 %v6089_v3 }
 0xf45   : > { %5690 = vmatmul.mubr.msk.f32.vlgmr.msra.gmra.mxu1 %vm1028_vm3, %v3307_v4  ;;  %v3311_v13 = vpop.permute.xlu1 %3310 }
 0xf46   : > { %v2730_v9 = vpop.permute.xlu0 %2729  ;;  %5692 = vmatprep.mubr.msk.f32.mxu1 %vm6090_vm1, %v6089_v3 }
 0xf49   : > { %5693 = vmatmul.mubr.msk.f32.gmra.mxu1 %vm1028_vm3, %v3309_v8 }
 0xf4a   : > { %v2734_v12 = vpop.permute.xlu0 %2733  ;;  %5695 = vmatprep.mubr.msk.f32.mxu1 %vm6090_vm1, %v6089_v3 }
 0xf4b   : > { %5609 = vmatpush3.msk.msra.mxu0 %vm1176_vm6, %v2734_v12 }
 0xf4c   : > { %5610 = vmatprep.subr.mxu0 %v6089_v3 }
 0xf4d   : > { %5611 = vmatpush3.msra.mxu0 %v2732_v6  ;;  %5696 = vmatmul.mubr.msk.f32.gmra.mxu1 %vm1028_vm3, %v3311_v13 }
 0xf4e   : > { %5612 = vmatprep.subr.mxu0 %v6089_v3  ;;  %5721 = vmatprep.mubr.msk.f32.mxu1 %vm6090_vm1, %v6089_v3 }
 0xf4f   : > { %5613 = vmatpush3.msra.mxu0 %v2730_v9 }
 0xf50   : > { %5638 = vmatprep.subr.mxu0 %v6089_v3 }
 0xfea   : > { %v2679_v16 = vpop.f32.mrf.mxu0 }
 0xfeb   : > { %v2693_v18 = vmul.f32 0.35355338, %v2679_v16 }
 0xfec   : > { %v5601_v22 = vpop.f32.mrf.mxu0 }
 0xfed   : > { %v2918_v19 = vpop.f32.mrf.mxu1  ;;  %v2696_v21 = vsel %vm1124_vm4, %v2693_v18, -inf }
 0xfee   : > { %v2932_v25 = vmul.f32 0.35355338, %v2918_v19  ;;  %2697 = vmax.xlane.f32.xlu0 %v2696_v21  ;;  %v2684_v26 = vpop.f32.mrf.mxu0 }
 0xfef   : > { %v2694_v27 = vmul.f32 0.35355338, %v2684_v26  ;;  %v5631_v28 = vpop.f32.mrf.mxu1 }
 0xff0   : > { %v5604_v29 = vpop.f32.mrf.mxu0  ;;  %v2935_v30 = vsel %vm1124_vm4, %v2932_v25, -inf }
 0xff1   : > { %v2923_v31 = vpop.f32.mrf.mxu1  ;;  %v2699_v32 = vsel %vm1124_vm4, %v2694_v27, -inf }
 0xff2   : > { %v2933_v15 = vmul.f32 0.35355338, %v2923_v31  ;;  %2700 = vmax.xlane.f32.xlu1 %v2699_v32  ;;  %v2689_v33 = vpop.f32.mrf.mxu0  ;;  %2936 = vmax.xlane.f32.xlu0 %v2935_v30 }
 0xff3   : > { %v5634_v35 = vpop.f32.mrf.mxu1  ;;  %v2695_v38 = vmul.f32 0.35355338, %v2689_v33 }
 0xff4   : > { %v5607_v36 = vpop.f32.mrf.mxu0  ;;  %v2938_v37 = vsel %vm1124_vm4, %v2933_v15, -inf }
 0xff5   : > { %v2928_v39 = vpop.f32.mrf.mxu1  ;;  %v2702_v44 = vsel %vm1131_vm5, %v2695_v38, -inf }
 0xff6   : > { %v6944_v40 = vmul.f32 0.35355338, %v2928_v39  ;;  %2939 = vmax.xlane.f32.xlu0 %v2938_v37 }
 0xff7   : > { %v5637_v41 = vpop.f32.mrf.mxu1 }
 0xff8   : > { %v2941_v11 = vsel %vm1131_vm5, %v6944_v40, -inf }
 0xff9   : > { %2942 = vmax.xlane.f32.xlu1 %v2941_v11  ;;  %v3157_v43 = vpop.f32.mrf.mxu1 }
 0xffa   : > { %v6949_v45 = vmul.f32 0.35355338, %v3157_v43  ;;  %2703 = vmax.xlane.f32.xlu0 %v2702_v44 }
 0xffb   : > { %v5661_v46 = vpop.f32.mrf.mxu1 }
 0xffc   : > { %v3174_v47 = vsel %vm1124_vm4, %v6949_v45, -inf }
 0xffd   : > { %v3162_v48 = vpop.f32.mrf.mxu1 }
 0xffe   : > { %v6953_v49 = vmul.f32 0.35355338, %v3162_v48  ;;  %3175 = vmax.xlane.f32.xlu0 %v3174_v47 }
 0xfff   : > { %v5664_v51 = vpop.f32.mrf.mxu1 }
0x1000   : > { %v3177_v52 = vsel %vm1124_vm4, %v6953_v49, -inf }
0x1001   : > { %3178 = vmax.xlane.f32.xlu1 %v3177_v52  ;;  %v3167_v54 = vpop.f32.mrf.mxu1 }
0x1002   : > { %v6957_v55 = vmul.f32 0.35355338, %v3167_v54 }
0x1003   : > { %v5667_v56 = vpop.f32.mrf.mxu1 }
0x1004   : > { %v3180_v57 = vsel %vm1131_vm5, %v6957_v55, -inf }
0x1005   : > { %3181 = vmax.xlane.f32.xlu0 %v3180_v57  ;;  %v3396_v10 = vpop.f32.mrf.mxu1 }
0x1006   : > { %v6961_v59 = vmul.f32 0.35355338, %v3396_v10 }
0x1007   : > { %v5691_v60 = vpop.f32.mrf.mxu1 }
0x1008   : > { %v3413_v23 = vsel %vm1124_vm4, %v6961_v59, -inf }
0x1009   : > { %3414 = vmax.xlane.f32.xlu1 %v3413_v23  ;;  %v3401_v14 = vpop.f32.mrf.mxu1 }
0x100a   : > { %v3411_v61 = vmul.f32 0.35355338, %v3401_v14 }
0x100b   : > { %v5694_v62 = vpop.f32.mrf.mxu1 }
0x100c   : > { %v3416_v17 = vsel %vm1124_vm4, %v3411_v61, -inf }
0x100d   : > { %3417 = vmax.xlane.f32.xlu0 %v3416_v17  ;;  %v6966_v63 = vpop.f32.mrf.mxu1 }
0x100f   : > { %v5697_v0 = vpop.f32.mrf.mxu1 }
0x101a   : > { %2972 = vrot.lane.b32.xlu1 %v6825_v53, %s7757_s5 }
0x1077   : > { %v2698_v20 = vpop.xlane.xlu0 %2697 }
0x1078   : > { %v2705_v1 = vsub.f32 %v2693_v18, %v2698_v20 }
0x107a   : > { %v2708_v2 = vmul.f32 1.442695, %v2705_v1 }
0x107b   : > { %v2701_v24 = vpop.xlane.xlu1 %2700  ;;  %v2937_v4 = vpop.xlane.xlu0 %2936 }
0x107c   : > { %5943 = vpow2.f32 %v2708_v2  ;;  %v2706_v5 = vsub.f32 %v2694_v27, %v2701_v24  ;;  %v2944_v6 = vsub.f32 %v2932_v25, %v2937_v4 }
0x107e   : > { %v2947_v8 = vmul.f32 1.442695, %v2944_v6  ;;  %v2710_v9 = vmul.f32 1.442695, %v2706_v5 }
0x107f   : > { %v2940_v12 = vpop.xlane.xlu0 %2939 }
0x1080   : > { %v2945_v13 = vsub.f32 %v2933_v15, %v2940_v12  ;;  %5945 = vpow2.f32 %v2947_v8 }
0x1081   : > { %5947 = vpow2.f32 %v2710_v9 }
0x1082   : > { %v2949_v16 = vmul.f32 1.442695, %v2945_v13  ;;  %v2943_v43 = vpop.xlane.xlu1 %2942 }
0x1083   : > { %v2704_v22 = vpop.xlane.xlu0 %2703  ;;  %v2946_v46 = vsub.f32 %v6944_v40, %v2943_v43 }
0x1084   : > { %v2707_v19 = vsub.f32 %v2695_v38, %v2704_v22  ;;  %5949 = vpow2.f32 %v2949_v16 }
0x1086   : > { %v2712_v21 = vmul.f32 1.442695, %v2707_v19 }
0x1087   : > { %v3176_v33 = vpop.xlane.xlu0 %3175 }
0x1088   : > { %5951 = vpow2.f32 %v2712_v21  ;;  %v3183_v35 = vsub.f32 %v6949_v45, %v3176_v33  ;;  %v2951_v45 = vmul.f32 1.442695, %v2946_v46 }
0x1089   : > { %v6970_v26 = vpop.eup %5943 }
0x108a   : > { %v2714_v18 = vsel %vm1124_vm4, %v6970_v26, 0.0  ;;  %v3186_v37 = vmul.f32 1.442695, %v3183_v35  ;;  %v3179_v57 = vpop.xlane.xlu1 %3178 }
0x108b   : > { %2715 = vadd.xlane.f32.xlu1 %v2714_v18  ;;  %v3184_v10 = vsub.f32 %v6953_v49, %v3179_v57 }
0x108c   : > { %5953 = vpow2.f32 %v3186_v37 }
0x108d   : > { %v6974_v27 = vpop.eup %5945  ;;  %v3188_v23 = vmul.f32 1.442695, %v3184_v10 }
0x108e   : > { %v2953_v25 = vsel %vm1124_vm4, %v6974_v27, 0.0  ;;  %v6978_v28 = vpop.eup %5947  ;;  %v3182_v36 = vpop.xlane.xlu0 %3181 }
0x108f   : > { %2954 = vadd.xlane.f32.xlu0 %v2953_v25  ;;  %v2717_v29 = vsel %vm1124_vm4, %v6978_v28, 0.0  ;;  %v3185_v38 = vsub.f32 %v6957_v55, %v3182_v36 }
0x1091   : > { %v6982_v30 = vpop.eup %5949  ;;  %v3190_v41 = vmul.f32 1.442695, %v3185_v38 }
0x1092   : > { %v2956_v15 = vsel %vm1124_vm4, %v6982_v30, 0.0  ;;  %v3415_v60 = vpop.xlane.xlu1 %3414 }
0x1093   : > { %2718 = vadd.xlane.f32.xlu0 %v2717_v29  ;;  %5955 = vpow2.f32 %v3190_v41  ;;  %v3422_v14 = vsub.f32 %v6961_v59, %v3415_v60 }
0x1095   : > { %v6984_v31 = vpop.eup %5951 }
0x1096   : > { %v2720_v32 = vsel %vm1131_vm5, %v6984_v31, 0.0  ;;  %v3418_v39 = vpop.xlane.xlu0 %3417 }
0x1097   : > { %2721 = vadd.xlane.f32.xlu1 %v2720_v32  ;;  %2957 = vadd.xlane.f32.xlu0 %v2956_v15  ;;  %v3423_v11 = vsub.f32 %v3411_v61, %v3418_v39  ;;  %v3425_v61 = vmul.f32 1.442695, %v3422_v14  ;;  %v4931_v14 = vld [vmem:[%s7704_s10 + $0x38] sm:$0xff] }
0x1098   : > { %5714 = vmatpush3.msra.mxu1 %v4931_v14  ;;  %v4936_v14 = vld [vmem:[%s7708_s14 + $0x28] sm:$0xff] }
0x1099   : > { %v3427_v44 = vmul.f32 1.442695, %v3423_v11  ;;  %v7003_v47 = vpop.eup %5953  ;;  %5715 = vmatprep.subr.mxu1 %v6089_v3 }
0x109a   : > { %v3192_v48 = vsel %vm1124_vm4, %v7003_v47, 0.0 }
0x109b   : > { %5957 = vpow2.f32 %v3427_v44 }
0x109c   : > { %5959 = vpow2.f32 %v2951_v45 }
0x109d   : > { %5961 = vpow2.f32 %v3188_v23 }
0x109e   : > { %5963 = vpow2.f32 %v3425_v61  ;;  %v4930_v61 = vld [vmem:[%s7704_s10 + $0x30] sm:$0xff] }
0x109f   : > { %5716 = vmatpush3.msra.mxu1 %v4930_v61  ;;  %v4935_v61 = vld [vmem:[%s7708_s14 + $0x20] sm:$0xff] }
0x10a0   : > { %v7007_v51 = vpop.eup %5955  ;;  %5717 = vmatprep.subr.mxu1 %v6089_v3 }
0x10a1   : > { %v3198_v52 = vsel %vm1131_vm5, %v7007_v51, 0.0 }
0x10a8   : > { %2970 = vrot.lane.b32.xlu1 %v6819_v50, %s7757_s5  ;;  %v7011_v54 = vpop.eup %5957 }
0x10a9   : > { %v3434_v40 = vsel %vm1124_vm4, %v7011_v54, 0.0  ;;  %v7015_v55 = vpop.eup %5959 }
0x10aa   : > { %v2959_v56 = vsel %vm1131_vm5, %v7015_v55, 0.0  ;;  %v7025_v62 = vpop.eup %5961 }
0x10ab   : > { %v3195_v17 = vsel %vm1124_vm4, %v7025_v62, 0.0  ;;  %v7029_v0 = vpop.eup %5963 }
0x10ad   : > { %2968 = vrot.lane.b32.xlu0 %v6823_v34, %s7757_s5  ;;  %s4856_s5 = sshll.u32 %s7764_s25, 1 }
0x10ae   : > { %s654_s23 = scalar_lea.vmem %s7715_s21, %s4856_s5 }
0x10b1   : > { %3211 = vrot.lane.b32.xlu0 %v6825_v53, %s7758_s24 }
0x10b5   : > { %3209 = vrot.lane.b32.xlu0 %v6819_v50, %s7758_s24 }
0x10b9   : > { %3207 = vrot.lane.b32.xlu0 %v6823_v34, %s7758_s24 }
0x10cc   : > { %3193 = vadd.xlane.f32.xlu1 %v3192_v48 }
0x10d0   : > { %3199 = vadd.xlane.f32.xlu1 %v3198_v52 }
0x10d4   : > { %3435 = vadd.xlane.f32.xlu1 %v3434_v40 }
0x10d8   : > { %2960 = vadd.xlane.f32.xlu0 %v2959_v56 }
0x10e5   : > { %3448 = vrot.lane.b32.xlu1 %v6819_v50, %s7759_s27  ;;  %v2973_v50 = vpop.permute.xlu1 %2972 }
0x10ee   : > { %3450 = vrot.lane.b32.xlu0 %v6825_v53, %s7759_s27  ;;  %v3431_v53 = vsel %vm1124_vm4, %v7029_v0, 0.0 }
0x110d   : > { %3196 = vadd.xlane.f32.xlu0 %v3195_v17 }
0x1111   : > { %3432 = vadd.xlane.f32.xlu0 %v3431_v53 }
0x1114   : > { %v2716_v49 = vpop.xlane.xlu1 %2715 }
0x1115   : > { %5965 = vrcp.f32 %v2716_v49  ;;  %v4928_v49 = vld [vmem:[%s7704_s10 + $0x20] sm:$0xff] }
0x1118   : > { %v2955_v20 = vpop.xlane.xlu0 %2954 }
0x111c   : > { %v2719_v59 = vpop.xlane.xlu0 %2718 }
0x111d   : > { %5967 = vrcp.f32 %v2719_v59 }
0x1120   : > { %v2722_v1 = vpop.xlane.xlu1 %2721  ;;  %v2958_v24 = vpop.xlane.xlu0 %2957 }
0x1121   : > { %5969 = vrcp.f32 %v2722_v1 }
0x1122   : > { %v5966_v2 = vpop.eup %5965  ;;  %5971 = vrcp.f32 %v2955_v20 }
0x1123   : > { %v2726_v4 = vmul.f32 %v5966_v2, %v6970_v26  ;;  %5973 = vrcp.f32 %v2958_v24 }
0x1124   : > { %v2971_v5 = vpop.permute.xlu1 %2970  ;;  %v2969_v6 = vpop.permute.xlu0 %2968 }
0x1125   : > { %5615 = vmatmul.mubr.msk.f32.vlgmr.msra.gmra.mxu0 %vm1124_vm4, %v2726_v4 }
0x1126   : > { %5639 = vmatpush3.msk.msra.mxu0 %vm1176_vm6, %v2973_v50  ;;  %5617 = vmatprep.mubr.msk.f32.mxu0 %vm6090_vm1, %v6089_v3 }
0x1127   : > { %5640 = vmatprep.subr.mxu0 %v6089_v3  ;;  %3446 = vrot.lane.b32.xlu0 %v6823_v34, %s7759_s27  ;;  %s7762_s27 = smov 24  }
0x1128   : > { %5641 = vmatpush3.msra.mxu0 %v2971_v5  ;;  %v3212_v13 = vpop.permute.xlu0 %3211 }
0x1129   : > { %5642 = vmatprep.subr.mxu0 %v6089_v3 }
0x112a   : > { %5643 = vmatpush3.msra.mxu0 %v2969_v6  ;;  %v5968_v8 = vpop.eup %5967 }
0x112b   : > { %5668 = vmatprep.subr.mxu0 %v6089_v3  ;;  %v2727_v9 = vmul.f32 %v5968_v8, %v6978_v28 }
0x112c   : > { %v3210_v19 = vpop.permute.xlu0 %3209 }
0x112d   : > { %5618 = vmatmul.mubr.msk.f32.gmra.mxu0 %vm1124_vm4, %v2727_v9 }
0x112e   : > { %v5970_v12 = vpop.eup %5969  ;;  %5620 = vmatprep.mubr.msk.f32.mxu0 %vm6090_vm1, %v6089_v3 }
0x112f   : > { %v2728_v16 = vmul.f32 %v5970_v12, %v6984_v31  ;;  %v5972_v22 = vpop.eup %5971 }
0x1130   : > { %v2965_v34 = vmul.f32 %v5972_v22, %v6974_v27  ;;  %v5974_v21 = vpop.eup %5973  ;;  %v3208_v18 = vpop.permute.xlu0 %3207  ;;  %v7064_v27 = vmul.f32 0.35355338, %v6966_v63 }
0x1131   : > { %5621 = vmatmul.mubr.msk.f32.gmra.mxu0 %vm1124_vm4, %v2728_v16  ;;  %v2966_v26 = vmul.f32 %v5974_v21, %v6982_v30 }
0x1132   : > { %5644 = vmatprep.mubr.msk.f32.mxu0 %vm6090_vm1, %v6089_v3  ;;  %v3419_v25 = vsel %vm1131_vm5, %v7064_v27, -inf }
0x1135   : > { %5645 = vmatmul.mubr.msk.f32.vlgmr.msra.gmra.mxu0 %vm1124_vm4, %v2965_v34 }
0x1136   : > { %5669 = vmatpush3.msk.msra.mxu0 %vm1176_vm6, %v3212_v13  ;;  %5647 = vmatprep.mubr.msk.f32.mxu0 %vm6090_vm1, %v6089_v3 }
0x1137   : > { %5670 = vmatprep.subr.mxu0 %v6089_v3 }
0x1138   : > { %5671 = vmatpush3.msra.mxu0 %v3210_v19 }
0x1139   : > { %5672 = vmatprep.subr.mxu0 %v6089_v3  ;;  %5648 = vmatmul.mubr.msk.f32.gmra.mxu0 %vm1124_vm4, %v2966_v26 }
0x113a   : > { %5673 = vmatpush3.msra.mxu0 %v3208_v18  ;;  %5650 = vmatprep.mubr.msk.f32.mxu0 %vm6090_vm1, %v6089_v3 }
0x113b   : > { %5698 = vmatprep.subr.mxu0 %v6089_v3 }
0x1146   : > { %3420 = vmax.xlane.f32.xlu0 %v3419_v25 }
0x1155   : > { %v3194_v28 = vpop.xlane.xlu1 %3193 }
0x1159   : > { %v3200_v30 = vpop.xlane.xlu1 %3199 }
0x115d   : > { %v3436_v33 = vpop.xlane.xlu1 %3435 }
0x1161   : > { %v2961_v29 = vpop.xlane.xlu0 %2960  ;;  %v3449_v36 = vpop.permute.xlu1 %3448 }
0x1162   : > { %5975 = vrcp.f32 %v2961_v29 }
0x1163   : > { %5977 = vrcp.f32 %v3194_v28 }
0x1165   : > { %v3451_v35 = vpop.permute.xlu0 %3450 }
0x116f   : > { %v5976_v31 = vpop.eup %5975 }
0x1170   : > { %v2967_v32 = vmul.f32 %v5976_v31, %v7015_v55  ;;  %v5978_v15 = vpop.eup %5977 }
0x1171   : > { %v3204_v63 = vmul.f32 %v5978_v15, %v7003_v47 }
0x1172   : > { %5651 = vmatmul.mubr.msk.f32.gmra.mxu0 %vm1124_vm4, %v2967_v32 }
0x1173   : > { %5674 = vmatprep.mubr.msk.f32.mxu0 %vm6090_vm1, %v6089_v3 }
0x1176   : > { %5675 = vmatmul.mubr.msk.f32.vlgmr.msra.gmra.mxu0 %vm1124_vm4, %v3204_v63  ;;  %v7140_v63 = vld [vmem:[%s7705_s11 + $0x1] ss:$0 sm:$0xff] }
0x1177   : > { %5699 = vmatpush3.msk.msra.mxu0 %vm1176_vm6, %v3451_v35  ;;  %5677 = vmatprep.mubr.msk.f32.mxu0 %vm6090_vm1, %v6089_v3 }
0x1178   : > { %5700 = vmatprep.subr.mxu0 %v6089_v3 }
0x1179   : > { %5701 = vmatpush3.msra.mxu0 %v3449_v36 }
0x117a   : > { %5702 = vmatprep.subr.mxu0 %v6089_v3 }
0x1196   : > { %v3197_v37 = vpop.xlane.xlu0 %3196 }
0x1197   : > { %5979 = vrcp.f32 %v3197_v37 }
0x1198   : > { %5981 = vrcp.f32 %v3200_v30 }
0x119a   : > { %v3433_v38 = vpop.xlane.xlu0 %3432 }
0x119b   : > { %5983 = vrcp.f32 %v3433_v38 }
0x119c   : > { %5985 = vrcp.f32 %v3436_v33 }
0x119e   : > { %v3447_v39 = vpop.permute.xlu0 %3446 }
0x119f   : > { %5703 = vmatpush3.msra.mxu0 %v3447_v39 }
0x11a0   : > { %5730 = vmatprep.subr.mxu0 %v6089_v3 }
0x11a4   : > { %v5980_v41 = vpop.eup %5979 }
0x11a5   : > { %v3205_v11 = vmul.f32 %v5980_v41, %v7025_v62  ;;  %v5982_v43 = vpop.eup %5981  ;;  %v4929_v62 = vld [vmem:[%s7704_s10 + $0x28] sm:$0xff] }
0x11a6   : > { %v3206_v44 = vmul.f32 %v5982_v43, %v7007_v51  ;;  %5718 = vmatpush3.msra.mxu1 %v4929_v62 }
0x11a7   : > { %5678 = vmatmul.mubr.msk.f32.gmra.mxu0 %vm1124_vm4, %v3205_v11  ;;  %5719 = vmatprep.subr.mxu1 %v6089_v3 }
0x11a8   : > { %5680 = vmatprep.mubr.msk.f32.mxu0 %vm6090_vm1, %v6089_v3  ;;  %v5984_v46 = vpop.eup %5983  ;;  %5720 = vmatpush3.msra.mxu1 %v4928_v49 }
0x11a9   : > { %v3443_v45 = vmul.f32 %v5984_v46, %v7029_v0  ;;  %v5986_v47 = vpop.eup %5985  ;;  %5747 = vmatprep.subr.mxu1 %v6089_v3 }
0x11aa   : > { %v3444_v48 = vmul.f32 %v5986_v47, %v7011_v54 }
0x11ab   : > { %5681 = vmatmul.mubr.msk.f32.gmra.mxu0 %vm1124_vm4, %v3206_v44 }
0x11ac   : > { %5704 = vmatprep.mubr.msk.f32.mxu0 %vm6090_vm1, %v6089_v3 }
0x11af   : > { %5705 = vmatmul.mubr.msk.f32.vlgmr.msra.gmra.mxu0 %vm1124_vm4, %v3443_v45 }
0x11b0   : > { %5707 = vmatprep.mubr.msk.f32.mxu0 %vm6090_vm1, %v6089_v3 }
0x11b3   : > { %5708 = vmatmul.mubr.msk.f32.gmra.mxu0 %vm1124_vm4, %v3444_v48 }
0x11b4   : > { %5710 = vmatprep.mubr.msk.f32.mxu0 %vm6090_vm1, %v6089_v3 }
0x11cf   : > { %v3421_v8 = vpop.xlane.xlu0 %3420 }
0x11d0   : > { %v3424_v9 = vsub.f32 %v7064_v27, %v3421_v8  ;;  %v7191_v8 = vld [vmem:[%s7707_s13 + $0x1] ss:$0 sm:$0xff] }
0x11d2   : > { %v3429_v12 = vmul.f32 1.442695, %v3424_v9 }
0x11d4   : > { %5987 = vpow2.f32 %v3429_v12 }
0x11e1   : > { %v5988_v13 = vpop.eup %5987 }
0x11e2   : > { %v3437_v16 = vsel %vm1131_vm5, %v5988_v13, 0.0 }
0x11e5   : > { %v2814_v51 = vpop.f32.mrf.mxu0 }
0x11e7   : > { %v5616_v52 = vpop.f32.mrf.mxu0 }
0x11ed   : > { %v2819_v40 = vpop.f32.mrf.mxu0 }
0x11ef   : > { %v5619_v55 = vpop.f32.mrf.mxu0 }
0x11f1   : > { %v7096_v56 = vpop.f32.mrf.mxu0 }
0x11f3   : > { %v5622_v57 = vpop.f32.mrf.mxu0 }
0x11f5   : > { %v3053_v10 = vpop.f32.mrf.mxu0 }
0x11f6   : > { %3548 = vrot.lane.b32.xlu1 %v3053_v10, %s7760_s22 }
0x11f7   : > { %v5646_v60 = vpop.f32.mrf.mxu0 }
0x11f9   : > { %v3058_v23 = vpop.f32.mrf.mxu0 }
0x11fa   : > { %3550 = vrot.lane.b32.xlu1 %v3058_v23, %s7760_s22  ;;  %v4938_v23 = vld [vmem:[%s7708_s14 + $0x38] sm:$0xff] }
0x11fb   : > { %v5649_v54 = vpop.f32.mrf.mxu0  ;;  %5731 = vmatpush3.msra.mxu0 %v4938_v23 }
0x11fc   : > { %5732 = vmatprep.subr.mxu0 %v6089_v3  ;;  %v4937_v54 = vld [vmem:[%s7708_s14 + $0x30] sm:$0xff] }
0x11fd   : > { %5733 = vmatpush3.msra.mxu0 %v4937_v54 }
0x11fe   : > { %5734 = vmatprep.subr.mxu0 %v6089_v3 }
0x11ff   : > { %5735 = vmatpush3.msra.mxu0 %v4936_v14 }
0x1200   : > { %5736 = vmatprep.subr.mxu0 %v6089_v3 }
0x1201   : > { %5737 = vmatpush3.msra.mxu0 %v4935_v61 }
0x1232   : > { %v3063_v17 = vpop.f32.mrf.mxu0 }
0x1234   : > { %v5652_v0 = vpop.f32.mrf.mxu0 }
0x1236   : > { %v3292_v50 = vpop.f32.mrf.mxu0 }
0x1237   : > { %3560 = vrot.lane.b32.xlu1 %v3292_v50, %s7761_s30 }
0x1238   : > { %v5676_v53 = vpop.f32.mrf.mxu0 }
0x1267   : > { %v3297_v20 = vpop.f32.mrf.mxu0 }
0x1268   : > { %v3549_v22 = vpop.permute.xlu1 %3548 }
0x1269   : > { %v5679_v59 = vpop.f32.mrf.mxu0  ;;  %v3581_v21 = vsel %vm1028_vm3, %v2814_v51, %v3549_v22 }
0x126b   : > { %v3302_v1 = vpop.f32.mrf.mxu0 }
0x126c   : > { %v3551_v34 = vpop.permute.xlu1 %3550 }
0x126d   : > { %v5682_v2 = vpop.f32.mrf.mxu0  ;;  %v3582_v27 = vsel %vm1028_vm3, %v2819_v40, %v3551_v34 }
0x126f   : > { %v3531_v24 = vpop.f32.mrf.mxu0 }
0x1270   : > { %3572 = vrot.lane.b32.xlu1 %v3531_v24, %s7762_s27 }
0x1271   : > { %v5706_v4 = vpop.f32.mrf.mxu0 }
0x1273   : > { %v3536_v5 = vpop.f32.mrf.mxu0 }
0x1274   : > { %3562 = vrot.lane.b32.xlu1 %v3297_v20, %s7761_s30  ;;  %3574 = vrot.lane.b32.xlu0 %v3536_v5, %s7762_s27  ;;  %v7186_v5 = vld [vmem:[%s7706_s12 + $0x1] ss:$0 sm:$0xff] }
0x1275   : > { %v5709_v6 = vpop.f32.mrf.mxu0 }
0x1298   : > { %3438 = vadd.xlane.f32.xlu1 %v3437_v16 }
0x12a9   : > { %v3561_v19 = vpop.permute.xlu1 %3560 }
0x12aa   : > { %v3584_v26 = vsel %vm2015_vm7, %v3581_v21, %v3561_v19  ;;  %v4955_v19 = vld [vmem:[%s7710_s16 + $0xf8] sm:$0xff] }
0x12e2   : > { %v3573_v18 = vpop.permute.xlu1 %3572 }
0x12e3   : > { %v3587_v25 = vsel %vm2019_vm8, %v3584_v26, %v3573_v18  ;;  %v4954_v26 = vld [vmem:[%s7710_s16 + $0xf0] sm:$0xff] }
0x12e4   : > { %5722 = vmatmul.mubr.msk.f32.vlgmr.msra.gmra.mxu1 %vm668_vm0, %v3587_v25 }
0x12e5   : > { %5724 = vmatprep.mubr.msk.f32.mxu1 %vm6090_vm1, %v6089_v3  ;;  %5748 = vmatpush3.msra.mxu1 %v4955_v19 }
0x12e6   : > { %v3563_v28 = vpop.permute.xlu1 %3562  ;;  %v3575_v29 = vpop.permute.xlu0 %3574  ;;  %5749 = vmatprep.subr.mxu1 %v6089_v3 }
0x12e7   : > { %v3585_v30 = vsel %vm2015_vm7, %v3582_v27, %v3563_v28  ;;  %5750 = vmatpush3.msra.mxu1 %v4954_v26  ;;  %v4953_v27 = vld [vmem:[%s7710_s16 + $0xe8] sm:$0xff] }
0x12e8   : > { %v3588_v31 = vsel %vm2019_vm8, %v3585_v30, %v3575_v29  ;;  %5751 = vmatprep.subr.mxu1 %v6089_v3  ;;  %v4952_v29 = vld [vmem:[%s7710_s16 + $0xe0] sm:$0xff]  ;;  %v4951_v30 = vld [vmem:[%s7710_s16 + $0xd8] sm:$0xff] }
0x12e9   : > { %5725 = vmatmul.mubr.msk.f32.gmra.mxu1 %vm668_vm0, %v3588_v31  ;;  %v4950_v31 = vld [vmem:[%s7710_s16 + $0xd0] sm:$0xff] }
0x12ea   : > { %5727 = vmatprep.mubr.msk.f32.mxu1 %vm6090_vm1, %v6089_v3  ;;  %5752 = vmatpush3.msra.mxu1 %v4953_v27 }
0x12eb   : > { %5753 = vmatprep.subr.mxu1 %v6089_v3 }
0x12ec   : > { %5754 = vmatpush3.msra.mxu1 %v4952_v29 }
0x12ed   : > { %5755 = vmatprep.subr.mxu1 %v6089_v3 }
0x12ee   : > { %5756 = vmatpush3.msra.mxu1 %v4951_v30 }
0x12ef   : > { %5757 = vmatprep.subr.mxu1 %v6089_v3 }
0x12f0   : > { %5758 = vmatpush3.msra.mxu1 %v4950_v31 }
0x12f1   : > { %5759 = vmatprep.subr.mxu1 %v6089_v3 }
0x1321   : > { %v3439_v32 = vpop.xlane.xlu1 %3438 }
0x1322   : > { %5989 = vrcp.f32 %v3439_v32  ;;  %v4949_v32 = vld [vmem:[%s7710_s16 + $0xc8] sm:$0xff] }
0x1323   : > { %5760 = vmatpush3.msra.mxu1 %v4949_v32 }
0x1324   : > { %5761 = vmatprep.subr.mxu1 %v6089_v3 }
0x132f   : > { %v5990_v15 = vpop.eup %5989 }
0x1330   : > { %v3445_v33 = vmul.f32 %v5990_v15, %v5988_v13  ;;  %v4948_v15 = vld [vmem:[%s7710_s16 + $0xc0] sm:$0xff] }
0x1331   : > { %5762 = vmatpush3.msra.mxu1 %v4948_v15 }
0x1332   : > { %5711 = vmatmul.mubr.msk.f32.gmra.mxu0 %vm1124_vm4, %v3445_v33  ;;  %5763 = vmatprep.subr.mxu1 %v6089_v3  ;;  %v4947_v33 = vld [vmem:[%s7710_s16 + $0xb8] sm:$0xff] }
0x1333   : > { %5738 = vmatprep.mubr.msk.f32.mxu0 %vm6090_vm1, %v6089_v3  ;;  %5764 = vmatpush3.msra.mxu1 %v4947_v33 }
0x1334   : > { %5765 = vmatprep.subr.mxu1 %v6089_v3 }
0x13a4   : > { %v3665_v35 = vpop.f32.mrf.mxu1 }
0x13a5   : > { %v3679_v36 = vadd.f32 %v3665_v35, %v6765_v42  ;;  %v4945_v35 = vld [vmem:[%s7710_s16 + $0xa8] sm:$0xff] }
0x13a6   : > { %v5723_v37 = vpop.f32.mrf.mxu1 }
0x13a7   : > { %v7144_v38 = vadd.f32 %v7140_v63, %v3679_v36  ;;  %v4944_v36 = vld [vmem:[%s7710_s16 + $0xa0] sm:$0xff]  ;;  %v4943_v37 = vld [vmem:[%s7710_s16 + $0x98] sm:$0xff] }
0x13a9   : > { %v3670_v39 = vpop.f32.mrf.mxu1  ;;  %v3691_v41 = vsel %vm668_vm0, %v7144_v38, 0.0 }
0x13aa   : > { %v3680_v11 = vadd.f32 %v3670_v39, %v6770_v58  ;;  %3692 = vadd.xlane.f32.xlu0 %v3691_v41  ;;  %v4942_v39 = vld [vmem:[%s7710_s16 + $0x90] sm:$0xff]  ;;  %v4941_v41 = vld [vmem:[%s7710_s16 + $0x88] sm:$0xff] }
0x13ab   : > { %v5726_v43 = vpop.f32.mrf.mxu1 }
0x13ac   : > { %v7150_v44 = vadd.f32 %v7140_v63, %v3680_v11  ;;  %v4940_v11 = vld [vmem:[%s7710_s16 + $0x80] sm:$0xff] }
0x13ad   : > { %v7275_v43 = vld [vmem:[%s7709_s15 + $0x1] ss:$0 sm:$0xff] }
0x13ae   : > { %v3694_v46 = vsel %vm668_vm0, %v7150_v44, 0.0 }
0x13af   : > { %3695 = vadd.xlane.f32.xlu1 %v3694_v46 }
0x13c0   : > { %3564 = vrot.lane.b32.xlu0 %v3302_v1, %s7761_s30  ;;  %3552 = vrot.lane.b32.xlu1 %v3063_v17, %s7760_s22 }
0x13f2   : > { %v3541_v42 = vpop.f32.mrf.mxu0 }
0x13f3   : > { %3576 = vrot.lane.b32.xlu1 %v3541_v42, %s7762_s27 }
0x13f4   : > { %v5712_v45 = vpop.f32.mrf.mxu0 }
0x1433   : > { %v3693_v47 = vpop.xlane.xlu0 %3692 }
0x1434   : > { %v3700_v48 = vmul.f32 0.03125, %v3693_v47 }
0x1436   : > { %v3703_v58 = vsub.f32 %v7144_v38, %v3700_v48 }
0x1437   : > { %v3565_v0 = vpop.permute.xlu0 %3564 }
0x1438   : > { %v3696_v51 = vpop.xlane.xlu1 %3695  ;;  %v3706_v52 = vmul.f32 %v3703_v58, %v3703_v58 }
0x1439   : > { %v3701_v40 = vmul.f32 0.03125, %v3696_v51 }
0x143a   : > { %v3709_v55 = vsel %vm668_vm0, %v3706_v52, 0.0 }
0x143b   : > { %v3704_v57 = vsub.f32 %v7150_v44, %v3701_v40  ;;  %3710 = vadd.xlane.f32.xlu1 %v3709_v55 }
0x143c   : > { %v3553_v62 = vpop.permute.xlu1 %3552 }
0x143d   : > { %v3707_v10 = vmul.f32 %v3704_v57, %v3704_v57  ;;  %v3583_v17 = vsel %vm1028_vm3, %v7096_v56, %v3553_v62 }
0x143e   : > { %v3586_v50 = vsel %vm2015_vm7, %v3583_v17, %v3565_v0 }
0x143f   : > { %v3712_v60 = vsel %vm668_vm0, %v3707_v10, 0.0 }
0x1440   : > { %3713 = vadd.xlane.f32.xlu0 %v3712_v60 }
0x1465   : > { %v3577_v53 = vpop.permute.xlu1 %3576 }
0x1466   : > { %v3589_v49 = vsel %vm2019_vm8, %v3586_v50, %v3577_v53 }
0x1467   : > { %5728 = vmatmul.mubr.msk.f32.gmra.mxu1 %vm668_vm0, %v3589_v49 }
0x1468   : > { %5779 = vmatprep.mubr.msk.f32.mxu1 %vm6090_vm1, %v6089_v3 }
0x14c4   : > { %v3711_v20 = vpop.xlane.xlu1 %3710 }
0x14c5   : > { %v3718_v59 = vmul.f32 0.03125, %v3711_v20 }
0x14c7   : > { %v3721_v1 = vadd.f32 1e-05, %v3718_v59 }
0x14c9   : > { %5991 = vrsqrt.f32 %v3721_v1  ;;  %v3714_v2 = vpop.xlane.xlu0 %3713 }
0x14ca   : > { %v3719_v24 = vmul.f32 0.03125, %v3714_v2 }
0x14cc   : > { %v3722_v4 = vadd.f32 1e-05, %v3719_v24 }
0x14ce   : > { %5993 = vrsqrt.f32 %v3722_v4 }
0x14d6   : > { %v5992_v56 = vpop.eup %5991 }
0x14d7   : > { %v3727_v6 = vmul.f32 %v5992_v56, %v3703_v58 }
0x14d9   : > { %v3736_v9 = vmul.f32 %v7186_v5, %v3727_v6  ;;  %v7291_v6 = vld [vmem:[%s7711_s17 + $0x1] ss:$0 sm:$0xff] }
0x14db   : > { %v5994_v12 = vpop.eup %5993  ;;  %v3745_v13 = vadd.f32 %v7191_v8, %v3736_v9 }
0x14dc   : > { %v3728_v16 = vmul.f32 %v5994_v12, %v3704_v57 }
0x14dd   : > { %5739 = vmatmul.mubr.msk.f32.vlgmr.msra.gmra.mxu0 %vm668_vm0, %v3745_v13 }
0x14de   : > { %5741 = vmatprep.mubr.msk.f32.mxu0 %vm6090_vm1, %v6089_v3  ;;  %v3737_v22 = vmul.f32 %v7186_v5, %v3728_v16 }
0x14e0   : > { %v3746_v34 = vadd.f32 %v7191_v8, %v3737_v22 }
0x14e2   : > { %5742 = vmatmul.mubr.msk.f32.gmra.mxu0 %vm668_vm0, %v3746_v34 }
0x14e3   : > { %5744 = vmatprep.mubr.msk.f32.mxu0 %vm6090_vm1, %v6089_v3 }
0x1527   : > { %v3675_v21 = vpop.f32.mrf.mxu1 }
0x1528   : > { %v3681_v18 = vadd.f32 %v3675_v21, %v6775_v7 }
0x1529   : > { %v5729_v25 = vpop.f32.mrf.mxu1 }
0x152a   : > { %v7216_v28 = vadd.f32 %v7140_v63, %v3681_v18  ;;  %v4946_v63 = vld [vmem:[%s7710_s16 + $0xb0] sm:$0xff] }
0x152b   : > { %5766 = vmatpush3.msra.mxu1 %v4946_v63 }
0x152c   : > { %v3697_v7 = vsel %vm871_vm2, %v7216_v28, 0.0  ;;  %5767 = vmatprep.subr.mxu1 %v6089_v3 }
0x152d   : > { %3698 = vadd.xlane.f32.xlu1 %v3697_v7  ;;  %5768 = vmatpush3.msra.mxu1 %v4945_v35 }
0x152e   : > { %5769 = vmatprep.subr.mxu1 %v6089_v3 }
0x152f   : > { %5770 = vmatpush3.msra.mxu1 %v4944_v36 }
0x1530   : > { %5771 = vmatprep.subr.mxu1 %v6089_v3 }
0x1531   : > { %5772 = vmatpush3.msra.mxu1 %v4943_v37 }
0x1532   : > { %5773 = vmatprep.subr.mxu1 %v6089_v3 }
0x1533   : > { %5774 = vmatpush3.msra.mxu1 %v4942_v39 }
0x1534   : > { %5775 = vmatprep.subr.mxu1 %v6089_v3 }
0x1535   : > { %5776 = vmatpush3.msra.mxu1 %v4941_v41  ;;  %v4018_v41 = vld [vmem:[%s7714_s20] sm:$0xff] }
0x1536   : > { %5777 = vmatprep.subr.mxu1 %v6089_v3 }
0x1537   : > { %5778 = vmatpush3.msra.mxu1 %v4940_v11 }
0x159d   : > { %v3829_v46 = vpop.f32.mrf.mxu0 }
0x159e   : > { %v3830_v42 = vadd.f32 %v7275_v43, %v3829_v46 }
0x159f   : > { %v5740_v45 = vpop.f32.mrf.mxu0 }
0x15a0   : > { %v5013_v47 = vmul.f32 -1.702, %v3830_v42 }
0x15a2   : > { %v3849_v48 = vmul.f32 1.442695, %v5013_v47  ;;  %v3834_v58 = vpop.f32.mrf.mxu0 }
0x15a3   : > { %v3835_v51 = vadd.f32 %v7275_v43, %v3834_v58 }
0x15a4   : > { %5995 = vpow2.f32 %v3849_v48  ;;  %v5743_v52 = vpop.f32.mrf.mxu0 }
0x15a5   : > { %v5014_v40 = vmul.f32 -1.702, %v3835_v51  ;;  %v7309_v52 = vld [vmem:[%s7712_s18] ss:$0 sm:$0xff] }
0x15a7   : > { %v3851_v55 = vmul.f32 1.442695, %v5014_v40 }
0x15a9   : > { %5997 = vpow2.f32 %v3851_v55 }
0x15b1   : > { %v5996_v57 = vpop.eup %5995 }
0x15b2   : > { %v3855_v10 = vadd.f32 1.0, %v5996_v57 }
0x15b4   : > { %5999 = vrcp.f32 %v3855_v10  ;;  %v7316_v10 = vld [vmem:[%s7713_s19] ss:$0 sm:$0xff] }
0x15b6   : > { %v5998_v60 = vpop.eup %5997  ;;  %v3699_v23 = vpop.xlane.xlu1 %3698 }
0x15b7   : > { %v3856_v54 = vadd.f32 1.0, %v5998_v60  ;;  %v3702_v14 = vmul.f32 0.03125, %v3699_v23 }
0x15b9   : > { %6001 = vrcp.f32 %v3856_v54  ;;  %v3705_v61 = vsub.f32 %v7216_v28, %v3702_v14  ;;  %v4019_v54 = vld [vmem:[%s7714_s20 + $0x8] sm:$0xff]  ;;  %v4020_v14 = vld [vmem:[%s7714_s20 + $0x10] sm:$0xff] }
0x15bb   : > { %v3708_v62 = vmul.f32 %v3705_v61, %v3705_v61 }
0x15bd   : > { %v3715_v17 = vsel %vm871_vm2, %v3708_v62, 0.0  ;;  %v4022_v62 = vld [vmem:[%s7714_s20 + $0x20] sm:$0xff] }
0x15be   : > { %3716 = vadd.xlane.f32.xlu1 %v3715_v17  ;;  %v4023_v17 = vld [vmem:[%s7714_s20 + $0x28] sm:$0xff] }
0x15c1   : > { %v6000_v0 = vpop.eup %5999 }
0x15c2   : > { %v3864_v50 = vmul.f32 %v6000_v0, %v3830_v42  ;;  %v4024_v0 = vld [vmem:[%s7714_s20 + $0x30] sm:$0xff] }
0x15c4   : > { %5780 = vmatmul.mubr.f32.vlgmr.msra.gmra.mxu1 %v3864_v50  ;;  %v4025_v50 = vld [vmem:[%s7714_s20 + $0x38] sm:$0xff] }
0x15c5   : > { %5782 = vmatprep.mubr.msk.f32.mxu1 %vm6090_vm1, %v6089_v3 }
0x15c6   : > { %v6002_v53 = vpop.eup %6001 }
0x15c7   : > { %v3865_v49 = vmul.f32 %v6002_v53, %v3835_v51  ;;  %v4026_v53 = vld [vmem:[%s7714_s20 + $0x40] sm:$0xff] }
0x15c9   : > { %5783 = vmatmul.mubr.f32.gmra.mxu1 %v3865_v49  ;;  %v4027_v49 = vld [vmem:[%s7714_s20 + $0x48] sm:$0xff] }
0x15ca   : > { %5785 = vmatprep.mubr.msk.f32.mxu1 %vm6090_vm1, %v6089_v3 }
0x1647   : > { %v3717_v20 = vpop.xlane.xlu1 %3716 }
0x1648   : > { %v3720_v59 = vmul.f32 0.03125, %v3717_v20  ;;  %v4028_v20 = vld [vmem:[%s7714_s20 + $0x50] sm:$0xff] }
0x164a   : > { %v3723_v1 = vadd.f32 1e-05, %v3720_v59  ;;  %v4029_v59 = vld [vmem:[%s7714_s20 + $0x58] sm:$0xff] }
0x164c   : > { %6003 = vrsqrt.f32 %v3723_v1  ;;  %v4030_v1 = vld [vmem:[%s7714_s20 + $0x60] sm:$0xff] }
0x1659   : > { %v6004_v2 = vpop.eup %6003 }
0x165a   : > { %v3729_v24 = vmul.f32 %v6004_v2, %v3705_v61  ;;  %v4021_v61 = vld [vmem:[%s7714_s20 + $0x18] sm:$0xff]  ;;  %v4031_v2 = vld [vmem:[%s7714_s20 + $0x68] sm:$0xff] }
0x165c   : > { %v3738_v4 = vmul.f32 %v7186_v5, %v3729_v24  ;;  %v4032_v24 = vld [vmem:[%s7714_s20 + $0x70] sm:$0xff] }
0x165e   : > { %v3747_v56 = vadd.f32 %v7191_v8, %v3738_v4  ;;  %v4033_v4 = vld [vmem:[%s7714_s20 + $0x78] sm:$0xff] }
0x1660   : > { %5745 = vmatmul.mubr.msk.f32.gmra.mxu0 %vm668_vm0, %v3747_v56  ;;  %v4034_v56 = vld [vmem:[%s7714_s20 + $0x80] sm:$0xff] }
0x1661   : > { %5792 = vmatprep.mubr.msk.f32.mxu0 %vm2015_vm7, %v4018_v41 }
0x1684   : > { %v3933_v9 = vpop.f32.mrf.mxu1 }
0x1685   : > { %v3947_v3 = vadd.f32 %v3933_v9, %v7144_v38  ;;  %v4035_v9 = vld [vmem:[%s7714_s20 + $0x88] sm:$0xff] }
0x1686   : > { %v5781_v12 = vpop.f32.mrf.mxu1 }
0x1687   : > { %v3956_v13 = vadd.f32 %v7291_v6, %v3947_v3  ;;  %v4036_v3 = vld [vmem:[%s7714_s20 + $0x90] sm:$0xff]  ;;  %v4037_v12 = vld [vmem:[%s7714_s20 + $0x98] sm:$0xff] }
0x1689   : > { %v3938_v16 = vpop.f32.mrf.mxu1  ;;  %v3961_v22 = vsel %vm668_vm0, %v3956_v13, 0.0 }
0x168a   : > { %v3948_v5 = vadd.f32 %v3938_v16, %v7150_v44  ;;  %3962 = vadd.xlane.f32.xlu1 %v3961_v22  ;;  %v4039_v16 = vld [vmem:[%s7714_s20 + $0xa8] sm:$0xff]  ;;  %v4040_v22 = vld [vmem:[%s7714_s20 + $0xb0] sm:$0xff] }
0x168b   : > { %v5784_v8 = vpop.f32.mrf.mxu1 }
0x168c   : > { %v3957_v34 = vadd.f32 %v7291_v6, %v3948_v5  ;;  %v4041_v5 = vld [vmem:[%s7714_s20 + $0xb8] sm:$0xff]  ;;  %v4042_v8 = vld [vmem:[%s7714_s20 + $0xc0] sm:$0xff] }
0x168e   : > { %v3964_v19 = vsel %vm668_vm0, %v3957_v34, 0.0 }
0x168f   : > { %3965 = vadd.xlane.f32.xlu0 %v3964_v19  ;;  %v4044_v19 = vld [vmem:[%s7714_s20 + $0xd0] sm:$0xff] }
0x1713   : > { %v3963_v21 = vpop.xlane.xlu1 %3962 }
0x1714   : > { %v3970_v26 = vmul.f32 0.03125, %v3963_v21  ;;  %v4045_v21 = vld [vmem:[%s7714_s20 + $0xd8] sm:$0xff] }
0x1716   : > { %v3973_v18 = vsub.f32 %v3956_v13, %v3970_v26  ;;  %v4038_v13 = vld [vmem:[%s7714_s20 + $0xa0] sm:$0xff] }
0x1717   : > { %v4046_v26 = vld [vmem:[%s7714_s20 + $0xe0] sm:$0xff] }
0x1718   : > { %v3966_v25 = vpop.xlane.xlu0 %3965  ;;  %v3976_v38 = vmul.f32 %v3973_v18, %v3973_v18 }
0x1719   : > { %v3971_v27 = vmul.f32 0.03125, %v3966_v25  ;;  %v4048_v25 = vld [vmem:[%s7714_s20 + $0xf0] sm:$0xff] }
0x171a   : > { %v3979_v29 = vsel %vm668_vm0, %v3976_v38, 0.0  ;;  %v4049_v38 = vld [vmem:[%s7714_s20 + $0xf8] sm:$0xff] }
0x171b   : > { %v3974_v7 = vsub.f32 %v3957_v34, %v3971_v27  ;;  %3980 = vadd.xlane.f32.xlu1 %v3979_v29  ;;  %v4043_v34 = vld [vmem:[%s7714_s20 + $0xc8] sm:$0xff] }
0x171d   : > { %v3977_v30 = vmul.f32 %v3974_v7, %v3974_v7 }
0x171f   : > { %v3982_v44 = vsel %vm668_vm0, %v3977_v30, 0.0 }
0x1720   : > { %v3839_v31 = vpop.f32.mrf.mxu0  ;;  %3983 = vadd.xlane.f32.xlu0 %v3982_v44 }
0x1721   : > { %v3840_v32 = vadd.f32 %v7275_v43, %v3839_v31 }
0x1722   : > { %v5746_v15 = vpop.f32.mrf.mxu0 }
0x1723   : > { %v5015_v33 = vmul.f32 -1.702, %v3840_v32 }
0x1725   : > { %v3853_v63 = vmul.f32 1.442695, %v5015_v33 }
0x1727   : > { %6005 = vpow2.f32 %v3853_v63 }
0x1734   : > { %v6006_v35 = vpop.eup %6005 }
0x1735   : > { %v3857_v36 = vadd.f32 1.0, %v6006_v35 }
0x1737   : > { %6007 = vrcp.f32 %v3857_v36 }
0x1744   : > { %v6008_v37 = vpop.eup %6007 }
0x1745   : > { %v3866_v39 = vmul.f32 %v6008_v37, %v3840_v32 }
0x1747   : > { %5786 = vmatmul.mubr.f32.gmra.mxu1 %v3866_v39 }
0x17a4   : > { %v3981_v11 = vpop.xlane.xlu1 %3980 }
0x17a5   : > { %v3988_v46 = vmul.f32 0.03125, %v3981_v11 }
0x17a7   : > { %v3991_v42 = vadd.f32 1e-05, %v3988_v46 }
0x17a9   : > { %v3984_v43 = vpop.xlane.xlu0 %3983  ;;  %6009 = vrsqrt.f32 %v3991_v42 }
0x17aa   : > { %v3989_v45 = vmul.f32 0.03125, %v3984_v43 }
0x17ac   : > { %v3992_v47 = vadd.f32 1e-05, %v3989_v45 }
0x17ae   : > { %6011 = vrsqrt.f32 %v3992_v47 }
0x17b6   : > { %v6010_v48 = vpop.eup %6009 }
0x17b7   : > { %v3997_v58 = vmul.f32 %v6010_v48, %v3973_v18  ;;  %v4047_v18 = vld [vmem:[%s7714_s20 + $0xe8] sm:$0xff] }
0x17b9   : > { %v4006_v57 = vmul.f32 %v7309_v52, %v3997_v58 }
0x17bb   : > { %v6012_v51 = vpop.eup %6011  ;;  %v4015_v23 = vadd.f32 %v7316_v10, %v4006_v57 }
0x17bc   : > { %v3998_v40 = vmul.f32 %v6012_v51, %v3974_v7 }
0x17be   : > { %v4007_v55 = vmul.f32 %v7309_v52, %v3998_v40 }
0x17c0   : > { %v4016_v60 = vadd.f32 %v7316_v10, %v4007_v55 }
0x17c2   : > { %5788 = vmatprep.subr.mxu0 %v4016_v60 }
0x17c3   : > { %5789 = vmatpush3.msra.mxu0 %v4016_v60 }
0x17c4   : > { %5790 = vmatprep.subr.mxu0 %v4015_v23 }
0x17c5   : > { %5791 = vmatpush3.msra.mxu0 %v4015_v23 }
0x17c6   : > { %5793 = vmatmul.mubr.msk.f32.vlgmr.msra.gmra.mxu0 %vm2015_vm7, %v4019_v54 }
0x17c7   : > { %5795 = vmatprep.mubr.msk.f32.mxu0 %vm2015_vm7, %v4020_v14 }
0x17ca   : > { %5796 = vmatmul.mubr.msk.f32.gmra.mxu0 %vm2015_vm7, %v4021_v61 }
0x17cb   : > { %5798 = vmatprep.mubr.msk.f32.mxu0 %vm2015_vm7, %v4022_v62 }
0x17ce   : > { %5799 = vmatmul.mubr.msk.f32.gmra.mxu0 %vm2015_vm7, %v4023_v17 }
0x17cf   : > { %5801 = vmatprep.mubr.msk.f32.mxu0 %vm2015_vm7, %v4024_v0 }
0x17d2   : > { %5802 = vmatmul.mubr.msk.f32.gmra.mxu0 %vm2015_vm7, %v4025_v50 }
0x17d3   : > { %5804 = vmatprep.mubr.msk.f32.mxu0 %vm2015_vm7, %v4026_v53 }
0x17d6   : > { %5805 = vmatmul.mubr.msk.f32.gmra.mxu0 %vm2015_vm7, %v4027_v49 }
0x17d7   : > { %5807 = vmatprep.mubr.msk.f32.mxu0 %vm2015_vm7, %v4028_v20 }
0x17da   : > { %5808 = vmatmul.mubr.msk.f32.gmra.mxu0 %vm2015_vm7, %v4029_v59 }
0x17db   : > { %5810 = vmatprep.mubr.msk.f32.mxu0 %vm2015_vm7, %v4030_v1 }
0x17de   : > { %5811 = vmatmul.mubr.msk.f32.gmra.mxu0 %vm2015_vm7, %v4031_v2 }
0x17df   : > { %5813 = vmatprep.mubr.msk.f32.mxu0 %vm2015_vm7, %v4032_v24 }
0x17e2   : > { %5814 = vmatmul.mubr.msk.f32.gmra.mxu0 %vm2015_vm7, %v4033_v4 }
0x17e3   : > { %5816 = vmatprep.mubr.msk.f32.mxu0 %vm2015_vm7, %v4034_v56 }
0x17e6   : > { %5817 = vmatmul.mubr.msk.f32.gmra.mxu0 %vm2015_vm7, %v4035_v9 }
0x17e7   : > { %5819 = vmatprep.mubr.msk.f32.mxu0 %vm2015_vm7, %v4036_v3 }
0x17ea   : > { %5820 = vmatmul.mubr.msk.f32.gmra.mxu0 %vm2015_vm7, %v4037_v12 }
0x17eb   : > { %5822 = vmatprep.mubr.msk.f32.mxu0 %vm2015_vm7, %v4038_v13 }
0x17ee   : > { %5823 = vmatmul.mubr.msk.f32.gmra.mxu0 %vm2015_vm7, %v4039_v16 }
0x17ef   : > { %5825 = vmatprep.mubr.msk.f32.mxu0 %vm2015_vm7, %v4040_v22 }
0x17f2   : > { %5826 = vmatmul.mubr.msk.f32.gmra.mxu0 %vm2015_vm7, %v4041_v5 }
0x17f3   : > { %5828 = vmatprep.mubr.msk.f32.mxu0 %vm2015_vm7, %v4042_v8 }
0x17f6   : > { %5829 = vmatmul.mubr.msk.f32.gmra.mxu0 %vm2015_vm7, %v4043_v34 }
0x17f7   : > { %5831 = vmatprep.mubr.msk.f32.mxu0 %vm2015_vm7, %v4044_v19 }
0x17fa   : > { %5832 = vmatmul.mubr.msk.f32.gmra.mxu0 %vm2015_vm7, %v4045_v21 }
0x17fb   : > { %5834 = vmatprep.mubr.msk.f32.mxu0 %vm2015_vm7, %v4046_v26 }
0x17fe   : > { %5835 = vmatmul.mubr.msk.f32.gmra.mxu0 %vm2015_vm7, %v4047_v18 }
0x17ff   : > { %5837 = vmatprep.mubr.msk.f32.mxu0 %vm2015_vm7, %v4048_v25 }
0x1802   : > { %5838 = vmatmul.mubr.msk.f32.gmra.mxu0 %vm2015_vm7, %v4049_v38 }
0x1807   : > { %v3943_v27 = vpop.f32.mrf.mxu1 }
0x1808   : > { %v3949_v29 = vadd.f32 %v3943_v27, %v7216_v28 }
0x1809   : > { %v5787_v7 = vpop.f32.mrf.mxu1 }
0x180a   : > { %v3958_v30 = vadd.f32 %v7291_v6, %v3949_v29 }
0x180c   : > { %v3967_v44 = vsel %vm871_vm2, %v3958_v30, 0.0 }
0x180d   : > { %3968 = vadd.xlane.f32.xlu0 %v3967_v44 }
0x1886   : > { %v7447_v31 = vpop.f32.mrf.mxu0 }
0x1888   : > { %v7449_v32 = vpop.f32.mrf.mxu0 }
0x188a   : > { %v7451_v15 = vpop.f32.mrf.mxu0 }
0x188c   : > { %v7453_v33 = vpop.f32.mrf.mxu0 }
0x188e   : > { %v7455_v63 = vpop.f32.mrf.mxu0 }
0x188f   : > { %v4376_v7 = vmul.f32 %v7455_v63, %v7455_v63 }
0x1890   : > { %v7457_v35 = vpop.f32.mrf.mxu0 }
0x1892   : > { %v7459_v36 = vpop.f32.mrf.mxu0 }
0x1893   : > { %v4378_v8 = vmul.f32 %v7459_v36, %v7459_v36 }
0x1894   : > { %v7461_v28 = vpop.f32.mrf.mxu0 }
0x1895   : > { %v4377_v26 = vmul.f32 %v7461_v28, %v7461_v28  ;;  %v4424_v25 = vsel %vm668_vm0, %v4378_v8, 0.0  ;;  %v4371_v8 = vmul.f32 %v7449_v32, %v7449_v32 }
0x1896   : > { %v7463_v6 = vpop.f32.mrf.mxu0  ;;  %v3969_v37 = vpop.xlane.xlu0 %3968 }
0x1897   : > { %v3972_v39 = vmul.f32 0.03125, %v3969_v37  ;;  %v4380_v56 = vmul.f32 %v7463_v6, %v7463_v6  ;;  %v4421_v37 = vsel %vm668_vm0, %v4377_v26, 0.0 }
0x1898   : > { %v7465_v41 = vpop.f32.mrf.mxu0 }
0x1899   : > { %v7467_v11 = vsub.f32 %v3958_v30, %v3972_v39  ;;  %v4379_v13 = vmul.f32 %v7465_v41, %v7465_v41  ;;  %v4430_v16 = vsel %vm668_vm0, %v4380_v56, 0.0  ;;  %v4372_v56 = vmul.f32 %v7447_v31, %v7447_v31 }
0x189a   : > { %v7469_v46 = vpop.f32.mrf.mxu0 }
0x189b   : > { %v3978_v42 = vmul.f32 %v7467_v11, %v7467_v11  ;;  %v4382_v53 = vmul.f32 %v7469_v46, %v7469_v46  ;;  %v4427_v34 = vsel %vm668_vm0, %v4379_v13, 0.0 }
0x189c   : > { %v7473_v43 = vpop.f32.mrf.mxu0 }
0x189d   : > { %v3985_v45 = vsel %vm871_vm2, %v3978_v42, 0.0  ;;  %v4381_v1 = vmul.f32 %v7473_v43, %v7473_v43  ;;  %v4436_v2 = vsel %vm668_vm0, %v4382_v53, 0.0  ;;  %v4373_v53 = vmul.f32 %v7453_v33, %v7453_v33 }
0x189e   : > { %v7476_v47 = vpop.f32.mrf.mxu0  ;;  %3986 = vadd.xlane.f32.xlu1 %v3985_v45  ;;  %v4418_v45 = vsel %vm668_vm0, %v4376_v7, 0.0 }
0x189f   : > { %v4384_v23 = vmul.f32 %v7476_v47, %v7476_v47  ;;  %v4433_v9 = vsel %vm668_vm0, %v4381_v1, 0.0 }
0x18a0   : > { %v7478_v48 = vpop.f32.mrf.mxu0 }
0x18a1   : > { %v4383_v62 = vmul.f32 %v7478_v48, %v7478_v48  ;;  %v4442_v17 = vsel %vm668_vm0, %v4384_v23, 0.0  ;;  %v4374_v23 = vmul.f32 %v7451_v15, %v7451_v15 }
0x18a2   : > { %v7480_v58 = vpop.f32.mrf.mxu0 }
0x18a3   : > { %v4386_v51 = vmul.f32 %v7480_v58, %v7480_v58  ;;  %v4439_v49 = vsel %vm668_vm0, %v4383_v62, 0.0 }
0x18a4   : > { %v7484_v40 = vpop.f32.mrf.mxu0 }
0x18a5   : > { %v4385_v55 = vmul.f32 %v7484_v40, %v7484_v40  ;;  %v4448_v57 = vsel %vm668_vm0, %v4386_v51, 0.0  ;;  %v4375_v51 = vmul.f32 %v7457_v35, %v7457_v35 }
0x18a6   : > { %v7489_v60 = vpop.f32.mrf.mxu0  ;;  %4449 = vadd.xlane.f32.xlu1 %v4448_v57 }
0x18a7   : > { %v4445_v54 = vsel %vm668_vm0, %v4385_v55, 0.0 }
0x18a8   : > { %v7494_v14 = vpop.f32.mrf.mxu0 }
0x18aa   : > { %v7496_v61 = vpop.f32.mrf.mxu0  ;;  %4446 = vadd.xlane.f32.xlu1 %v4445_v54  ;;  %v4415_v54 = vsel %vm668_vm0, %v4375_v51, 0.0 }
0x18ac   : > { %v7501_v0 = vpop.f32.mrf.mxu0 }
0x18ae   : > { %v7503_v50 = vpop.f32.mrf.mxu0  ;;  %4443 = vadd.xlane.f32.xlu1 %v4442_v17 }
0x18af   : > { %v4392_v7 = vmul.f32 %v7503_v50, %v7503_v50 }
0x18b0   : > { %v7508_v20 = vpop.f32.mrf.mxu0 }
0x18b2   : > { %v7510_v59 = vpop.f32.mrf.mxu0  ;;  %4440 = vadd.xlane.f32.xlu1 %v4439_v49  ;;  %v4412_v49 = vsel %vm668_vm0, %v4374_v23, 0.0  ;;  %v4387_v23 = vmul.f32 %v7494_v14, %v7494_v14 }
0x18b3   : > { %v4394_v26 = vmul.f32 %v7510_v59, %v7510_v59 }
0x18b4   : > { %v7515_v24 = vpop.f32.mrf.mxu0 }
0x18b6   : > { %v7517_v4 = vpop.f32.mrf.mxu0  ;;  %4437 = vadd.xlane.f32.xlu1 %v4436_v2 }
0x18b7   : > { %v4396_v1 = vmul.f32 %v7517_v4, %v7517_v4 }
0x18b8   : > { %v7522_v3 = vpop.f32.mrf.mxu0 }
0x18b9   : > { %v4395_v13 = vmul.f32 %v7522_v3, %v7522_v3 }
0x18ba   : > { %v7524_v12 = vpop.f32.mrf.mxu0  ;;  %4434 = vadd.xlane.f32.xlu1 %v4433_v9  ;;  %v4409_v9 = vsel %vm668_vm0, %v4373_v53, 0.0 }
0x18bb   : > { %v4398_v55 = vmul.f32 %v7524_v12, %v7524_v12 }
0x18bc   : > { %v7529_v22 = vpop.f32.mrf.mxu0 }
0x18bd   : > { %v4397_v62 = vmul.f32 %v7529_v22, %v7529_v22  ;;  %v4484_v17 = vsel %vm668_vm0, %v4398_v55, 0.0  ;;  %v4388_v55 = vmul.f32 %v7489_v60, %v7489_v60 }
0x18be   : > { %v7531_v5 = vpop.f32.mrf.mxu0  ;;  %4431 = vadd.xlane.f32.xlu1 %v4430_v16  ;;  %v4478_v16 = vsel %vm668_vm0, %v4396_v1, 0.0 }
0x18bf   : > { %v4400_v30 = vmul.f32 %v7531_v5, %v7531_v5  ;;  %v4481_v2 = vsel %vm668_vm0, %v4397_v62, 0.0  ;;  %v4451_v62 = vsel %vm668_vm0, %v4387_v23, 0.0 }
0x18c0   : > { %v7536_v19 = vpop.f32.mrf.mxu0 }
0x18c1   : > { %v4399_v39 = vmul.f32 %v7536_v19, %v7536_v19  ;;  %v4490_v42 = vsel %vm668_vm0, %v4400_v30, 0.0 }
0x18c2   : > { %v7538_v21 = vpop.f32.mrf.mxu0  ;;  %4428 = vadd.xlane.f32.xlu1 %v4427_v34  ;;  %v4406_v34 = vsel %vm668_vm0, %v4372_v56, 0.0 }
0x18c3   : > { %v4402_v18 = vmul.f32 %v7538_v21, %v7538_v21  ;;  %v4487_v57 = vsel %vm668_vm0, %v4399_v39, 0.0  ;;  %v4390_v39 = vmul.f32 %v7496_v61, %v7496_v61 }
0x18c4   : > { %v7545_v38 = vpop.f32.mrf.mxu0 }
0x18c5   : > { %v4401_v27 = vmul.f32 %v7545_v38, %v7545_v38  ;;  %v4496_v29 = vsel %vm668_vm0, %v4402_v18, 0.0  ;;  %v4475_v18 = vsel %vm668_vm0, %v4395_v13, 0.0  ;;  %v4460_v51 = vsel %vm668_vm0, %v4390_v39, 0.0 }
0x18c6   : > { %4497 = vadd.xlane.f32.xlu0 %v4496_v29  ;;  %4425 = vadd.xlane.f32.xlu1 %v4424_v25  ;;  %v4403_v25 = vsel %vm668_vm0, %v4371_v8, 0.0  ;;  %v4472_v29 = vsel %vm668_vm0, %v4394_v26, 0.0 }
0x18c7   : > { %v4493_v44 = vsel %vm668_vm0, %v4401_v27, 0.0  ;;  %v4393_v27 = vmul.f32 %v7515_v24, %v7515_v24 }
0x18c9   : > { %v4469_v30 = vsel %vm668_vm0, %v4393_v27, 0.0 }
0x18ca   : > { %4494 = vadd.xlane.f32.xlu0 %v4493_v44  ;;  %4422 = vadd.xlane.f32.xlu1 %v4421_v37  ;;  %v4466_v44 = vsel %vm668_vm0, %v4392_v7, 0.0  ;;  %v4391_v37 = vmul.f32 %v7508_v20, %v7508_v20 }
0x18ce   : > { %4491 = vadd.xlane.f32.xlu0 %v4490_v42  ;;  %4419 = vadd.xlane.f32.xlu1 %v4418_v45  ;;  %v4463_v42 = vsel %vm668_vm0, %v4391_v37, 0.0  ;;  %v4389_v45 = vmul.f32 %v7501_v0, %v7501_v0 }
0x18d2   : > { %4488 = vadd.xlane.f32.xlu0 %v4487_v57  ;;  %4416 = vadd.xlane.f32.xlu1 %v4415_v54  ;;  %v4457_v57 = vsel %vm668_vm0, %v4389_v45, 0.0  ;;  %v4454_v54 = vsel %vm668_vm0, %v4388_v55, 0.0 }
0x18d6   : > { %4485 = vadd.xlane.f32.xlu0 %v4484_v17  ;;  %4413 = vadd.xlane.f32.xlu1 %v4412_v49 }
0x18da   : > { %4482 = vadd.xlane.f32.xlu0 %v4481_v2  ;;  %4410 = vadd.xlane.f32.xlu1 %v4409_v9 }
0x18de   : > { %4479 = vadd.xlane.f32.xlu0 %v4478_v16  ;;  %4407 = vadd.xlane.f32.xlu1 %v4406_v34 }
0x18e2   : > { %4476 = vadd.xlane.f32.xlu0 %v4475_v18  ;;  %4404 = vadd.xlane.f32.xlu1 %v4403_v25 }
0x18e6   : > { %4473 = vadd.xlane.f32.xlu0 %v4472_v29 }
0x18ea   : > { %4470 = vadd.xlane.f32.xlu0 %v4469_v30 }
0x18ee   : > { %4467 = vadd.xlane.f32.xlu0 %v4466_v44 }
0x18f2   : > { %4464 = vadd.xlane.f32.xlu0 %v4463_v42 }
0x18f6   : > { %4461 = vadd.xlane.f32.xlu0 %v4460_v51 }
0x18fa   : > { %4458 = vadd.xlane.f32.xlu0 %v4457_v57 }
0x18fe   : > { %4455 = vadd.xlane.f32.xlu0 %v4454_v54 }
0x1902   : > { %4452 = vadd.xlane.f32.xlu0 %v4451_v62 }
0x1927   : > { %v3987_v17 = vpop.xlane.xlu1 %3986 }
0x1928   : > { %v3990_v53 = vmul.f32 0.03125, %v3987_v17 }
0x192a   : > { %v3993_v49 = vadd.f32 1e-05, %v3990_v53 }
0x192c   : > { %6013 = vrsqrt.f32 %v3993_v49 }
0x192f   : > { %v4450_v1 = vpop.xlane.xlu1 %4449 }
0x1930   : > { %v4514_v29 = vadd.f32 1e-12, %v4450_v1 }
0x1932   : > { %6015 = vrsqrt.f32 %v4514_v29 }
0x1933   : > { %v4447_v2 = vpop.xlane.xlu1 %4446 }
0x1937   : > { %v4444_v56 = vpop.xlane.xlu1 %4443 }
0x1939   : > { %v6014_v9 = vpop.eup %6013 }
0x193a   : > { %v3999_v13 = vmul.f32 %v6014_v9, %v7467_v11  ;;  %v4513_v11 = vadd.f32 1e-12, %v4447_v2 }
0x193b   : > { %v4441_v8 = vpop.xlane.xlu1 %4440 }
0x193c   : > { %v4008_v16 = vmul.f32 %v7309_v52, %v3999_v13  ;;  %v4511_v51 = vadd.f32 1e-12, %v4441_v8 }
0x193e   : > { %v7615_v34 = vadd.f32 %v7316_v10, %v4008_v16  ;;  %v4512_v10 = vadd.f32 1e-12, %v4444_v56 }
0x193f   : > { %v4438_v25 = vpop.xlane.xlu1 %4437  ;;  %v6016_v62 = vpop.eup %6015 }
0x1940   : > { %v4595_v26 = vmul.f32 %v7615_v34, %v7615_v34  ;;  %v4510_v54 = vadd.f32 1e-12, %v4438_v25  ;;  %v4578_v9 = vmul.f32 %v6016_v62, %v7480_v58 }
0x1942   : > { %v4596_v18 = vsel %vm871_vm2, %v4595_v26, 0.0 }
0x1943   : > { %4597 = vadd.xlane.f32.xlu0 %v4596_v18  ;;  %v4435_v27 = vpop.xlane.xlu1 %4434 }
0x1944   : > { %v4509_v2 = vadd.f32 1e-12, %v4435_v27 }
0x1947   : > { %v4432_v30 = vpop.xlane.xlu1 %4431 }
0x1948   : > { %v4508_v25 = vadd.f32 1e-12, %v4432_v30 }
0x194b   : > { %v4429_v39 = vpop.xlane.xlu1 %4428 }
0x194f   : > { %v4498_v7 = vpop.xlane.xlu0 %4497  ;;  %v4426_v57 = vpop.xlane.xlu1 %4425 }
0x1950   : > { %v4530_v44 = vadd.f32 1e-12, %v4498_v7 }
0x1952   : > { %6017 = vrsqrt.f32 %v4530_v44 }
0x1953   : > { %v4495_v52 = vpop.xlane.xlu0 %4494  ;;  %6019 = vrsqrt.f32 %v4513_v11  ;;  %v4423_v56 = vpop.xlane.xlu1 %4422 }
0x1954   : > { %v4529_v37 = vadd.f32 1e-12, %v4495_v52  ;;  %v4507_v52 = vadd.f32 1e-12, %v4429_v39 }
0x1956   : > { %6021 = vrsqrt.f32 %v4529_v37 }
0x1957   : > { %v4492_v42 = vpop.xlane.xlu0 %4491  ;;  %6023 = vrsqrt.f32 %v4512_v10  ;;  %v4420_v7 = vpop.xlane.xlu1 %4419 }
0x1958   : > { %v4528_v45 = vadd.f32 1e-12, %v4492_v42  ;;  %v4506_v42 = vadd.f32 1e-12, %v4426_v57 }
0x195a   : > { %6025 = vrsqrt.f32 %v4528_v45 }
0x195b   : > { %v4489_v55 = vpop.xlane.xlu0 %4488  ;;  %6027 = vrsqrt.f32 %v4511_v51  ;;  %v4417_v51 = vpop.xlane.xlu1 %4416 }
0x195c   : > { %v4527_v23 = vadd.f32 1e-12, %v4489_v55 }
0x195e   : > { %6029 = vrsqrt.f32 %v4527_v23 }
0x195f   : > { %v4486_v17 = vpop.xlane.xlu0 %4485  ;;  %v6018_v53 = vpop.eup %6017  ;;  %6031 = vrsqrt.f32 %v4510_v54  ;;  %v4505_v54 = vadd.f32 1e-12, %v4423_v56 }
0x1960   : > { %v4526_v49 = vadd.f32 1e-12, %v4486_v17  ;;  %v4594_v1 = vmul.f32 %v6018_v53, %v7538_v21  ;;  %v6020_v13 = vpop.eup %6019  ;;  %v4414_v53 = vpop.xlane.xlu1 %4413 }
0x1961   : > { %v4577_v21 = vmul.f32 %v6020_v13, %v7484_v40 }
0x1962   : > { %6033 = vrsqrt.f32 %v4526_v49  ;;  %5308 = vmatprep.subr.msk.mxu0 %vm668_vm0, %v4594_v1  ;;  %v4504_v1 = vadd.f32 1e-12, %v4420_v7 }
0x1963   : > { %v4483_v16 = vpop.xlane.xlu0 %4482  ;;  %v6022_v8 = vpop.eup %6021  ;;  %5309 = vmatpush3.xpose.msk.msra.mxu0 %vm668_vm0, %v4578_v9  ;;  %6035 = vrsqrt.f32 %v4509_v2 }
0x1964   : > { %v4525_v26 = vadd.f32 1e-12, %v4483_v16  ;;  %v4593_v18 = vmul.f32 %v6022_v8, %v7545_v38  ;;  %v6024_v29 = vpop.eup %6023  ;;  %v4503_v16 = vadd.f32 1e-12, %v4417_v51 }
0x1965   : > { %v4576_v38 = vmul.f32 %v6024_v29, %v7476_v47  ;;  %v4502_v29 = vadd.f32 1e-12, %v4414_v53 }
0x1966   : > { %6037 = vrsqrt.f32 %v4525_v26  ;;  %5310 = vmatprep.subr.msk.mxu0 %vm668_vm0, %v4593_v18  ;;  %v4411_v26 = vpop.xlane.xlu1 %4410 }
0x1967   : > { %v4480_v58 = vpop.xlane.xlu0 %4479  ;;  %v6026_v27 = vpop.eup %6025  ;;  %5311 = vmatpush3.xpose.msk.msra.mxu0 %vm668_vm0, %v4577_v21  ;;  %6039 = vrsqrt.f32 %v4508_v25 }
0x1968   : > { %v4524_v44 = vadd.f32 1e-12, %v4480_v58  ;;  %v4592_v11 = vmul.f32 %v6026_v27, %v7531_v5  ;;  %v6028_v37 = vpop.eup %6027 }
0x1969   : > { %v4575_v5 = vmul.f32 %v6028_v37, %v7478_v48 }
0x196a   : > { %6041 = vrsqrt.f32 %v4524_v44  ;;  %5312 = vmatprep.subr.msk.mxu0 %vm668_vm0, %v4592_v11  ;;  %v4408_v44 = vpop.xlane.xlu1 %4407 }
0x196b   : > { %v4477_v40 = vpop.xlane.xlu0 %4476  ;;  %v6030_v30 = vpop.eup %6029  ;;  %5313 = vmatpush3.xpose.msk.msra.mxu0 %vm668_vm0, %v4576_v38  ;;  %6043 = vrsqrt.f32 %v4507_v52  ;;  %v4501_v38 = vadd.f32 1e-12, %v4411_v26 }
0x196c   : > { %v4523_v10 = vadd.f32 1e-12, %v4477_v40  ;;  %v4591_v45 = vmul.f32 %v6030_v30, %v7536_v19  ;;  %v6032_v55 = vpop.eup %6031 }
0x196d   : > { %v4574_v19 = vmul.f32 %v6032_v55, %v7469_v46 }
0x196e   : > { %6045 = vrsqrt.f32 %v4523_v10  ;;  %5314 = vmatprep.subr.msk.mxu0 %vm668_vm0, %v4591_v45  ;;  %v4405_v51 = vpop.xlane.xlu1 %4404 }
0x196f   : > { %v4474_v47 = vpop.xlane.xlu0 %4473  ;;  %v6034_v39 = vpop.eup %6033  ;;  %5315 = vmatpush3.xpose.msk.msra.mxu0 %vm668_vm0, %v4575_v5  ;;  %6047 = vrsqrt.f32 %v4506_v42  ;;  %v4500_v42 = vadd.f32 1e-12, %v4408_v44 }
0x1970   : > { %v4522_v23 = vadd.f32 1e-12, %v4474_v47  ;;  %v4590_v62 = vmul.f32 %v6034_v39, %v7524_v12  ;;  %v6036_v57 = vpop.eup %6035  ;;  %v4499_v39 = vadd.f32 1e-12, %v4405_v51 }
0x1971   : > { %v4573_v56 = vmul.f32 %v6036_v57, %v7473_v43 }
0x1972   : > { %6049 = vrsqrt.f32 %v4522_v23  ;;  %5316 = vmatprep.subr.msk.mxu0 %vm668_vm0, %v4590_v62 }
0x1973   : > { %v4471_v48 = vpop.xlane.xlu0 %4470  ;;  %v6038_v17 = vpop.eup %6037  ;;  %5317 = vmatpush3.xpose.msk.msra.mxu0 %vm668_vm0, %v4574_v19  ;;  %6051 = vrsqrt.f32 %v4505_v54 }
0x1974   : > { %v4521_v49 = vadd.f32 1e-12, %v4471_v48  ;;  %v4589_v2 = vmul.f32 %v6038_v17, %v7529_v22  ;;  %v6040_v12 = vpop.eup %6039 }
0x1975   : > { %v4572_v18 = vmul.f32 %v6040_v12, %v7463_v6 }
0x1976   : > { %6053 = vrsqrt.f32 %v4521_v49  ;;  %5318 = vmatprep.subr.msk.mxu0 %vm668_vm0, %v4589_v2 }
0x1977   : > { %v4468_v46 = vpop.xlane.xlu0 %4467  ;;  %v6042_v9 = vpop.eup %6041  ;;  %5319 = vmatpush3.xpose.msk.msra.mxu0 %vm668_vm0, %v4573_v56  ;;  %6055 = vrsqrt.f32 %v4504_v1 }
0x1978   : > { %v4520_v13 = vadd.f32 1e-12, %v4468_v46  ;;  %v4588_v8 = vmul.f32 %v6042_v9, %v7517_v4  ;;  %v6044_v22 = vpop.eup %6043 }
0x1979   : > { %v4571_v4 = vmul.f32 %v6044_v22, %v7465_v41 }
0x197a   : > { %6057 = vrsqrt.f32 %v4520_v13  ;;  %5320 = vmatprep.subr.msk.mxu0 %vm668_vm0, %v4588_v8  ;;  %v4779_v8 = vlaneseq }
0x197b   : > { %v4465_v43 = vpop.xlane.xlu0 %4464  ;;  %v6046_v25 = vpop.eup %6045  ;;  %5321 = vmatpush3.xpose.msk.msra.mxu0 %vm668_vm0, %v4572_v18  ;;  %6059 = vrsqrt.f32 %v4503_v16 }
0x197c   : > { %v4519_v21 = vadd.f32 1e-12, %v4465_v43  ;;  %v4587_v58 = vmul.f32 %v6046_v25, %v7522_v3  ;;  %v6048_v27 = vpop.eup %6047  ;;  %v4780_v18 = vshrl.u32 %v4779_v8, 7  ;;  %vm4793_vm9 = vcmp.lt.s32.totalorder %v4779_v8, 256 }
0x197d   : > { %v4570_v3 = vmul.f32 %v6048_v27, %v7459_v36 }
0x197e   : > { %6061 = vrsqrt.f32 %v4519_v21  ;;  %5322 = vmatprep.subr.msk.mxu0 %vm668_vm0, %v4587_v58 }
0x197f   : > { %v6050_v7 = vpop.eup %6049  ;;  %v4462_v6 = vpop.xlane.xlu0 %4461  ;;  %5323 = vmatpush3.xpose.msk.msra.mxu0 %vm668_vm0, %v4571_v4  ;;  %6063 = vrsqrt.f32 %v4502_v29 }
0x1980   : > { %v4518_v11 = vadd.f32 1e-12, %v4462_v6  ;;  %v4586_v52 = vmul.f32 %v6050_v7, %v7510_v59  ;;  %v6052_v37 = vpop.eup %6051 }
0x1981   : > { %v4569_v59 = vmul.f32 %v6052_v37, %v7461_v28 }
0x1982   : > { %6065 = vrsqrt.f32 %v4518_v11  ;;  %5324 = vmatprep.subr.msk.mxu0 %vm668_vm0, %v4586_v52 }
0x1983   : > { %v6054_v40 = vpop.eup %6053  ;;  %v4459_v41 = vpop.xlane.xlu0 %4458  ;;  %5325 = vmatpush3.xpose.msk.msra.mxu0 %vm668_vm0, %v4570_v3  ;;  %6067 = vrsqrt.f32 %v4501_v38 }
0x1984   : > { %v4517_v30 = vadd.f32 1e-12, %v4459_v41  ;;  %v4585_v10 = vmul.f32 %v6054_v40, %v7515_v24  ;;  %v6056_v45 = vpop.eup %6055 }
0x1985   : > { %v4568_v24 = vmul.f32 %v6056_v45, %v7455_v63 }
0x1986   : > { %6069 = vrsqrt.f32 %v4517_v30  ;;  %5326 = vmatprep.subr.msk.mxu0 %vm668_vm0, %v4585_v10 }
0x1987   : > { %v6058_v5 = vpop.eup %6057  ;;  %v4456_v55 = vpop.xlane.xlu0 %4455  ;;  %5327 = vmatpush3.xpose.msk.msra.mxu0 %vm668_vm0, %v4569_v59  ;;  %6071 = vrsqrt.f32 %v4500_v42 }
0x1988   : > { %v4516_v36 = vadd.f32 1e-12, %v4456_v55  ;;  %v4584_v47 = vmul.f32 %v6058_v5, %v7503_v50  ;;  %v6060_v23 = vpop.eup %6059 }
0x1989   : > { %v4567_v50 = vmul.f32 %v6060_v23, %v7457_v35 }
0x198a   : > { %6073 = vrsqrt.f32 %v4516_v36  ;;  %5328 = vmatprep.subr.msk.mxu0 %vm668_vm0, %v4584_v47 }
0x198b   : > { %v6062_v54 = vpop.eup %6061  ;;  %v4453_v62 = vpop.xlane.xlu0 %4452  ;;  %5329 = vmatpush3.xpose.msk.msra.mxu0 %vm668_vm0, %v4568_v24  ;;  %6075 = vrsqrt.f32 %v4499_v39 }
0x198c   : > { %v4515_v28 = vadd.f32 1e-12, %v4453_v62  ;;  %v4583_v19 = vmul.f32 %v6062_v54, %v7508_v20  ;;  %v6064_v57 = vpop.eup %6063 }
0x198d   : > { %v4566_v53 = vmul.f32 %v6064_v57, %v7451_v15 }
0x198e   : > { %6077 = vrsqrt.f32 %v4515_v28  ;;  %5330 = vmatprep.subr.msk.mxu0 %vm668_vm0, %v4583_v19 }
0x198f   : > { %v6066_v48 = vpop.eup %6065  ;;  %5331 = vmatpush3.xpose.msk.msra.mxu0 %vm668_vm0, %v4567_v50 }
0x1990   : > { %v4582_v17 = vmul.f32 %v6066_v48, %v7496_v61  ;;  %v6068_v63 = vpop.eup %6067 }
0x1991   : > { %v4565_v35 = vmul.f32 %v6068_v63, %v7453_v33 }
0x1992   : > { %5332 = vmatprep.subr.msk.mxu0 %vm668_vm0, %v4582_v17 }
0x1993   : > { %v6070_v49 = vpop.eup %6069  ;;  %5333 = vmatpush3.xpose.msk.msra.mxu0 %vm668_vm0, %v4566_v53 }
0x1994   : > { %v4581_v20 = vmul.f32 %v6070_v49, %v7501_v0  ;;  %v6072_v1 = vpop.eup %6071 }
0x1995   : > { %v4564_v15 = vmul.f32 %v6072_v1, %v7447_v31  ;;  %v6105_v31 = vmov 1966171168  }
0x1996   : > { %5334 = vmatprep.subr.msk.mxu0 %vm668_vm0, %v4581_v20 }
0x1997   : > { %v6074_v2 = vpop.eup %6073  ;;  %5335 = vmatpush3.xpose.msk.msra.mxu0 %vm668_vm0, %v4565_v35 }
0x1998   : > { %v4580_v61 = vmul.f32 %v6074_v2, %v7489_v60  ;;  %v6076_v56 = vpop.eup %6075 }
0x1999   : > { %v4563_v46 = vmul.f32 %v6076_v56, %v7449_v32 }
0x199a   : > { %5336 = vmatprep.subr.msk.mxu0 %vm668_vm0, %v4580_v61 }
0x199b   : > { %v6078_v12 = vpop.eup %6077  ;;  %5337 = vmatpush3.xpose.msk.msra.mxu0 %vm668_vm0, %v4564_v15 }
0x199c   : > { %v4579_v0 = vmul.f32 %v6078_v12, %v7494_v14  ;;  %v4777_v14 = vunpack.c.l.s4 %v6105_v31 }
0x199e   : > { %5338 = vmatprep.subr.msk.mxu0 %vm668_vm0, %v4579_v0  ;;  %v4778_v26 = vunpack.c.0.s8 %v4777_v14 }
0x199f   : > { %5339 = vmatpush3.xpose.msk.msra.mxu0 %vm668_vm0, %v4563_v46 }
0x19a0   : > { %v4781_v22 = vsub.s32 %v4778_v26, %v4780_v18 }
0x19cc   : > { %v4598_v33 = vpop.xlane.xlu0 %4597 }
0x19cd   : > { %v4599_v9 = vadd.f32 1e-12, %v4598_v33 }
0x19cf   : > { %6079 = vrsqrt.f32 %v4599_v9 }
0x19dc   : > { %v6080_v60 = vpop.eup %6079 }
0x19dd   : > { %v4601_v13 = vmul.f32 14.285714, %v6080_v60 }
0x19df   : > { %v4602_v16 = vmul.f32 %v4601_v13, %v7615_v34 }
0x19e1   : > { %5340 = vmatprep.mubr.msk.f32.mxu0 %vm668_vm0, %v4602_v16 }
0x19e2   : > { %5341 = vmatmul.mubr.msk.f32.vlgmr.msra.gmra.mxu0 %vm668_vm0, %v4602_v16 }
0x1aa2   : > { %v4768_v32 = vpop.f32.mrf.mxu0 }
0x1aa4   : > { %v4770_v43 = vpop.f32.mrf.mxu0 }
0x1aa5   : > { %v4775_v25 = vcombine.low %v4768_v32, %v4770_v43 }
0x1aa7   : > { %v4782_v21 = vrot.slane %v4775_v25, %v4781_v22 }
0x1aa9   : > { %v4789_v34 = vrot.slane %v4782_v21, %v4781_v22 }
0x1aab   : > { %4795 = vst.msk [vmem:[%s654_s23] sm:$0x3] %vm4793_vm9, %v4789_v34 }
0x1aac PF: > { %s31_s2 = sadd.s32 1, %s6087_s2  }
0x1aad   : > { %p28_p4 = scmp.ge.s32.totalorder %s31_s2, 4  }
0x1aaf   :  { %30 = sbr.rel (!%p28_p4) target bundleno = 7 (0x7), region = 146 }

</bundles_post_ra>
